<compile_context>
chip_gen: v6e
topology: v6e:2x2x1
jax: 0.10.0
libtpu: 0.0.40
codegen_flags: <defaults>
</compile_context>

<pallas_src>
import math

import numpy as np
import jax
import jax.numpy as jnp
from jax.experimental import pallas as pl
from jax.experimental.pallas import tpu as pltpu

_LANE = 128


def _round_up(x, m):
    return (x + m - 1) // m * m


# ------------------- constant shift / selection matrices (wrapper) -----------

def _shift_mats(batch, length):
    """Per-batch row shift matrices (f32), block-diagonal over the batch.
    s_dn @ x -> x[l-1] (0 at l==0);  s_up @ x -> x[l+1] (0 at l==L-1)."""
    m = batch * length
    i = np.arange(m)[:, None]
    j = np.arange(m)[None, :]
    same = (i // length) == (j // length)
    s_dn = (same & (j == i - 1)).astype(np.float32)
    s_up = (same & (j == i + 1)).astype(np.float32)
    return jnp.asarray(s_dn), jnp.asarray(s_up)


def _stride2_mats(batch, l_in):
    """Row-selection matrices for the k=3,s=2,p=1 conv and the 1x1,s=2
    downsample: g0 @ a -> a[2l-1], g1 @ a -> a[2l], g2 @ a -> a[2l+1]
    (per batch; rows that fall outside the batch are all-zero = zero pad)."""
    l_out = l_in // 2
    i = np.arange(batch * l_out)[:, None]
    j = np.arange(batch * l_in)[None, :]
    same = (i // l_out) == (j // l_in)
    li = i % l_out
    lj = j % l_in
    g0 = (same & (lj == 2 * li - 1)).astype(np.float32)
    g1 = (same & (lj == 2 * li)).astype(np.float32)
    g2 = (same & (lj == 2 * li + 1)).astype(np.float32)
    return jnp.asarray(g0), jnp.asarray(g1), jnp.asarray(g2)


def _avgpool_mat(batch, length):
    """AdaptiveAvgPool1d(1) as a (B, B*L) averaging matrix."""
    i = np.arange(batch)[:, None]
    j = np.arange(batch * length)[None, :]
    pm = ((j // length) == i).astype(np.float32) / float(length)
    return jnp.asarray(pm)


# ------------------------- parameter construction ----------------------------

def _init_conv(key, c_out, c_in, k):
    std = 1.0 / math.sqrt(c_in * k)
    return std * jax.random.normal(key, (c_out, c_in, k), dtype=jnp.float32)


def _init_bn(key, c):
    k1, k2 = jax.random.split(key)
    gamma = 1.0 + 0.1 * jax.random.normal(k1, (c,), dtype=jnp.float32)
    beta = 0.1 * jax.random.normal(k2, (c,), dtype=jnp.float32)
    mean = jnp.zeros((c,), jnp.float32)       # eval-mode running statistics
    var = jnp.ones((c,), jnp.float32)
    return gamma, beta, mean, var


def _fold_bn(w, gamma, beta, mean, var, eps=1e-5):
    """Fold eval-mode BN into a (C_out, C_in, K) conv weight; returns (w', bias)."""
    scale = gamma / jnp.sqrt(var + eps)
    bias = beta - scale * mean
    return w * scale[:, None, None], bias


def _pack_bias(b, cout_p):
    return jnp.pad(b, (0, cout_p - b.shape[0])).reshape(1, cout_p).astype(jnp.float32)


def _pack_taps(w_folded, cin_p, cout_p, extra=None):
    """(C_out, C_in, K) conv weight -> bf16 (cin_p, (K[+1])*cout_p) matrix
    [W_0 | ... | W_{K-1} | (W_down)]; each tap zero-padded to (cin_p, cout_p)."""
    c_out, c_in, k = w_folded.shape
    taps = [w_folded[:, :, t] for t in range(k)]
    if extra is not None:
        taps.append(extra[:, :, 0])
    cols = []
    for t in taps:
        cols.append(jnp.pad(jnp.transpose(t),
                            ((0, cin_p - c_in), (0, cout_p - c_out))))
    return jnp.concatenate(cols, axis=1).astype(jnp.bfloat16)


def build_params(key, layers=(1, 1, 1, 1), input_c=3, num_classes=2):
    assert num_classes <= _LANE
    keys = iter(jax.random.split(key, 16 + 8 * sum(layers)))

    # Stem: Conv1d(input_c, 64, k=7, s=2, p=3, bias=False) + BN folded; the
    # im2col weight matrix is k-major / channel-minor to match the patches.
    w = _init_conv(next(keys), 64, input_c, 7)
    wf, bf_ = _fold_bn(w, *_init_bn(next(keys), 64))
    cout_p = _round_up(64, _LANE)
    w_mat = jnp.transpose(wf, (2, 1, 0)).reshape(7 * input_c, 64)
    weights = {
        'stem_w': jnp.pad(w_mat, ((0, 0), (0, cout_p - 64))).astype(jnp.bfloat16),
        'stem_b': _pack_bias(bf_, cout_p),
        'blocks': [],
    }

    stage_cfgs = []
    in_ch = 64
    for out_ch, n_blocks, stride in zip((64, 128, 256, 512), layers, (1, 2, 2, 2)):
        blk_ws, blk_cfgs = [], []
        for b in range(n_blocks):
            s = stride if b == 0 else 1
            need_down = (s != 1) or (in_ch != out_ch)
            # With BasicBlock / expansion=1 a downsample only occurs at stride 2.
            assert not (need_down and s == 1)
            cin_p = _round_up(in_ch, _LANE)
            cout_pb = _round_up(out_ch, _LANE)
            w1, b1 = _fold_bn(_init_conv(next(keys), out_ch, in_ch, 3),
                              *_init_bn(next(keys), out_ch))
            w2, b2 = _fold_bn(_init_conv(next(keys), out_ch, out_ch, 3),
                              *_init_bn(next(keys), out_ch))
            wd_f = None
            bw = {}
            if need_down:
                wd_f, bd = _fold_bn(_init_conv(next(keys), out_ch, in_ch, 1),
                                    *_init_bn(next(keys), out_ch))
                bw['bd'] = _pack_bias(bd, cout_pb)
            bw['w1'] = _pack_taps(w1, cin_p, cout_pb, extra=wd_f)
            bw['b1'] = _pack_bias(b1, cout_pb)
            bw['w2'] = _pack_taps(w2, cout_pb, cout_pb)
            bw['b2'] = _pack_bias(b2, cout_pb)
            blk_ws.append(bw)
            blk_cfgs.append((s, cout_pb, need_down))
            in_ch = out_ch
        weights['blocks'].append(blk_ws)
        stage_cfgs.append((stride, tuple(blk_cfgs)))

    # FC (512 -> num_classes), weight padded lane-dense to 128 output classes.
    bound = 1.0 / math.sqrt(512)
    fc_w = jax.random.uniform(next(keys), (num_classes, 512), jnp.float32, -bound, bound)
    fc_b = jax.random.uniform(next(keys), (num_classes,), jnp.float32, -bound, bound)
    nc_p = _round_up(num_classes, _LANE)
    weights['fc_w'] = jnp.pad(jnp.transpose(fc_w),
                              ((0, 0), (0, nc_p - num_classes))).astype(jnp.bfloat16)
    weights['fc_b'] = _pack_bias(fc_b, nc_p)

    cfg = {'input_c': input_c, 'num_classes': num_classes, 'stages': tuple(stage_cfgs)}
    return weights, cfg


# ------------------------------ fused forward ---------------------------------

def resnet_forward(x, weights, cfg):
    """x: (B, C_in, L), the PyTorch Conv1d layout.  Returns (B, num_classes)."""
    B, c_in, L = x.shape
    assert c_in == cfg['input_c']
    K, S, P = 7, 2, 3
    Lc = (L + 2 * P - K) // S + 1            # stem conv output length
    assert Lc % 2 == 0, "stem expects an even conv-output length"
    Lp = Lc // 2                             # MaxPool1d(3, 2, pad=1) output length
    M1 = B * Lp
    assert M1 % 8 == 0, "B*L after the stem must be sublane-aligned"

    # --- wrapper-side prep (tiny, one time): channels-last im2col on raw input
    x_cl = jnp.transpose(x, (0, 2, 1)).astype(jnp.float32)           # (B, L, C_in)
    xp = jnp.pad(x_cl, ((0, 0), (P, P), (0, 0)))
    cols = [xp[:, k:k + S * Lc:S, :] for k in range(K)]              # k-major, c-minor
    patches = jnp.concatenate(cols, axis=-1)                         # (B, Lc, K*C_in)
    pe = patches[:, 0::2, :].reshape(M1, K * c_in)                   # conv rows 2j
    po = patches[:, 1::2, :].reshape(M1, K * c_in)                   # conv rows 2j+1
    p_all = jnp.concatenate([pe, po], axis=0).astype(jnp.bfloat16)   # (2*M1, K*C_in)

    # --- flat operand list + an index "plan" consumed by the kernel ----------
    inputs = [p_all, weights['stem_w'], weights['stem_b']]

    def add(a):
        inputs.append(a)
        return len(inputs) - 1

    stem_sdn_i = add(_shift_mats(B, Lp)[0])       # y[2j-1] <- shift of y[2j+1]

    plan = []
    length = Lp
    for (stage_stride, blk_cfgs), blk_ws in zip(cfg['stages'], weights['blocks']):
        st = {}
        if stage_stride == 2:
            assert length % 2 == 0, "stride-2 stage expects an even input length"
            g0, g1, g2 = _stride2_mats(B, length)
            st['g'] = (add(g0), add(g1), add(g2))
            length //= 2
        s_dn, s_up = _shift_mats(B, length)
        st['s'] = (add(s_dn), add(s_up))
        st['blocks'] = []
        for (blk_stride, c_out_p, has_down), bw in zip(blk_cfgs, blk_ws):
            st['blocks'].append({
                'stride': blk_stride, 'c': c_out_p,
                'w1': add(bw['w1']), 'b1': add(bw['b1']),
                'w2': add(bw['w2']), 'b2': add(bw['b2']),
                'bd': add(bw['bd']) if has_down else None})
        plan.append(st)

    pm_i = add(_avgpool_mat(B, length))
    fcw_i = add(weights['fc_w'])
    fcb_i = add(weights['fc_b'])
    nc_p = weights['fc_w'].shape[1]

    # --- the single fused kernel ----------------------------------------------
    def kernel(*refs):
        o_ref = refs[-1]
        r = refs[:-1]

        def mm(a, b):
            return jnp.dot(a, b, preferred_element_type=jnp.float32)

        def conv3(x_bf, w_i, b_i, s_dn, s_up, c):
            # 3-tap, stride-1, pad-1 conv as one deep-K matmul; the per-batch
            # +-1 row shifts (with zero padding) are tiny 0/1 matmuls on the
            # MXU, so there is no sublane shifting / scratch traffic.
            a = mm(x_bf, r[w_i][...])                                # (M, 3c) f32
            return (mm(s_dn, a[:, 0:c]) + a[:, c:2 * c]
                    + mm(s_up, a[:, 2 * c:3 * c]) + r[b_i][...])

        # Stem: conv7(s2,p3) + BN + ReLU, even/odd conv rows in one deep dot...
        y = jnp.maximum(mm(r[0][...], r[1][...]) + r[2][...], 0.0)   # (2*M1, 128)
        ye = y[0:M1]                                                 # y[b, 2j]
        yo = y[M1:2 * M1]                                            # y[b, 2j+1]
        # ...then maxpool3(s2,p1): window j = {2j-1, 2j, 2j+1}.  ReLU >= 0 makes
        # the zero rows from the shift matrix equivalent to -inf padding.
        ym = mm(r[stem_sdn_i][...], yo)                              # y[b, 2j-1]
        xact = jnp.maximum(jnp.maximum(ye, yo), ym).astype(jnp.bfloat16)

        # Residual stages (activations stay in VMEM/vregs, bf16 between convs).
        for st in plan:
            s_dn = r[st['s'][0]][...]
            s_up = r[st['s'][1]][...]
            for blk in st['blocks']:
                c = blk['c']
                if blk['stride'] == 1:
                    y1 = jnp.maximum(
                        conv3(xact, blk['w1'], blk['b1'], s_dn, s_up, c), 0.0)
                    z = conv3(y1.astype(jnp.bfloat16), blk['w2'], blk['b2'],
                              s_dn, s_up, c)
                    xact = jnp.maximum(z + xact.astype(jnp.float32), 0.0
                                       ).astype(jnp.bfloat16)
                else:
                    # conv1 (k=3,s=2,p=1) and the 1x1 stride-2 downsample share
                    # one deep matmul; G0/G1/G2 select rows 2l-1 / 2l / 2l+1.
                    g0 = r[st['g'][0]][...]
                    g1 = r[st['g'][1]][...]
                    g2 = r[st['g'][2]][...]
                    a = mm(xact, r[blk['w1']][...])                  # (M_in, 4c)
                    y1 = jnp.maximum(
                        mm(g0, a[:, 0:c]) + mm(g1, a[:, c:2 * c])
                        + mm(g2, a[:, 2 * c:3 * c]) + r[blk['b1']][...], 0.0)
                    ident = mm(g1, a[:, 3 * c:4 * c]) + r[blk['bd']][...]
                    z = conv3(y1.astype(jnp.bfloat16), blk['w2'], blk['b2'],
                              s_dn, s_up, c)
                    xact = jnp.maximum(z + ident, 0.0).astype(jnp.bfloat16)

        # Head: global average pool (tiny matmul) + FC, lane-dense 128 output.
        feats = mm(r[pm_i][...], xact.astype(jnp.float32))           # (B, 512)
        o_ref[...] = mm(feats.astype(jnp.bfloat16), r[fcw_i][...]) + r[fcb_i][...]

    vmem = pl.BlockSpec(memory_space=pltpu.MemorySpace.VMEM)
    out = pl.pallas_call(
        kernel,
        out_shape=jax.ShapeDtypeStruct((B, nc_p), jnp.float32),
        in_specs=[vmem] * len(inputs),
        out_specs=vmem,
    )(*inputs)
    return out[:, :cfg['num_classes']]


# ----------------------------------- main --------------------------------------

if __name__ == "__main__":
    key = jax.random.PRNGKey(0)
    k_params, k_x = jax.random.split(key)

    # ResNet(block=BasicBlock, layers=[1, 1, 1, 1], input_c=3, num_classes=2)
    weights, cfg = build_params(k_params, layers=(1, 1, 1, 1), input_c=3,
                                num_classes=2)

    # Input in the PyTorch Conv1d layout: (batch=2, channels=3, length=64)
    x = jax.random.normal(k_x, (2, 3, 64), dtype=jnp.float32)

    fwd = jax.jit(lambda xx, ww: resnet_forward(xx, ww, cfg))
    out = fwd(x, weights)
    jax.block_until_ready(out)
    assert out.shape == (2, 2), out.shape
    print("KERNEL_OK")
</pallas_src>

<mosaic_0001>
module attributes {stable_mosaic.version = 11 : i64} {
  func.func @kernel(%arg0: memref<64x21xbf16, #tpu.memory_space<vmem>>, %arg1: memref<21x128xbf16, #tpu.memory_space<vmem>>, %arg2: memref<1x128xf32, #tpu.memory_space<vmem>>, %arg3: memref<32x32xf32, #tpu.memory_space<vmem>>, %arg4: memref<32x32xf32, #tpu.memory_space<vmem>>, %arg5: memref<32x32xf32, #tpu.memory_space<vmem>>, %arg6: memref<128x384xbf16, #tpu.memory_space<vmem>>, %arg7: memref<1x128xf32, #tpu.memory_space<vmem>>, %arg8: memref<128x384xbf16, #tpu.memory_space<vmem>>, %arg9: memref<1x128xf32, #tpu.memory_space<vmem>>, %arg10: memref<16x32xf32, #tpu.memory_space<vmem>>, %arg11: memref<16x32xf32, #tpu.memory_space<vmem>>, %arg12: memref<16x32xf32, #tpu.memory_space<vmem>>, %arg13: memref<16x16xf32, #tpu.memory_space<vmem>>, %arg14: memref<16x16xf32, #tpu.memory_space<vmem>>, %arg15: memref<128x512xbf16, #tpu.memory_space<vmem>>, %arg16: memref<1x128xf32, #tpu.memory_space<vmem>>, %arg17: memref<128x384xbf16, #tpu.memory_space<vmem>>, %arg18: memref<1x128xf32, #tpu.memory_space<vmem>>, %arg19: memref<1x128xf32, #tpu.memory_space<vmem>>, %arg20: memref<8x16xf32, #tpu.memory_space<vmem>>, %arg21: memref<8x16xf32, #tpu.memory_space<vmem>>, %arg22: memref<8x16xf32, #tpu.memory_space<vmem>>, %arg23: memref<8x8xf32, #tpu.memory_space<vmem>>, %arg24: memref<8x8xf32, #tpu.memory_space<vmem>>, %arg25: memref<128x1024xbf16, #tpu.memory_space<vmem>>, %arg26: memref<1x256xf32, #tpu.memory_space<vmem>>, %arg27: memref<256x768xbf16, #tpu.memory_space<vmem>>, %arg28: memref<1x256xf32, #tpu.memory_space<vmem>>, %arg29: memref<1x256xf32, #tpu.memory_space<vmem>>, %arg30: memref<4x8xf32, #tpu.memory_space<vmem>>, %arg31: memref<4x8xf32, #tpu.memory_space<vmem>>, %arg32: memref<4x8xf32, #tpu.memory_space<vmem>>, %arg33: memref<4x4xf32, #tpu.memory_space<vmem>>, %arg34: memref<4x4xf32, #tpu.memory_space<vmem>>, %arg35: memref<256x2048xbf16, #tpu.memory_space<vmem>>, %arg36: memref<1x512xf32, #tpu.memory_space<vmem>>, %arg37: memref<512x1536xbf16, #tpu.memory_space<vmem>>, %arg38: memref<1x512xf32, #tpu.memory_space<vmem>>, %arg39: memref<1x512xf32, #tpu.memory_space<vmem>>, %arg40: memref<2x4xf32, #tpu.memory_space<vmem>>, %arg41: memref<512x128xbf16, #tpu.memory_space<vmem>>, %arg42: memref<1x128xf32, #tpu.memory_space<vmem>>, %arg43: memref<2x128xf32, #tpu.memory_space<vmem>>) attributes {dimension_semantics = [], scalar_prefetch = 0 : i64, scratch_operands = 0 : i64, tpu.core_type = #tpu.core_type<tc>} {
    %c0 = arith.constant 0 : index
    %c0_0 = arith.constant 0 : index
    %0 = vector.load %arg0[%c0, %c0_0] : memref<64x21xbf16, #tpu.memory_space<vmem>>, vector<64x21xbf16>
    %c0_1 = arith.constant 0 : index
    %c0_2 = arith.constant 0 : index
    %1 = vector.load %arg1[%c0_1, %c0_2] : memref<21x128xbf16, #tpu.memory_space<vmem>>, vector<21x128xbf16>
    %cst = arith.constant dense<0.000000e+00> : vector<64x128xf32>
    %2 = tpu.matmul %0, %1, %cst {dimension_numbers = #tpu.dot_dimension_numbers<[1], [0], [0], [1], [0, 0, 1, 1], [], []>} : vector<64x21xbf16>, vector<21x128xbf16>, vector<64x128xf32> -> vector<64x128xf32>
    %c0_3 = arith.constant 0 : index
    %c0_4 = arith.constant 0 : index
    %3 = vector.load %arg2[%c0_3, %c0_4] : memref<1x128xf32, #tpu.memory_space<vmem>>, vector<1x128xf32>
    %4 = vector.broadcast %3 : vector<1x128xf32> to vector<64x128xf32>
    %5 = arith.addf %2, %4 : vector<64x128xf32>
    %cst_5 = arith.constant 0.000000e+00 : f32
    %6 = vector.broadcast %cst_5 : f32 to vector<64x128xf32>
    %7 = arith.maximumf %5, %6 : vector<64x128xf32>
    %8 = vector.extract_strided_slice %7 {offsets = [0, 0], sizes = [32, 128], strides = [1, 1]} : vector<64x128xf32> to vector<32x128xf32>
    %9 = vector.extract_strided_slice %7 {offsets = [32, 0], sizes = [32, 128], strides = [1, 1]} : vector<64x128xf32> to vector<32x128xf32>
    %c0_6 = arith.constant 0 : index
    %c0_7 = arith.constant 0 : index
    %10 = vector.load %arg3[%c0_6, %c0_7] : memref<32x32xf32, #tpu.memory_space<vmem>>, vector<32x32xf32>
    %cst_8 = arith.constant dense<0.000000e+00> : vector<32x128xf32>
    %11 = tpu.matmul %10, %9, %cst_8 {dimension_numbers = #tpu.dot_dimension_numbers<[1], [0], [0], [1], [0, 0, 1, 1], [], []>} : vector<32x32xf32>, vector<32x128xf32>, vector<32x128xf32> -> vector<32x128xf32>
    %12 = arith.maximumf %8, %9 : vector<32x128xf32>
    %13 = arith.maximumf %12, %11 : vector<32x128xf32>
    %14 = arith.truncf %13 : vector<32x128xf32> to vector<32x128xbf16>
    %c0_9 = arith.constant 0 : index
    %c0_10 = arith.constant 0 : index
    %15 = vector.load %arg4[%c0_9, %c0_10] : memref<32x32xf32, #tpu.memory_space<vmem>>, vector<32x32xf32>
    %c0_11 = arith.constant 0 : index
    %c0_12 = arith.constant 0 : index
    %16 = vector.load %arg5[%c0_11, %c0_12] : memref<32x32xf32, #tpu.memory_space<vmem>>, vector<32x32xf32>
    %c0_13 = arith.constant 0 : index
    %c0_14 = arith.constant 0 : index
    %17 = vector.load %arg6[%c0_13, %c0_14] : memref<128x384xbf16, #tpu.memory_space<vmem>>, vector<128x384xbf16>
    %cst_15 = arith.constant dense<0.000000e+00> : vector<32x384xf32>
    %18 = tpu.matmul %14, %17, %cst_15 {dimension_numbers = #tpu.dot_dimension_numbers<[1], [0], [0], [1], [0, 0, 1, 1], [], []>} : vector<32x128xbf16>, vector<128x384xbf16>, vector<32x384xf32> -> vector<32x384xf32>
    %19 = vector.extract_strided_slice %18 {offsets = [0, 0], sizes = [32, 128], strides = [1, 1]} : vector<32x384xf32> to vector<32x128xf32>
    %cst_16 = arith.constant dense<0.000000e+00> : vector<32x128xf32>
    %20 = tpu.matmul %15, %19, %cst_16 {dimension_numbers = #tpu.dot_dimension_numbers<[1], [0], [0], [1], [0, 0, 1, 1], [], []>} : vector<32x32xf32>, vector<32x128xf32>, vector<32x128xf32> -> vector<32x128xf32>
    %21 = vector.extract_strided_slice %18 {offsets = [0, 128], sizes = [32, 128], strides = [1, 1]} : vector<32x384xf32> to vector<32x128xf32>
    %22 = arith.addf %20, %21 : vector<32x128xf32>
    %23 = vector.extract_strided_slice %18 {offsets = [0, 256], sizes = [32, 128], strides = [1, 1]} : vector<32x384xf32> to vector<32x128xf32>
    %cst_17 = arith.constant dense<0.000000e+00> : vector<32x128xf32>
    %24 = tpu.matmul %16, %23, %cst_17 {dimension_numbers = #tpu.dot_dimension_numbers<[1], [0], [0], [1], [0, 0, 1, 1], [], []>} : vector<32x32xf32>, vector<32x128xf32>, vector<32x128xf32> -> vector<32x128xf32>
    %25 = arith.addf %22, %24 : vector<32x128xf32>
    %c0_18 = arith.constant 0 : index
    %c0_19 = arith.constant 0 : index
    %26 = vector.load %arg7[%c0_18, %c0_19] : memref<1x128xf32, #tpu.memory_space<vmem>>, vector<1x128xf32>
    %27 = vector.broadcast %26 : vector<1x128xf32> to vector<32x128xf32>
    %28 = arith.addf %25, %27 : vector<32x128xf32>
    %cst_20 = arith.constant 0.000000e+00 : f32
    %29 = vector.broadcast %cst_20 : f32 to vector<32x128xf32>
    %30 = arith.maximumf %28, %29 : vector<32x128xf32>
    %31 = arith.truncf %30 : vector<32x128xf32> to vector<32x128xbf16>
    %c0_21 = arith.constant 0 : index
    %c0_22 = arith.constant 0 : index
    %32 = vector.load %arg8[%c0_21, %c0_22] : memref<128x384xbf16, #tpu.memory_space<vmem>>, vector<128x384xbf16>
    %cst_23 = arith.constant dense<0.000000e+00> : vector<32x384xf32>
    %33 = tpu.matmul %31, %32, %cst_23 {dimension_numbers = #tpu.dot_dimension_numbers<[1], [0], [0], [1], [0, 0, 1, 1], [], []>} : vector<32x128xbf16>, vector<128x384xbf16>, vector<32x384xf32> -> vector<32x384xf32>
    %34 = vector.extract_strided_slice %33 {offsets = [0, 0], sizes = [32, 128], strides = [1, 1]} : vector<32x384xf32> to vector<32x128xf32>
    %cst_24 = arith.constant dense<0.000000e+00> : vector<32x128xf32>
    %35 = tpu.matmul %15, %34, %cst_24 {dimension_numbers = #tpu.dot_dimension_numbers<[1], [0], [0], [1], [0, 0, 1, 1], [], []>} : vector<32x32xf32>, vector<32x128xf32>, vector<32x128xf32> -> vector<32x128xf32>
    %36 = vector.extract_strided_slice %33 {offsets = [0, 128], sizes = [32, 128], strides = [1, 1]} : vector<32x384xf32> to vector<32x128xf32>
    %37 = arith.addf %35, %36 : vector<32x128xf32>
    %38 = vector.extract_strided_slice %33 {offsets = [0, 256], sizes = [32, 128], strides = [1, 1]} : vector<32x384xf32> to vector<32x128xf32>
    %cst_25 = arith.constant dense<0.000000e+00> : vector<32x128xf32>
    %39 = tpu.matmul %16, %38, %cst_25 {dimension_numbers = #tpu.dot_dimension_numbers<[1], [0], [0], [1], [0, 0, 1, 1], [], []>} : vector<32x32xf32>, vector<32x128xf32>, vector<32x128xf32> -> vector<32x128xf32>
    %40 = arith.addf %37, %39 : vector<32x128xf32>
    %c0_26 = arith.constant 0 : index
    %c0_27 = arith.constant 0 : index
    %41 = vector.load %arg9[%c0_26, %c0_27] : memref<1x128xf32, #tpu.memory_space<vmem>>, vector<1x128xf32>
    %42 = vector.broadcast %41 : vector<1x128xf32> to vector<32x128xf32>
    %43 = arith.addf %40, %42 : vector<32x128xf32>
    %44 = arith.extf %14 : vector<32x128xbf16> to vector<32x128xf32>
    %45 = arith.addf %43, %44 : vector<32x128xf32>
    %cst_28 = arith.constant 0.000000e+00 : f32
    %46 = vector.broadcast %cst_28 : f32 to vector<32x128xf32>
    %47 = arith.maximumf %45, %46 : vector<32x128xf32>
    %48 = arith.truncf %47 : vector<32x128xf32> to vector<32x128xbf16>
    %c0_29 = arith.constant 0 : index
    %c0_30 = arith.constant 0 : index
    %49 = vector.load %arg13[%c0_29, %c0_30] : memref<16x16xf32, #tpu.memory_space<vmem>>, vector<16x16xf32>
    %c0_31 = arith.constant 0 : index
    %c0_32 = arith.constant 0 : index
    %50 = vector.load %arg14[%c0_31, %c0_32] : memref<16x16xf32, #tpu.memory_space<vmem>>, vector<16x16xf32>
    %c0_33 = arith.constant 0 : index
    %c0_34 = arith.constant 0 : index
    %51 = vector.load %arg10[%c0_33, %c0_34] : memref<16x32xf32, #tpu.memory_space<vmem>>, vector<16x32xf32>
    %c0_35 = arith.constant 0 : index
    %c0_36 = arith.constant 0 : index
    %52 = vector.load %arg11[%c0_35, %c0_36] : memref<16x32xf32, #tpu.memory_space<vmem>>, vector<16x32xf32>
    %c0_37 = arith.constant 0 : index
    %c0_38 = arith.constant 0 : index
    %53 = vector.load %arg12[%c0_37, %c0_38] : memref<16x32xf32, #tpu.memory_space<vmem>>, vector<16x32xf32>
    %c0_39 = arith.constant 0 : index
    %c0_40 = arith.constant 0 : index
    %54 = vector.load %arg15[%c0_39, %c0_40] : memref<128x512xbf16, #tpu.memory_space<vmem>>, vector<128x512xbf16>
    %cst_41 = arith.constant dense<0.000000e+00> : vector<32x512xf32>
    %55 = tpu.matmul %48, %54, %cst_41 {dimension_numbers = #tpu.dot_dimension_numbers<[1], [0], [0], [1], [0, 0, 1, 1], [], []>} : vector<32x128xbf16>, vector<128x512xbf16>, vector<32x512xf32> -> vector<32x512xf32>
    %56 = vector.extract_strided_slice %55 {offsets = [0, 0], sizes = [32, 128], strides = [1, 1]} : vector<32x512xf32> to vector<32x128xf32>
    %cst_42 = arith.constant dense<0.000000e+00> : vector<16x128xf32>
    %57 = tpu.matmul %51, %56, %cst_42 {dimension_numbers = #tpu.dot_dimension_numbers<[1], [0], [0], [1], [0, 0, 1, 1], [], []>} : vector<16x32xf32>, vector<32x128xf32>, vector<16x128xf32> -> vector<16x128xf32>
    %58 = vector.extract_strided_slice %55 {offsets = [0, 128], sizes = [32, 128], strides = [1, 1]} : vector<32x512xf32> to vector<32x128xf32>
    %cst_43 = arith.constant dense<0.000000e+00> : vector<16x128xf32>
    %59 = tpu.matmul %52, %58, %cst_43 {dimension_numbers = #tpu.dot_dimension_numbers<[1], [0], [0], [1], [0, 0, 1, 1], [], []>} : vector<16x32xf32>, vector<32x128xf32>, vector<16x128xf32> -> vector<16x128xf32>
    %60 = arith.addf %57, %59 : vector<16x128xf32>
    %61 = vector.extract_strided_slice %55 {offsets = [0, 256], sizes = [32, 128], strides = [1, 1]} : vector<32x512xf32> to vector<32x128xf32>
    %cst_44 = arith.constant dense<0.000000e+00> : vector<16x128xf32>
    %62 = tpu.matmul %53, %61, %cst_44 {dimension_numbers = #tpu.dot_dimension_numbers<[1], [0], [0], [1], [0, 0, 1, 1], [], []>} : vector<16x32xf32>, vector<32x128xf32>, vector<16x128xf32> -> vector<16x128xf32>
    %63 = arith.addf %60, %62 : vector<16x128xf32>
    %c0_45 = arith.constant 0 : index
    %c0_46 = arith.constant 0 : index
    %64 = vector.load %arg16[%c0_45, %c0_46] : memref<1x128xf32, #tpu.memory_space<vmem>>, vector<1x128xf32>
    %65 = vector.broadcast %64 : vector<1x128xf32> to vector<16x128xf32>
    %66 = arith.addf %63, %65 : vector<16x128xf32>
    %cst_47 = arith.constant 0.000000e+00 : f32
    %67 = vector.broadcast %cst_47 : f32 to vector<16x128xf32>
    %68 = arith.maximumf %66, %67 : vector<16x128xf32>
    %69 = vector.extract_strided_slice %55 {offsets = [0, 384], sizes = [32, 128], strides = [1, 1]} : vector<32x512xf32> to vector<32x128xf32>
    %cst_48 = arith.constant dense<0.000000e+00> : vector<16x128xf32>
    %70 = tpu.matmul %52, %69, %cst_48 {dimension_numbers = #tpu.dot_dimension_numbers<[1], [0], [0], [1], [0, 0, 1, 1], [], []>} : vector<16x32xf32>, vector<32x128xf32>, vector<16x128xf32> -> vector<16x128xf32>
    %c0_49 = arith.constant 0 : index
    %c0_50 = arith.constant 0 : index
    %71 = vector.load %arg19[%c0_49, %c0_50] : memref<1x128xf32, #tpu.memory_space<vmem>>, vector<1x128xf32>
    %72 = vector.broadcast %71 : vector<1x128xf32> to vector<16x128xf32>
    %73 = arith.addf %70, %72 : vector<16x128xf32>
    %74 = arith.truncf %68 : vector<16x128xf32> to vector<16x128xbf16>
    %c0_51 = arith.constant 0 : index
    %c0_52 = arith.constant 0 : index
    %75 = vector.load %arg17[%c0_51, %c0_52] : memref<128x384xbf16, #tpu.memory_space<vmem>>, vector<128x384xbf16>
    %cst_53 = arith.constant dense<0.000000e+00> : vector<16x384xf32>
    %76 = tpu.matmul %74, %75, %cst_53 {dimension_numbers = #tpu.dot_dimension_numbers<[1], [0], [0], [1], [0, 0, 1, 1], [], []>} : vector<16x128xbf16>, vector<128x384xbf16>, vector<16x384xf32> -> vector<16x384xf32>
    %77 = vector.extract_strided_slice %76 {offsets = [0, 0], sizes = [16, 128], strides = [1, 1]} : vector<16x384xf32> to vector<16x128xf32>
    %cst_54 = arith.constant dense<0.000000e+00> : vector<16x128xf32>
    %78 = tpu.matmul %49, %77, %cst_54 {dimension_numbers = #tpu.dot_dimension_numbers<[1], [0], [0], [1], [0, 0, 1, 1], [], []>} : vector<16x16xf32>, vector<16x128xf32>, vector<16x128xf32> -> vector<16x128xf32>
    %79 = vector.extract_strided_slice %76 {offsets = [0, 128], sizes = [16, 128], strides = [1, 1]} : vector<16x384xf32> to vector<16x128xf32>
    %80 = arith.addf %78, %79 : vector<16x128xf32>
    %81 = vector.extract_strided_slice %76 {offsets = [0, 256], sizes = [16, 128], strides = [1, 1]} : vector<16x384xf32> to vector<16x128xf32>
    %cst_55 = arith.constant dense<0.000000e+00> : vector<16x128xf32>
    %82 = tpu.matmul %50, %81, %cst_55 {dimension_numbers = #tpu.dot_dimension_numbers<[1], [0], [0], [1], [0, 0, 1, 1], [], []>} : vector<16x16xf32>, vector<16x128xf32>, vector<16x128xf32> -> vector<16x128xf32>
    %83 = arith.addf %80, %82 : vector<16x128xf32>
    %c0_56 = arith.constant 0 : index
    %c0_57 = arith.constant 0 : index
    %84 = vector.load %arg18[%c0_56, %c0_57] : memref<1x128xf32, #tpu.memory_space<vmem>>, vector<1x128xf32>
    %85 = vector.broadcast %84 : vector<1x128xf32> to vector<16x128xf32>
    %86 = arith.addf %83, %85 : vector<16x128xf32>
    %87 = arith.addf %86, %73 : vector<16x128xf32>
    %cst_58 = arith.constant 0.000000e+00 : f32
    %88 = vector.broadcast %cst_58 : f32 to vector<16x128xf32>
    %89 = arith.maximumf %87, %88 : vector<16x128xf32>
    %90 = arith.truncf %89 : vector<16x128xf32> to vector<16x128xbf16>
    %c0_59 = arith.constant 0 : index
    %c0_60 = arith.constant 0 : index
    %91 = vector.load %arg23[%c0_59, %c0_60] : memref<8x8xf32, #tpu.memory_space<vmem>>, vector<8x8xf32>
    %c0_61 = arith.constant 0 : index
    %c0_62 = arith.constant 0 : index
    %92 = vector.load %arg24[%c0_61, %c0_62] : memref<8x8xf32, #tpu.memory_space<vmem>>, vector<8x8xf32>
    %c0_63 = arith.constant 0 : index
    %c0_64 = arith.constant 0 : index
    %93 = vector.load %arg20[%c0_63, %c0_64] : memref<8x16xf32, #tpu.memory_space<vmem>>, vector<8x16xf32>
    %c0_65 = arith.constant 0 : index
    %c0_66 = arith.constant 0 : index
    %94 = vector.load %arg21[%c0_65, %c0_66] : memref<8x16xf32, #tpu.memory_space<vmem>>, vector<8x16xf32>
    %c0_67 = arith.constant 0 : index
    %c0_68 = arith.constant 0 : index
    %95 = vector.load %arg22[%c0_67, %c0_68] : memref<8x16xf32, #tpu.memory_space<vmem>>, vector<8x16xf32>
    %c0_69 = arith.constant 0 : index
    %c0_70 = arith.constant 0 : index
    %96 = vector.load %arg25[%c0_69, %c0_70] : memref<128x1024xbf16, #tpu.memory_space<vmem>>, vector<128x1024xbf16>
    %cst_71 = arith.constant dense<0.000000e+00> : vector<16x1024xf32>
    %97 = tpu.matmul %90, %96, %cst_71 {dimension_numbers = #tpu.dot_dimension_numbers<[1], [0], [0], [1], [0, 0, 1, 1], [], []>} : vector<16x128xbf16>, vector<128x1024xbf16>, vector<16x1024xf32> -> vector<16x1024xf32>
    %98 = vector.extract_strided_slice %97 {offsets = [0, 0], sizes = [16, 256], strides = [1, 1]} : vector<16x1024xf32> to vector<16x256xf32>
    %cst_72 = arith.constant dense<0.000000e+00> : vector<8x256xf32>
    %99 = tpu.matmul %93, %98, %cst_72 {dimension_numbers = #tpu.dot_dimension_numbers<[1], [0], [0], [1], [0, 0, 1, 1], [], []>} : vector<8x16xf32>, vector<16x256xf32>, vector<8x256xf32> -> vector<8x256xf32>
    %100 = vector.extract_strided_slice %97 {offsets = [0, 256], sizes = [16, 256], strides = [1, 1]} : vector<16x1024xf32> to vector<16x256xf32>
    %cst_73 = arith.constant dense<0.000000e+00> : vector<8x256xf32>
    %101 = tpu.matmul %94, %100, %cst_73 {dimension_numbers = #tpu.dot_dimension_numbers<[1], [0], [0], [1], [0, 0, 1, 1], [], []>} : vector<8x16xf32>, vector<16x256xf32>, vector<8x256xf32> -> vector<8x256xf32>
    %102 = arith.addf %99, %101 : vector<8x256xf32>
    %103 = vector.extract_strided_slice %97 {offsets = [0, 512], sizes = [16, 256], strides = [1, 1]} : vector<16x1024xf32> to vector<16x256xf32>
    %cst_74 = arith.constant dense<0.000000e+00> : vector<8x256xf32>
    %104 = tpu.matmul %95, %103, %cst_74 {dimension_numbers = #tpu.dot_dimension_numbers<[1], [0], [0], [1], [0, 0, 1, 1], [], []>} : vector<8x16xf32>, vector<16x256xf32>, vector<8x256xf32> -> vector<8x256xf32>
    %105 = arith.addf %102, %104 : vector<8x256xf32>
    %c0_75 = arith.constant 0 : index
    %c0_76 = arith.constant 0 : index
    %106 = vector.load %arg26[%c0_75, %c0_76] : memref<1x256xf32, #tpu.memory_space<vmem>>, vector<1x256xf32>
    %107 = vector.broadcast %106 : vector<1x256xf32> to vector<8x256xf32>
    %108 = arith.addf %105, %107 : vector<8x256xf32>
    %cst_77 = arith.constant 0.000000e+00 : f32
    %109 = vector.broadcast %cst_77 : f32 to vector<8x256xf32>
    %110 = arith.maximumf %108, %109 : vector<8x256xf32>
    %111 = vector.extract_strided_slice %97 {offsets = [0, 768], sizes = [16, 256], strides = [1, 1]} : vector<16x1024xf32> to vector<16x256xf32>
    %cst_78 = arith.constant dense<0.000000e+00> : vector<8x256xf32>
    %112 = tpu.matmul %94, %111, %cst_78 {dimension_numbers = #tpu.dot_dimension_numbers<[1], [0], [0], [1], [0, 0, 1, 1], [], []>} : vector<8x16xf32>, vector<16x256xf32>, vector<8x256xf32> -> vector<8x256xf32>
    %c0_79 = arith.constant 0 : index
    %c0_80 = arith.constant 0 : index
    %113 = vector.load %arg29[%c0_79, %c0_80] : memref<1x256xf32, #tpu.memory_space<vmem>>, vector<1x256xf32>
    %114 = vector.broadcast %113 : vector<1x256xf32> to vector<8x256xf32>
    %115 = arith.addf %112, %114 : vector<8x256xf32>
    %116 = arith.truncf %110 : vector<8x256xf32> to vector<8x256xbf16>
    %c0_81 = arith.constant 0 : index
    %c0_82 = arith.constant 0 : index
    %117 = vector.load %arg27[%c0_81, %c0_82] : memref<256x768xbf16, #tpu.memory_space<vmem>>, vector<256x768xbf16>
    %cst_83 = arith.constant dense<0.000000e+00> : vector<8x768xf32>
    %118 = tpu.matmul %116, %117, %cst_83 {dimension_numbers = #tpu.dot_dimension_numbers<[1], [0], [0], [1], [0, 0, 1, 1], [], []>} : vector<8x256xbf16>, vector<256x768xbf16>, vector<8x768xf32> -> vector<8x768xf32>
    %119 = vector.extract_strided_slice %118 {offsets = [0, 0], sizes = [8, 256], strides = [1, 1]} : vector<8x768xf32> to vector<8x256xf32>
    %cst_84 = arith.constant dense<0.000000e+00> : vector<8x256xf32>
    %120 = tpu.matmul %91, %119, %cst_84 {dimension_numbers = #tpu.dot_dimension_numbers<[1], [0], [0], [1], [0, 0, 1, 1], [], []>} : vector<8x8xf32>, vector<8x256xf32>, vector<8x256xf32> -> vector<8x256xf32>
    %121 = vector.extract_strided_slice %118 {offsets = [0, 256], sizes = [8, 256], strides = [1, 1]} : vector<8x768xf32> to vector<8x256xf32>
    %122 = arith.addf %120, %121 : vector<8x256xf32>
    %123 = vector.extract_strided_slice %118 {offsets = [0, 512], sizes = [8, 256], strides = [1, 1]} : vector<8x768xf32> to vector<8x256xf32>
    %cst_85 = arith.constant dense<0.000000e+00> : vector<8x256xf32>
    %124 = tpu.matmul %92, %123, %cst_85 {dimension_numbers = #tpu.dot_dimension_numbers<[1], [0], [0], [1], [0, 0, 1, 1], [], []>} : vector<8x8xf32>, vector<8x256xf32>, vector<8x256xf32> -> vector<8x256xf32>
    %125 = arith.addf %122, %124 : vector<8x256xf32>
    %c0_86 = arith.constant 0 : index
    %c0_87 = arith.constant 0 : index
    %126 = vector.load %arg28[%c0_86, %c0_87] : memref<1x256xf32, #tpu.memory_space<vmem>>, vector<1x256xf32>
    %127 = vector.broadcast %126 : vector<1x256xf32> to vector<8x256xf32>
    %128 = arith.addf %125, %127 : vector<8x256xf32>
    %129 = arith.addf %128, %115 : vector<8x256xf32>
    %cst_88 = arith.constant 0.000000e+00 : f32
    %130 = vector.broadcast %cst_88 : f32 to vector<8x256xf32>
    %131 = arith.maximumf %129, %130 : vector<8x256xf32>
    %132 = arith.truncf %131 : vector<8x256xf32> to vector<8x256xbf16>
    %c0_89 = arith.constant 0 : index
    %c0_90 = arith.constant 0 : index
    %133 = vector.load %arg33[%c0_89, %c0_90] : memref<4x4xf32, #tpu.memory_space<vmem>>, vector<4x4xf32>
    %c0_91 = arith.constant 0 : index
    %c0_92 = arith.constant 0 : index
    %134 = vector.load %arg34[%c0_91, %c0_92] : memref<4x4xf32, #tpu.memory_space<vmem>>, vector<4x4xf32>
    %c0_93 = arith.constant 0 : index
    %c0_94 = arith.constant 0 : index
    %135 = vector.load %arg30[%c0_93, %c0_94] : memref<4x8xf32, #tpu.memory_space<vmem>>, vector<4x8xf32>
    %c0_95 = arith.constant 0 : index
    %c0_96 = arith.constant 0 : index
    %136 = vector.load %arg31[%c0_95, %c0_96] : memref<4x8xf32, #tpu.memory_space<vmem>>, vector<4x8xf32>
    %c0_97 = arith.constant 0 : index
    %c0_98 = arith.constant 0 : index
    %137 = vector.load %arg32[%c0_97, %c0_98] : memref<4x8xf32, #tpu.memory_space<vmem>>, vector<4x8xf32>
    %c0_99 = arith.constant 0 : index
    %c0_100 = arith.constant 0 : index
    %138 = vector.load %arg35[%c0_99, %c0_100] : memref<256x2048xbf16, #tpu.memory_space<vmem>>, vector<256x2048xbf16>
    %cst_101 = arith.constant dense<0.000000e+00> : vector<8x2048xf32>
    %139 = tpu.matmul %132, %138, %cst_101 {dimension_numbers = #tpu.dot_dimension_numbers<[1], [0], [0], [1], [0, 0, 1, 1], [], []>} : vector<8x256xbf16>, vector<256x2048xbf16>, vector<8x2048xf32> -> vector<8x2048xf32>
    %140 = vector.extract_strided_slice %139 {offsets = [0, 0], sizes = [8, 512], strides = [1, 1]} : vector<8x2048xf32> to vector<8x512xf32>
    %cst_102 = arith.constant dense<0.000000e+00> : vector<4x512xf32>
    %141 = tpu.matmul %135, %140, %cst_102 {dimension_numbers = #tpu.dot_dimension_numbers<[1], [0], [0], [1], [0, 0, 1, 1], [], []>} : vector<4x8xf32>, vector<8x512xf32>, vector<4x512xf32> -> vector<4x512xf32>
    %142 = vector.extract_strided_slice %139 {offsets = [0, 512], sizes = [8, 512], strides = [1, 1]} : vector<8x2048xf32> to vector<8x512xf32>
    %cst_103 = arith.constant dense<0.000000e+00> : vector<4x512xf32>
    %143 = tpu.matmul %136, %142, %cst_103 {dimension_numbers = #tpu.dot_dimension_numbers<[1], [0], [0], [1], [0, 0, 1, 1], [], []>} : vector<4x8xf32>, vector<8x512xf32>, vector<4x512xf32> -> vector<4x512xf32>
    %144 = arith.addf %141, %143 : vector<4x512xf32>
    %145 = vector.extract_strided_slice %139 {offsets = [0, 1024], sizes = [8, 512], strides = [1, 1]} : vector<8x2048xf32> to vector<8x512xf32>
    %cst_104 = arith.constant dense<0.000000e+00> : vector<4x512xf32>
    %146 = tpu.matmul %137, %145, %cst_104 {dimension_numbers = #tpu.dot_dimension_numbers<[1], [0], [0], [1], [0, 0, 1, 1], [], []>} : vector<4x8xf32>, vector<8x512xf32>, vector<4x512xf32> -> vector<4x512xf32>
    %147 = arith.addf %144, %146 : vector<4x512xf32>
    %c0_105 = arith.constant 0 : index
    %c0_106 = arith.constant 0 : index
    %148 = vector.load %arg36[%c0_105, %c0_106] : memref<1x512xf32, #tpu.memory_space<vmem>>, vector<1x512xf32>
    %149 = vector.broadcast %148 : vector<1x512xf32> to vector<4x512xf32>
    %150 = arith.addf %147, %149 : vector<4x512xf32>
    %cst_107 = arith.constant 0.000000e+00 : f32
    %151 = vector.broadcast %cst_107 : f32 to vector<4x512xf32>
    %152 = arith.maximumf %150, %151 : vector<4x512xf32>
    %153 = vector.extract_strided_slice %139 {offsets = [0, 1536], sizes = [8, 512], strides = [1, 1]} : vector<8x2048xf32> to vector<8x512xf32>
    %cst_108 = arith.constant dense<0.000000e+00> : vector<4x512xf32>
    %154 = tpu.matmul %136, %153, %cst_108 {dimension_numbers = #tpu.dot_dimension_numbers<[1], [0], [0], [1], [0, 0, 1, 1], [], []>} : vector<4x8xf32>, vector<8x512xf32>, vector<4x512xf32> -> vector<4x512xf32>
    %c0_109 = arith.constant 0 : index
    %c0_110 = arith.constant 0 : index
    %155 = vector.load %arg39[%c0_109, %c0_110] : memref<1x512xf32, #tpu.memory_space<vmem>>, vector<1x512xf32>
    %156 = vector.broadcast %155 : vector<1x512xf32> to vector<4x512xf32>
    %157 = arith.addf %154, %156 : vector<4x512xf32>
    %158 = arith.truncf %152 : vector<4x512xf32> to vector<4x512xbf16>
    %c0_111 = arith.constant 0 : index
    %c0_112 = arith.constant 0 : index
    %159 = vector.load %arg37[%c0_111, %c0_112] : memref<512x1536xbf16, #tpu.memory_space<vmem>>, vector<512x1536xbf16>
    %cst_113 = arith.constant dense<0.000000e+00> : vector<4x1536xf32>
    %160 = tpu.matmul %158, %159, %cst_113 {dimension_numbers = #tpu.dot_dimension_numbers<[1], [0], [0], [1], [0, 0, 1, 1], [], []>} : vector<4x512xbf16>, vector<512x1536xbf16>, vector<4x1536xf32> -> vector<4x1536xf32>
    %161 = vector.extract_strided_slice %160 {offsets = [0, 0], sizes = [4, 512], strides = [1, 1]} : vector<4x1536xf32> to vector<4x512xf32>
    %cst_114 = arith.constant dense<0.000000e+00> : vector<4x512xf32>
    %162 = tpu.matmul %133, %161, %cst_114 {dimension_numbers = #tpu.dot_dimension_numbers<[1], [0], [0], [1], [0, 0, 1, 1], [], []>} : vector<4x4xf32>, vector<4x512xf32>, vector<4x512xf32> -> vector<4x512xf32>
    %163 = vector.extract_strided_slice %160 {offsets = [0, 512], sizes = [4, 512], strides = [1, 1]} : vector<4x1536xf32> to vector<4x512xf32>
    %164 = arith.addf %162, %163 : vector<4x512xf32>
    %165 = vector.extract_strided_slice %160 {offsets = [0, 1024], sizes = [4, 512], strides = [1, 1]} : vector<4x1536xf32> to vector<4x512xf32>
    %cst_115 = arith.constant dense<0.000000e+00> : vector<4x512xf32>
    %166 = tpu.matmul %134, %165, %cst_115 {dimension_numbers = #tpu.dot_dimension_numbers<[1], [0], [0], [1], [0, 0, 1, 1], [], []>} : vector<4x4xf32>, vector<4x512xf32>, vector<4x512xf32> -> vector<4x512xf32>
    %167 = arith.addf %164, %166 : vector<4x512xf32>
    %c0_116 = arith.constant 0 : index
    %c0_117 = arith.constant 0 : index
    %168 = vector.load %arg38[%c0_116, %c0_117] : memref<1x512xf32, #tpu.memory_space<vmem>>, vector<1x512xf32>
    %169 = vector.broadcast %168 : vector<1x512xf32> to vector<4x512xf32>
    %170 = arith.addf %167, %169 : vector<4x512xf32>
    %171 = arith.addf %170, %157 : vector<4x512xf32>
    %cst_118 = arith.constant 0.000000e+00 : f32
    %172 = vector.broadcast %cst_118 : f32 to vector<4x512xf32>
    %173 = arith.maximumf %171, %172 : vector<4x512xf32>
    %174 = arith.truncf %173 : vector<4x512xf32> to vector<4x512xbf16>
    %c0_119 = arith.constant 0 : index
    %c0_120 = arith.constant 0 : index
    %175 = vector.load %arg40[%c0_119, %c0_120] : memref<2x4xf32, #tpu.memory_space<vmem>>, vector<2x4xf32>
    %176 = arith.extf %174 : vector<4x512xbf16> to vector<4x512xf32>
    %cst_121 = arith.constant dense<0.000000e+00> : vector<2x512xf32>
    %177 = tpu.matmul %175, %176, %cst_121 {dimension_numbers = #tpu.dot_dimension_numbers<[1], [0], [0], [1], [0, 0, 1, 1], [], []>} : vector<2x4xf32>, vector<4x512xf32>, vector<2x512xf32> -> vector<2x512xf32>
    %178 = arith.truncf %177 : vector<2x512xf32> to vector<2x512xbf16>
    %c0_122 = arith.constant 0 : index
    %c0_123 = arith.constant 0 : index
    %179 = vector.load %arg41[%c0_122, %c0_123] : memref<512x128xbf16, #tpu.memory_space<vmem>>, vector<512x128xbf16>
    %cst_124 = arith.constant dense<0.000000e+00> : vector<2x128xf32>
    %180 = tpu.matmul %178, %179, %cst_124 {dimension_numbers = #tpu.dot_dimension_numbers<[1], [0], [0], [1], [0, 0, 1, 1], [], []>} : vector<2x512xbf16>, vector<512x128xbf16>, vector<2x128xf32> -> vector<2x128xf32>
    %c0_125 = arith.constant 0 : index
    %c0_126 = arith.constant 0 : index
    %181 = vector.load %arg42[%c0_125, %c0_126] : memref<1x128xf32, #tpu.memory_space<vmem>>, vector<1x128xf32>
    %182 = vector.broadcast %181 : vector<1x128xf32> to vector<2x128xf32>
    %183 = arith.addf %180, %182 : vector<2x128xf32>
    %c0_127 = arith.constant 0 : index
    %c0_128 = arith.constant 0 : index
    %184 = vector.load %arg43[%c0_127, %c0_128] : memref<2x128xf32, #tpu.memory_space<vmem>>, vector<2x128xf32>
    tpu.vector_store %arg43[%c0_127, %c0_128], %183 {strides = array<i32>} : memref<2x128xf32, #tpu.memory_space<vmem>>, vector<2x128xf32>,
    return
  }
}

</mosaic_0001>

<bundles_post_ra>
// kernel: _lambda_.1
= control target key start
LH: loop header
LB: loop body
LE: loop exit
PB: predicated region body
PF: predicated region fallthrough
CT: control target
= control target key end

     0   :  { %s14255_s6 = smov 1   ;;  %s14256_s10 = smov 2   ;;  %s15006_s0 = inlined_call_operand.smem [shape: u32[44], index: -1, kind: input, shape index: {}] }
   0x1   :  { %s14368_s5 = sld [smem:[%s15006_s0]]   ;;  %s14257_s14 = smov 3  }
   0x2   :  { %s14373_s9 = sld [smem:[%s15006_s0 + %s14255_s6]]   ;;  %s14258_s18 = smov 4  }
   0x3   :  { %s14378_s13 = sld [smem:[%s15006_s0 + %s14256_s10]]   ;;  %s14259_s22 = smov 5  }
   0x4   :  { %s14383_s17 = sld [smem:[%s15006_s0 + %s14257_s14]]   ;;  %s14260_s26 = smov 6  }
   0x5   :  { %s14388_s21 = sld [smem:[%s15006_s0 + %s14258_s18]]   ;;  %s14261_s30 = smov 7  }
   0x6   :  { %s14393_s25 = sld [smem:[%s15006_s0 + %s14259_s22]]   ;;  %s14262_s4 = smov 8  }
   0x7   :  { %15008 = sst [smem:[#allocation91_spill]] %s14368_s5  ;;  %s14263_s10 = smov 9  }
   0x8   :  { %15009 = sst [smem:[#allocation92_spill]] %s14373_s9  ;;  %s14264_s15 = smov 10  }
   0x9   :  { %s14398_s29 = sld [smem:[%s15006_s0 + %s14260_s26]]   ;;  %s14265_s20 = smov 11  }
   0xa   :  { %15010 = sst [smem:[#allocation93_spill]] %s14383_s17  ;;  %s14266_s26 = smov 12  }
   0xb   :  { %s14403_s3 = sld [smem:[%s15006_s0 + %s14261_s30]]   ;;  %s14267_s1 = smov 13  }
   0xc   :  { %15011 = sst [smem:[#allocation94_spill]] %s14393_s25  ;;  %s14268_s7 = smov 14  }
   0xd   :  { %s14408_s8 = sld [smem:[%s15006_s0 + %s14262_s4]]   ;;  %s14270_s22 = smov 16  }
   0xe   :  { %s14413_s14 = sld [smem:[%s15006_s0 + %s14263_s10]]   ;;  %s14271_s28 = smov 17  }
   0xf   :  { %s14418_s19 = sld [smem:[%s15006_s0 + %s14264_s15]]   ;;  %s14269_s15 = smov 15  }
  0x10   :  { %s14423_s24 = sld [smem:[%s15006_s0 + %s14265_s20]]  }
  0x11   :  { %15012 = sst [smem:[#allocation95_spill]] %s14403_s3 }
  0x12   :  { %s14428_s30 = sld [smem:[%s15006_s0 + %s14266_s26]]  }
  0x13   :  { %s14433_s6 = sld [smem:[%s15006_s0 + %s14267_s1]]  }
  0x14   :  { %15013 = sst [smem:[#allocation96_spill]] %s14413_s14 }
  0x15   :  { %s14438_s12 = sld [smem:[%s15006_s0 + %s14268_s7]]   ;;  %s14272_s7 = smov 18  }
  0x16   :  { %15014 = sst [smem:[#allocation97_spill]] %s14423_s24 }
  0x17   :  { %s14443_s20 = sld [smem:[%s15006_s0 + %s14269_s15]]   ;;  %s14273_s15 = smov 19  }
  0x18   :  { %s14448_s27 = sld [smem:[%s15006_s0 + %s14270_s22]]   ;;  %s14274_s22 = smov 20  }
  0x19   :  { %15015 = sst [smem:[#allocation98_spill]] %s14433_s6 }
  0x1a   :  { %s14453_s4 = sld [smem:[%s15006_s0 + %s14271_s28]]   ;;  %s14275_s28 = smov 21  }
  0x1b   :  { %s14458_s5 = sld [smem:[%s15006_s0 + %s14272_s7]]   ;;  %s14276_s7 = smov 22  }
  0x1c   :  { %s14468_s6 = sld [smem:[%s15006_s0 + %s14274_s22]]   ;;  %s14278_s22 = smov 24  }
  0x1d   :  { %15016 = sst [smem:[#allocation99_spill]] %s14443_s20 }
  0x1e   :  { %s14463_s20 = sld [smem:[%s15006_s0 + %s14273_s15]]   ;;  %s14277_s15 = smov 23  }
  0x1f   :  { %s14478_s24 = sld [smem:[%s15006_s0 + %s14276_s7]]   ;;  %s14280_s7 = smov 26  }
  0x20   :  { %15017 = sst [smem:[#allocation100_spill]] %s14453_s4 }
  0x21   :  { %s14473_s4 = sld [smem:[%s15006_s0 + %s14275_s28]]   ;;  %s14279_s28 = smov 25  }
  0x22   :  { %s14488_s14 = sld [smem:[%s15006_s0 + %s14278_s22]]   ;;  %s14282_s22 = smov 28  }
  0x23   :  { %s14498_s3 = sld [smem:[%s15006_s0 + %s14280_s7]]   ;;  %s14284_s7 = smov 30  }
  0x24   :  { %15018 = sst [smem:[#allocation101_spill]] %s14463_s20 }
  0x25   :  { %s14483_s20 = sld [smem:[%s15006_s0 + %s14277_s15]]   ;;  %s14281_s15 = smov 27  }
  0x26   :  { %s14508_s25 = sld [smem:[%s15006_s0 + %s14282_s22]]   ;;  %s14286_s22 = smov 32  }
  0x27   :  { %15019 = sst [smem:[#allocation102_spill]] %s14473_s4 }
  0x28   :  { %s14493_s4 = sld [smem:[%s15006_s0 + %s14279_s28]]   ;;  %s14283_s28 = smov 29  }
  0x29   :  { %s14518_s17 = sld [smem:[%s15006_s0 + %s14284_s7]]   ;;  %s14288_s7 = smov 34  }
  0x2a   :  { %s14528_s9 = sld [smem:[%s15006_s0 + %s14286_s22]]   ;;  %s14290_s22 = smov 36  }
  0x2b   :  { %15020 = sst [smem:[#allocation103_spill]] %s14483_s20 }
  0x2c   :  { %s14503_s20 = sld [smem:[%s15006_s0 + %s14281_s15]]   ;;  %s14285_s15 = smov 31  }
  0x2e   :  { %15021 = sst [smem:[#allocation104_spill]] %s14493_s4 }
  0x2f   :  { %s14513_s4 = sld [smem:[%s15006_s0 + %s14283_s28]]   ;;  %s14287_s28 = smov 33  }
  0x30   :  { %15024 = sst [smem:[#allocation107_spill]] %s14518_s17 }
  0x31   :  { %15026 = sst [smem:[#allocation109_spill]] %s14528_s9 }
  0x32   :  { %15022 = sst [smem:[#allocation105_spill]] %s14503_s20 }
  0x33   :  { %s14523_s20 = sld [smem:[%s15006_s0 + %s14285_s15]]   ;;  %s14289_s15 = smov 35  }
  0x34   :  { %s14538_s17 = sld [smem:[%s15006_s0 + %s14288_s7]]   ;;  %s14292_s7 = smov 38  }
  0x35   :  { %15023 = sst [smem:[#allocation106_spill]] %s14513_s4 }
  0x36   :  { %s14533_s4 = sld [smem:[%s15006_s0 + %s14287_s28]]   ;;  %s14291_s28 = smov 37  }
  0x37   :  { %s14548_s9 = sld [smem:[%s15006_s0 + %s14290_s22]]   ;;  %s14294_s22 = smov 40  }
  0x39   :  { %15025 = sst [smem:[#allocation108_spill]] %s14523_s20 }
  0x3a   :  { %15028 = sst [smem:[#allocation111_spill]] %s14538_s17 }
  0x3b   :  { %s14543_s20 = sld [smem:[%s15006_s0 + %s14289_s15]]   ;;  %s14293_s15 = smov 39  }
  0x3c   :  { %15027 = sst [smem:[#allocation110_spill]] %s14533_s4 }
  0x3d   :  { %15030 = sst [smem:[#allocation113_spill]] %s14548_s9 }
  0x3e   :  { %s14553_s4 = sld [smem:[%s15006_s0 + %s14291_s28]]   ;;  %s14295_s28 = smov 41  }
  0x3f   :  { %s14558_s17 = sld [smem:[%s15006_s0 + %s14292_s7]]   ;;  %s14296_s7 = smov 42  }
  0x40   :  { %s14568_s9 = sld [smem:[%s15006_s0 + %s14294_s22]]  }
  0x41   :  { %15029 = sst [smem:[#allocation112_spill]] %s14543_s20 }
  0x42   :  { %s14563_s20 = sld [smem:[%s15006_s0 + %s14293_s15]]   ;;  %s14297_s15 = smov 43  }
  0x44   :  { %15031 = sst [smem:[#allocation114_spill]] %s14553_s4 }
  0x45   :  { %15032 = sst [smem:[#allocation115_spill]] %s14558_s17 }
  0x46   :  { %s14573_s4 = sld [smem:[%s15006_s0 + %s14295_s28]]  }
  0x47   :  { %s14578_s17 = sld [smem:[%s15006_s0 + %s14296_s7]]  }
  0x48   :  { %15033 = sst [smem:[#allocation116_spill]] %s14563_s20 }
  0x49   :  { %s14583_s20 = sld [smem:[%s15006_s0 + %s14297_s15]]  }
  0x4a   :  { %92 = vsyncpa [#allocation3], 0 }
  0x4b   :  { %93 = vsyncpa [#allocation6], 0 }
  0x4c   :  { %94 = vsyncpa [#allocation9], 0 }
  0x4d   :  { %95 = vsyncpa [#allocation12], 0 }
  0x4e   :  { %96 = vsyncpa [#allocation15], 0 }
  0x4f   :  { %97 = vsyncpa [#allocation18], 0 }
  0x50   :  { %98 = vsyncpa [#allocation21], 0 }
  0x51   :  { %99 = vsyncpa [#allocation24], 0 }
  0x52   :  { %100 = vsyncpa [#allocation27], 0 }
  0x53   :  { %101 = vsyncpa [#allocation30], 0 }
  0x54   :  { %102 = vsyncpa [#allocation33], 0 }
  0x55   :  { %103 = vsyncpa [#allocation36], 0 }
  0x56   :  { %104 = vsyncpa [#allocation39], 0 }
  0x57   :  { %105 = vsyncpa [#allocation42], 0 }
  0x58   :  { %106 = vsyncpa [#allocation45], 0 }
  0x59   :  { %107 = vsyncpa [#allocation48], 0 }
  0x5a   :  { %108 = vsyncpa [#allocation51], 0 }
  0x5b   :  { %109 = vsyncpa [#allocation54], 0 }
  0x5c   :  { %110 = vsyncpa [#allocation57], 0 }
  0x5d   :  { %111 = vsyncpa [#allocation60], 0 }
  0x5e   :  { %112 = vsyncpa [#allocation63], 0 }
  0x5f   :  { %113 = vsyncpa [#allocation66], 0 }
  0x60   :  { %114 = vsyncpa [#allocation4], 0  ;;  %s14298_s0 = smov [#allocation5]  }
  0x61   :  { %s135_s22 = sshll.u32 %s14298_s0, 4  ;;  %s136_s22 = int_to_ptr.vmem [resolvable:$true] %s135_s22 }
  0x62   :  { %s13357_s23 = scalar_lea.vmem %s136_s22, 16  ;;  %s13361_s26 = scalar_lea.vmem %s136_s22, 32 }
  0x63   :  { %p13358_p0 = scmp.ne.s32.totalorder %s136_s22, %s13357_s23  ;;  %p13362_p1 = scmp.lt.s32.totalorder %s136_s22, %s136_s22 }
  0x64   :  { %p13363_p2 = scmp.lt.s32.totalorder %s13361_s26, %s13357_s23 }
  0x66   :  { %p13364_p3 = por %p13363_p2, %p13362_p1 }
  0x68   :  { %p13365_p4 = pnand %p13364_p3, %p13358_p0 }
  0x6a   :  { %13368 = shalt.err (!%p13365_p4)
}
  0x6b   :  { %138 = dma.hbm_to_vmem [thread:$0]  %s14378_s13, 16, %s136_s22, [#allocation6]  }
  0x6c   :  { %s14299_s28 = smov [#allocation8]   ;;  %s14300_s2 = smov [#allocation11]  }
  0x6d   :  { %s156_s1 = sshll.u32 %s14299_s28, 4  ;;  %s180_s7 = sshll.u32 %s14300_s2, 4  ;;  %s157_s1 = int_to_ptr.vmem [resolvable:$true] %s156_s1  ;;  %s181_s7 = int_to_ptr.vmem [resolvable:$true] %s180_s7 }
  0x6e   :  { %s13377_s10 = scalar_lea.vmem %s157_s1, 512  ;;  %p13382_p6 = scmp.lt.s32.totalorder %s157_s1, %s157_s1 }
  0x6f   :  { %p13378_p5 = scmp.ne.s32.totalorder %s157_s1, %s13377_s10  ;;  %p13383_p7 = scmp.lt.s32.totalorder %s13377_s10, %s13377_s10 }
  0x71   :  { %p13384_p8 = por %p13383_p7, %p13382_p6 }
  0x73   :  { %p13385_p9 = pnand %p13384_p8, %p13378_p5 }
  0x75   :  { %13388 = shalt.err (!%p13385_p9)
}
  0x76   :  { %s14301_s11 = smov 128   ;;  %s14302_s15 = smov 8  }
  0x77   :  { %162 = dma.hbm_to_vmem [thread:$0]  %s14388_s21, 512, %s157_s1, [#allocation9], %s14301_s11, %s14301_s11, %s14302_s15  }
  0x78   :  { %s13397_s13 = scalar_lea.vmem %s181_s7, 3072  ;;  %p13402_p11 = scmp.lt.s32.totalorder %s181_s7, %s181_s7 }
  0x79   :  { %p13398_p10 = scmp.ne.s32.totalorder %s181_s7, %s13397_s13  ;;  %p13403_p12 = scmp.lt.s32.totalorder %s13397_s13, %s13397_s13 }
  0x7b   :  { %p13404_p13 = por %p13403_p12, %p13402_p11 }
  0x7d   :  { %p13405_p0 = pnand %p13404_p13, %p13398_p10 }
  0x7f   :  { %13408 = shalt.err (!%p13405_p0)
}
  0x80   :  { %s14303_s16 = smov 192   ;;  %s14304_s18 = smov 12  }
  0x81   :  { %186 = dma.hbm_to_vmem [thread:$0]  %s14398_s29, 3072, %s181_s7, [#allocation12], %s14303_s16, %s14303_s16, %s14304_s18  }
  0x82   :  { %s14305_s0 = smov [#allocation14]   ;;  %s14306_s23 = smov [#allocation17]  }
  0x83   :  { %s202_s22 = sshll.u32 %s14305_s0, 4  ;;  %s224_s21 = sshll.u32 %s14306_s23, 4  ;;  %s203_s22 = int_to_ptr.vmem [resolvable:$true] %s202_s22  ;;  %s225_s21 = int_to_ptr.vmem [resolvable:$true] %s224_s21 }
  0x84   :  { %s13417_s26 = scalar_lea.vmem %s203_s22, 3072  ;;  %p13422_p2 = scmp.lt.s32.totalorder %s203_s22, %s203_s22 }
  0x85   :  { %p13418_p1 = scmp.ne.s32.totalorder %s203_s22, %s13417_s26  ;;  %p13423_p3 = scmp.lt.s32.totalorder %s13417_s26, %s13417_s26 }
  0x87   :  { %p13424_p4 = por %p13423_p3, %p13422_p2 }
  0x89   :  { %p13425_p5 = pnand %p13424_p4, %p13418_p1 }
  0x8b   :  { %13428 = shalt.err (!%p13425_p5)
}
  0x8c   :  { %208 = dma.hbm_to_vmem [thread:$0]  %s14408_s8, 3072, %s203_s22, [#allocation15], %s14303_s16, %s14303_s16, %s14304_s18  }
  0x8d   :  { %s13437_s28 = scalar_lea.vmem %s225_s21, 256  ;;  %p13442_p7 = scmp.lt.s32.totalorder %s225_s21, %s225_s21 }
  0x8e   :  { %p13438_p6 = scmp.ne.s32.totalorder %s225_s21, %s13437_s28  ;;  %p13443_p8 = scmp.lt.s32.totalorder %s13437_s28, %s13437_s28 }
  0x90   :  { %p13444_p9 = por %p13443_p8, %p13442_p7 }
  0x92   :  { %p13445_p10 = pnand %p13444_p9, %p13438_p6 }
  0x94   :  { %13448 = shalt.err (!%p13445_p10)
}
  0x95   :  { %230 = dma.hbm_to_vmem [thread:$0]  %s14418_s19, 256, %s225_s21, [#allocation18], %s14301_s11, %s14301_s11, %s14302_s15  }
  0x96   :  { %s14307_s29 = smov [#allocation20]   ;;  %s14308_s2 = smov [#allocation23]  }
  0x97   :  { %s248_s1 = sshll.u32 %s14307_s29, 4  ;;  %s272_s7 = sshll.u32 %s14308_s2, 4  ;;  %s249_s1 = int_to_ptr.vmem [resolvable:$true] %s248_s1  ;;  %s273_s7 = int_to_ptr.vmem [resolvable:$true] %s272_s7 }
  0x98   :  { %s13457_s10 = scalar_lea.vmem %s249_s1, 256  ;;  %p13462_p12 = scmp.lt.s32.totalorder %s249_s1, %s249_s1 }
  0x99   :  { %p13458_p11 = scmp.ne.s32.totalorder %s249_s1, %s13457_s10  ;;  %p13463_p13 = scmp.lt.s32.totalorder %s13457_s10, %s13457_s10 }
  0x9b   :  { %p13464_p0 = por %p13463_p13, %p13462_p12 }
  0x9d   :  { %p13465_p1 = pnand %p13464_p0, %p13458_p11 }
  0x9f   :  { %13468 = shalt.err (!%p13465_p1)
}
  0xa0   :  { %254 = dma.hbm_to_vmem [thread:$0]  %s14428_s30, 256, %s249_s1, [#allocation21], %s14301_s11, %s14301_s11, %s14302_s15  }
  0xa1   :  { %s13477_s8 = scalar_lea.vmem %s273_s7, 256  ;;  %p13482_p3 = scmp.lt.s32.totalorder %s273_s7, %s273_s7 }
  0xa2   :  { %p13478_p2 = scmp.ne.s32.totalorder %s273_s7, %s13477_s8  ;;  %p13483_p4 = scmp.lt.s32.totalorder %s13477_s8, %s13477_s8 }
  0xa4   :  { %p13484_p5 = por %p13483_p4, %p13482_p3 }
  0xa6   :  { %p13485_p6 = pnand %p13484_p5, %p13478_p2 }
  0xa8   :  { %13488 = shalt.err (!%p13485_p6)
}
  0xa9   :  { %278 = dma.hbm_to_vmem [thread:$0]  %s14438_s12, 256, %s273_s7, [#allocation24], %s14301_s11, %s14301_s11, %s14302_s15  }
  0xaa   :  { %s14309_s19 = smov [#allocation26]   ;;  %s14310_s0 = smov [#allocation29]  }
  0xab   :  { %s297_s13 = sshll.u32 %s14309_s19, 4  ;;  %s319_s22 = sshll.u32 %s14310_s0, 4  ;;  %s298_s13 = int_to_ptr.vmem [resolvable:$true] %s297_s13  ;;  %s320_s22 = int_to_ptr.vmem [resolvable:$true] %s319_s22 }
  0xac   :  { %s13497_s23 = scalar_lea.vmem %s298_s13, 16  ;;  %s13501_s30 = scalar_lea.vmem %s298_s13, 32 }
  0xad   :  { %p13498_p7 = scmp.ne.s32.totalorder %s298_s13, %s13497_s23  ;;  %p13502_p8 = scmp.lt.s32.totalorder %s298_s13, %s298_s13 }
  0xae   :  { %p13503_p9 = scmp.lt.s32.totalorder %s13501_s30, %s13497_s23 }
  0xb0   :  { %p13504_p10 = por %p13503_p9, %p13502_p8 }
  0xb2   :  { %p13505_p11 = pnand %p13504_p10, %p13498_p7 }
  0xb4   :  { %13508 = shalt.err (!%p13505_p11)
}
  0xb5   :  { %300 = dma.hbm_to_vmem [thread:$0]  %s14448_s27, 16, %s298_s13, [#allocation27]  }
  0xb6   :  { %s13517_s21 = scalar_lea.vmem %s320_s22, 16  ;;  %s13521_s26 = scalar_lea.vmem %s320_s22, 32 }
  0xb7   :  { %p13518_p12 = scmp.ne.s32.totalorder %s320_s22, %s13517_s21  ;;  %p13522_p13 = scmp.lt.s32.totalorder %s320_s22, %s320_s22 }
  0xb8   :  { %p13523_p0 = scmp.lt.s32.totalorder %s13521_s26, %s13517_s21 }
  0xba   :  { %p13524_p1 = por %p13523_p0, %p13522_p13 }
  0xbc   :  { %p13525_p2 = pnand %p13524_p1, %p13518_p12 }
  0xbe   :  { %13528 = shalt.err (!%p13525_p2)
}
  0xbf   :  { %322 = dma.hbm_to_vmem [thread:$0]  %s14458_s5, 16, %s320_s22, [#allocation30]  }
  0xc0   :  { %s14311_s12 = smov [#allocation32]   ;;  %s14312_s29 = smov [#allocation35]  }
  0xc1   :  { %s339_s28 = sshll.u32 %s14311_s12, 4  ;;  %s359_s1 = sshll.u32 %s14312_s29, 4  ;;  %s340_s28 = int_to_ptr.vmem [resolvable:$true] %s339_s28  ;;  %s360_s1 = int_to_ptr.vmem [resolvable:$true] %s359_s1 }
  0xc2   :  { %s13537_s2 = scalar_lea.vmem %s340_s28, 128  ;;  %p13542_p4 = scmp.lt.s32.totalorder %s340_s28, %s340_s28 }
  0xc3   :  { %p13538_p3 = scmp.ne.s32.totalorder %s340_s28, %s13537_s2  ;;  %p13543_p5 = scmp.lt.s32.totalorder %s13537_s2, %s13537_s2 }
  0xc5   :  { %p13544_p6 = por %p13543_p5, %p13542_p4 }
  0xc7   :  { %p13545_p7 = pnand %p13544_p6, %p13538_p3 }
  0xc9   :  { %13548 = shalt.err (!%p13545_p7)
}
  0xca   :  { %342 = dma.hbm_to_vmem [thread:$0]  %s14468_s6, 128, %s340_s28, [#allocation33]  }
  0xcb   :  { %s13557_s27 = scalar_lea.vmem %s360_s1, 128  ;;  %p13562_p9 = scmp.lt.s32.totalorder %s360_s1, %s360_s1 }
  0xcc   :  { %p13558_p8 = scmp.ne.s32.totalorder %s360_s1, %s13557_s27  ;;  %p13563_p10 = scmp.lt.s32.totalorder %s13557_s27, %s13557_s27 }
  0xce   :  { %p13564_p11 = por %p13563_p10, %p13562_p9 }
  0xd0   :  { %p13565_p12 = pnand %p13564_p11, %p13558_p8 }
  0xd2   :  { %13568 = shalt.err (!%p13565_p12)
}
  0xd3   :  { %362 = dma.hbm_to_vmem [thread:$0]  %s14478_s24, 128, %s360_s1, [#allocation36]  }
  0xd4   :  { %s14313_s5 = smov [#allocation38]   ;;  %s14314_s10 = smov [#allocation41]  }
  0xd5   :  { %s379_s7 = sshll.u32 %s14313_s5, 4  ;;  %s401_s8 = sshll.u32 %s14314_s10, 4  ;;  %s380_s7 = int_to_ptr.vmem [resolvable:$true] %s379_s7  ;;  %s402_s8 = int_to_ptr.vmem [resolvable:$true] %s401_s8 }
  0xd6   :  { %s13577_s19 = scalar_lea.vmem %s380_s7, 128  ;;  %p13582_p0 = scmp.lt.s32.totalorder %s380_s7, %s380_s7 }
  0xd7   :  { %p13578_p13 = scmp.ne.s32.totalorder %s380_s7, %s13577_s19  ;;  %p13583_p1 = scmp.lt.s32.totalorder %s13577_s19, %s13577_s19 }
  0xd9   :  { %p13584_p2 = por %p13583_p1, %p13582_p0 }
  0xdb   :  { %p13585_p3 = pnand %p13584_p2, %p13578_p13 }
  0xdd   :  { %13588 = shalt.err (!%p13585_p3)
}
  0xde   :  { %382 = dma.hbm_to_vmem [thread:$0]  %s14488_s14, 128, %s380_s7, [#allocation39]  }
  0xdf   :  { %s13597_s6 = scalar_lea.vmem %s402_s8, 32  ;;  %p13602_p5 = scmp.lt.s32.totalorder %s402_s8, %s402_s8 }
  0xe0   :  { %p13598_p4 = scmp.ne.s32.totalorder %s402_s8, %s13597_s6  ;;  %p13603_p6 = scmp.lt.s32.totalorder %s13597_s6, %s13597_s6 }
  0xe2   :  { %p13604_p7 = por %p13603_p6, %p13602_p5 }
  0xe4   :  { %p13605_p8 = pnand %p13604_p7, %p13598_p4 }
  0xe6   :  { %13608 = shalt.err (!%p13605_p8)
}
  0xe7   :  { %404 = dma.hbm_to_vmem [thread:$0]  %s14498_s3, 32, %s402_s8, [#allocation42]  }
  0xe8   :  { %s14315_s24 = smov [#allocation44]   ;;  %s14316_s0 = smov [#allocation47]  }
  0xe9   :  { %s423_s13 = sshll.u32 %s14315_s24, 4  ;;  %s443_s22 = sshll.u32 %s14316_s0, 4  ;;  %s424_s13 = int_to_ptr.vmem [resolvable:$true] %s423_s13  ;;  %s444_s22 = int_to_ptr.vmem [resolvable:$true] %s443_s22 }
  0xea   :  { %s13617_s23 = scalar_lea.vmem %s424_s13, 32  ;;  %p13622_p10 = scmp.lt.s32.totalorder %s424_s13, %s424_s13 }
  0xeb   :  { %p13618_p9 = scmp.ne.s32.totalorder %s424_s13, %s13617_s23  ;;  %p13623_p11 = scmp.lt.s32.totalorder %s13617_s23, %s13617_s23 }
  0xed   :  { %p13624_p12 = por %p13623_p11, %p13622_p10 }
  0xef   :  { %p13625_p13 = pnand %p13624_p12, %p13618_p9 }
  0xf1   :  { %13628 = shalt.err (!%p13625_p13)
}
  0xf2   :  { %426 = dma.hbm_to_vmem [thread:$0]  %s14508_s25, 32, %s424_s13, [#allocation45]  }
  0xf3   :  { %s13637_s14 = scalar_lea.vmem %s444_s22, 64  ;;  %p13642_p1 = scmp.lt.s32.totalorder %s444_s22, %s444_s22 }
  0xf4   :  { %p13638_p0 = scmp.ne.s32.totalorder %s444_s22, %s13637_s14  ;;  %p13643_p2 = scmp.lt.s32.totalorder %s13637_s14, %s13637_s14 }
  0xf6   :  { %p13644_p3 = por %p13643_p2, %p13642_p1 }
  0xf8   :  { %p13645_p4 = pnand %p13644_p3, %p13638_p0 }
  0xfa   :  { %13648 = shalt.err (!%p13645_p4)
}
  0xfb   :  { %s15034_s3 = sld [smem:[#allocation107_spill]]  ;;  %s14317_s30 = smov [#allocation50]  }
  0xfc   :  { %s463_s21 = sshll.u32 %s14317_s30, 4  ;;  %s14318_s26 = smov [#allocation53]   ;;  %s464_s21 = int_to_ptr.vmem [resolvable:$true] %s463_s21 }
  0xfd   :  { %s483_s12 = sshll.u32 %s14318_s26, 4  ;;  %s13657_s28 = scalar_lea.vmem %s464_s21, 64  ;;  %s484_s12 = int_to_ptr.vmem [resolvable:$true] %s483_s12 }
  0xfe   :  { %p13658_p5 = scmp.ne.s32.totalorder %s464_s21, %s13657_s28  ;;  %p13662_p6 = scmp.lt.s32.totalorder %s464_s21, %s464_s21 }
  0xff   :  { %p13663_p7 = scmp.lt.s32.totalorder %s13657_s28, %s13657_s28 }
 0x101   :  { %446 = dma.hbm_to_vmem [thread:$0]  %s15034_s3, 64, %s444_s22, [#allocation48]  }
 0x102   :  { %p13664_p8 = por %p13663_p7, %p13662_p6 }
 0x104   :  { %p13665_p9 = pnand %p13664_p8, %p13658_p5 }
 0x106   :  { %13668 = shalt.err (!%p13665_p9)
}
 0x107   :  { %s15035_s25 = sld [smem:[#allocation109_spill]]  ;;  %s13677_s29 = scalar_lea.vmem %s484_s12, 64 }
 0x108   :  { %p13678_p10 = scmp.ne.s32.totalorder %s484_s12, %s13677_s29  ;;  %p13682_p11 = scmp.lt.s32.totalorder %s484_s12, %s484_s12 }
 0x109   :  { %p13683_p12 = scmp.lt.s32.totalorder %s13677_s29, %s13677_s29 }
 0x10b   :  { %p13684_p13 = por %p13683_p12, %p13682_p11 }
 0x10d   :  { %466 = dma.hbm_to_vmem [thread:$0]  %s15035_s25, 64, %s464_s21, [#allocation51]  }
 0x10e   :  { %p13685_p0 = pnand %p13684_p13, %p13678_p10 }
 0x110   :  { %13688 = shalt.err (!%p13685_p0)
}
 0x111   :  { %s15036_s1 = sld [smem:[#allocation111_spill]]  ;;  %s14319_s2 = smov [#allocation56]  }
 0x112   :  { %s505_s27 = sshll.u32 %s14319_s2, 4  ;;  %s14320_s5 = smov [#allocation59]   ;;  %s506_s27 = int_to_ptr.vmem [resolvable:$true] %s505_s27 }
 0x113   :  { %s527_s7 = sshll.u32 %s14320_s5, 4  ;;  %s13697_s10 = scalar_lea.vmem %s506_s27, 64  ;;  %s528_s7 = int_to_ptr.vmem [resolvable:$true] %s527_s7 }
 0x114   :  { %p13698_p1 = scmp.ne.s32.totalorder %s506_s27, %s13697_s10  ;;  %p13702_p2 = scmp.lt.s32.totalorder %s506_s27, %s506_s27 }
 0x115   :  { %p13703_p3 = scmp.lt.s32.totalorder %s13697_s10, %s13697_s10 }
 0x117   :  { %486 = dma.hbm_to_vmem [thread:$0]  %s15036_s1, 64, %s484_s12, [#allocation54]  }
 0x118   :  { %p13704_p4 = por %p13703_p3, %p13702_p2 }
 0x11a   :  { %p13705_p5 = pnand %p13704_p4, %p13698_p1 }
 0x11c   :  { %13708 = shalt.err (!%p13705_p5)
}
 0x11d   :  { %s15037_s8 = sld [smem:[#allocation113_spill]]  ;;  %s13717_s19 = scalar_lea.vmem %s528_s7, 64 }
 0x11e   :  { %p13718_p6 = scmp.ne.s32.totalorder %s528_s7, %s13717_s19  ;;  %p13722_p7 = scmp.lt.s32.totalorder %s528_s7, %s528_s7 }
 0x11f   :  { %p13723_p8 = scmp.lt.s32.totalorder %s13717_s19, %s13717_s19 }
 0x121   :  { %p13724_p9 = por %p13723_p8, %p13722_p7 }
 0x123   :  { %508 = dma.hbm_to_vmem [thread:$0]  %s15037_s8, 64, %s506_s27, [#allocation57]  }
 0x124   :  { %p13725_p10 = pnand %p13724_p9, %p13718_p6 }
 0x126   :  { %13728 = shalt.err (!%p13725_p10)
}
 0x127   :  { %s15038_s6 = sld [smem:[#allocation115_spill]]  ;;  %s14321_s24 = smov [#allocation62]  }
 0x128   :  { %s547_s13 = sshll.u32 %s14321_s24, 4  ;;  %s14322_s0 = smov [#allocation2]   ;;  %s548_s13 = int_to_ptr.vmem [resolvable:$true] %s547_s13 }
 0x129   :  { %s122_s22 = sshll.u32 %s14322_s0, 4  ;;  %s13737_s23 = scalar_lea.vmem %s548_s13, 32  ;;  %s123_s22 = int_to_ptr.vmem [resolvable:$true] %s122_s22 }
 0x12a   :  { %p13738_p11 = scmp.ne.s32.totalorder %s548_s13, %s13737_s23  ;;  %p13742_p12 = scmp.lt.s32.totalorder %s548_s13, %s548_s13 }
 0x12b   :  { %p13743_p13 = scmp.lt.s32.totalorder %s13737_s23, %s13737_s23 }
 0x12d   :  { %530 = dma.hbm_to_vmem [thread:$0]  %s15038_s6, 64, %s528_s7, [#allocation60]  }
 0x12e   :  { %p13744_p0 = por %p13743_p13, %p13742_p12 }
 0x130   :  { %p13745_p1 = pnand %p13744_p0, %p13738_p11 }
 0x132   :  { %13748 = shalt.err (!%p13745_p1)
}
 0x133   :  { %550 = dma.hbm_to_vmem [thread:$0]  %s14568_s9, 32, %s548_s13, [#allocation63]  }
 0x134   :  { %s13757_s14 = scalar_lea.vmem %s123_s22, 192  ;;  %p13762_p3 = scmp.lt.s32.totalorder %s123_s22, %s123_s22 }
 0x135   :  { %p13758_p2 = scmp.ne.s32.totalorder %s123_s22, %s13757_s14  ;;  %p13763_p4 = scmp.lt.s32.totalorder %s13757_s14, %s13757_s14 }
 0x137   :  { %p13764_p5 = por %p13763_p4, %p13762_p3 }
 0x139   :  { %p13765_p6 = pnand %p13764_p5, %p13758_p2 }
 0x13b   :  { %13768 = shalt.err (!%p13765_p6)
}
 0x13c   :  { %s14323_s3 = smov 64   ;;  %s15039_s30 = sld [smem:[#allocation92_spill]] }
 0x13d   :  { %s14324_s21 = smov 4   ;;  %s14325_s26 = smov [#allocation7]  }
 0x13e   :  { %s144_s12 = sshll.u32 %s14325_s26, 4  ;;  %s14326_s28 = smov [#allocation10]   ;;  %s145_s12 = int_to_ptr.vmem [resolvable:$true] %s144_s12 }
 0x13f   :  { %s168_s9 = sshll.u32 %s14326_s28, 4  ;;  %s13777_s25 = scalar_lea.vmem %s145_s12, 512  ;;  %s169_s9 = int_to_ptr.vmem [resolvable:$true] %s168_s9 }
 0x140   :  { %p13778_p7 = scmp.ne.s32.totalorder %s145_s12, %s13777_s25  ;;  %p13782_p8 = scmp.lt.s32.totalorder %s145_s12, %s145_s12 }
 0x141   :  { %p13783_p9 = scmp.lt.s32.totalorder %s13777_s25, %s13777_s25 }
 0x142   :  { %128 = dma.hbm_to_vmem [thread:$0]  %s15039_s30, 192, %s123_s22, [#allocation3], %s14323_s3, %s14323_s3, %s14324_s21  }
 0x143   :  { %p13784_p10 = por %p13783_p9, %p13782_p8 }
 0x145   :  { %p13785_p11 = pnand %p13784_p10, %p13778_p7 }
 0x147   :  { %13788 = shalt.err (!%p13785_p11)
}
 0x148   :  { %s15040_s29 = sld [smem:[#allocation93_spill]]  ;;  %s13797_s1 = scalar_lea.vmem %s169_s9, 512 }
 0x149   :  { %p13798_p12 = scmp.ne.s32.totalorder %s169_s9, %s13797_s1  ;;  %p13802_p13 = scmp.lt.s32.totalorder %s169_s9, %s169_s9 }
 0x14a   :  { %p13803_p0 = scmp.lt.s32.totalorder %s13797_s1, %s13797_s1 }
 0x14c   :  { %p13804_p1 = por %p13803_p0, %p13802_p13 }
 0x14e   :  { %150 = dma.hbm_to_vmem [thread:$0]  %s15040_s29, 512, %s145_s12, [#allocation6], %s14301_s11, %s14301_s11, %s14302_s15  }
 0x14f   :  { %p13805_p2 = pnand %p13804_p1, %p13798_p12 }
 0x151   :  { %13808 = shalt.err (!%p13805_p2)
}
 0x152   :  { %s15041_s2 = sld [smem:[#allocation94_spill]]  ;;  %s14327_s27 = smov [#allocation13]  }
 0x153   :  { %s193_s5 = sshll.u32 %s14327_s27, 4  ;;  %s14328_s7 = smov [#allocation16]   ;;  %s194_s5 = int_to_ptr.vmem [resolvable:$true] %s193_s5 }
 0x154   :  { %s215_s10 = sshll.u32 %s14328_s7, 4  ;;  %s13817_s8 = scalar_lea.vmem %s194_s5, 16  ;;  %s216_s10 = int_to_ptr.vmem [resolvable:$true] %s215_s10 }
 0x155   :  { %p13818_p3 = scmp.ne.s32.totalorder %s194_s5, %s13817_s8  ;;  %s13821_s19 = scalar_lea.vmem %s194_s5, 32 }
 0x156   :  { %p13822_p4 = scmp.lt.s32.totalorder %s194_s5, %s194_s5  ;;  %p13823_p5 = scmp.lt.s32.totalorder %s13821_s19, %s13817_s8 }
 0x158   :  { %174 = dma.hbm_to_vmem [thread:$0]  %s15041_s2, 512, %s169_s9, [#allocation9], %s14301_s11, %s14301_s11, %s14302_s15  }
 0x159   :  { %p13824_p6 = por %p13823_p5, %p13822_p4 }
 0x15b   :  { %p13825_p7 = pnand %p13824_p6, %p13818_p3 }
 0x15d   :  { %13828 = shalt.err (!%p13825_p7)
}
 0x15e   :  { %s15042_s6 = sld [smem:[#allocation95_spill]]  ;;  %s13837_s24 = scalar_lea.vmem %s216_s10, 16 }
 0x15f   :  { %p13838_p8 = scmp.ne.s32.totalorder %s216_s10, %s13837_s24  ;;  %s13841_s13 = scalar_lea.vmem %s216_s10, 32 }
 0x160   :  { %p13842_p9 = scmp.lt.s32.totalorder %s216_s10, %s216_s10  ;;  %p13843_p10 = scmp.lt.s32.totalorder %s13841_s13, %s13837_s24 }
 0x162   :  { %p13844_p11 = por %p13843_p10, %p13842_p9 }
 0x164   :  { %196 = dma.hbm_to_vmem [thread:$0]  %s15042_s6, 16, %s194_s5, [#allocation12]  }
 0x165   :  { %p13845_p12 = pnand %p13844_p11, %p13838_p8 }
 0x167   :  { %13848 = shalt.err (!%p13845_p12)
}
 0x168   :  { %s15043_s0 = sld [smem:[#allocation96_spill]]  ;;  %s14329_s22 = smov [#allocation19]  }
 0x169   :  { %s236_s23 = sshll.u32 %s14329_s22, 4  ;;  %s14330_s14 = smov [#allocation22]   ;;  %s237_s23 = int_to_ptr.vmem [resolvable:$true] %s236_s23 }
 0x16a   :  { %s260_s30 = sshll.u32 %s14330_s14, 4  ;;  %s13857_s26 = scalar_lea.vmem %s237_s23, 256  ;;  %s261_s30 = int_to_ptr.vmem [resolvable:$true] %s260_s30 }
 0x16b   :  { %p13858_p13 = scmp.ne.s32.totalorder %s237_s23, %s13857_s26  ;;  %p13862_p0 = scmp.lt.s32.totalorder %s237_s23, %s237_s23 }
 0x16c   :  { %p13863_p1 = scmp.lt.s32.totalorder %s13857_s26, %s13857_s26 }
 0x16e   :  { %218 = dma.hbm_to_vmem [thread:$0]  %s15043_s0, 16, %s216_s10, [#allocation15]  }
 0x16f   :  { %p13864_p2 = por %p13863_p1, %p13862_p0 }
 0x171   :  { %p13865_p3 = pnand %p13864_p2, %p13858_p13 }
 0x173   :  { %13868 = shalt.err (!%p13865_p3)
}
 0x174   :  { %s15044_s12 = sld [smem:[#allocation97_spill]]  ;;  %s13877_s28 = scalar_lea.vmem %s261_s30, 256 }
 0x175   :  { %p13878_p4 = scmp.ne.s32.totalorder %s261_s30, %s13877_s28  ;;  %p13882_p5 = scmp.lt.s32.totalorder %s261_s30, %s261_s30 }
 0x176   :  { %p13883_p6 = scmp.lt.s32.totalorder %s13877_s28, %s13877_s28 }
 0x178   :  { %p13884_p7 = por %p13883_p6, %p13882_p5 }
 0x17a   :  { %242 = dma.hbm_to_vmem [thread:$0]  %s15044_s12, 256, %s237_s23, [#allocation18], %s14301_s11, %s14301_s11, %s14302_s15  }
 0x17b   :  { %p13885_p8 = pnand %p13884_p7, %p13878_p4 }
 0x17d   :  { %13888 = shalt.err (!%p13885_p8)
}
 0x17e   :  { %s15045_s9 = sld [smem:[#allocation98_spill]]  ;;  %s14331_s25 = smov [#allocation25]  }
 0x17f   :  { %s284_s29 = sshll.u32 %s14331_s25, 4  ;;  %s285_s29 = int_to_ptr.vmem [resolvable:$true] %s284_s29 }
 0x180   :  { %s13897_s1 = scalar_lea.vmem %s285_s29, 4096  ;;  %p13902_p10 = scmp.lt.s32.totalorder %s285_s29, %s285_s29 }
 0x181   :  { %p13898_p9 = scmp.ne.s32.totalorder %s285_s29, %s13897_s1  ;;  %p13903_p11 = scmp.lt.s32.totalorder %s13897_s1, %s13897_s1 }
 0x183   :  { %p13904_p12 = por %p13903_p11, %p13902_p10 }
 0x184   :  { %266 = dma.hbm_to_vmem [thread:$0]  %s15045_s9, 256, %s261_s30, [#allocation21], %s14301_s11, %s14301_s11, %s14302_s15  }
 0x185   :  { %p13905_p13 = pnand %p13904_p12, %p13898_p9 }
 0x187   :  { %13908 = shalt.err (!%p13905_p13)
}
 0x188   :  { %s14332_s2 = smov 256   ;;  %s15046_s27 = sld [smem:[#allocation99_spill]] }
 0x189   :  { %s14333_s5 = smov 16   ;;  %s14334_s7 = smov [#allocation28]  }
 0x18a   :  { %s306_s10 = sshll.u32 %s14334_s7, 4  ;;  %s14335_s8 = smov [#allocation31]   ;;  %s307_s10 = int_to_ptr.vmem [resolvable:$true] %s306_s10 }
 0x18b   :  { %s329_s19 = sshll.u32 %s14335_s8, 4  ;;  %s13917_s11 = scalar_lea.vmem %s307_s10, 3072  ;;  %s330_s19 = int_to_ptr.vmem [resolvable:$true] %s329_s19 }
 0x18c   :  { %p13918_p0 = scmp.ne.s32.totalorder %s307_s10, %s13917_s11  ;;  %p13922_p1 = scmp.lt.s32.totalorder %s307_s10, %s307_s10 }
 0x18d   :  { %p13923_p2 = scmp.lt.s32.totalorder %s13917_s11, %s13917_s11 }
 0x18e   :  { %290 = dma.hbm_to_vmem [thread:$0]  %s15046_s27, 4096, %s285_s29, [#allocation24], %s14332_s2, %s14332_s2, %s14333_s5  }
 0x18f   :  { %p13924_p3 = por %p13923_p2, %p13922_p1 }
 0x191   :  { %p13925_p4 = pnand %p13924_p3, %p13918_p0 }
 0x193   :  { %13928 = shalt.err (!%p13925_p4)
}
 0x194   :  { %s15047_s15 = sld [smem:[#allocation100_spill]]  ;;  %s13937_s6 = scalar_lea.vmem %s330_s19, 16 }
 0x195   :  { %p13938_p5 = scmp.ne.s32.totalorder %s330_s19, %s13937_s6  ;;  %s13941_s24 = scalar_lea.vmem %s330_s19, 32 }
 0x196   :  { %p13942_p6 = scmp.lt.s32.totalorder %s330_s19, %s330_s19  ;;  %p13943_p7 = scmp.lt.s32.totalorder %s13941_s24, %s13937_s6 }
 0x198   :  { %p13944_p8 = por %p13943_p7, %p13942_p6 }
 0x19a   :  { %312 = dma.hbm_to_vmem [thread:$0]  %s15047_s15, 3072, %s307_s10, [#allocation27], %s14303_s16, %s14303_s16, %s14304_s18  }
 0x19b   :  { %p13945_p9 = pnand %p13944_p8, %p13938_p5 }
 0x19d   :  { %13948 = shalt.err (!%p13945_p9)
}
 0x19e   :  { %s15048_s13 = sld [smem:[#allocation101_spill]]  ;;  %s14336_s0 = smov [#allocation34]  }
 0x19f   :  { %s349_s22 = sshll.u32 %s14336_s0, 4  ;;  %s14337_s23 = smov [#allocation37]   ;;  %s350_s22 = int_to_ptr.vmem [resolvable:$true] %s349_s22 }
 0x1a0   :  { %s369_s14 = sshll.u32 %s14337_s23, 4  ;;  %s13957_s30 = scalar_lea.vmem %s350_s22, 128  ;;  %s370_s14 = int_to_ptr.vmem [resolvable:$true] %s369_s14 }
 0x1a1   :  { %p13958_p10 = scmp.ne.s32.totalorder %s350_s22, %s13957_s30  ;;  %p13962_p11 = scmp.lt.s32.totalorder %s350_s22, %s350_s22 }
 0x1a2   :  { %p13963_p12 = scmp.lt.s32.totalorder %s13957_s30, %s13957_s30 }
 0x1a4   :  { %332 = dma.hbm_to_vmem [thread:$0]  %s15048_s13, 16, %s330_s19, [#allocation30]  }
 0x1a5   :  { %p13964_p13 = por %p13963_p12, %p13962_p11 }
 0x1a7   :  { %p13965_p0 = pnand %p13964_p13, %p13958_p10 }
 0x1a9   :  { %13968 = shalt.err (!%p13965_p0)
}
 0x1aa   :  { %s15049_s16 = sld [smem:[#allocation102_spill]]  ;;  %s13977_s18 = scalar_lea.vmem %s370_s14, 128 }
 0x1ab   :  { %p13978_p1 = scmp.ne.s32.totalorder %s370_s14, %s13977_s18  ;;  %p13982_p2 = scmp.lt.s32.totalorder %s370_s14, %s370_s14 }
 0x1ac   :  { %p13983_p3 = scmp.lt.s32.totalorder %s13977_s18, %s13977_s18 }
 0x1ae   :  { %p13984_p4 = por %p13983_p3, %p13982_p2 }
 0x1b0   :  { %352 = dma.hbm_to_vmem [thread:$0]  %s15049_s16, 128, %s350_s22, [#allocation33]  }
 0x1b1   :  { %p13985_p5 = pnand %p13984_p4, %p13978_p1 }
 0x1b3   :  { %13988 = shalt.err (!%p13985_p5)
}
 0x1b4   :  { %s15050_s26 = sld [smem:[#allocation103_spill]]  ;;  %s14338_s12 = smov [#allocation40]  }
 0x1b5   :  { %s388_s28 = sshll.u32 %s14338_s12, 4  ;;  %s389_s28 = int_to_ptr.vmem [resolvable:$true] %s388_s28 }
 0x1b6   :  { %s13997_s9 = scalar_lea.vmem %s389_s28, 8192  ;;  %p14002_p7 = scmp.lt.s32.totalorder %s389_s28, %s389_s28 }
 0x1b7   :  { %p13998_p6 = scmp.ne.s32.totalorder %s389_s28, %s13997_s9  ;;  %p14003_p8 = scmp.lt.s32.totalorder %s13997_s9, %s13997_s9 }
 0x1b9   :  { %p14004_p9 = por %p14003_p8, %p14002_p7 }
 0x1ba   :  { %372 = dma.hbm_to_vmem [thread:$0]  %s15050_s26, 128, %s370_s14, [#allocation36]  }
 0x1bb   :  { %p14005_p10 = pnand %p14004_p9, %p13998_p6 }
 0x1bd   :  { %14008 = shalt.err (!%p14005_p10)
}
 0x1be   :  { %s14339_s25 = smov 512   ;;  %s15051_s29 = sld [smem:[#allocation104_spill]] }
 0x1bf   :  { %s14340_s1 = smov 32   ;;  %s14341_s2 = smov [#allocation43]  }
 0x1c0   :  { %s410_s27 = sshll.u32 %s14341_s2, 4  ;;  %s411_s27 = int_to_ptr.vmem [resolvable:$true] %s410_s27 }
 0x1c1   :  { %s14017_s5 = scalar_lea.vmem %s411_s27, 12288  ;;  %p14022_p12 = scmp.lt.s32.totalorder %s411_s27, %s411_s27 }
 0x1c2   :  { %p14018_p11 = scmp.ne.s32.totalorder %s411_s27, %s14017_s5  ;;  %p14023_p13 = scmp.lt.s32.totalorder %s14017_s5, %s14017_s5 }
 0x1c4   :  { %394 = dma.hbm_to_vmem [thread:$0]  %s15051_s29, 8192, %s389_s28, [#allocation39], %s14339_s25, %s14339_s25, %s14340_s1  }
 0x1c5   :  { %p14024_p0 = por %p14023_p13, %p14022_p12 }
 0x1c7   :  { %p14025_p1 = pnand %p14024_p0, %p14018_p11 }
 0x1c9   :  { %14028 = shalt.err (!%p14025_p1)
}
 0x1ca   :  { %s14342_s7 = smov 384   ;;  %s15052_s10 = sld [smem:[#allocation105_spill]] }
 0x1cb   :  { %s14343_s8 = smov 24   ;;  %s14344_s19 = smov [#allocation46]  }
 0x1cc   :  { %s433_s11 = sshll.u32 %s14344_s19, 4  ;;  %s14345_s15 = smov [#allocation49]   ;;  %s434_s11 = int_to_ptr.vmem [resolvable:$true] %s433_s11 }
 0x1cd   :  { %s453_s6 = sshll.u32 %s14345_s15, 4  ;;  %s14037_s24 = scalar_lea.vmem %s434_s11, 32  ;;  %s454_s6 = int_to_ptr.vmem [resolvable:$true] %s453_s6 }
 0x1ce   :  { %p14038_p2 = scmp.ne.s32.totalorder %s434_s11, %s14037_s24  ;;  %p14042_p3 = scmp.lt.s32.totalorder %s434_s11, %s434_s11 }
 0x1cf   :  { %p14043_p4 = scmp.lt.s32.totalorder %s14037_s24, %s14037_s24 }
 0x1d0   :  { %416 = dma.hbm_to_vmem [thread:$0]  %s15052_s10, 12288, %s411_s27, [#allocation42], %s14342_s7, %s14342_s7, %s14343_s8  }
 0x1d1   :  { %p14044_p5 = por %p14043_p4, %p14042_p3 }
 0x1d3   :  { %p14045_p6 = pnand %p14044_p5, %p14038_p2 }
 0x1d5   :  { %14048 = shalt.err (!%p14045_p6)
}
 0x1d6   :  { %s15053_s13 = sld [smem:[#allocation106_spill]]  ;;  %s14057_s0 = scalar_lea.vmem %s454_s6, 64 }
 0x1d7   :  { %p14058_p7 = scmp.ne.s32.totalorder %s454_s6, %s14057_s0  ;;  %p14062_p8 = scmp.lt.s32.totalorder %s454_s6, %s454_s6 }
 0x1d8   :  { %p14063_p9 = scmp.lt.s32.totalorder %s14057_s0, %s14057_s0 }
 0x1da   :  { %p14064_p10 = por %p14063_p9, %p14062_p8 }
 0x1dc   :  { %436 = dma.hbm_to_vmem [thread:$0]  %s15053_s13, 32, %s434_s11, [#allocation45]  }
 0x1dd   :  { %p14065_p11 = pnand %p14064_p10, %p14058_p7 }
 0x1df   :  { %14068 = shalt.err (!%p14065_p11)
}
 0x1e0   :  { %s15054_s22 = sld [smem:[#allocation108_spill]]  ;;  %s14346_s23 = smov [#allocation52]  }
 0x1e1   :  { %s473_s14 = sshll.u32 %s14346_s23, 4  ;;  %s14347_s30 = smov [#allocation55]   ;;  %s474_s14 = int_to_ptr.vmem [resolvable:$true] %s473_s14 }
 0x1e2   :  { %s492_s16 = sshll.u32 %s14347_s30, 4  ;;  %s14077_s18 = scalar_lea.vmem %s474_s14, 64  ;;  %s493_s16 = int_to_ptr.vmem [resolvable:$true] %s492_s16 }
 0x1e3   :  { %p14078_p12 = scmp.ne.s32.totalorder %s474_s14, %s14077_s18  ;;  %p14082_p13 = scmp.lt.s32.totalorder %s474_s14, %s474_s14 }
 0x1e4   :  { %p14083_p0 = scmp.lt.s32.totalorder %s14077_s18, %s14077_s18 }
 0x1e6   :  { %456 = dma.hbm_to_vmem [thread:$0]  %s15054_s22, 64, %s454_s6, [#allocation48]  }
 0x1e7   :  { %p14084_p1 = por %p14083_p0, %p14082_p13 }
 0x1e9   :  { %p14085_p2 = pnand %p14084_p1, %p14078_p12 }
 0x1eb   :  { %14088 = shalt.err (!%p14085_p2)
}
 0x1ec   :  { %s15055_s26 = sld [smem:[#allocation110_spill]]  ;;  %s14097_s12 = scalar_lea.vmem %s493_s16, 32768 }
 0x1ed   :  { %p14098_p3 = scmp.ne.s32.totalorder %s493_s16, %s14097_s12  ;;  %p14102_p4 = scmp.lt.s32.totalorder %s493_s16, %s493_s16 }
 0x1ee   :  { %p14103_p5 = scmp.lt.s32.totalorder %s14097_s12, %s14097_s12 }
 0x1f0   :  { %p14104_p6 = por %p14103_p5, %p14102_p4 }
 0x1f2   :  { %476 = dma.hbm_to_vmem [thread:$0]  %s15055_s26, 64, %s474_s14, [#allocation51]  }
 0x1f3   :  { %p14105_p7 = pnand %p14104_p6, %p14098_p3 }
 0x1f5   :  { %14108 = shalt.err (!%p14105_p7)
}
 0x1f6   :  { %s14348_s28 = smov 1024   ;;  %s15056_s9 = sld [smem:[#allocation112_spill]] }
 0x1f7   :  { %s14349_s25 = smov [#allocation58]  }
 0x1f8   :  { %s514_s29 = sshll.u32 %s14349_s25, 4  ;;  %s515_s29 = int_to_ptr.vmem [resolvable:$true] %s514_s29 }
 0x1f9   :  { %s14117_s1 = scalar_lea.vmem %s515_s29, 49152  ;;  %p14122_p9 = scmp.lt.s32.totalorder %s515_s29, %s515_s29 }
 0x1fa   :  { %p14118_p8 = scmp.ne.s32.totalorder %s515_s29, %s14117_s1  ;;  %p14123_p10 = scmp.lt.s32.totalorder %s14117_s1, %s14117_s1 }
 0x1fc   :  { %498 = dma.hbm_to_vmem [thread:$0]  %s15056_s9, 32768, %s493_s16, [#allocation54], %s14348_s28, %s14348_s28, %s14323_s3  }
 0x1fd   :  { %p14124_p11 = por %p14123_p10, %p14122_p9 }
 0x1ff   :  { %p14125_p12 = pnand %p14124_p11, %p14118_p8 }
 0x201   :  { %14128 = shalt.err (!%p14125_p12)
}
 0x202   :  { %s14350_s2 = smov 768   ;;  %s15057_s27 = sld [smem:[#allocation114_spill]] }
 0x203   :  { %s14351_s5 = smov 48   ;;  %s14352_s7 = smov [#allocation61]  }
 0x204   :  { %s537_s10 = sshll.u32 %s14352_s7, 4  ;;  %s14353_s8 = smov [#allocation64]   ;;  %s538_s10 = int_to_ptr.vmem [resolvable:$true] %s537_s10 }
 0x205   :  { %s556_s19 = sshll.u32 %s14353_s8, 4  ;;  %s14137_s11 = scalar_lea.vmem %s538_s10, 64  ;;  %s557_s19 = int_to_ptr.vmem [resolvable:$true] %s556_s19 }
 0x206   :  { %p14138_p13 = scmp.ne.s32.totalorder %s538_s10, %s14137_s11  ;;  %p14142_p0 = scmp.lt.s32.totalorder %s538_s10, %s538_s10 }
 0x207   :  { %p14143_p1 = scmp.lt.s32.totalorder %s14137_s11, %s14137_s11 }
 0x208   :  { %520 = dma.hbm_to_vmem [thread:$0]  %s15057_s27, 49152, %s515_s29, [#allocation57], %s14350_s2, %s14350_s2, %s14351_s5  }
 0x209   :  { %p14144_p2 = por %p14143_p1, %p14142_p0 }
 0x20b   :  { %p14145_p3 = pnand %p14144_p2, %p14138_p13 }
 0x20d   :  { %14148 = shalt.err (!%p14145_p3)
}
 0x20e   :  { %s15058_s15 = sld [smem:[#allocation116_spill]]  ;;  %s14157_s6 = scalar_lea.vmem %s557_s19, 4096 }
 0x20f   :  { %p14158_p4 = scmp.ne.s32.totalorder %s557_s19, %s14157_s6  ;;  %p14162_p5 = scmp.lt.s32.totalorder %s557_s19, %s557_s19 }
 0x210   :  { %p14163_p6 = scmp.lt.s32.totalorder %s14157_s6, %s14157_s6 }
 0x212   :  { %p14164_p7 = por %p14163_p6, %p14162_p5 }
 0x214   :  { %540 = dma.hbm_to_vmem [thread:$0]  %s15058_s15, 64, %s538_s10, [#allocation60]  }
 0x215   :  { %p14165_p8 = pnand %p14164_p7, %p14158_p4 }
 0x217   :  { %14168 = shalt.err (!%p14165_p8)
}
 0x218   :  { %562 = dma.hbm_to_vmem [thread:$0]  %s14573_s4, 4096, %s557_s19, [#allocation63], %s14323_s3, %s14323_s3, %s14324_s21  }
 0x219   :  { %s14354_s24 = smov [#allocation65]  }
 0x21a   :  { %s569_s13 = sshll.u32 %s14354_s24, 4  ;;  %s570_s13 = int_to_ptr.vmem [resolvable:$true] %s569_s13 }
 0x21b   :  { %s14177_s0 = scalar_lea.vmem %s570_s13, 16  ;;  %s14181_s22 = scalar_lea.vmem %s570_s13, 32 }
 0x21c   :  { %p14178_p9 = scmp.ne.s32.totalorder %s570_s13, %s14177_s0  ;;  %p14182_p10 = scmp.lt.s32.totalorder %s570_s13, %s570_s13 }
 0x21d   :  { %p14183_p11 = scmp.lt.s32.totalorder %s14181_s22, %s14177_s0 }
 0x21f   :  { %p14184_p12 = por %p14183_p11, %p14182_p10 }
 0x221   :  { %p14185_p13 = pnand %p14184_p12, %p14178_p9 }
 0x223   :  { %14188 = shalt.err (!%p14185_p13)
}
 0x224   :  { %572 = dma.hbm_to_vmem [thread:$0]  %s14578_s17, 16, %s570_s13, [#allocation66]  }
 0x225   :  { %14209 = dma.done.wait [#allocation3], 192  }
 0x226   :  { %14210 = vsyncadd [#allocation3], 4294967104 }
 0x227   :  { %14211 = dma.done.wait [#allocation6], 528  }
 0x228   :  { %14212 = vsyncadd [#allocation6], 4294966768 }
 0x229   :  { %14213 = dma.done.wait [#allocation9], 1024  }
 0x22a   :  { %14214 = vsyncadd [#allocation9], 4294966272 }
 0x22b   :  { %14215 = dma.done.wait [#allocation12], 3088  }
 0x22c   :  { %14216 = vsyncadd [#allocation12], 4294964208 }
 0x22d   :  { %14217 = dma.done.wait [#allocation15], 3088  }
 0x22e   :  { %14218 = vsyncadd [#allocation15], 4294964208 }
 0x22f   :  { %14219 = dma.done.wait [#allocation18], 512  }
 0x230   :  { %14220 = vsyncadd [#allocation18], 4294966784 }
 0x231   :  { %14221 = dma.done.wait [#allocation21], 512  }
 0x232   :  { %14222 = vsyncadd [#allocation21], 4294966784 }
 0x233   :  { %14223 = dma.done.wait [#allocation24], 4352  }
 0x234   :  { %14224 = vsyncadd [#allocation24], 4294962944 }
 0x235   :  { %14225 = dma.done.wait [#allocation27], 3088  }
 0x236   :  { %14226 = vsyncadd [#allocation27], 4294964208 }
 0x237   :  { %14227 = dma.done.wait [#allocation30], 32  }
 0x238   :  { %14228 = vsyncadd [#allocation30], 4294967264 }
 0x239   :  { %14229 = dma.done.wait [#allocation33], 256  }
 0x23a   :  { %14230 = vsyncadd [#allocation33], 4294967040 }
 0x23b   :  { %14231 = dma.done.wait [#allocation36], 256  }
 0x23c   :  { %14232 = vsyncadd [#allocation36], 4294967040 }
 0x23d   :  { %14233 = dma.done.wait [#allocation39], 8320  }
 0x23e   :  { %14234 = vsyncadd [#allocation39], 4294958976 }
 0x23f   :  { %14235 = dma.done.wait [#allocation42], 12320  }
 0x240   :  { %14236 = vsyncadd [#allocation42], 4294954976 }
 0x241   :  { %14237 = dma.done.wait [#allocation45], 64  }
 0x242   :  { %14238 = vsyncadd [#allocation45], 4294967232 }
 0x243   :  { %14239 = dma.done.wait [#allocation48], 128  }
 0x244   :  { %14240 = vsyncadd [#allocation48], 4294967168 }
 0x245   :  { %14241 = dma.done.wait [#allocation51], 128  }
 0x246   :  { %14242 = vsyncadd [#allocation51], 4294967168 }
 0x247   :  { %14243 = dma.done.wait [#allocation54], 32832  }
 0x248   :  { %14244 = vsyncadd [#allocation54], 4294934464 }
 0x249   :  { %14245 = dma.done.wait [#allocation57], 49216  }
 0x24a   :  { %14246 = vsyncadd [#allocation57], 4294918080 }
 0x24b   :  { %14247 = dma.done.wait [#allocation60], 128  }
 0x24c   :  { %14248 = vsyncadd [#allocation60], 4294967168 }
 0x24d   :  { %14249 = dma.done.wait [#allocation63], 4128  }
 0x24e   :  { %14250 = vsyncadd [#allocation63], 4294963168 }
 0x24f   :  { %14251 = dma.done.wait [#allocation66], 16  }
 0x250   :  { %14252 = vsyncadd [#allocation66], 4294967280  ;;  %s15059_s17 = sld [smem:[#allocation91_spill]]  ;;  %vm760_vm0 = vcmask 1041408   ;;  %vm761_vm1 = vcmask 1042432   ;;  %v14355_v0 = vmov 65535  }
 0x251   :  { %v762_v1 = vsel %vm760_vm0, 4294967295, %v14355_v0  ;;  %vm747_vm2 = vcmask 171008   ;;  %v12446_v3 = vld [vmem:[#allocation2 + $0x8] ss:$0 sps:$4 sm:$0x77]   ;;  %v12447_v4 = vld [vmem:[#allocation2] sm:$0xff]  }
 0x252   :  { %v763_v2 = vsel %vm761_vm1, %v762_v1, 0  ;;  %v840_v10 = vld [vmem:[#allocation7] sm:$0xff]  ;;  %vm844_vm3 = vcmask 261120   ;;  %v12452_v11 = vld [vmem:[#allocation11 + $0xa8] ss:$12 sps:$4 sm:$0xff]   ;;  %v843_v58 = vld [vmem:[#allocation7 + $0x18] sm:$0xff] }
 0x253   :  { %v765_v5 = vand.u32 %v12446_v3, %v763_v2  ;;  %12161 = vmatprep.mubr.msk.f32.mxu1 %vm844_vm3, %v840_v10  ;;  %v12454_v12 = vld [vmem:[#allocation11 + $0xac] ss:$12 sps:$4 sm:$0xff]   ;;  %v12457_v13 = vld [vmem:[#allocation11 + $0x94] ss:$12 sps:$4 sm:$0xff]   ;;  %v12455_v14 = vld [vmem:[#allocation11 + $0x90] ss:$12 sps:$4 sm:$0xff]  }
 0x254   :  { %v12461_v15 = vld [vmem:[#allocation11 + $0x7c] ss:$12 sps:$4 sm:$0xff]   ;;  %v12459_v16 = vld [vmem:[#allocation11 + $0x78] ss:$12 sps:$4 sm:$0xff]   ;;  %v12463_v18 = vld [vmem:[#allocation11 + $0x60] ss:$12 sps:$4 sm:$0xff]  }
 0x255   :  { %12141 = vmatprep.subr.bf16.mxu0 %v765_v5  ;;  %v12465_v17 = vld [vmem:[#allocation11 + $0x64] ss:$12 sps:$4 sm:$0xff]   ;;  %v12469_v19 = vld [vmem:[#allocation11 + $0x4c] ss:$12 sps:$4 sm:$0xff]   ;;  %v12467_v20 = vld [vmem:[#allocation11 + $0x48] ss:$12 sps:$4 sm:$0xff]  }
 0x256   :  { %v12448_v6 = vld [vmem:[%s15059_s17] sm:$0xff]   ;;  %12142 = vmatpush3.bf16.msra.mxu0 %v765_v5  ;;  %v12449_v7 = vld [vmem:[%s15059_s17 + $0x8] sm:$0xff]   ;;  %v12450_v8 = vld [vmem:[%s15059_s17 + $0x10] sm:$0xff]   ;;  %v14356_v3 = vmov 0   ;;  %vm14358_vm4 = vmmov 0   ;;  %vm2789_vm5 = vcmask 130048  }
 0x257   :  { %12145 = vmatprep.mubr.msk.bf16.mxu0 %vm747_vm2, %v12448_v6  ;;  %12143 = vmatprep.subr.bf16.mxu0 %v12447_v4  ;;  %v12451_v9 = vld [vmem:[%s15059_s17 + $0x18] sm:$0xff]   ;;  %v12473_v21 = vld [vmem:[#allocation11 + $0x34] ss:$12 sps:$4 sm:$0xff]   ;;  %v12475_v24 = vld [vmem:[#allocation11 + $0x18] ss:$12 sps:$4 sm:$0xff]   ;;  %vm4553_vm6 = vcmask 64512  }
 0x258   :  { %v12471_v22 = vld [vmem:[#allocation11 + $0x30] ss:$12 sps:$4 sm:$0xff]   ;;  %v841_v55 = vld [vmem:[#allocation7 + $0x8] sm:$0xff]  ;;  %v12462_v57 = vld [vmem:[#allocation11 + $0x98] ss:$12 sps:$4 sm:$0xff]   ;;  %vm10030_vm7 = vcmask 1043456  }
 0x259   :  { %v12477_v23 = vld [vmem:[#allocation11 + $0x1c] ss:$12 sps:$4 sm:$0xff]   ;;  %v842_v56 = vld [vmem:[#allocation7 + $0x10] sm:$0xff]  ;;  %v12466_v59 = vld [vmem:[#allocation11 + $0x80] ss:$12 sps:$4 sm:$0xff]   ;;  %vm10026_vm8 = vcmask 31744  }
 0x25a   :  { %12144 = vmatpush3.bf16.msra.mxu0 %v12447_v4  ;;  %v10973_v25 = vld [vmem:[#allocation5] ss:$0 sm:$0xff]  ;;  %v12470_v60 = vld [vmem:[#allocation11 + $0x68] ss:$12 sps:$4 sm:$0xff]   ;;  %v12478_v62 = vld [vmem:[#allocation11 + $0x38] ss:$12 sps:$4 sm:$0xff]  }
 0x25b   :  { %1120 = vmatprep.subr.bf16.mxu0 %v12454_v12  ;;  %v12458_v53 = vld [vmem:[#allocation11 + $0xb0] ss:$12 sps:$4 sm:$0xff]   ;;  %v12482_v0 = vld [vmem:[#allocation11 + $0x20] ss:$12 sps:$4 sm:$0xff]   ;;  %v12483_v2 = vld [vmem:[#allocation11 + $0x8] ss:$12 sps:$4 sm:$0xff]  }
 0x25c   :  { %v12474_v61 = vld [vmem:[#allocation11 + $0x50] ss:$12 sps:$4 sm:$0xff]   ;;  %v12479_v1 = vld [vmem:[#allocation11] ss:$12 sps:$4 sm:$0xff]   ;;  %s14359_s4 = smov [#allocation67]  }
 0x25d   :  { %12146 = vmatmul.mubr.msk.bf16.vlgmr.msra.gmra.mxu0 %vm747_vm2, %v12449_v7  ;;  %v12481_v63 = vld [vmem:[#allocation11 + $0x4] ss:$12 sps:$4 sm:$0xff]   ;;  %s10900_s3 = sshll.u32 %s14359_s4, 4  ;;  %s10901_s3 = int_to_ptr.vmem [resolvable:$true] %s10900_s3 }
 0x25e   :  { %12149 = vmatprep.mubr.msk.bf16.mxu0 %vm747_vm2, %v12450_v8  ;;  %1121 = vmatpush1.bf16.msra.mxu0 %v12452_v11  ;;  %s14189_s21 = scalar_lea.vmem %s10901_s3, 32  ;;  %p14194_p1 = scmp.lt.s32.totalorder %s10901_s3, %s10901_s3 }
 0x25f   :  { %1122 = vmatprep.subr.bf16.mxu0 %v12457_v13  ;;  %p14190_p0 = scmp.ne.s32.totalorder %s10901_s3, %s14189_s21  ;;  %p14195_p2 = scmp.lt.s32.totalorder %s14189_s21, %s14189_s21 }
 0x261   :  { %p14196_p3 = por %p14195_p2, %p14194_p1 }
 0x262   :  { %1123 = vmatpush1.bf16.msra.mxu0 %v12455_v14  ;;  %v14688_v14 = vld [vmem:[#allocation8] sm:$0xff] }
 0x263   :  { %1124 = vmatprep.subr.bf16.mxu0 %v12461_v15  ;;  %v14690_v15 = vld [vmem:[#allocation10] sm:$0xff]  ;;  %p14197_p4 = pnand %p14196_p3, %p14190_p0 }
 0x265   :  { %12150 = vmatmul.mubr.msk.bf16.gmra.mxu0 %vm747_vm2, %v12451_v9 }
 0x266   :  { %1125 = vmatpush1.bf16.msra.mxu0 %v12459_v16  ;;  %1152 = vmatprep.mubr.bf16.mxu0 %v14356_v3 }
 0x267   :  { %1126 = vmatprep.subr.bf16.mxu0 %v12465_v17 }
 0x26a   :  { %1127 = vmatpush1.bf16.msra.mxu0 %v12463_v18 }
 0x26b   :  { %1128 = vmatprep.subr.bf16.mxu0 %v12469_v19 }
 0x26e   :  { %1129 = vmatpush1.bf16.msra.mxu0 %v12467_v20 }
 0x26f   :  { %1130 = vmatprep.subr.bf16.mxu0 %v12473_v21 }
 0x272   :  { %1131 = vmatpush1.bf16.msra.mxu0 %v12471_v22 }
 0x273   :  { %1132 = vmatprep.subr.bf16.mxu0 %v12477_v23 }
 0x276   :  { %1133 = vmatpush1.bf16.msra.mxu0 %v12475_v24 }
 0x277   :  { %1134 = vmatprep.subr.bf16.mxu0 %v12481_v63 }
 0x27a   :  { %1135 = vmatpush1.bf16.msra.mxu0 %v12479_v1 }
 0x31d   :  { %v12147_v26 = vpop.f32.mrf.mxu0 }
 0x31e   :  { %v810_v27 = vadd.f32 %v12147_v26, %v10973_v25 }
 0x31f   :  { %v801_v28 = vpop.f32.mrf.mxu0 }
 0x320   :  { %v802_v29 = vadd.f32 %v10973_v25, %v801_v28  ;;  %v834_v37 = vmax.f32 %v810_v27, 0.0  ;;  %v14702_v27 = vld [vmem:[#allocation10 + $0x8] sm:$0xff]  ;;  %v14704_v28 = vld [vmem:[#allocation10 + $0x10] sm:$0xff] }
 0x321   :  { %v12148_v30 = vpop.f32.mrf.mxu0 }
 0x322   :  { %v813_v31 = vadd.f32 %v12148_v30, %v10973_v25  ;;  %v832_v41 = vmax.f32 %v802_v29, 0.0  ;;  %v12490_v29 = vld [vmem:[#allocation14 + $0xb0] ss:$12 sps:$4 sm:$0xff]   ;;  %v14708_v30 = vld [vmem:[#allocation8 + $0x8] sm:$0xff] }
 0x323   :  { %v804_v32 = vpop.f32.mrf.mxu0 }
 0x324   :  { %v805_v33 = vadd.f32 %v10973_v25, %v804_v32  ;;  %v835_v46 = vmax.f32 %v813_v31, 0.0  ;;  %v14712_v31 = vld [vmem:[#allocation10 + $0x18] sm:$0xff] }
 0x325   :  { %v12151_v34 = vpop.f32.mrf.mxu0  ;;  %v12486_v32 = vld [vmem:[#allocation14 + $0xac] ss:$12 sps:$4 sm:$0xff]  }
 0x326   :  { %v826_v35 = vadd.f32 %v12151_v34, %v10973_v25  ;;  %v833_v50 = vmax.f32 %v805_v33, 0.0  ;;  %v14714_v33 = vld [vmem:[#allocation8 + $0x10] sm:$0xff] }
 0x327   :  { %v817_v36 = vpop.f32.mrf.mxu0  ;;  %v12484_v34 = vld [vmem:[#allocation14 + $0xa8] ss:$12 sps:$4 sm:$0xff]  }
 0x328   :  { %v838_v38 = vmax.f32 %v826_v35, 0.0  ;;  %v818_v39 = vadd.f32 %v10973_v25, %v817_v36  ;;  %v12494_v35 = vld [vmem:[#allocation14 + $0x98] ss:$12 sps:$4 sm:$0xff]   ;;  %v12489_v36 = vld [vmem:[#allocation14 + $0x94] ss:$12 sps:$4 sm:$0xff]  }
 0x329   :  { %v12152_v40 = vpop.f32.mrf.mxu0 }
 0x32a   :  { %v836_v42 = vmax.f32 %v818_v39, 0.0  ;;  %v829_v43 = vadd.f32 %v12152_v40, %v10973_v25  ;;  %v14672_v44 = vmax.f32 %v834_v37, %v838_v38  ;;  %v12498_v37 = vld [vmem:[#allocation14 + $0x80] ss:$12 sps:$4 sm:$0xff]   ;;  %v12487_v39 = vld [vmem:[#allocation14 + $0x90] ss:$12 sps:$4 sm:$0xff]  }
 0x32b   :  { %v820_v45 = vpop.f32.mrf.mxu0  ;;  %v12493_v40 = vld [vmem:[#allocation14 + $0x7c] ss:$12 sps:$4 sm:$0xff]  }
 0x32c   :  { %v839_v47 = vmax.f32 %v829_v43, 0.0  ;;  %v821_v48 = vadd.f32 %v10973_v25, %v820_v45  ;;  %v942_v49 = vmax.f32 %v832_v41, %v836_v42  ;;  %v12502_v41 = vld [vmem:[#allocation14 + $0x68] ss:$12 sps:$4 sm:$0xff]   ;;  %v12497_v43 = vld [vmem:[#allocation14 + $0x64] ss:$12 sps:$4 sm:$0xff]  }
 0x32d   :  { %v12501_v45 = vld [vmem:[#allocation14 + $0x4c] ss:$12 sps:$4 sm:$0xff]  }
 0x32e   :  { %v837_v51 = vmax.f32 %v821_v48, 0.0  ;;  %12153 = vmatprep.subr.mxu1 %v839_v47  ;;  %v945_v52 = vmax.f32 %v835_v46, %v839_v47  ;;  %v12499_v46 = vld [vmem:[#allocation14 + $0x48] ss:$12 sps:$4 sm:$0xff]   ;;  %v12506_v48 = vld [vmem:[#allocation14 + $0x50] ss:$12 sps:$4 sm:$0xff]  }
 0x32f   :  { %12154 = vmatpush3.msra.mxu1 %v839_v47  ;;  %v12505_v47 = vld [vmem:[#allocation14 + $0x34] ss:$12 sps:$4 sm:$0xff]  }
 0x330   :  { %12155 = vmatprep.subr.mxu1 %v838_v38  ;;  %v943_v54 = vmax.f32 %v833_v50, %v837_v51  ;;  %v12509_v50 = vld [vmem:[#allocation14 + $0x1c] ss:$12 sps:$4 sm:$0xff]  }
 0x331   :  { %12156 = vmatpush3.msra.mxu1 %v838_v38  ;;  %v14722_v38 = vld [vmem:[#allocation8 + $0x18] sm:$0xff] }
 0x332   :  { %12157 = vmatprep.subr.mxu1 %v837_v51 }
 0x333   :  { %12158 = vmatpush3.msra.mxu1 %v837_v51  ;;  %v12510_v51 = vld [vmem:[#allocation14 + $0x38] ss:$12 sps:$4 sm:$0xff]  }
 0x334   :  { %12159 = vmatprep.subr.mxu1 %v836_v42 }
 0x335   :  { %12160 = vmatpush3.msra.mxu1 %v836_v42  ;;  %v12491_v42 = vld [vmem:[#allocation14 + $0x78] ss:$12 sps:$4 sm:$0xff]  }
 0x336   :  { %12162 = vmatmul.mubr.msk.f32.vlgmr.msra.gmra.mxu1 %vm844_vm3, %v841_v55  ;;  %12167 = vmatprep.subr.bf16.mxu1 %v12458_v53  ;;  %v12511_v55 = vld [vmem:[#allocation14] ss:$12 sps:$4 sm:$0xff]  }
 0x337   :  { %12164 = vmatprep.mubr.msk.f32.mxu1 %vm844_vm3, %v842_v56  ;;  %12168 = vmatpush3.bf16.msra.mxu1 %v12458_v53  ;;  %v12513_v53 = vld [vmem:[#allocation14 + $0x4] ss:$12 sps:$4 sm:$0xff]   ;;  %v12515_v56 = vld [vmem:[#allocation14 + $0x8] ss:$12 sps:$4 sm:$0xff]  }
 0x338   :  { %12169 = vmatprep.subr.bf16.mxu1 %v12462_v57 }
 0x33a   :  { %12165 = vmatmul.mubr.msk.f32.gmra.mxu1 %vm844_vm3, %v843_v58 }
 0x33b   :  { %12170 = vmatpush3.bf16.msra.mxu1 %v12462_v57 }
 0x33c   :  { %12171 = vmatprep.subr.bf16.mxu1 %v12466_v59 }
 0x33f   :  { %12172 = vmatpush3.bf16.msra.mxu1 %v12466_v59 }
 0x340   :  { %12173 = vmatprep.subr.bf16.mxu1 %v12470_v60 }
 0x343   :  { %12174 = vmatpush3.bf16.msra.mxu1 %v12470_v60 }
 0x344   :  { %12175 = vmatprep.subr.bf16.mxu1 %v12474_v61 }
 0x347   :  { %12176 = vmatpush3.bf16.msra.mxu1 %v12474_v61 }
 0x348   :  { %12177 = vmatprep.subr.bf16.mxu1 %v12478_v62 }
 0x34b   :  { %12178 = vmatpush3.bf16.msra.mxu1 %v12478_v62  ;;  %v11020_v62 = vld [vmem:[#allocation13] ss:$0 sm:$0xff] }
 0x34c   :  { %12179 = vmatprep.subr.bf16.mxu1 %v12482_v0 }
 0x34f   :  { %12180 = vmatpush3.bf16.msra.mxu1 %v12482_v0 }
 0x350   :  { %12181 = vmatprep.subr.bf16.mxu1 %v12483_v2 }
 0x353   :  { %12182 = vmatpush3.bf16.msra.mxu1 %v12483_v2 }
 0x3f6   :  { %v12163_v4 = vpop.f32.mrf.mxu1 }
 0x3f7   :  { %v947_v6 = vmax.f32 %v943_v54, %v12163_v4  ;;  %v12514_v54 = vld [vmem:[#allocation14 + $0x20] ss:$12 sps:$4 sm:$0xff]  }
 0x3f8   :  { %v923_v5 = vpop.f32.mrf.mxu1 }
 0x3f9   :  { %v946_v7 = vmax.f32 %v942_v49, %v923_v5  ;;  %v12503_v49 = vld [vmem:[#allocation14 + $0x30] ss:$12 sps:$4 sm:$0xff]  }
 0x3fa   :  { %v12166_v8 = vpop.f32.mrf.mxu1 }
 0x3fb   :  { %v14678_v9 = vpack.c.bf16 %v947_v6, %v946_v7  ;;  %v949_v11 = vmax.f32 %v945_v52, %v12166_v8  ;;  %v12507_v52 = vld [vmem:[#allocation14 + $0x18] ss:$12 sps:$4 sm:$0xff]  }
 0x3fc   :  { %v933_v10 = vpop.f32.mrf.mxu1 }
 0x3fd   :  { %v948_v12 = vmax.f32 %v14672_v44, %v933_v10  ;;  %1153 = vmatmul.mubr.bf16.vlgmr.msra.gmra.mxu0 %v14678_v9  ;;  %12183 = vmatprep.mubr.bf16.mxu1 %v14678_v9  ;;  %v12495_v44 = vld [vmem:[#allocation14 + $0x60] ss:$12 sps:$4 sm:$0xff]  }
 0x3fe   :  { %1162 = vmatprep.mubr.bf16.mxu0 %v14356_v3 }
 0x3ff   :  { %v14684_v13 = vpack.c.bf16 %v949_v11, %v948_v12 }
 0x401   :  { %12184 = vmatmul.mubr.bf16.vlgmr.msra.gmra.mxu1 %v14684_v13 }
 0x402   :  { %12195 = vmatprep.mubr.msk.f32.mxu1 %vm844_vm3, %v14688_v14 }
 0x405   :  { %1163 = vmatmul.mubr.bf16.gmra.mxu0 %v14684_v13 }
 0x406   :  { %12209 = vmatprep.mubr.msk.f32.mxu0 %vm844_vm3, %v14690_v15 }
 0x4bd   :  { %v1154_v16 = vpop.f32.mrf.mxu0 }
 0x4bf   :  { %v14696_v17 = vpop.f32.mrf.mxu0 }
 0x4c1   :  { %v1158_v18 = vpop.f32.mrf.mxu0  ;;  %v12185_v19 = vpop.f32.mrf.mxu1 }
 0x4c3   :  { %v14698_v20 = vpop.f32.mrf.mxu0  ;;  %v1207_v21 = vpop.f32.mrf.mxu1 }
 0x4c5   :  { %v1164_v22 = vpop.f32.mrf.mxu0  ;;  %v12186_v23 = vpop.f32.mrf.mxu1 }
 0x4c6   :  { %12201 = vmatprep.subr.mxu0 %v12186_v23 }
 0x4c7   :  { %v14700_v24 = vpop.f32.mrf.mxu0  ;;  %12202 = vmatpush3.msra.mxu0 %v12186_v23  ;;  %v1210_v25 = vpop.f32.mrf.mxu1 }
 0x4c8   :  { %12203 = vmatprep.subr.mxu0 %v12185_v19 }
 0x4c9   :  { %v1168_v26 = vpop.f32.mrf.mxu0  ;;  %12204 = vmatpush3.msra.mxu0 %v12185_v19 }
 0x4ca   :  { %12187 = vmatprep.subr.mxu1 %v1168_v26  ;;  %12205 = vmatprep.subr.mxu0 %v1210_v25 }
 0x4cb   :  { %12188 = vmatpush3.msra.mxu1 %v1168_v26  ;;  %12206 = vmatpush3.msra.mxu0 %v1210_v25  ;;  %v1170_v57 = vpop.f32.mrf.mxu0 }
 0x4cc   :  { %12189 = vmatprep.subr.mxu1 %v1164_v22  ;;  %12207 = vmatprep.subr.mxu0 %v1207_v21 }
 0x4cd   :  { %12190 = vmatpush3.msra.mxu1 %v1164_v22  ;;  %12208 = vmatpush3.msra.mxu0 %v1207_v21 }
 0x4ce   :  { %12191 = vmatprep.subr.mxu1 %v1158_v18  ;;  %12210 = vmatmul.mubr.msk.f32.vlgmr.msra.gmra.mxu0 %vm844_vm3, %v14702_v27 }
 0x4cf   :  { %12192 = vmatpush3.msra.mxu1 %v1158_v18  ;;  %12212 = vmatprep.mubr.msk.f32.mxu0 %vm844_vm3, %v14704_v28 }
 0x4d0   :  { %12193 = vmatprep.subr.mxu1 %v1154_v16  ;;  %12215 = vmatprep.subr.bf16.mxu0 %v12490_v29 }
 0x4d1   :  { %12194 = vmatpush3.msra.mxu1 %v1154_v16  ;;  %12216 = vmatpush3.bf16.msra.mxu0 %v12490_v29 }
 0x4d2   :  { %12196 = vmatmul.mubr.msk.f32.vlgmr.msra.gmra.mxu1 %vm844_vm3, %v14708_v30  ;;  %12213 = vmatmul.mubr.msk.f32.gmra.mxu0 %vm844_vm3, %v14712_v31 }
 0x4d3   :  { %12198 = vmatprep.mubr.msk.f32.mxu1 %vm844_vm3, %v14714_v33  ;;  %1597 = vmatprep.subr.bf16.mxu1 %v12486_v32 }
 0x4d4   :  { %1598 = vmatpush1.bf16.msra.mxu1 %v12484_v34  ;;  %12217 = vmatprep.subr.bf16.mxu0 %v12494_v35 }
 0x4d5   :  { %1599 = vmatprep.subr.bf16.mxu1 %v12489_v36  ;;  %12218 = vmatpush3.bf16.msra.mxu0 %v12494_v35 }
 0x4d6   :  { %12199 = vmatmul.mubr.msk.f32.gmra.mxu1 %vm844_vm3, %v14722_v38  ;;  %12219 = vmatprep.subr.bf16.mxu0 %v12498_v37 }
 0x4d7   :  { %1629 = vmatprep.mubr.bf16.mxu1 %v14356_v3 }
 0x4d8   :  { %1600 = vmatpush1.bf16.msra.mxu1 %v12487_v39 }
 0x4d9   :  { %1601 = vmatprep.subr.bf16.mxu1 %v12493_v40  ;;  %12220 = vmatpush3.bf16.msra.mxu0 %v12498_v37 }
 0x4da   :  { %12221 = vmatprep.subr.bf16.mxu0 %v12502_v41 }
 0x4dc   :  { %1602 = vmatpush1.bf16.msra.mxu1 %v12491_v42  ;;  %v12519_v42 = vld [vmem:[#allocation25 + $0xe8] ss:$16 sps:$4 sm:$0xff]  }
 0x4dd   :  { %1603 = vmatprep.subr.bf16.mxu1 %v12497_v43  ;;  %12222 = vmatpush3.bf16.msra.mxu0 %v12502_v41  ;;  %v12518_v43 = vld [vmem:[#allocation25 + $0xe4] ss:$16 sps:$4 sm:$0xff]  }
 0x4de   :  { %12223 = vmatprep.subr.bf16.mxu0 %v12506_v48 }
 0x4e0   :  { %1604 = vmatpush1.bf16.msra.mxu1 %v12495_v44  ;;  %v12516_v44 = vld [vmem:[#allocation25 + $0xe0] ss:$16 sps:$4 sm:$0xff]  }
 0x4e1   :  { %1605 = vmatprep.subr.bf16.mxu1 %v12501_v45  ;;  %12224 = vmatpush3.bf16.msra.mxu0 %v12506_v48  ;;  %v12527_v45 = vld [vmem:[#allocation25 + $0xcc] ss:$16 sps:$4 sm:$0xff]   ;;  %v12530_v48 = vld [vmem:[#allocation25 + $0xa4] ss:$16 sps:$4 sm:$0xff]  }
 0x4e2   :  { %12225 = vmatprep.subr.bf16.mxu0 %v12510_v51 }
 0x4e4   :  { %1606 = vmatpush1.bf16.msra.mxu1 %v12499_v46  ;;  %v12524_v46 = vld [vmem:[#allocation25 + $0xc4] ss:$16 sps:$4 sm:$0xff]  }
 0x4e5   :  { %1607 = vmatprep.subr.bf16.mxu1 %v12505_v47  ;;  %12226 = vmatpush3.bf16.msra.mxu0 %v12510_v51  ;;  %v12525_v47 = vld [vmem:[#allocation25 + $0xc8] ss:$16 sps:$4 sm:$0xff]   ;;  %v12545_v51 = vld [vmem:[#allocation25 + $0x6c] ss:$16 sps:$4 sm:$0xff]  }
 0x4e6   :  { %12227 = vmatprep.subr.bf16.mxu0 %v12514_v54 }
 0x4e8   :  { %1608 = vmatpush1.bf16.msra.mxu1 %v12503_v49  ;;  %v12531_v49 = vld [vmem:[#allocation25 + $0xa8] ss:$16 sps:$4 sm:$0xff]  }
 0x4e9   :  { %1609 = vmatprep.subr.bf16.mxu1 %v12509_v50  ;;  %12228 = vmatpush3.bf16.msra.mxu0 %v12514_v54  ;;  %v12537_v50 = vld [vmem:[#allocation25 + $0x88] ss:$16 sps:$4 sm:$0xff]   ;;  %v12540_v54 = vld [vmem:[#allocation25 + $0x60] ss:$16 sps:$4 sm:$0xff]  }
 0x4ea   :  { %12229 = vmatprep.subr.bf16.mxu0 %v12515_v56 }
 0x4ec   :  { %1610 = vmatpush1.bf16.msra.mxu1 %v12507_v52  ;;  %v12534_v52 = vld [vmem:[#allocation25 + $0x80] ss:$16 sps:$4 sm:$0xff]  }
 0x4ed   :  { %1611 = vmatprep.subr.bf16.mxu1 %v12513_v53  ;;  %12230 = vmatpush3.bf16.msra.mxu0 %v12515_v56  ;;  %v12542_v53 = vld [vmem:[#allocation25 + $0x64] ss:$16 sps:$4 sm:$0xff]   ;;  %v12551_v56 = vld [vmem:[#allocation25 + $0x4c] ss:$16 sps:$4 sm:$0xff]  }
 0x4f0   :  { %1612 = vmatpush1.bf16.msra.mxu1 %v12511_v55  ;;  %v12548_v55 = vld [vmem:[#allocation25 + $0x44] ss:$16 sps:$4 sm:$0xff]  }
 0x58e   :  { %v12211_v58 = vpop.f32.mrf.mxu0 }
 0x590   :  { %v1397_v60 = vpop.f32.mrf.mxu0 }
 0x592   :  { %v12197_v59 = vpop.f32.mrf.mxu1  ;;  %v12214_v0 = vpop.f32.mrf.mxu0 }
 0x593   :  { %v1306_v61 = vadd.f32 %v12197_v59, %v14698_v20  ;;  %v12554_v59 = vld [vmem:[#allocation25 + $0x24] ss:$16 sps:$4 sm:$0xff]  }
 0x594   :  { %v1300_v63 = vpop.f32.mrf.mxu1  ;;  %v1407_v10 = vpop.f32.mrf.mxu0 }
 0x595   :  { %v1417_v1 = vadd.f32 %v12211_v58, %v1306_v61  ;;  %v1301_v2 = vadd.f32 %v1300_v63, %v14696_v17  ;;  %v12549_v58 = vld [vmem:[#allocation25 + $0x48] ss:$16 sps:$4 sm:$0xff]   ;;  %v12552_v61 = vld [vmem:[#allocation25 + $0x20] ss:$16 sps:$4 sm:$0xff]   ;;  %v12560_v63 = vld [vmem:[#allocation25 + $0x4] ss:$16 sps:$4 sm:$0xff]  }
 0x596   :  { %v12200_v4 = vpop.f32.mrf.mxu1 }
 0x597   :  { %v1428_v5 = vadd.f32 %v11020_v62, %v1417_v1  ;;  %v1416_v6 = vadd.f32 %v1397_v60, %v1301_v2  ;;  %v1316_v7 = vadd.f32 %v12200_v4, %v1170_v57  ;;  %v12546_v57 = vld [vmem:[#allocation25 + $0x40] ss:$16 sps:$4 sm:$0xff]   ;;  %v12557_v60 = vld [vmem:[#allocation25 + $0x2c] ss:$16 sps:$4 sm:$0xff]   ;;  %v12561_v2 = vld [vmem:[#allocation25 + $0x8] ss:$16 sps:$4 sm:$0xff]  }
 0x598   :  { %v1310_v8 = vpop.f32.mrf.mxu1  ;;  %v12558_v1 = vld [vmem:[#allocation25] ss:$16 sps:$4 sm:$0xff]  }
 0x599   :  { %v1427_v11 = vadd.f32 %v11020_v62, %v1416_v6  ;;  %v1311_v12 = vadd.f32 %v1310_v8, %v14700_v24  ;;  %v1419_v16 = vadd.f32 %v12214_v0, %v1316_v7  ;;  %v1432_v18 = vmax.f32 %v1428_v5, 0.0  ;;  %v12563_v0 = vld [vmem:[#allocation25 + $0xc] ss:$16 sps:$4 sm:$0xff]  }
 0x59b   :  { %v1431_v19 = vmax.f32 %v1427_v11, 0.0  ;;  %v1430_v21 = vadd.f32 %v11020_v62, %v1419_v16  ;;  %v1418_v20 = vadd.f32 %v1407_v10, %v1311_v12  ;;  %v11053_v10 = vld [vmem:[#allocation16] ss:$0 sm:$0xff] }
 0x59d   :  { %v1435_v22 = vpack.c.bf16 %v1432_v18, %v1431_v19  ;;  %v1429_v23 = vadd.f32 %v11020_v62, %v1418_v20  ;;  %v1434_v25 = vmax.f32 %v1430_v21, 0.0  ;;  %v12555_v62 = vld [vmem:[#allocation25 + $0x28] ss:$16 sps:$4 sm:$0xff]   ;;  %v1885_v20 = vunpack.c.h.bf16 %v14678_v9 }
 0x59f   :  { %v1433_v26 = vmax.f32 %v1429_v23, 0.0  ;;  %1630 = vmatmul.mubr.bf16.vlgmr.msra.gmra.mxu1 %v1435_v22  ;;  %12231 = vmatprep.mubr.bf16.mxu0 %v1435_v22 }
 0x5a0   :  { %1639 = vmatprep.mubr.bf16.mxu1 %v14356_v3 }
 0x5a1   :  { %v1436_v17 = vpack.c.bf16 %v1434_v25, %v1433_v26  ;;  %v1884_v25 = vunpack.c.l.bf16 %v14678_v9 }
 0x5a3   :  { %12232 = vmatmul.mubr.bf16.vlgmr.msra.gmra.mxu0 %v1436_v17 }
 0x5a4   :  { %12243 = vmatprep.mubr.msk.f32.mxu0 %vm844_vm3, %v14688_v14 }
 0x5a7   :  { %1640 = vmatmul.mubr.bf16.gmra.mxu1 %v1436_v17 }
 0x5a8   :  { %12257 = vmatprep.mubr.msk.f32.mxu1 %vm844_vm3, %v14690_v15  ;;  %v12521_v15 = vld [vmem:[#allocation25 + $0xec] ss:$16 sps:$4 sm:$0xff]  }
 0x65f   :  { %v1631_v24 = vpop.f32.mrf.mxu1 }
 0x661   :  { %v14735_v29 = vpop.f32.mrf.mxu1 }
 0x663   :  { %v1635_v32 = vpop.f32.mrf.mxu1  ;;  %v12233_v34 = vpop.f32.mrf.mxu0 }
 0x665   :  { %v14737_v35 = vpop.f32.mrf.mxu1  ;;  %v1684_v36 = vpop.f32.mrf.mxu0 }
 0x667   :  { %v1641_v37 = vpop.f32.mrf.mxu1  ;;  %v12234_v39 = vpop.f32.mrf.mxu0 }
 0x668   :  { %12249 = vmatprep.subr.mxu1 %v12234_v39 }
 0x669   :  { %v14739_v40 = vpop.f32.mrf.mxu1  ;;  %12250 = vmatpush3.msra.mxu1 %v12234_v39  ;;  %v1687_v14 = vpop.f32.mrf.mxu0  ;;  %v1886_v39 = vunpack.c.l.bf16 %v14684_v13 }
 0x66a   :  { %12251 = vmatprep.subr.mxu1 %v12233_v34 }
 0x66b   :  { %v1645_v41 = vpop.f32.mrf.mxu1  ;;  %12252 = vmatpush3.msra.mxu1 %v12233_v34 }
 0x66c   :  { %12235 = vmatprep.subr.mxu0 %v1645_v41  ;;  %12253 = vmatprep.subr.mxu1 %v1687_v14 }
 0x66d   :  { %12236 = vmatpush3.msra.mxu0 %v1645_v41  ;;  %12254 = vmatpush3.msra.mxu1 %v1687_v14  ;;  %v1647_v4 = vpop.f32.mrf.mxu1 }
 0x66e   :  { %12237 = vmatprep.subr.mxu0 %v1641_v37  ;;  %12255 = vmatprep.subr.mxu1 %v1684_v36 }
 0x66f   :  { %12238 = vmatpush3.msra.mxu0 %v1641_v37  ;;  %12256 = vmatpush3.msra.mxu1 %v1684_v36 }
 0x670   :  { %12239 = vmatprep.subr.mxu0 %v1635_v32  ;;  %12258 = vmatmul.mubr.msk.f32.vlgmr.msra.gmra.mxu1 %vm844_vm3, %v14702_v27  ;;  %v12533_v27 = vld [vmem:[#allocation25 + $0xac] ss:$16 sps:$4 sm:$0xff]  }
 0x671   :  { %12240 = vmatpush3.msra.mxu0 %v1635_v32  ;;  %12260 = vmatprep.mubr.msk.f32.mxu1 %vm844_vm3, %v14704_v28  ;;  %v12522_v28 = vld [vmem:[#allocation25 + $0xc0] ss:$16 sps:$4 sm:$0xff]  }
 0x672   :  { %12241 = vmatprep.subr.mxu0 %v1631_v24  ;;  %2153 = vmatprep.subr.bf16.mxu1 %v12521_v15 }
 0x673   :  { %12242 = vmatpush3.msra.mxu0 %v1631_v24  ;;  %2154 = vmatpush1.bf16.msra.mxu1 %v12519_v42 }
 0x674   :  { %12244 = vmatmul.mubr.msk.f32.vlgmr.msra.gmra.mxu0 %vm844_vm3, %v14708_v30  ;;  %12261 = vmatmul.mubr.msk.f32.gmra.mxu1 %vm844_vm3, %v14712_v31  ;;  %v12539_v30 = vld [vmem:[#allocation25 + $0x8c] ss:$16 sps:$4 sm:$0xff]   ;;  %v12528_v31 = vld [vmem:[#allocation25 + $0xa0] ss:$16 sps:$4 sm:$0xff]  }
 0x675   :  { %12246 = vmatprep.mubr.msk.f32.mxu0 %vm844_vm3, %v14714_v33  ;;  %2100 = vmatprep.subr.bf16.mxu0 %v12518_v43  ;;  %v12536_v33 = vld [vmem:[#allocation25 + $0x84] ss:$16 sps:$4 sm:$0xff]   ;;  %v1887_v43 = vunpack.c.h.bf16 %v14684_v13 }
 0x676   :  { %2101 = vmatpush1.bf16.msra.mxu0 %v12516_v44  ;;  %2155 = vmatprep.subr.bf16.mxu1 %v12527_v45 }
 0x677   :  { %2102 = vmatprep.subr.bf16.mxu0 %v12524_v46  ;;  %2156 = vmatpush1.bf16.msra.mxu1 %v12525_v47  ;;  %v1902_v47 = vld [vmem:[#allocation17] sm:$0xff] }
 0x678   :  { %12247 = vmatmul.mubr.msk.f32.gmra.mxu0 %vm844_vm3, %v14722_v38  ;;  %2157 = vmatprep.subr.bf16.mxu1 %v12533_v27  ;;  %v12543_v38 = vld [vmem:[#allocation25 + $0x68] ss:$16 sps:$4 sm:$0xff]   ;;  %v1904_v27 = vld [vmem:[#allocation19] sm:$0xff] }
 0x679   :  { %2132 = vmatprep.mubr.bf16.mxu0 %v14356_v3  ;;  %2185 = vmatprep.mubr.bf16.mxu1 %v14356_v3 }
 0x67a   :  { %2103 = vmatpush1.bf16.msra.mxu0 %v12522_v28 }
 0x67b   :  { %2104 = vmatprep.subr.bf16.mxu0 %v12530_v48  ;;  %2158 = vmatpush1.bf16.msra.mxu1 %v12531_v49 }
 0x67c   :  { %2159 = vmatprep.subr.bf16.mxu1 %v12539_v30 }
 0x67e   :  { %2105 = vmatpush1.bf16.msra.mxu0 %v12528_v31 }
 0x67f   :  { %2106 = vmatprep.subr.bf16.mxu0 %v12536_v33  ;;  %2160 = vmatpush1.bf16.msra.mxu1 %v12537_v50 }
 0x680   :  { %2161 = vmatprep.subr.bf16.mxu1 %v12545_v51 }
 0x682   :  { %2107 = vmatpush1.bf16.msra.mxu0 %v12534_v52 }
 0x683   :  { %2108 = vmatprep.subr.bf16.mxu0 %v12542_v53  ;;  %2162 = vmatpush1.bf16.msra.mxu1 %v12543_v38 }
 0x684   :  { %2163 = vmatprep.subr.bf16.mxu1 %v12551_v56 }
 0x686   :  { %2109 = vmatpush1.bf16.msra.mxu0 %v12540_v54 }
 0x687   :  { %2110 = vmatprep.subr.bf16.mxu0 %v12548_v55  ;;  %2164 = vmatpush1.bf16.msra.mxu1 %v12549_v58 }
 0x688   :  { %2165 = vmatprep.subr.bf16.mxu1 %v12557_v60  ;;  %v1906_v60 = vld [vmem:[#allocation20] sm:$0xff] }
 0x68a   :  { %2111 = vmatpush1.bf16.msra.mxu0 %v12546_v57  ;;  %v1903_v57 = vld [vmem:[#allocation17 + $0x8] sm:$0xff] }
 0x68b   :  { %2112 = vmatprep.subr.bf16.mxu0 %v12554_v59  ;;  %2166 = vmatpush1.bf16.msra.mxu1 %v12555_v62  ;;  %v1905_v59 = vld [vmem:[#allocation19 + $0x8] sm:$0xff]  ;;  %v1907_v62 = vld [vmem:[#allocation20 + $0x8] sm:$0xff] }
 0x68c   :  { %2167 = vmatprep.subr.bf16.mxu1 %v12563_v0  ;;  %v12567_v0 = vld [vmem:[#allocation28 + $0xb0] ss:$12 sps:$4 sm:$0xff]  }
 0x68e   :  { %2113 = vmatpush1.bf16.msra.mxu0 %v12552_v61  ;;  %v12566_v61 = vld [vmem:[#allocation28 + $0xac] ss:$12 sps:$4 sm:$0xff]  }
 0x68f   :  { %2114 = vmatprep.subr.bf16.mxu0 %v12560_v63  ;;  %2168 = vmatpush1.bf16.msra.mxu1 %v12561_v2  ;;  %v12564_v63 = vld [vmem:[#allocation28 + $0xa8] ss:$12 sps:$4 sm:$0xff]   ;;  %v14357_v2 = vmov 0.0  }
 0x692   :  { %2115 = vmatpush1.bf16.msra.mxu0 %v12558_v1  ;;  %v12570_v1 = vld [vmem:[#allocation28 + $0x94] ss:$12 sps:$4 sm:$0xff]  }
 0x730   :  { %v12259_v5 = vpop.f32.mrf.mxu1 }
 0x732   :  { %v1850_v7 = vpop.f32.mrf.mxu1 }
 0x734   :  { %v12245_v6 = vpop.f32.mrf.mxu0  ;;  %v12262_v12 = vpop.f32.mrf.mxu1 }
 0x735   :  { %v1771_v8 = vadd.f32 %v12245_v6, %v14737_v35  ;;  %v12574_v6 = vld [vmem:[#allocation28 + $0x7c] ss:$12 sps:$4 sm:$0xff]  }
 0x736   :  { %v1765_v11 = vpop.f32.mrf.mxu0  ;;  %v1860_v17 = vpop.f32.mrf.mxu1 }
 0x737   :  { %v1870_v16 = vadd.f32 %v12259_v5, %v1771_v8  ;;  %v1766_v18 = vadd.f32 %v1765_v11, %v14735_v29  ;;  %v12571_v5 = vld [vmem:[#allocation28 + $0x98] ss:$12 sps:$4 sm:$0xff]   ;;  %v12575_v8 = vld [vmem:[#allocation28 + $0x80] ss:$12 sps:$4 sm:$0xff]  }
 0x738   :  { %v12248_v19 = vpop.f32.mrf.mxu0  ;;  %v12576_v11 = vld [vmem:[#allocation28 + $0x60] ss:$12 sps:$4 sm:$0xff]  }
 0x739   :  { %v1881_v21 = vadd.f32 %v11053_v10, %v1870_v16  ;;  %v1869_v22 = vadd.f32 %v1850_v7, %v1766_v18  ;;  %v1781_v23 = vadd.f32 %v12248_v19, %v1647_v4  ;;  %v12568_v4 = vld [vmem:[#allocation28 + $0x90] ss:$12 sps:$4 sm:$0xff]   ;;  %v12572_v7 = vld [vmem:[#allocation28 + $0x78] ss:$12 sps:$4 sm:$0xff]   ;;  %v12580_v16 = vld [vmem:[#allocation28 + $0x48] ss:$12 sps:$4 sm:$0xff]  }
 0x73a   :  { %v1775_v26 = vpop.f32.mrf.mxu0  ;;  %v12582_v18 = vld [vmem:[#allocation28 + $0x4c] ss:$12 sps:$4 sm:$0xff]   ;;  %v12583_v19 = vld [vmem:[#allocation28 + $0x50] ss:$12 sps:$4 sm:$0xff]  }
 0x73b   :  { %v1889_v24 = vadd.f32 %v1885_v20, %v1881_v21  ;;  %v1880_v32 = vadd.f32 %v11053_v10, %v1869_v22  ;;  %v1776_v34 = vadd.f32 %v1775_v26, %v14739_v40  ;;  %v1872_v35 = vadd.f32 %v12262_v12, %v1781_v23  ;;  %v12579_v12 = vld [vmem:[#allocation28 + $0x68] ss:$12 sps:$4 sm:$0xff]   ;;  %v12584_v20 = vld [vmem:[#allocation28 + $0x30] ss:$12 sps:$4 sm:$0xff]   ;;  %v12587_v22 = vld [vmem:[#allocation28 + $0x38] ss:$12 sps:$4 sm:$0xff]  }
 0x73c   :  { %v12586_v21 = vld [vmem:[#allocation28 + $0x34] ss:$12 sps:$4 sm:$0xff]   ;;  %v12590_v23 = vld [vmem:[#allocation28 + $0x1c] ss:$12 sps:$4 sm:$0xff]  }
 0x73d   :  { %v1888_v36 = vadd.f32 %v1884_v25, %v1880_v32  ;;  %v1871_v37 = vadd.f32 %v1860_v17, %v1776_v34  ;;  %v1893_v29 = vmax.f32 %v1889_v24, 0.0  ;;  %v1883_v41 = vadd.f32 %v11053_v10, %v1872_v35  ;;  %v12588_v25 = vld [vmem:[#allocation28 + $0x18] ss:$12 sps:$4 sm:$0xff]   ;;  %v12591_v26 = vld [vmem:[#allocation28 + $0x20] ss:$12 sps:$4 sm:$0xff]  }
 0x73e   :  { %v12594_v17 = vld [vmem:[#allocation28 + $0x4] ss:$12 sps:$4 sm:$0xff]   ;;  %v12592_v24 = vld [vmem:[#allocation28] ss:$12 sps:$4 sm:$0xff]   ;;  %v12595_v32 = vld [vmem:[#allocation28 + $0x8] ss:$12 sps:$4 sm:$0xff]  }
 0x73f   :  { %v1892_v14 = vmax.f32 %v1888_v36, 0.0  ;;  %v1882_v15 = vadd.f32 %v11053_v10, %v1871_v37  ;;  %v1891_v9 = vadd.f32 %v1887_v43, %v1883_v41  ;;  %v12578_v10 = vld [vmem:[#allocation28 + $0x64] ss:$12 sps:$4 sm:$0xff]  }
 0x741   :  { %v1896_v42 = vpack.c.bf16 %v1893_v29, %v1892_v14  ;;  %v1890_v44 = vadd.f32 %v1886_v39, %v1882_v15  ;;  %v1895_v45 = vmax.f32 %v1891_v9, 0.0  ;;  %v11092_v14 = vld [vmem:[#allocation26] ss:$0 sm:$0xff] }
 0x743   :  { %2133 = vmatmul.mubr.bf16.vlgmr.msra.gmra.mxu0 %v1896_v42  ;;  %2186 = vmatmul.mubr.bf16.vlgmr.msra.gmra.mxu1 %v1896_v42  ;;  %v1894_v40 = vmax.f32 %v1890_v44, 0.0 }
 0x744   :  { %2142 = vmatprep.mubr.bf16.mxu0 %v14356_v3  ;;  %2195 = vmatprep.mubr.bf16.mxu1 %v14356_v3 }
 0x745   :  { %v1897_v46 = vpack.c.bf16 %v1895_v45, %v1894_v40 }
 0x74b   :  { %2143 = vmatmul.mubr.bf16.gmra.mxu0 %v1897_v46  ;;  %2196 = vmatmul.mubr.bf16.gmra.mxu1 %v1897_v46 }
 0x74c   :  { %12282 = vmatprep.mubr.msk.f32.mxu1 %vm844_vm3, %v1902_v47  ;;  %12271 = vmatprep.mubr.msk.f32.mxu0 %vm844_vm3, %v1904_v27  ;;  %v1898_v47 = vld [vmem:[#allocation22] sm:$0xff] }
 0x803   :  { %v2134_v13 = vpop.f32.mrf.mxu0  ;;  %v2187_v28 = vpop.f32.mrf.mxu1 }
 0x805   :  { %v2136_v48 = vpop.f32.mrf.mxu0  ;;  %v2189_v49 = vpop.f32.mrf.mxu1 }
 0x807   :  { %v2138_v30 = vpop.f32.mrf.mxu0  ;;  %v2191_v31 = vpop.f32.mrf.mxu1 }
 0x809   :  { %v2140_v33 = vpop.f32.mrf.mxu0  ;;  %v2193_v50 = vpop.f32.mrf.mxu1 }
 0x80b   :  { %v2144_v51 = vpop.f32.mrf.mxu0  ;;  %v2197_v52 = vpop.f32.mrf.mxu1 }
 0x80d   :  { %v2146_v53 = vpop.f32.mrf.mxu0  ;;  %v2199_v38 = vpop.f32.mrf.mxu1 }
 0x80f   :  { %v2148_v54 = vpop.f32.mrf.mxu0  ;;  %v2201_v56 = vpop.f32.mrf.mxu1 }
 0x810   :  { %12274 = vmatprep.subr.mxu1 %v2148_v54 }
 0x811   :  { %v2150_v55 = vpop.f32.mrf.mxu0  ;;  %12275 = vmatpush3.msra.mxu1 %v2148_v54  ;;  %v2203_v58 = vpop.f32.mrf.mxu1  ;;  %v3021_v54 = vld [vmem:[#allocation40 + $0x180] sm:$0xff] }
 0x812   :  { %12263 = vmatprep.subr.mxu0 %v2150_v55  ;;  %12276 = vmatprep.subr.mxu1 %v2144_v51 }
 0x813   :  { %12264 = vmatpush3.msra.mxu0 %v2150_v55  ;;  %12277 = vmatpush3.msra.mxu1 %v2144_v51  ;;  %v3030_v51 = vld [vmem:[#allocation40 + $0x1c8] sm:$0xff]  ;;  %v3025_v55 = vld [vmem:[#allocation40 + $0x1a0] sm:$0xff] }
 0x814   :  { %12265 = vmatprep.subr.mxu0 %v2146_v53  ;;  %12278 = vmatprep.subr.mxu1 %v2138_v30 }
 0x815   :  { %12266 = vmatpush3.msra.mxu0 %v2146_v53  ;;  %12279 = vmatpush3.msra.mxu1 %v2138_v30 }
 0x816   :  { %12267 = vmatprep.subr.mxu0 %v2140_v33  ;;  %12280 = vmatprep.subr.mxu1 %v2134_v13 }
 0x817   :  { %12268 = vmatpush3.msra.mxu0 %v2140_v33  ;;  %12281 = vmatpush3.msra.mxu1 %v2134_v13  ;;  %v3029_v33 = vld [vmem:[#allocation40 + $0x1c0] sm:$0xff] }
 0x818   :  { %12269 = vmatprep.subr.mxu0 %v2136_v48  ;;  %12296 = vmatprep.subr.mxu1 %v2203_v58 }
 0x819   :  { %12270 = vmatpush3.msra.mxu0 %v2136_v48  ;;  %12283 = vmatmul.mubr.msk.f32.vlgmr.msra.gmra.mxu1 %vm844_vm3, %v1903_v57  ;;  %v3026_v57 = vld [vmem:[#allocation40 + $0x1a8] sm:$0xff] }
 0x81a   :  { %12297 = vmatpush3.msra.mxu1 %v2203_v58  ;;  %12285 = vmatprep.subr.mxu0 %v2201_v56 }
 0x81b   :  { %12298 = vmatprep.subr.mxu1 %v2199_v38  ;;  %12272 = vmatmul.mubr.msk.f32.vlgmr.msra.gmra.mxu0 %vm844_vm3, %v1905_v59 }
 0x81c   :  { %12286 = vmatpush3.msra.mxu0 %v2201_v56  ;;  %12299 = vmatpush3.msra.mxu1 %v2199_v38  ;;  %v3022_v56 = vld [vmem:[#allocation40 + $0x188] sm:$0xff] }
 0x81d   :  { %12287 = vmatprep.subr.mxu0 %v2197_v52  ;;  %12300 = vmatprep.subr.mxu1 %v2193_v50 }
 0x81e   :  { %12288 = vmatpush3.msra.mxu0 %v2197_v52  ;;  %12301 = vmatpush3.msra.mxu1 %v2193_v50  ;;  %v3033_v50 = vld [vmem:[#allocation40 + $0x1e0] sm:$0xff]  ;;  %v3034_v52 = vld [vmem:[#allocation40 + $0x1e8] sm:$0xff] }
 0x81f   :  { %12289 = vmatprep.subr.mxu0 %v2191_v31  ;;  %12302 = vmatprep.subr.mxu1 %v2189_v49 }
 0x820   :  { %12290 = vmatpush3.msra.mxu0 %v2191_v31  ;;  %12303 = vmatpush3.msra.mxu1 %v2189_v49 }
 0x821   :  { %12291 = vmatprep.subr.mxu0 %v2187_v28  ;;  %12293 = vmatprep.mubr.msk.f32.mxu0 %vm844_vm3, %v1906_v60  ;;  %v1901_v60 = vld [vmem:[#allocation23 + $0x8] sm:$0xff] }
 0x822   :  { %12292 = vmatpush3.msra.mxu0 %v2187_v28  ;;  %12304 = vmatprep.mubr.msk.f32.mxu1 %vm844_vm3, %v1904_v27  ;;  %v1900_v27 = vld [vmem:[#allocation23] sm:$0xff] }
 0x823   :  { %12294 = vmatmul.mubr.msk.f32.vlgmr.msra.gmra.mxu0 %vm844_vm3, %v1907_v62  ;;  %2705 = vmatprep.subr.bf16.mxu0 %v12566_v61  ;;  %v11182_v61 = vcombine.high %v3029_v33, %v3033_v50  ;;  %v11184_v62 = vcombine.high %v3030_v51, %v3034_v52 }
 0x824   :  { %12307 = vmatprep.subr.bf16.mxu1 %v14357_v2  ;;  %12305 = vmatmul.mubr.msk.f32.vlgmr.msra.gmra.mxu1 %vm844_vm3, %v1905_v59  ;;  %v1899_v59 = vld [vmem:[#allocation22 + $0x8] sm:$0xff] }
 0x825   :  { %2706 = vmatpush1.bf16.msra.mxu0 %v12564_v63  ;;  %12308 = vmatpush3.bf16.msra.mxu1 %v12567_v0  ;;  %v11181_v63 = vcombine.low %v3029_v33, %v3033_v50  ;;  %v11183_v0 = vcombine.low %v3030_v51, %v3034_v52  ;;  %v2973_v51 = vld [vmem:[#allocation40] sm:$0xff] }
 0x826   :  { %2707 = vmatprep.subr.bf16.mxu0 %v12570_v1  ;;  %12309 = vmatprep.subr.bf16.mxu1 %v14357_v2  ;;  %v11174_v1 = vcombine.high %v3021_v54, %v3025_v55  ;;  %v2977_v52 = vld [vmem:[#allocation40 + $0x20] sm:$0xff] }
 0x827   :  { %2737 = vmatprep.mubr.bf16.mxu0 %v14356_v3  ;;  %12323 = vmatprep.mubr.msk.bf16.mxu1 %vm14358_vm4, %v14357_v2 }
 0x829   :  { %2708 = vmatpush1.bf16.msra.mxu0 %v12568_v4  ;;  %12310 = vmatpush3.bf16.msra.mxu1 %v12571_v5  ;;  %v11176_v4 = vcombine.high %v3022_v56, %v3026_v57  ;;  %v3013_v5 = vld [vmem:[#allocation40 + $0x140] sm:$0xff] }
 0x82a   :  { %2709 = vmatprep.subr.bf16.mxu0 %v12574_v6  ;;  %12311 = vmatprep.subr.bf16.mxu1 %v14357_v2  ;;  %v3017_v6 = vld [vmem:[#allocation40 + $0x160] sm:$0xff] }
 0x82d   :  { %2710 = vmatpush1.bf16.msra.mxu0 %v12572_v7  ;;  %12312 = vmatpush3.bf16.msra.mxu1 %v12575_v8  ;;  %v3014_v7 = vld [vmem:[#allocation40 + $0x148] sm:$0xff] }
 0x82e   :  { %2711 = vmatprep.subr.bf16.mxu0 %v12578_v10  ;;  %12313 = vmatprep.subr.bf16.mxu1 %v14357_v2  ;;  %v3018_v8 = vld [vmem:[#allocation40 + $0x168] sm:$0xff]  ;;  %v11173_v10 = vcombine.low %v3021_v54, %v3025_v55  ;;  %v11125_v55 = vcombine.low %v2973_v51, %v2977_v52 }
 0x82f   :  { %v2978_v54 = vld [vmem:[#allocation40 + $0x28] sm:$0xff] }
 0x831   :  { %2712 = vmatpush1.bf16.msra.mxu0 %v12576_v11  ;;  %12314 = vmatpush3.bf16.msra.mxu1 %v12579_v12  ;;  %v11175_v11 = vcombine.low %v3022_v56, %v3026_v57  ;;  %v11166_v12 = vcombine.high %v3013_v5, %v3017_v6 }
 0x832   :  { %12315 = vmatprep.subr.bf16.mxu1 %v14357_v2  ;;  %2713 = vmatprep.subr.bf16.mxu0 %v12582_v18  ;;  %v3005_v18 = vld [vmem:[#allocation40 + $0x100] sm:$0xff] }
 0x835   :  { %2714 = vmatpush1.bf16.msra.mxu0 %v12580_v16  ;;  %12316 = vmatpush3.bf16.msra.mxu1 %v12583_v19  ;;  %v11168_v16 = vcombine.high %v3014_v7, %v3018_v8  ;;  %v3009_v19 = vld [vmem:[#allocation40 + $0x120] sm:$0xff] }
 0x836   :  { %2715 = vmatprep.subr.bf16.mxu0 %v12586_v21  ;;  %12317 = vmatprep.subr.bf16.mxu1 %v14357_v2  ;;  %v3006_v21 = vld [vmem:[#allocation40 + $0x108] sm:$0xff] }
 0x839   :  { %2716 = vmatpush1.bf16.msra.mxu0 %v12584_v20  ;;  %12318 = vmatpush3.bf16.msra.mxu1 %v12587_v22  ;;  %v3010_v20 = vld [vmem:[#allocation40 + $0x128] sm:$0xff]  ;;  %v11165_v22 = vcombine.low %v3013_v5, %v3017_v6 }
 0x83a   :  { %12319 = vmatprep.subr.bf16.mxu1 %v14357_v2  ;;  %2717 = vmatprep.subr.bf16.mxu0 %v12590_v23  ;;  %v11167_v23 = vcombine.low %v3014_v7, %v3018_v8  ;;  %v11093_v8 = vld [vmem:[#allocation31] ss:$0 sm:$0xff] }
 0x83d   :  { %2718 = vmatpush1.bf16.msra.mxu0 %v12588_v25  ;;  %12320 = vmatpush3.bf16.msra.mxu1 %v12591_v26  ;;  %v11158_v25 = vcombine.high %v3005_v18, %v3009_v19  ;;  %v11160_v26 = vcombine.high %v3006_v21, %v3010_v20 }
 0x83e   :  { %12321 = vmatprep.subr.bf16.mxu1 %v14357_v2  ;;  %2719 = vmatprep.subr.bf16.mxu0 %v12594_v17  ;;  %v2997_v17 = vld [vmem:[#allocation40 + $0xc0] sm:$0xff] }
 0x841   :  { %2720 = vmatpush1.bf16.msra.mxu0 %v12592_v24  ;;  %12322 = vmatpush3.bf16.msra.mxu1 %v12595_v32  ;;  %v3001_v24 = vld [vmem:[#allocation40 + $0xe0] sm:$0xff]  ;;  %v2998_v32 = vld [vmem:[#allocation40 + $0xc8] sm:$0xff] }
 0x8d9   :  { %v12284_v35 = vpop.f32.mrf.mxu1 }
 0x8db   :  { %v12273_v34 = vpop.f32.mrf.mxu0  ;;  %v2359_v37 = vpop.f32.mrf.mxu1 }
 0x8dc   :  { %v2365_v39 = vadd.f32 %v12284_v35, %v12273_v34  ;;  %v3002_v34 = vld [vmem:[#allocation40 + $0xe8] sm:$0xff]  ;;  %v11157_v35 = vcombine.low %v3005_v18, %v3009_v19 }
 0x8dd   :  { %v2278_v36 = vpop.f32.mrf.mxu0 }
 0x8de   :  { %v2360_v41 = vadd.f32 %v2359_v37, %v2278_v36  ;;  %v11159_v36 = vcombine.low %v3006_v21, %v3010_v20  ;;  %v11150_v37 = vcombine.high %v2997_v17, %v3001_v24 }
 0x8e3   :  { %v12295_v29 = vpop.f32.mrf.mxu0 }
 0x8e4   :  { %v2450_v15 = vadd.f32 %v12295_v29, %v2365_v39  ;;  %v14784_v13 = vpop.f32.mrf.mxu1  ;;  %v11152_v39 = vcombine.high %v2998_v32, %v3002_v34  ;;  %v11149_v29 = vcombine.low %v2997_v17, %v3001_v24  ;;  %v3023_v17 = vld [vmem:[#allocation40 + $0x190] sm:$0xff] }
 0x8e5   :  { %v2440_v42 = vpop.f32.mrf.mxu0  ;;  %v2541_v19 = vadd.f32 %v14784_v13, %v11093_v8  ;;  %v3027_v24 = vld [vmem:[#allocation40 + $0x1b0] sm:$0xff]  ;;  %v3016_v13 = vld [vmem:[#allocation40 + $0x158] sm:$0xff] }
 0x8e6   :  { %v2459_v43 = vadd.f32 %v11092_v14, %v2450_v15  ;;  %v2449_v44 = vadd.f32 %v2440_v42, %v2360_v41  ;;  %v14786_v28 = vpop.f32.mrf.mxu1  ;;  %v2989_v41 = vld [vmem:[#allocation40 + $0x80] sm:$0xff]  ;;  %v2990_v42 = vld [vmem:[#allocation40 + $0x88] sm:$0xff] }
 0x8e7   :  { %v2993_v15 = vld [vmem:[#allocation40 + $0xa0] sm:$0xff] }
 0x8e8   :  { %v2458_v9 = vadd.f32 %v11092_v14, %v2449_v44  ;;  %v2461_v40 = vmax.f32 %v2459_v43, 0.0  ;;  %v11151_v14 = vcombine.low %v2998_v32, %v3002_v34  ;;  %v11142_v43 = vcombine.high %v2989_v41, %v2993_v15  ;;  %v2994_v44 = vld [vmem:[#allocation40 + $0xa8] sm:$0xff]  ;;  %v3024_v32 = vld [vmem:[#allocation40 + $0x198] sm:$0xff] }
 0x8e9   :  { %v3028_v34 = vld [vmem:[#allocation40 + $0x1b8] sm:$0xff] }
 0x8ea   :  { %v2460_v45 = vmax.f32 %v2458_v9, 0.0  ;;  %v11141_v9 = vcombine.low %v2989_v41, %v2993_v15  ;;  %v3020_v41 = vld [vmem:[#allocation40 + $0x178] sm:$0xff]  ;;  %v11179_v15 = vcombine.low %v3024_v32, %v3028_v34 }
 0x8ec   :  { %v2544_v46 = vpack.c.bf16 %v2461_v40, %v2460_v45  ;;  %v11143_v40 = vcombine.low %v2990_v42, %v2994_v44  ;;  %v11144_v45 = vcombine.high %v2990_v42, %v2994_v44  ;;  %v3007_v44 = vld [vmem:[#allocation40 + $0x110] sm:$0xff] }
 0x8ee   :  { %2738 = vmatmul.mubr.bf16.vlgmr.msra.gmra.mxu0 %v2544_v46  ;;  %12324 = vmatmul.mubr.bf16.vlgmr.msra.gmra.mxu1 %v2544_v46  ;;  %v2981_v46 = vld [vmem:[#allocation40 + $0x40] sm:$0xff] }
 0x8ef   :  { %12331 = vmatprep.mubr.msk.f32.mxu0 %vm2789_vm5, %v1898_v47  ;;  %12338 = vmatprep.mubr.msk.f32.mxu1 %vm2789_vm5, %v1900_v27  ;;  %v2985_v47 = vld [vmem:[#allocation40 + $0x60] sm:$0xff] }
 0x8f0   :  { %v11134_v27 = vcombine.high %v2981_v46, %v2985_v47 }
 0x9ae   :  { %v2739_v48 = vpop.f32.mrf.mxu0  ;;  %v2782_v49 = vpop.f32.mrf.mxu1 }
 0x9b0   :  { %v14788_v30 = vpop.f32.mrf.mxu0  ;;  %v12325_v31 = vpop.f32.mrf.mxu1 }
 0x9b1   :  { %v11133_v31 = vcombine.low %v2981_v46, %v2985_v47  ;;  %v11171_v47 = vcombine.low %v3016_v13, %v3020_v41 }
 0x9b2   :  { %v2743_v53 = vpop.f32.mrf.mxu0  ;;  %v2785_v38 = vpop.f32.mrf.mxu1 }
 0x9b3   :  { %12327 = vmatprep.subr.mxu0 %v2743_v53  ;;  %12334 = vmatprep.subr.mxu1 %v2785_v38 }
 0x9b4   :  { %v12326_v58 = vpop.f32.mrf.mxu1  ;;  %12328 = vmatpush3.msra.mxu0 %v2743_v53  ;;  %12335 = vmatpush3.msra.mxu1 %v2785_v38  ;;  %v2974_v53 = vld [vmem:[#allocation40 + $0x8] sm:$0xff]  ;;  %v11126_v38 = vcombine.high %v2973_v51, %v2977_v52 }
 0x9b5   :  { %12329 = vmatprep.subr.mxu0 %v2739_v48  ;;  %12336 = vmatprep.subr.mxu1 %v2782_v49  ;;  %v11127_v56 = vcombine.low %v2974_v53, %v2978_v54  ;;  %v11128_v57 = vcombine.high %v2974_v53, %v2978_v54  ;;  %v3031_v58 = vld [vmem:[#allocation40 + $0x1d0] sm:$0xff] }
 0x9b6   :  { %12330 = vmatpush3.msra.mxu0 %v2739_v48  ;;  %12337 = vmatpush3.msra.mxu1 %v2782_v49  ;;  %v2982_v48 = vld [vmem:[#allocation40 + $0x48] sm:$0xff]  ;;  %v2995_v54 = vld [vmem:[#allocation40 + $0xb0] sm:$0xff] }
 0x9b7   :  { %12332 = vmatmul.mubr.msk.f32.vlgmr.msra.gmra.mxu0 %vm2789_vm5, %v1899_v59  ;;  %12339 = vmatmul.mubr.msk.f32.vlgmr.msra.gmra.mxu1 %vm2789_vm5, %v1901_v60  ;;  %v2986_v49 = vld [vmem:[#allocation40 + $0x68] sm:$0xff]  ;;  %v3035_v59 = vld [vmem:[#allocation40 + $0x1f0] sm:$0xff]  ;;  %v3032_v60 = vld [vmem:[#allocation40 + $0x1d8] sm:$0xff] }
 0x9b8   :  { %3357 = vmatprep.subr.bf16.mxu0 %v11182_v61  ;;  %3400 = vmatprep.subr.bf16.mxu1 %v11184_v62  ;;  %v11135_v33 = vcombine.low %v2982_v48, %v2986_v49  ;;  %v11136_v50 = vcombine.high %v2982_v48, %v2986_v49  ;;  %v11186_v61 = vcombine.high %v3031_v58, %v3035_v59  ;;  %v3036_v62 = vld [vmem:[#allocation40 + $0x1f8] sm:$0xff]  ;;  %v2999_v49 = vld [vmem:[#allocation40 + $0xd0] sm:$0xff] }
 0x9b9   :  { %3358 = vmatpush1.bf16.msra.mxu0 %v11181_v63  ;;  %3401 = vmatpush1.bf16.msra.mxu1 %v11183_v0  ;;  %v11185_v63 = vcombine.low %v3031_v58, %v3035_v59  ;;  %v11187_v0 = vcombine.low %v3032_v60, %v3036_v62 }
 0x9ba   :  { %3359 = vmatprep.subr.bf16.mxu0 %v11174_v1  ;;  %3402 = vmatprep.subr.bf16.mxu1 %v11176_v4  ;;  %v11188_v1 = vcombine.high %v3032_v60, %v3036_v62  ;;  %v2745_v4 = vpop.f32.mrf.mxu0  ;;  %v2987_v62 = vld [vmem:[#allocation40 + $0x70] sm:$0xff] }
 0x9bb   :  { %3389 = vmatprep.mubr.bf16.mxu0 %v14356_v3  ;;  %3432 = vmatprep.mubr.bf16.mxu1 %v14356_v3 }
 0x9bd   :  { %3360 = vmatpush1.bf16.msra.mxu0 %v11173_v10  ;;  %3403 = vmatpush1.bf16.msra.mxu1 %v11175_v11  ;;  %v11124_v11 = vld [vmem:[#allocation29] ss:$0 sm:$0xff] }
 0x9be   :  { %3361 = vmatprep.subr.bf16.mxu0 %v11166_v12  ;;  %3404 = vmatprep.subr.bf16.mxu1 %v11168_v16 }
 0x9c1   :  { %3362 = vmatpush1.bf16.msra.mxu0 %v11165_v22  ;;  %3405 = vmatpush1.bf16.msra.mxu1 %v11167_v23  ;;  %v2536_v22 = vadd.f32 %v11093_v8, %v14786_v28  ;;  %v11177_v28 = vcombine.low %v3023_v17, %v3027_v24  ;;  %v2979_v8 = vld [vmem:[#allocation40 + $0x30] sm:$0xff] }
 0x9c2   :  { %3363 = vmatprep.subr.bf16.mxu0 %v11158_v25  ;;  %3406 = vmatprep.subr.bf16.mxu1 %v11160_v26 }
 0x9c5   :  { %3364 = vmatpush1.bf16.msra.mxu0 %v11157_v35  ;;  %3407 = vmatpush1.bf16.msra.mxu1 %v11159_v36 }
 0x9c6   :  { %3365 = vmatprep.subr.bf16.mxu0 %v11150_v37  ;;  %3408 = vmatprep.subr.bf16.mxu1 %v11152_v39  ;;  %v11180_v39 = vcombine.high %v3024_v32, %v3028_v34 }
 0x9c9   :  { %3366 = vmatpush1.bf16.msra.mxu0 %v11149_v29  ;;  %3409 = vmatpush1.bf16.msra.mxu1 %v11151_v14  ;;  %v3015_v29 = vld [vmem:[#allocation40 + $0x150] sm:$0xff] }
 0x9ca   :  { %3367 = vmatprep.subr.bf16.mxu0 %v11142_v43  ;;  %3410 = vmatprep.subr.bf16.mxu1 %v11144_v45  ;;  %v3019_v14 = vld [vmem:[#allocation40 + $0x170] sm:$0xff]  ;;  %v11172_v43 = vcombine.high %v3016_v13, %v3020_v41  ;;  %v3012_v45 = vld [vmem:[#allocation40 + $0x138] sm:$0xff] }
 0x9cb   :  { %v11170_v42 = vcombine.high %v3015_v29, %v3019_v14  ;;  %v11169_v46 = vcombine.low %v3015_v29, %v3019_v14 }
 0x9cd   :  { %3368 = vmatpush1.bf16.msra.mxu0 %v11141_v9  ;;  %3411 = vmatpush1.bf16.msra.mxu1 %v11143_v40  ;;  %v3011_v9 = vld [vmem:[#allocation40 + $0x130] sm:$0xff]  ;;  %v3008_v40 = vld [vmem:[#allocation40 + $0x118] sm:$0xff] }
 0x9ce   :  { %3369 = vmatprep.subr.bf16.mxu0 %v11134_v27  ;;  %3412 = vmatprep.subr.bf16.mxu1 %v11136_v50  ;;  %v11162_v27 = vcombine.high %v3007_v44, %v3011_v9  ;;  %v11164_v48 = vcombine.high %v3008_v40, %v3012_v45  ;;  %v3004_v50 = vld [vmem:[#allocation40 + $0xf8] sm:$0xff]  ;;  %v11161_v51 = vcombine.low %v3007_v44, %v3011_v9 }
 0x9cf   :  { %v11163_v52 = vcombine.low %v3008_v40, %v3012_v45  ;;  %v12601_v44 = vld [vmem:[#allocation43 + $0x15c] ss:$24 sps:$4 sm:$0xff]   ;;  %v12599_v40 = vld [vmem:[#allocation43 + $0x158] ss:$24 sps:$4 sm:$0xff]   ;;  %v12607_v45 = vld [vmem:[#allocation43 + $0x12c] ss:$24 sps:$4 sm:$0xff]  }
 0x9d0   :  { %v12604_v9 = vld [vmem:[#allocation43 + $0x124] ss:$24 sps:$4 sm:$0xff]  }
 0x9d1   :  { %3370 = vmatpush1.bf16.msra.mxu0 %v11133_v31  ;;  %3413 = vmatpush1.bf16.msra.mxu1 %v11135_v33  ;;  %v3003_v31 = vld [vmem:[#allocation40 + $0xf0] sm:$0xff]  ;;  %v3000_v33 = vld [vmem:[#allocation40 + $0xd8] sm:$0xff] }
 0x9d2   :  { %3371 = vmatprep.subr.bf16.mxu0 %v11126_v38  ;;  %3414 = vmatprep.subr.bf16.mxu1 %v11128_v57  ;;  %v11154_v53 = vcombine.high %v2999_v49, %v3003_v31  ;;  %v2991_v38 = vld [vmem:[#allocation40 + $0x90] sm:$0xff]  ;;  %v11153_v57 = vcombine.low %v2999_v49, %v3003_v31  ;;  %v11155_v58 = vcombine.low %v3000_v33, %v3004_v50  ;;  %v12616_v31 = vld [vmem:[#allocation43 + $0xc4] ss:$24 sps:$4 sm:$0xff]  }
 0x9d3   :  { %v11146_v59 = vcombine.high %v2991_v38, %v2995_v54  ;;  %v12608_v49 = vld [vmem:[#allocation43 + $0xf0] ss:$24 sps:$4 sm:$0xff]  }
 0x9d5   :  { %3372 = vmatpush1.bf16.msra.mxu0 %v11125_v55  ;;  %3415 = vmatpush1.bf16.msra.mxu1 %v11127_v56  ;;  %v2992_v55 = vld [vmem:[#allocation40 + $0x98] sm:$0xff] }
 0x9d6   :  { %3443 = vmatprep.subr.bf16.mxu0 %v11186_v61  ;;  %3486 = vmatprep.subr.bf16.mxu1 %v11188_v1  ;;  %v2996_v56 = vld [vmem:[#allocation40 + $0xb8] sm:$0xff]  ;;  %v2983_v61 = vld [vmem:[#allocation40 + $0x50] sm:$0xff]  ;;  %v11145_v1 = vcombine.low %v2991_v38, %v2995_v54 }
 0x9d7   :  { %v11148_v60 = vcombine.high %v2992_v55, %v2996_v56  ;;  %v12620_v38 = vld [vmem:[#allocation43 + $0x90] ss:$24 sps:$4 sm:$0xff]   ;;  %v12628_v54 = vld [vmem:[#allocation43 + $0x64] ss:$24 sps:$4 sm:$0xff]  }
 0xa77   :  { %v12333_v5 = vpop.f32.mrf.mxu0  ;;  %v12340_v6 = vpop.f32.mrf.mxu1 }
 0xa78   :  { %v2868_v7 = vadd.f32 %v12333_v5, %v2745_v4  ;;  %v11147_v4 = vcombine.low %v2992_v55, %v2996_v56  ;;  %v11138_v5 = vcombine.high %v2983_v61, %v2987_v62  ;;  %v12623_v55 = vld [vmem:[#allocation43 + $0x98] ss:$24 sps:$4 sm:$0xff]   ;;  %v12631_v56 = vld [vmem:[#allocation43 + $0x6c] ss:$24 sps:$4 sm:$0xff]  }
 0xa79   :  { %v2862_v10 = vpop.f32.mrf.mxu0  ;;  %v2943_v18 = vpop.f32.mrf.mxu1 }
 0xa7a   :  { %v2863_v12 = vadd.f32 %v2862_v10, %v14788_v30  ;;  %v2953_v16 = vadd.f32 %v12340_v6, %v2868_v7  ;;  %v11178_v30 = vcombine.high %v3023_v17, %v3027_v24  ;;  %v2975_v7 = vld [vmem:[#allocation40 + $0x10] sm:$0xff]  ;;  %v2976_v10 = vld [vmem:[#allocation40 + $0x18] sm:$0xff] }
 0xa7c   :  { %v2962_v21 = vadd.f32 %v11124_v11, %v2953_v16  ;;  %v2952_v20 = vadd.f32 %v2943_v18, %v2863_v12  ;;  %v11137_v12 = vcombine.low %v2983_v61, %v2987_v62  ;;  %v11130_v18 = vcombine.high %v2975_v7, %v2979_v8  ;;  %v12632_v61 = vld [vmem:[#allocation43 + $0x30] ss:$24 sps:$4 sm:$0xff]   ;;  %v12640_v62 = vld [vmem:[#allocation43 + $0x4] ss:$24 sps:$4 sm:$0xff]  }
 0xa7e   :  { %v2964_v23 = vadd.f32 %v2962_v21, %v2541_v19  ;;  %v2961_v25 = vadd.f32 %v11124_v11, %v2952_v20  ;;  %v2980_v11 = vld [vmem:[#allocation40 + $0x38] sm:$0xff]  ;;  %v11129_v21 = vcombine.low %v2975_v7, %v2979_v8  ;;  %v12644_v7 = vld [vmem:[#allocation43 + $0x2d0] ss:$24 sps:$4 sm:$0xff]  }
 0xa7f   :  { %v11132_v19 = vcombine.high %v2976_v10, %v2980_v11  ;;  %v11131_v20 = vcombine.low %v2976_v10, %v2980_v11  ;;  %v12652_v8 = vld [vmem:[#allocation43 + $0x2a4] ss:$24 sps:$4 sm:$0xff]   ;;  %v12647_v10 = vld [vmem:[#allocation43 + $0x2d8] ss:$24 sps:$4 sm:$0xff]  }
 0xa80   :  { %v2963_v26 = vadd.f32 %v2961_v25, %v2536_v22  ;;  %v2966_v35 = vmax.f32 %v2964_v23, 0.0  ;;  %v12655_v11 = vld [vmem:[#allocation43 + $0x2ac] ss:$24 sps:$4 sm:$0xff]  }
 0xa82   :  { %v2965_v36 = vmax.f32 %v2963_v26, 0.0 }
 0xa84   :  { %v14797_v37 = vpack.c.bf16 %v2966_v35, %v2965_v36  ;;  %v2971_v35 = vld [vmem:[#allocation34] sm:$0xff]  ;;  %v2970_v36 = vld [vmem:[#allocation32] sm:$0xff] }
 0xa86   :  { %3390 = vmatmul.mubr.bf16.vlgmr.msra.gmra.mxu0 %v14797_v37  ;;  %3433 = vmatmul.mubr.bf16.vlgmr.msra.gmra.mxu1 %v14797_v37 }
 0xa87   :  { %3444 = vmatpush1.bf16.msra.mxu0 %v11185_v63  ;;  %3487 = vmatpush1.bf16.msra.mxu1 %v11187_v0  ;;  %v2984_v63 = vld [vmem:[#allocation40 + $0x58] sm:$0xff] }
 0xa88   :  { %3445 = vmatprep.subr.bf16.mxu0 %v11178_v30  ;;  %3488 = vmatprep.subr.bf16.mxu1 %v11180_v39  ;;  %v2988_v0 = vld [vmem:[#allocation40 + $0x78] sm:$0xff] }
 0xa89   :  { %3475 = vmatprep.mubr.bf16.mxu0 %v14356_v3  ;;  %3518 = vmatprep.mubr.bf16.mxu1 %v14356_v3  ;;  %v11156_v3 = vcombine.high %v3000_v33, %v3004_v50  ;;  %v11140_v6 = vcombine.high %v2984_v63, %v2988_v0  ;;  %v11139_v16 = vcombine.low %v2984_v63, %v2988_v0  ;;  %v12611_v33 = vld [vmem:[#allocation43 + $0xf8] ss:$24 sps:$4 sm:$0xff]   ;;  %v12619_v50 = vld [vmem:[#allocation43 + $0xcc] ss:$24 sps:$4 sm:$0xff]  }
 0xa8a   :  { %v12635_v63 = vld [vmem:[#allocation43 + $0x38] ss:$24 sps:$4 sm:$0xff]   ;;  %v12643_v0 = vld [vmem:[#allocation43 + $0xc] ss:$24 sps:$4 sm:$0xff]  }
 0xa8b   :  { %3446 = vmatpush1.bf16.msra.mxu0 %v11177_v28  ;;  %3489 = vmatpush1.bf16.msra.mxu1 %v11179_v15  ;;  %v12598_v15 = vld [vmem:[#allocation43 + $0x154] ss:$24 sps:$4 sm:$0xff]  }
 0xa8c   :  { %3447 = vmatprep.subr.bf16.mxu0 %v11170_v42  ;;  %3490 = vmatprep.subr.bf16.mxu1 %v11172_v43  ;;  %v2972_v42 = vld [vmem:[#allocation35] sm:$0xff] }
 0xa8d   :  { %v12596_v43 = vld [vmem:[#allocation43 + $0x150] ss:$24 sps:$4 sm:$0xff]  }
 0xa8f   :  { %3448 = vmatpush1.bf16.msra.mxu0 %v11169_v46  ;;  %3491 = vmatpush1.bf16.msra.mxu1 %v11171_v47  ;;  %v12602_v46 = vld [vmem:[#allocation43 + $0x120] ss:$24 sps:$4 sm:$0xff]   ;;  %v12610_v47 = vld [vmem:[#allocation43 + $0xf4] ss:$24 sps:$4 sm:$0xff]  }
 0xa90   :  { %3449 = vmatprep.subr.bf16.mxu0 %v11162_v27  ;;  %3492 = vmatprep.subr.bf16.mxu1 %v11164_v48  ;;  %v12605_v27 = vld [vmem:[#allocation43 + $0x128] ss:$24 sps:$4 sm:$0xff]   ;;  %v12613_v48 = vld [vmem:[#allocation43 + $0xfc] ss:$24 sps:$4 sm:$0xff]  }
 0xa93   :  { %3450 = vmatpush1.bf16.msra.mxu0 %v11161_v51  ;;  %3493 = vmatpush1.bf16.msra.mxu1 %v11163_v52  ;;  %v12614_v51 = vld [vmem:[#allocation43 + $0xc0] ss:$24 sps:$4 sm:$0xff]   ;;  %v12622_v52 = vld [vmem:[#allocation43 + $0x94] ss:$24 sps:$4 sm:$0xff]  }
 0xa94   :  { %3451 = vmatprep.subr.bf16.mxu0 %v11154_v53  ;;  %3494 = vmatprep.subr.bf16.mxu1 %v11156_v3  ;;  %v12617_v53 = vld [vmem:[#allocation43 + $0xc8] ss:$24 sps:$4 sm:$0xff]   ;;  %v12625_v3 = vld [vmem:[#allocation43 + $0x9c] ss:$24 sps:$4 sm:$0xff]  }
 0xa97   :  { %3452 = vmatpush1.bf16.msra.mxu0 %v11153_v57  ;;  %3495 = vmatpush1.bf16.msra.mxu1 %v11155_v58  ;;  %v12626_v57 = vld [vmem:[#allocation43 + $0x60] ss:$24 sps:$4 sm:$0xff]   ;;  %v12634_v58 = vld [vmem:[#allocation43 + $0x34] ss:$24 sps:$4 sm:$0xff]  }
 0xa98   :  { %3453 = vmatprep.subr.bf16.mxu0 %v11146_v59  ;;  %3496 = vmatprep.subr.bf16.mxu1 %v11148_v60  ;;  %v12629_v59 = vld [vmem:[#allocation43 + $0x68] ss:$24 sps:$4 sm:$0xff]   ;;  %v12637_v60 = vld [vmem:[#allocation43 + $0x3c] ss:$24 sps:$4 sm:$0xff]  }
 0xa9b   :  { %3454 = vmatpush1.bf16.msra.mxu0 %v11145_v1  ;;  %3497 = vmatpush1.bf16.msra.mxu1 %v11147_v4  ;;  %v12638_v1 = vld [vmem:[#allocation43] ss:$24 sps:$4 sm:$0xff]   ;;  %v12646_v4 = vld [vmem:[#allocation43 + $0x2d4] ss:$24 sps:$4 sm:$0xff]  }
 0xa9c   :  { %3455 = vmatprep.subr.bf16.mxu0 %v11138_v5  ;;  %3498 = vmatprep.subr.bf16.mxu1 %v11140_v6  ;;  %v12641_v5 = vld [vmem:[#allocation43 + $0x8] ss:$24 sps:$4 sm:$0xff]   ;;  %v12649_v6 = vld [vmem:[#allocation43 + $0x2dc] ss:$24 sps:$4 sm:$0xff]  }
 0xa9f   :  { %3456 = vmatpush1.bf16.msra.mxu0 %v11137_v12  ;;  %3499 = vmatpush1.bf16.msra.mxu1 %v11139_v16  ;;  %v12650_v12 = vld [vmem:[#allocation43 + $0x2a0] ss:$24 sps:$4 sm:$0xff]   ;;  %v12658_v16 = vld [vmem:[#allocation43 + $0x274] ss:$24 sps:$4 sm:$0xff]  }
 0xaa0   :  { %3457 = vmatprep.subr.bf16.mxu0 %v11130_v18  ;;  %3500 = vmatprep.subr.bf16.mxu1 %v11132_v19  ;;  %v12653_v18 = vld [vmem:[#allocation43 + $0x2a8] ss:$24 sps:$4 sm:$0xff]   ;;  %v12661_v19 = vld [vmem:[#allocation43 + $0x27c] ss:$24 sps:$4 sm:$0xff]  }
 0xaa3   :  { %3458 = vmatpush1.bf16.msra.mxu0 %v11129_v21  ;;  %3501 = vmatpush1.bf16.msra.mxu1 %v11131_v20  ;;  %v12656_v21 = vld [vmem:[#allocation43 + $0x270] ss:$24 sps:$4 sm:$0xff]   ;;  %v12664_v20 = vld [vmem:[#allocation43 + $0x244] ss:$24 sps:$4 sm:$0xff]  }
 0xaa6   :  { %3476 = vmatmul.mubr.bf16.vlgmr.msra.gmra.mxu0 %v14797_v37  ;;  %3519 = vmatmul.mubr.bf16.vlgmr.msra.gmra.mxu1 %v14797_v37 }
 0xaa7   :  { %3596 = vmatprep.mubr.f32.mxu0 %v14357_v2  ;;  %3670 = vmatprep.mubr.f32.mxu1 %v14357_v2 }
 0xb46   :  { %v3391_v22 = vpop.f32.mrf.mxu0  ;;  %v3434_v23 = vpop.f32.mrf.mxu1 }
 0xb48   :  { %v3393_v25 = vpop.f32.mrf.mxu0  ;;  %v3436_v26 = vpop.f32.mrf.mxu1 }
 0xb4a   :  { %v3395_v17 = vpop.f32.mrf.mxu0  ;;  %v3438_v24 = vpop.f32.mrf.mxu1 }
 0xb4c   :  { %v3397_v32 = vpop.f32.mrf.mxu0  ;;  %v3440_v34 = vpop.f32.mrf.mxu1 }
 0xb4d   :  { %3560 = vmatprep.subr.mxu0 %v3440_v34  ;;  %3634 = vmatprep.subr.mxu1 %v3397_v32  ;;  %v12668_v32 = vld [vmem:[#allocation43 + $0x210] ss:$24 sps:$4 sm:$0xff]   ;;  %v12676_v34 = vld [vmem:[#allocation43 + $0x1e4] ss:$24 sps:$4 sm:$0xff]  }
 0xb4e   :  { %3561 = vmatpush1.msra.mxu0 %v3438_v24  ;;  %3635 = vmatpush1.msra.mxu1 %v3395_v17  ;;  %v12665_v17 = vld [vmem:[#allocation43 + $0x248] ss:$24 sps:$4 sm:$0xff]   ;;  %v12673_v24 = vld [vmem:[#allocation43 + $0x21c] ss:$24 sps:$4 sm:$0xff]  }
 0xb4f   :  { %3562 = vmatprep.subr.mxu0 %v3436_v26  ;;  %3636 = vmatprep.subr.mxu1 %v3393_v25  ;;  %v12662_v25 = vld [vmem:[#allocation43 + $0x240] ss:$24 sps:$4 sm:$0xff]   ;;  %v12670_v26 = vld [vmem:[#allocation43 + $0x214] ss:$24 sps:$4 sm:$0xff]  }
 0xb50   :  { %3563 = vmatpush1.msra.mxu0 %v3434_v23  ;;  %3637 = vmatpush1.msra.mxu1 %v3391_v22  ;;  %v12659_v22 = vld [vmem:[#allocation43 + $0x278] ss:$24 sps:$4 sm:$0xff]   ;;  %v12667_v23 = vld [vmem:[#allocation43 + $0x24c] ss:$24 sps:$4 sm:$0xff]  }
 0xb51   :  { %11189 = vmatmul.mubr.msk.f32.vlgmr.msra.gmra.mxu0 %vm2789_vm5, %v2971_v35  ;;  %11190 = vmatmul.mubr.msk.f32.vlgmr.msra.gmra.mxu1 %vm2789_vm5, %v2970_v36  ;;  %v12674_v36 = vld [vmem:[#allocation43 + $0x1e0] ss:$24 sps:$4 sm:$0xff]  }
 0xb52   :  { %3744 = vmatprep.mubr.f32.mxu0 %v14357_v2  ;;  %3845 = vmatprep.mubr.f32.mxu1 %v14357_v2 }
 0xb66   :  { %v3477_v37 = vpop.f32.mrf.mxu0  ;;  %v3520_v30 = vpop.f32.mrf.mxu1 }
 0xb68   :  { %v3479_v39 = vpop.f32.mrf.mxu0  ;;  %v3522_v29 = vpop.f32.mrf.mxu1 }
 0xb6a   :  { %v3481_v14 = vpop.f32.mrf.mxu0  ;;  %v3524_v13 = vpop.f32.mrf.mxu1 }
 0xb6c   :  { %v3483_v41 = vpop.f32.mrf.mxu0  ;;  %v3526_v28 = vpop.f32.mrf.mxu1 }
 0xb6d   :  { %3708 = vmatprep.subr.mxu0 %v3483_v41  ;;  %3809 = vmatprep.subr.mxu1 %v3526_v28  ;;  %v12688_v41 = vld [vmem:[#allocation43 + $0x184] ss:$24 sps:$4 sm:$0xff]   ;;  %v12686_v28 = vld [vmem:[#allocation43 + $0x180] ss:$24 sps:$4 sm:$0xff]  }
 0xb6e   :  { %3709 = vmatpush1.msra.mxu0 %v3481_v14  ;;  %3810 = vmatpush1.msra.mxu1 %v3524_v13  ;;  %v12685_v14 = vld [vmem:[#allocation43 + $0x1bc] ss:$24 sps:$4 sm:$0xff]   ;;  %v12683_v13 = vld [vmem:[#allocation43 + $0x1b8] ss:$24 sps:$4 sm:$0xff]  }
 0xb6f   :  { %3710 = vmatprep.subr.mxu0 %v3479_v39  ;;  %3811 = vmatprep.subr.mxu1 %v3522_v29  ;;  %v12682_v39 = vld [vmem:[#allocation43 + $0x1b4] ss:$24 sps:$4 sm:$0xff]   ;;  %v12680_v29 = vld [vmem:[#allocation43 + $0x1b0] ss:$24 sps:$4 sm:$0xff]  }
 0xb70   :  { %3711 = vmatpush1.msra.mxu0 %v3477_v37  ;;  %3812 = vmatpush1.msra.mxu1 %v3520_v30  ;;  %v12679_v37 = vld [vmem:[#allocation43 + $0x1ec] ss:$24 sps:$4 sm:$0xff]   ;;  %v12677_v30 = vld [vmem:[#allocation43 + $0x1e8] ss:$24 sps:$4 sm:$0xff]  }
 0xb71   :  { %11191 = vmatmul.mubr.msk.f32.vlgmr.msra.gmra.mxu0 %vm2789_vm5, %v2972_v42  ;;  %4430 = vmatprep.subr.bf16.mxu0 %v12598_v15  ;;  %v12691_v15 = vld [vmem:[#allocation43 + $0x18c] ss:$24 sps:$4 sm:$0xff]   ;;  %v12689_v42 = vld [vmem:[#allocation43 + $0x188] ss:$24 sps:$4 sm:$0xff]  }
 0xb72   :  { %4431 = vmatpush1.bf16.msra.mxu0 %v12596_v43  ;;  %4471 = vmatprep.subr.bf16.mxu1 %v12601_v44  ;;  %v12694_v43 = vld [vmem:[#allocation43 + $0x164] ss:$24 sps:$4 sm:$0xff]   ;;  %v3755_v44 = vlaneseq }
 0xb73   :  { %11192 = vmatmul.mubr.msk.f32.vlgmr.msra.gmra.mxu1 %vm2789_vm5, %v2971_v35  ;;  %4432 = vmatprep.subr.bf16.mxu0 %v12604_v9  ;;  %v12671_v35 = vld [vmem:[#allocation43 + $0x218] ss:$24 sps:$4 sm:$0xff]  }
 0xb74   :  { %4472 = vmatpush1.bf16.msra.mxu1 %v12599_v40  ;;  %v14813_v9 = vshrl.u32 %v3755_v44, 7 }
 0xb75   :  { %4473 = vmatprep.subr.bf16.mxu1 %v12607_v45 }
 0xb76   :  { %4433 = vmatpush1.bf16.msra.mxu0 %v12602_v46  ;;  %v14816_v46 = vsub.s32 0, %v14813_v9 }
 0xb77   :  { %4434 = vmatprep.subr.bf16.mxu0 %v12610_v47  ;;  %v3753_v47 = vld [vmem:[#allocation41] sm:$0x3] }
 0xb78   :  { %4474 = vmatpush1.bf16.msra.mxu1 %v12605_v27  ;;  %v14819_v27 = vsub.s32 1, %v14813_v9 }
 0xb79   :  { %4475 = vmatprep.subr.bf16.mxu1 %v12613_v48 }
 0xb7a   :  { %4435 = vmatpush1.bf16.msra.mxu0 %v12608_v49 }
 0xb7b   :  { %4436 = vmatprep.subr.bf16.mxu0 %v12616_v31 }
 0xb7c   :  { %4476 = vmatpush1.bf16.msra.mxu1 %v12611_v33  ;;  %v3758_v33 = vrot.slane %v3753_v47, %v14816_v46 }
 0xb7d   :  { %4477 = vmatprep.subr.bf16.mxu1 %v12619_v50 }
 0xb7e   :  { %4437 = vmatpush1.bf16.msra.mxu0 %v12614_v51 }
 0xb7f   :  { %4438 = vmatprep.subr.bf16.mxu0 %v12622_v52 }
 0xb80   :  { %4478 = vmatpush1.bf16.msra.mxu1 %v12617_v53  ;;  %v3762_v53 = vrot.slane %v3753_v47, %v14819_v27 }
 0xb81   :  { %4479 = vmatprep.subr.bf16.mxu1 %v12625_v3 }
 0xb82   :  { %4439 = vmatpush1.bf16.msra.mxu0 %v12620_v38 }
 0xb83   :  { %4440 = vmatprep.subr.bf16.mxu0 %v12628_v54 }
 0xb84   :  { %4480 = vmatpush1.bf16.msra.mxu1 %v12623_v55 }
 0xb85   :  { %4481 = vmatprep.subr.bf16.mxu1 %v12631_v56 }
 0xb86   :  { %4441 = vmatpush1.bf16.msra.mxu0 %v12626_v57 }
 0xb87   :  { %4442 = vmatprep.subr.bf16.mxu0 %v12634_v58 }
 0xb88   :  { %4482 = vmatpush1.bf16.msra.mxu1 %v12629_v59  ;;  %v12692_v59 = vld [vmem:[#allocation43 + $0x160] ss:$24 sps:$4 sm:$0xff]  }
 0xb89   :  { %4483 = vmatprep.subr.bf16.mxu1 %v12637_v60 }
 0xb8a   :  { %4443 = vmatpush1.bf16.msra.mxu0 %v12632_v61  ;;  %v12697_v61 = vld [vmem:[#allocation43 + $0x134] ss:$24 sps:$4 sm:$0xff]  }
 0xb8b   :  { %4444 = vmatprep.subr.bf16.mxu0 %v12640_v62  ;;  %v12695_v62 = vld [vmem:[#allocation43 + $0x130] ss:$24 sps:$4 sm:$0xff]  }
 0xb8c   :  { %4484 = vmatpush1.bf16.msra.mxu1 %v12635_v63  ;;  %v12700_v63 = vld [vmem:[#allocation43 + $0x104] ss:$24 sps:$4 sm:$0xff]  }
 0xb8d   :  { %4485 = vmatprep.subr.bf16.mxu1 %v12643_v0  ;;  %v12698_v0 = vld [vmem:[#allocation43 + $0x100] ss:$24 sps:$4 sm:$0xff]  }
 0xb8e   :  { %4445 = vmatpush1.bf16.msra.mxu0 %v12638_v1  ;;  %v12703_v1 = vld [vmem:[#allocation43 + $0xd4] ss:$24 sps:$4 sm:$0xff]  }
 0xb8f   :  { %4446 = vmatprep.subr.bf16.mxu0 %v12646_v4  ;;  %v12701_v4 = vld [vmem:[#allocation43 + $0xd0] ss:$24 sps:$4 sm:$0xff]  }
 0xb90   :  { %4486 = vmatpush1.bf16.msra.mxu1 %v12641_v5  ;;  %v12706_v5 = vld [vmem:[#allocation43 + $0xa4] ss:$24 sps:$4 sm:$0xff]  }
 0xb91   :  { %4487 = vmatprep.subr.bf16.mxu1 %v12649_v6  ;;  %v12704_v6 = vld [vmem:[#allocation43 + $0xa0] ss:$24 sps:$4 sm:$0xff]  }
 0xb92   :  { %4447 = vmatpush2.bf16.msra.mxu0 %v12644_v7  ;;  %v12709_v7 = vld [vmem:[#allocation43 + $0x74] ss:$24 sps:$4 sm:$0xff]  }
 0xb93   :  { %4448 = vmatprep.subr.bf16.mxu0 %v12652_v8  ;;  %v12707_v8 = vld [vmem:[#allocation43 + $0x70] ss:$24 sps:$4 sm:$0xff]  }
 0xb94   :  { %4488 = vmatpush2.bf16.msra.mxu1 %v12647_v10  ;;  %v12712_v10 = vld [vmem:[#allocation43 + $0x44] ss:$24 sps:$4 sm:$0xff]  }
 0xb95   :  { %4489 = vmatprep.subr.bf16.mxu1 %v12655_v11  ;;  %v12710_v11 = vld [vmem:[#allocation43 + $0x40] ss:$24 sps:$4 sm:$0xff]  }
 0xb96   :  { %4449 = vmatpush2.bf16.msra.mxu0 %v12650_v12  ;;  %v12715_v12 = vld [vmem:[#allocation43 + $0x14] ss:$24 sps:$4 sm:$0xff]  }
 0xb97   :  { %4450 = vmatprep.subr.bf16.mxu0 %v12658_v16  ;;  %v12713_v16 = vld [vmem:[#allocation43 + $0x10] ss:$24 sps:$4 sm:$0xff]  }
 0xb98   :  { %4490 = vmatpush2.bf16.msra.mxu1 %v12653_v18  ;;  %v12718_v18 = vld [vmem:[#allocation43 + $0x2e4] ss:$24 sps:$4 sm:$0xff]  }
 0xb99   :  { %4491 = vmatprep.subr.bf16.mxu1 %v12661_v19  ;;  %v12716_v19 = vld [vmem:[#allocation43 + $0x2e0] ss:$24 sps:$4 sm:$0xff]  }
 0xb9a   :  { %4451 = vmatpush2.bf16.msra.mxu0 %v12656_v21  ;;  %v12721_v21 = vld [vmem:[#allocation43 + $0x2b4] ss:$24 sps:$4 sm:$0xff]  }
 0xb9b   :  { %4452 = vmatprep.subr.bf16.mxu0 %v12664_v20  ;;  %v12719_v20 = vld [vmem:[#allocation43 + $0x2b0] ss:$24 sps:$4 sm:$0xff]  }
 0xb9c   :  { %4492 = vmatpush2.bf16.msra.mxu1 %v12659_v22  ;;  %v12724_v22 = vld [vmem:[#allocation43 + $0x284] ss:$24 sps:$4 sm:$0xff]  }
 0xb9d   :  { %4493 = vmatprep.subr.bf16.mxu1 %v12667_v23  ;;  %v12722_v23 = vld [vmem:[#allocation43 + $0x280] ss:$24 sps:$4 sm:$0xff]  }
 0xb9e   :  { %4453 = vmatpush2.bf16.msra.mxu0 %v12662_v25  ;;  %v12727_v25 = vld [vmem:[#allocation43 + $0x254] ss:$24 sps:$4 sm:$0xff]  }
 0xb9f   :  { %4454 = vmatprep.subr.bf16.mxu0 %v12670_v26  ;;  %v12725_v26 = vld [vmem:[#allocation43 + $0x250] ss:$24 sps:$4 sm:$0xff]  }
 0xba0   :  { %4494 = vmatpush2.bf16.msra.mxu1 %v12665_v17  ;;  %v12730_v17 = vld [vmem:[#allocation43 + $0x224] ss:$24 sps:$4 sm:$0xff]  }
 0xba1   :  { %4495 = vmatprep.subr.bf16.mxu1 %v12673_v24  ;;  %v12728_v24 = vld [vmem:[#allocation43 + $0x220] ss:$24 sps:$4 sm:$0xff]  }
 0xba2   :  { %4455 = vmatpush2.bf16.msra.mxu0 %v12668_v32  ;;  %v12733_v32 = vld [vmem:[#allocation43 + $0x1f4] ss:$24 sps:$4 sm:$0xff]  }
 0xba3   :  { %4456 = vmatprep.subr.bf16.mxu0 %v12676_v34  ;;  %v12731_v34 = vld [vmem:[#allocation43 + $0x1f0] ss:$24 sps:$4 sm:$0xff]  }
 0xba4   :  { %4496 = vmatpush2.bf16.msra.mxu1 %v12671_v35  ;;  %v12736_v35 = vld [vmem:[#allocation43 + $0x1c4] ss:$24 sps:$4 sm:$0xff]  }
 0xba5   :  { %4497 = vmatprep.subr.bf16.mxu1 %v12679_v37  ;;  %v12739_v37 = vld [vmem:[#allocation43 + $0x194] ss:$24 sps:$4 sm:$0xff]  }
 0xba6   :  { %4457 = vmatpush2.bf16.msra.mxu0 %v12674_v36  ;;  %v12734_v36 = vld [vmem:[#allocation43 + $0x1c0] ss:$24 sps:$4 sm:$0xff]  }
 0xba7   :  { %4458 = vmatprep.subr.bf16.mxu0 %v12682_v39 }
 0xba8   :  { %4498 = vmatpush2.bf16.msra.mxu1 %v12677_v30  ;;  %v12737_v30 = vld [vmem:[#allocation43 + $0x190] ss:$24 sps:$4 sm:$0xff]  }
 0xba9   :  { %4499 = vmatprep.subr.bf16.mxu1 %v12685_v14 }
 0xbaa   :  { %4459 = vmatpush2.bf16.msra.mxu0 %v12680_v29 }
 0xbab   :  { %4460 = vmatprep.subr.bf16.mxu0 %v12688_v41 }
 0xbac   :  { %4500 = vmatpush2.bf16.msra.mxu1 %v12683_v13 }
 0xbad   :  { %4501 = vmatprep.subr.bf16.mxu1 %v12691_v15  ;;  %v2968_v15 = vld [vmem:[#allocation37] sm:$0xff] }
 0xbae   :  { %4461 = vmatpush2.bf16.msra.mxu0 %v12686_v28 }
 0xbaf   :  { %4512 = vmatprep.subr.bf16.mxu0 %v12694_v43 }
 0xbb0   :  { %4502 = vmatpush2.bf16.msra.mxu1 %v12689_v42 }
 0xc11   :  { %v3598_v40 = vpop.f32.mrf.mxu0  ;;  %v3672_v45 = vpop.f32.mrf.mxu1 }
 0xc12   :  { %v3673_v31 = vadd.f32 %v3672_v45, %v3598_v40 }
 0xc13   :  { %v3600_v48 = vpop.f32.mrf.mxu0  ;;  %v3674_v49 = vpop.f32.mrf.mxu1 }
 0xc14   :  { %v3675_v51 = vadd.f32 %v3674_v49, %v3600_v48  ;;  %v2969_v48 = vld [vmem:[#allocation38] sm:$0xff] }
 0xc31   :  { %v3746_v50 = vpop.f32.mrf.mxu0 }
 0xc32   :  { %v3751_v52 = vadd.f32 %v3746_v50, %v3673_v31  ;;  %v4849_v50 = vld [vmem:[#allocation55 + $0x3c0] sm:$0xff] }
 0xc33   :  { %v3748_v3 = vpop.f32.mrf.mxu0  ;;  %v14829_v39 = vpop.f32.mrf.mxu1 }
 0xc34   :  { %v3765_v38 = vadd.f32 %v3758_v33, %v3751_v52  ;;  %v3752_v54 = vadd.f32 %v3748_v3, %v3675_v51  ;;  %v4841_v33 = vld [vmem:[#allocation55 + $0x380] sm:$0xff]  ;;  %v4842_v51 = vld [vmem:[#allocation55 + $0x388] sm:$0xff] }
 0xc35   :  { %v14831_v29 = vpop.f32.mrf.mxu1  ;;  %v11403_v52 = vcombine.low %v4841_v33, %v4849_v50  ;;  %v4850_v3 = vld [vmem:[#allocation55 + $0x3c8] sm:$0xff] }
 0xc36   :  { %v3766_v55 = vadd.f32 %v3762_v53, %v3752_v54  ;;  %v3767_v56 = vmax.f32 %v3765_v38, 0.0  ;;  %v11404_v53 = vcombine.high %v4841_v33, %v4849_v50  ;;  %v4825_v38 = vld [vmem:[#allocation55 + $0x300] sm:$0xff]  ;;  %v4730_v33 = vld [vmem:[#allocation55 + $0x8] sm:$0xff] }
 0xc37   :  { %v4833_v54 = vld [vmem:[#allocation55 + $0x340] sm:$0xff]  ;;  %v4738_v50 = vld [vmem:[#allocation55 + $0x48] sm:$0xff] }
 0xc38   :  { %v3768_v57 = vmax.f32 %v3766_v55, 0.0  ;;  %v14823_v60 = vpack.c.bf16 %v3767_v56, %v3767_v56  ;;  %v11405_v55 = vcombine.low %v4842_v51, %v4850_v3  ;;  %v11406_v56 = vcombine.high %v4842_v51, %v4850_v3 }
 0xc39   :  { %v11294_v3 = vcombine.high %v4730_v33, %v4738_v50 }
 0xc3a   :  { %v3853_v58 = vpack.c.bf16 %v3768_v57, %v3768_v57  ;;  %v11388_v57 = vcombine.high %v4825_v38, %v4833_v54 }
 0xc3c   :  { %4462 = vmatprep.mubr.bf16.mxu0 %v3853_v58  ;;  %4503 = vmatprep.mubr.bf16.mxu1 %v3853_v58 }
 0xc3d   :  { %4463 = vmatmul.mubr.bf16.vlgmr.msra.gmra.mxu0 %v14823_v60  ;;  %4504 = vmatmul.mubr.bf16.vlgmr.msra.gmra.mxu1 %v14823_v60 }
 0xc3e   :  { %4513 = vmatpush1.bf16.msra.mxu0 %v12692_v59  ;;  %4544 = vmatprep.mubr.bf16.mxu0 %v3853_v58  ;;  %v4826_v58 = vld [vmem:[#allocation55 + $0x308] sm:$0xff] }
 0xc3f   :  { %4514 = vmatprep.subr.bf16.mxu0 %v12697_v61  ;;  %4621 = vmatprep.mubr.f32.mxu1 %v14357_v2  ;;  %v4834_v59 = vld [vmem:[#allocation55 + $0x348] sm:$0xff] }
 0xc40   :  { %v11390_v61 = vcombine.high %v4826_v58, %v4834_v59 }
 0xc42   :  { %4515 = vmatpush1.bf16.msra.mxu0 %v12695_v62  ;;  %v4817_v62 = vld [vmem:[#allocation55 + $0x2c0] sm:$0xff] }
 0xc43   :  { %4516 = vmatprep.subr.bf16.mxu0 %v12700_v63  ;;  %v4810_v63 = vld [vmem:[#allocation55 + $0x288] sm:$0xff] }
 0xc46   :  { %4517 = vmatpush1.bf16.msra.mxu0 %v12698_v0  ;;  %v4818_v0 = vld [vmem:[#allocation55 + $0x2c8] sm:$0xff] }
 0xc47   :  { %4518 = vmatprep.subr.bf16.mxu0 %v12703_v1  ;;  %v11387_v1 = vcombine.low %v4825_v38, %v4833_v54  ;;  %v4969_v38 = vld [vmem:[#allocation55 + $0x780] sm:$0xff] }
 0xc48   :  { %v4977_v54 = vld [vmem:[#allocation55 + $0x7c0] sm:$0xff] }
 0xc4a   :  { %4519 = vmatpush1.bf16.msra.mxu0 %v12701_v4  ;;  %v11389_v4 = vcombine.low %v4826_v58, %v4834_v59  ;;  %v11293_v58 = vcombine.low %v4730_v33, %v4738_v50  ;;  %v11532_v59 = vcombine.high %v4969_v38, %v4977_v54  ;;  %v4873_v33 = vld [vmem:[#allocation55 + $0x480] sm:$0xff] }
 0xc4b   :  { %4520 = vmatprep.subr.bf16.mxu0 %v12706_v5  ;;  %v4881_v50 = vld [vmem:[#allocation55 + $0x4c0] sm:$0xff] }
 0xc4e   :  { %4521 = vmatpush1.bf16.msra.mxu0 %v12704_v6  ;;  %v11374_v6 = vcombine.high %v4810_v63, %v4818_v0 }
 0xc4f   :  { %4522 = vmatprep.subr.bf16.mxu0 %v12709_v7  ;;  %v4793_v7 = vld [vmem:[#allocation55 + $0x200] sm:$0xff] }
 0xc52   :  { %4523 = vmatpush1.bf16.msra.mxu0 %v12707_v8  ;;  %v4801_v8 = vld [vmem:[#allocation55 + $0x240] sm:$0xff] }
 0xc53   :  { %4524 = vmatprep.subr.bf16.mxu0 %v12712_v10  ;;  %v4794_v10 = vld [vmem:[#allocation55 + $0x208] sm:$0xff] }
 0xc56   :  { %4525 = vmatpush1.bf16.msra.mxu0 %v12710_v11  ;;  %v4802_v11 = vld [vmem:[#allocation55 + $0x248] sm:$0xff] }
 0xc57   :  { %4526 = vmatprep.subr.bf16.mxu0 %v12715_v12 }
 0xc5a   :  { %4527 = vmatpush1.bf16.msra.mxu0 %v12713_v16  ;;  %v11373_v16 = vcombine.low %v4810_v63, %v4818_v0  ;;  %v4954_v63 = vld [vmem:[#allocation55 + $0x708] sm:$0xff] }
 0xc5b   :  { %4528 = vmatprep.subr.bf16.mxu0 %v12718_v18  ;;  %v11356_v18 = vcombine.high %v4793_v7, %v4801_v8  ;;  %v4962_v0 = vld [vmem:[#allocation55 + $0x748] sm:$0xff] }
 0xc5e   :  { %4529 = vmatpush2.bf16.msra.mxu0 %v12716_v19  ;;  %v11358_v19 = vcombine.high %v4794_v10, %v4802_v11 }
 0xc5f   :  { %4530 = vmatprep.subr.bf16.mxu0 %v12721_v21  ;;  %v4777_v21 = vld [vmem:[#allocation55 + $0x180] sm:$0xff] }
 0xc62   :  { %4531 = vmatpush2.bf16.msra.mxu0 %v12719_v20  ;;  %v4785_v20 = vld [vmem:[#allocation55 + $0x1c0] sm:$0xff] }
 0xc63   :  { %4532 = vmatprep.subr.bf16.mxu0 %v12724_v22  ;;  %v4778_v22 = vld [vmem:[#allocation55 + $0x188] sm:$0xff] }
 0xc66   :  { %4533 = vmatpush2.bf16.msra.mxu0 %v12722_v23  ;;  %v4786_v23 = vld [vmem:[#allocation55 + $0x1c8] sm:$0xff] }
 0xc67   :  { %4534 = vmatprep.subr.bf16.mxu0 %v12727_v25  ;;  %v11355_v25 = vcombine.low %v4793_v7, %v4801_v8  ;;  %v4937_v7 = vld [vmem:[#allocation55 + $0x680] sm:$0xff] }
 0xc68   :  { %v4945_v8 = vld [vmem:[#allocation55 + $0x6c0] sm:$0xff] }
 0xc6a   :  { %4535 = vmatpush2.bf16.msra.mxu0 %v12725_v26  ;;  %v11357_v26 = vcombine.low %v4794_v10, %v4802_v11  ;;  %v4938_v10 = vld [vmem:[#allocation55 + $0x688] sm:$0xff] }
 0xc6b   :  { %4536 = vmatprep.subr.bf16.mxu0 %v12730_v17  ;;  %v11340_v17 = vcombine.high %v4777_v21, %v4785_v20  ;;  %v4946_v11 = vld [vmem:[#allocation55 + $0x6c8] sm:$0xff] }
 0xc6e   :  { %4537 = vmatpush2.bf16.msra.mxu0 %v12728_v24  ;;  %v11342_v24 = vcombine.high %v4778_v22, %v4786_v23 }
 0xc6f   :  { %4538 = vmatprep.subr.bf16.mxu0 %v12733_v32  ;;  %v4761_v32 = vld [vmem:[#allocation55 + $0x100] sm:$0xff] }
 0xc72   :  { %4539 = vmatpush2.bf16.msra.mxu0 %v12731_v34  ;;  %v4769_v34 = vld [vmem:[#allocation55 + $0x140] sm:$0xff] }
 0xc73   :  { %4540 = vmatprep.subr.bf16.mxu0 %v12736_v35  ;;  %v4762_v35 = vld [vmem:[#allocation55 + $0x108] sm:$0xff] }
 0xc76   :  { %4541 = vmatpush2.bf16.msra.mxu0 %v12734_v36  ;;  %v4770_v36 = vld [vmem:[#allocation55 + $0x148] sm:$0xff] }
 0xc77   :  { %4542 = vmatprep.subr.bf16.mxu0 %v12739_v37  ;;  %v11339_v37 = vcombine.low %v4777_v21, %v4785_v20  ;;  %v4921_v21 = vld [vmem:[#allocation55 + $0x600] sm:$0xff] }
 0xc78   :  { %v4929_v20 = vld [vmem:[#allocation55 + $0x640] sm:$0xff] }
 0xc7a   :  { %4543 = vmatpush2.bf16.msra.mxu0 %v12737_v30  ;;  %v11341_v30 = vcombine.low %v4778_v22, %v4786_v23  ;;  %v4922_v22 = vld [vmem:[#allocation55 + $0x608] sm:$0xff] }
 0xc7b   :  { %6306 = vmatprep.subr.bf16.mxu0 %v11406_v56  ;;  %v4978_v56 = vld [vmem:[#allocation55 + $0x7c8] sm:$0xff] }
 0xc7c   :  { %v4930_v23 = vld [vmem:[#allocation55 + $0x648] sm:$0xff] }
 0xc7d   :  { %4545 = vmatmul.mubr.bf16.vlgmr.msra.gmra.mxu0 %v14823_v60  ;;  %v4809_v60 = vld [vmem:[#allocation55 + $0x280] sm:$0xff] }
 0xc7e   :  { %6307 = vmatpush1.bf16.msra.mxu0 %v11405_v55  ;;  %v11372_v5 = vcombine.high %v4809_v60, %v4817_v62  ;;  %v11371_v12 = vcombine.low %v4809_v60, %v4817_v62  ;;  %v4970_v55 = vld [vmem:[#allocation55 + $0x788] sm:$0xff]  ;;  %v4961_v62 = vld [vmem:[#allocation55 + $0x740] sm:$0xff] }
 0xc7f   :  { %6308 = vmatprep.subr.bf16.mxu0 %v11390_v61  ;;  %v11534_v60 = vcombine.high %v4970_v55, %v4978_v56  ;;  %v4953_v61 = vld [vmem:[#allocation55 + $0x700] sm:$0xff] }
 0xc82   :  { %6309 = vmatpush1.bf16.msra.mxu0 %v11389_v4  ;;  %v11533_v4 = vcombine.low %v4970_v55, %v4978_v56  ;;  %v4857_v55 = vld [vmem:[#allocation55 + $0x400] sm:$0xff] }
 0xc83   :  { %6310 = vmatprep.subr.bf16.mxu0 %v11374_v6  ;;  %v11518_v6 = vcombine.high %v4954_v63, %v4962_v0  ;;  %v4865_v56 = vld [vmem:[#allocation55 + $0x440] sm:$0xff] }
 0xc86   :  { %6311 = vmatpush1.bf16.msra.mxu0 %v11373_v16  ;;  %v11517_v16 = vcombine.low %v4954_v63, %v4962_v0  ;;  %v4843_v63 = vld [vmem:[#allocation55 + $0x390] sm:$0xff] }
 0xc87   :  { %6312 = vmatprep.subr.bf16.mxu0 %v11358_v19  ;;  %v11502_v19 = vcombine.high %v4938_v10, %v4946_v11  ;;  %v4851_v0 = vld [vmem:[#allocation55 + $0x3d0] sm:$0xff] }
 0xc8a   :  { %6313 = vmatpush1.bf16.msra.mxu0 %v11357_v26  ;;  %v11501_v26 = vcombine.low %v4938_v10, %v4946_v11  ;;  %v3769_v11 = vld [vmem:[#allocation46] sm:$0x3] }
 0xc8b   :  { %6314 = vmatprep.subr.bf16.mxu0 %v11342_v24  ;;  %v11486_v24 = vcombine.high %v4922_v22, %v4930_v23 }
 0xc8e   :  { %6315 = vmatpush1.bf16.msra.mxu0 %v11341_v30  ;;  %v11485_v30 = vcombine.low %v4922_v22, %v4930_v23  ;;  %v3778_v22 = vrot.slane %v3769_v11, %v14819_v27 }
 0xcfd   :  { %v4464_v14 = vpop.f32.mrf.mxu0  ;;  %v14833_v13 = vpop.f32.mrf.mxu1 }
 0xcff   :  { %v4466_v41 = vpop.f32.mrf.mxu0  ;;  %v14835_v28 = vpop.f32.mrf.mxu1 }
 0xd00   :  { %4587 = vmatprep.subr.mxu1 %v4466_v41  ;;  %v11326_v41 = vcombine.high %v4762_v35, %v4770_v36 }
 0xd01   :  { %v4468_v42 = vpop.f32.mrf.mxu0  ;;  %v4509_v43 = vpop.f32.mrf.mxu1  ;;  %4588 = vmatpush1.msra.mxu1 %v4464_v14  ;;  %v11324_v14 = vcombine.high %v4761_v32, %v4769_v34 }
 0xd02   :  { %11289 = vmatmul.mubr.msk.f32.vlgmr.msra.gmra.mxu1 %vm4553_vm6, %v2968_v15  ;;  %v4745_v15 = vld [vmem:[#allocation55 + $0x80] sm:$0xff]  ;;  %v4746_v43 = vld [vmem:[#allocation55 + $0x88] sm:$0xff]  ;;  %6316 = vmatprep.subr.bf16.mxu0 %v11326_v41 }
 0xd03   :  { %v4469_v44 = vpop.f32.mrf.mxu0  ;;  %v4510_v40 = vpop.f32.mrf.mxu1  ;;  %4695 = vmatprep.mubr.f32.mxu1 %v14357_v2  ;;  %v4753_v42 = vld [vmem:[#allocation55 + $0xc0] sm:$0xff] }
 0xd04   :  { %v4754_v44 = vld [vmem:[#allocation55 + $0xc8] sm:$0xff]  ;;  %v11323_v40 = vcombine.low %v4761_v32, %v4769_v34  ;;  %v11307_v51 = vcombine.low %v4745_v15, %v4753_v42  ;;  %v4905_v32 = vld [vmem:[#allocation55 + $0x580] sm:$0xff] }
 0xd05   :  { %v4913_v34 = vld [vmem:[#allocation55 + $0x5c0] sm:$0xff] }
 0xd3d   :  { %v4546_v45 = vpop.f32.mrf.mxu0 }
 0xd3f   :  { %v4548_v47 = vpop.f32.mrf.mxu0 }
 0xd40   :  { %4661 = vmatprep.subr.mxu1 %v4548_v47  ;;  %v11308_v47 = vcombine.high %v4745_v15, %v4753_v42  ;;  %v11467_v15 = vcombine.low %v4905_v32, %v4913_v34 }
 0xd41   :  { %v4550_v49 = vpop.f32.mrf.mxu0  ;;  %4662 = vmatpush1.msra.mxu1 %v4546_v45  ;;  %v11325_v45 = vcombine.low %v4762_v35, %v4770_v36  ;;  %v4906_v35 = vld [vmem:[#allocation55 + $0x588] sm:$0xff] }
 0xd42   :  { %11290 = vmatmul.mubr.msk.f32.vlgmr.msra.gmra.mxu1 %vm4553_vm6, %v2969_v48  ;;  %6265 = vmatprep.subr.bf16.mxu1 %v11404_v53  ;;  %v11310_v48 = vcombine.high %v4746_v43, %v4754_v44  ;;  %v4729_v49 = vld [vmem:[#allocation55] sm:$0xff]  ;;  %v4914_v36 = vld [vmem:[#allocation55 + $0x5c8] sm:$0xff] }
 0xd43   :  { %v4551_v31 = vpop.f32.mrf.mxu0  ;;  %6266 = vmatpush1.bf16.msra.mxu1 %v11403_v52  ;;  %6317 = vmatpush1.bf16.msra.mxu0 %v11325_v45  ;;  %v11309_v52 = vcombine.low %v4746_v43, %v4754_v44  ;;  %v11470_v41 = vcombine.high %v4906_v35, %v4914_v36  ;;  %v11469_v42 = vcombine.low %v4906_v35, %v4914_v36  ;;  %v4889_v43 = vld [vmem:[#allocation55 + $0x500] sm:$0xff] }
 0xd44   :  { %6267 = vmatprep.subr.bf16.mxu1 %v11388_v57  ;;  %v4737_v31 = vld [vmem:[#allocation55 + $0x40] sm:$0xff]  ;;  %6318 = vmatprep.subr.bf16.mxu0 %v11310_v48  ;;  %v3850_v35 = vadd.f32 %v14831_v29, %v3778_v22 }
 0xd45   :  { %v11292_v53 = vcombine.high %v4729_v49, %v4737_v31  ;;  %v11291_v57 = vcombine.low %v4729_v49, %v4737_v31  ;;  %v4897_v44 = vld [vmem:[#allocation55 + $0x540] sm:$0xff] }
 0xd46   :  { %v11452_v45 = vcombine.high %v4889_v43, %v4897_v44  ;;  %v11451_v48 = vcombine.low %v4889_v43, %v4897_v44  ;;  %v4836_v43 = vld [vmem:[#allocation55 + $0x358] sm:$0xff] }
 0xd47   :  { %6268 = vmatpush1.bf16.msra.mxu1 %v11387_v1  ;;  %6319 = vmatpush1.bf16.msra.mxu0 %v11309_v52  ;;  %v11531_v1 = vcombine.low %v4969_v38, %v4977_v54  ;;  %v11436_v52 = vcombine.high %v4873_v33, %v4881_v50 }
 0xd48   :  { %6269 = vmatprep.subr.bf16.mxu1 %v11372_v5  ;;  %6320 = vmatprep.subr.bf16.mxu0 %v11294_v3  ;;  %v11516_v5 = vcombine.high %v4953_v61, %v4961_v62  ;;  %v11435_v3 = vcombine.low %v4873_v33, %v4881_v50 }
 0xd4b   :  { %6270 = vmatpush1.bf16.msra.mxu1 %v11371_v12  ;;  %6321 = vmatpush1.bf16.msra.mxu0 %v11293_v58  ;;  %v11515_v12 = vcombine.low %v4953_v61, %v4961_v62  ;;  %v11420_v58 = vcombine.high %v4857_v55, %v4865_v56 }
 0xd4c   :  { %6271 = vmatprep.subr.bf16.mxu1 %v11356_v18  ;;  %6322 = vmatprep.subr.bf16.mxu0 %v11534_v60  ;;  %v11500_v18 = vcombine.high %v4937_v7, %v4945_v8  ;;  %v11419_v60 = vcombine.low %v4857_v55, %v4865_v56 }
 0xd4f   :  { %6272 = vmatpush1.bf16.msra.mxu1 %v11355_v25  ;;  %6323 = vmatpush2.bf16.msra.mxu0 %v11533_v4  ;;  %v11499_v25 = vcombine.low %v4937_v7, %v4945_v8  ;;  %v11408_v4 = vcombine.high %v4843_v63, %v4851_v0 }
 0xd50   :  { %6273 = vmatprep.subr.bf16.mxu1 %v11340_v17  ;;  %6324 = vmatprep.subr.bf16.mxu0 %v11518_v6  ;;  %v11484_v17 = vcombine.high %v4921_v21, %v4929_v20  ;;  %v11407_v6 = vcombine.low %v4843_v63, %v4851_v0 }
 0xd53   :  { %6274 = vmatpush1.bf16.msra.mxu1 %v11339_v37  ;;  %6325 = vmatpush2.bf16.msra.mxu0 %v11517_v16  ;;  %v11483_v37 = vcombine.low %v4921_v21, %v4929_v20 }
 0xd54   :  { %6275 = vmatprep.subr.bf16.mxu1 %v11324_v14  ;;  %6326 = vmatprep.subr.bf16.mxu0 %v11502_v19  ;;  %v11468_v14 = vcombine.high %v4905_v32, %v4913_v34 }
 0xd57   :  { %6276 = vmatpush1.bf16.msra.mxu1 %v11323_v40  ;;  %6327 = vmatpush2.bf16.msra.mxu0 %v11501_v26  ;;  %v4890_v40 = vld [vmem:[#allocation55 + $0x508] sm:$0xff] }
 0xd58   :  { %6277 = vmatprep.subr.bf16.mxu1 %v11308_v47  ;;  %6328 = vmatprep.subr.bf16.mxu0 %v11486_v24  ;;  %v4898_v47 = vld [vmem:[#allocation55 + $0x548] sm:$0xff] }
 0xd59   :  { %v11453_v49 = vcombine.low %v4890_v40, %v4898_v47  ;;  %v11454_v31 = vcombine.high %v4890_v40, %v4898_v47  ;;  %v4811_v40 = vld [vmem:[#allocation55 + $0x290] sm:$0xff]  ;;  %v4812_v47 = vld [vmem:[#allocation55 + $0x298] sm:$0xff] }
 0xd5b   :  { %6278 = vmatpush1.bf16.msra.mxu1 %v11307_v51  ;;  %6329 = vmatpush2.bf16.msra.mxu0 %v11485_v30  ;;  %v4874_v51 = vld [vmem:[#allocation55 + $0x488] sm:$0xff] }
 0xd5c   :  { %6279 = vmatprep.subr.bf16.mxu1 %v11292_v53  ;;  %6330 = vmatprep.subr.bf16.mxu0 %v11470_v41  ;;  %v4882_v53 = vld [vmem:[#allocation55 + $0x4c8] sm:$0xff]  ;;  %v4827_v41 = vld [vmem:[#allocation55 + $0x310] sm:$0xff] }
 0xd5d   :  { %v11437_v38 = vcombine.low %v4874_v51, %v4882_v53  ;;  %v11438_v54 = vcombine.high %v4874_v51, %v4882_v53  ;;  %v4795_v51 = vld [vmem:[#allocation55 + $0x210] sm:$0xff]  ;;  %v4796_v53 = vld [vmem:[#allocation55 + $0x218] sm:$0xff] }
 0xd5f   :  { %6280 = vmatpush1.bf16.msra.mxu1 %v11291_v57  ;;  %6331 = vmatpush2.bf16.msra.mxu0 %v11469_v42  ;;  %v4858_v57 = vld [vmem:[#allocation55 + $0x408] sm:$0xff]  ;;  %v4828_v42 = vld [vmem:[#allocation55 + $0x318] sm:$0xff] }
 0xd60   :  { %6281 = vmatprep.subr.bf16.mxu1 %v11532_v59  ;;  %6332 = vmatprep.subr.bf16.mxu0 %v11454_v31  ;;  %v4866_v59 = vld [vmem:[#allocation55 + $0x448] sm:$0xff]  ;;  %v11394_v29 = vcombine.high %v4828_v42, %v4836_v43  ;;  %v11393_v31 = vcombine.low %v4828_v42, %v4836_v43 }
 0xd61   :  { %v11421_v61 = vcombine.low %v4858_v57, %v4866_v59  ;;  %v11422_v62 = vcombine.high %v4858_v57, %v4866_v59  ;;  %v4779_v57 = vld [vmem:[#allocation55 + $0x190] sm:$0xff]  ;;  %v4780_v59 = vld [vmem:[#allocation55 + $0x198] sm:$0xff] }
 0xd63   :  { %6282 = vmatpush2.bf16.msra.mxu1 %v11531_v1  ;;  %6333 = vmatpush2.bf16.msra.mxu0 %v11453_v49  ;;  %v4844_v1 = vld [vmem:[#allocation55 + $0x398] sm:$0xff] }
 0xd64   :  { %6283 = vmatprep.subr.bf16.mxu1 %v11516_v5  ;;  %6334 = vmatprep.subr.bf16.mxu0 %v11438_v54  ;;  %v4852_v5 = vld [vmem:[#allocation55 + $0x3d8] sm:$0xff] }
 0xd65   :  { %v11409_v7 = vcombine.low %v4844_v1, %v4852_v5  ;;  %v11410_v8 = vcombine.high %v4844_v1, %v4852_v5  ;;  %v4763_v1 = vld [vmem:[#allocation55 + $0x110] sm:$0xff]  ;;  %v4764_v5 = vld [vmem:[#allocation55 + $0x118] sm:$0xff] }
 0xd67   :  { %6284 = vmatpush2.bf16.msra.mxu1 %v11515_v12  ;;  %6335 = vmatpush2.bf16.msra.mxu0 %v11437_v38  ;;  %v4704_v12 = vld [vmem:[#allocation44] sm:$0x3] }
 0xd68   :  { %6285 = vmatprep.subr.bf16.mxu1 %v11500_v18  ;;  %6336 = vmatprep.subr.bf16.mxu0 %v11422_v62  ;;  %v3774_v18 = vrot.slane %v3769_v11, %v14816_v46  ;;  %v4709_v21 = vrot.slane %v4704_v12, %v14816_v46  ;;  %v4713_v26 = vrot.slane %v4704_v12, %v14819_v27  ;;  %v4747_v12 = vld [vmem:[#allocation55 + $0x90] sm:$0xff] }
 0xd6a   :  { %v3848_v24 = vadd.f32 %v14829_v39, %v3774_v18  ;;  %v4748_v18 = vld [vmem:[#allocation55 + $0x98] sm:$0xff] }
 0xd6b   :  { %6286 = vmatpush2.bf16.msra.mxu1 %v11499_v25  ;;  %6337 = vmatpush2.bf16.msra.mxu0 %v11421_v61 }
 0xd6c   :  { %6287 = vmatprep.subr.bf16.mxu1 %v11484_v17  ;;  %6388 = vmatprep.subr.bf16.mxu0 %v11410_v8 }
 0xd6f   :  { %6288 = vmatpush2.bf16.msra.mxu1 %v11483_v37 }
 0xd70   :  { %6289 = vmatprep.subr.bf16.mxu1 %v11468_v14 }
 0xd73   :  { %6290 = vmatpush2.bf16.msra.mxu1 %v11467_v15  ;;  %v4835_v15 = vld [vmem:[#allocation55 + $0x350] sm:$0xff] }
 0xd74   :  { %6291 = vmatprep.subr.bf16.mxu1 %v11452_v45  ;;  %v11392_v39 = vcombine.high %v4827_v41, %v4835_v15  ;;  %v4819_v45 = vld [vmem:[#allocation55 + $0x2d0] sm:$0xff]  ;;  %v11391_v49 = vcombine.low %v4827_v41, %v4835_v15 }
 0xd75   :  { %v11376_v33 = vcombine.high %v4811_v40, %v4819_v45  ;;  %v11375_v38 = vcombine.low %v4811_v40, %v4819_v45  ;;  %v4955_v40 = vld [vmem:[#allocation55 + $0x710] sm:$0xff]  ;;  %v4964_v45 = vld [vmem:[#allocation55 + $0x758] sm:$0xff] }
 0xd77   :  { %6292 = vmatpush2.bf16.msra.mxu1 %v11451_v48  ;;  %v4820_v48 = vld [vmem:[#allocation55 + $0x2d8] sm:$0xff] }
 0xd78   :  { %6293 = vmatprep.subr.bf16.mxu1 %v11436_v52  ;;  %v11378_v50 = vcombine.high %v4812_v47, %v4820_v48  ;;  %v4803_v52 = vld [vmem:[#allocation55 + $0x250] sm:$0xff]  ;;  %v11377_v54 = vcombine.low %v4812_v47, %v4820_v48 }
 0xd79   :  { %v11360_v55 = vcombine.high %v4795_v51, %v4803_v52  ;;  %v11359_v61 = vcombine.low %v4795_v51, %v4803_v52  ;;  %v4940_v51 = vld [vmem:[#allocation55 + $0x698] sm:$0xff] }
 0xd7a   :  { %v4948_v52 = vld [vmem:[#allocation55 + $0x6d8] sm:$0xff] }
 0xd7b   :  { %6294 = vmatpush2.bf16.msra.mxu1 %v11435_v3  ;;  %v4804_v3 = vld [vmem:[#allocation55 + $0x258] sm:$0xff] }
 0xd7c   :  { %6295 = vmatprep.subr.bf16.mxu1 %v11420_v58  ;;  %v11362_v56 = vcombine.high %v4796_v53, %v4804_v3  ;;  %v4787_v58 = vld [vmem:[#allocation55 + $0x1d0] sm:$0xff]  ;;  %v11361_v62 = vcombine.low %v4796_v53, %v4804_v3 }
 0xd7d   :  { %v11344_v63 = vcombine.high %v4779_v57, %v4787_v58 }
 0xd7f   :  { %6296 = vmatpush2.bf16.msra.mxu1 %v11419_v60  ;;  %v4788_v60 = vld [vmem:[#allocation55 + $0x1d8] sm:$0xff] }
 0xd80   :  { %6347 = vmatprep.subr.bf16.mxu1 %v11408_v4  ;;  %v11346_v0 = vcombine.high %v4780_v59, %v4788_v60  ;;  %v4771_v4 = vld [vmem:[#allocation55 + $0x150] sm:$0xff]  ;;  %v11345_v8 = vcombine.low %v4780_v59, %v4788_v60  ;;  %v11505_v60 = vcombine.low %v4940_v51, %v4948_v52 }
 0xdc2   :  { %v4623_v10 = vpop.f32.mrf.mxu1 }
 0xdc3   :  { %v4624_v19 = vadd.f32 %v4623_v10, %v14833_v13  ;;  %v11328_v10 = vcombine.high %v4763_v1, %v4771_v4 }
 0xdc4   :  { %v4625_v16 = vpop.f32.mrf.mxu1 }
 0xdc5   :  { %v4626_v23 = vadd.f32 %v4625_v16, %v14835_v28  ;;  %v4755_v16 = vld [vmem:[#allocation55 + $0xd0] sm:$0xff] }
 0xdc6   :  { %v11312_v22 = vcombine.high %v4747_v12, %v4755_v16 }
 0xe02   :  { %v4697_v20 = vpop.f32.mrf.mxu1 }
 0xe03   :  { %v4702_v25 = vadd.f32 %v4697_v20, %v4624_v19  ;;  %v4756_v19 = vld [vmem:[#allocation55 + $0xd8] sm:$0xff] }
 0xe04   :  { %v4699_v17 = vpop.f32.mrf.mxu1 }
 0xe05   :  { %v4716_v32 = vadd.f32 %v4709_v21, %v4702_v25  ;;  %v4703_v34 = vadd.f32 %v4699_v17, %v4626_v23  ;;  %v11327_v21 = vcombine.low %v4763_v1, %v4771_v4  ;;  %v11314_v23 = vcombine.high %v4748_v18, %v4756_v19  ;;  %v4731_v25 = vld [vmem:[#allocation55 + $0x10] sm:$0xff]  ;;  %v4732_v17 = vld [vmem:[#allocation55 + $0x18] sm:$0xff] }
 0xe06   :  { %v4908_v1 = vld [vmem:[#allocation55 + $0x598] sm:$0xff] }
 0xe07   :  { %v4718_v36 = vadd.f32 %v4716_v32, %v3848_v24  ;;  %v4717_v37 = vadd.f32 %v4713_v26, %v4703_v34  ;;  %v4739_v26 = vld [vmem:[#allocation55 + $0x50] sm:$0xff]  ;;  %v4740_v24 = vld [vmem:[#allocation55 + $0x58] sm:$0xff]  ;;  %v11311_v32 = vcombine.low %v4747_v12, %v4755_v16  ;;  %v11313_v34 = vcombine.low %v4748_v18, %v4756_v19 }
 0xe08   :  { %v11295_v41 = vcombine.low %v4731_v25, %v4739_v26  ;;  %v11297_v15 = vcombine.low %v4732_v17, %v4740_v24  ;;  %v4916_v4 = vld [vmem:[#allocation55 + $0x5d8] sm:$0xff] }
 0xe09   :  { %v4719_v13 = vadd.f32 %v4717_v37, %v3850_v35  ;;  %v4720_v30 = vmax.f32 %v4718_v36, 0.0  ;;  %v11296_v35 = vcombine.high %v4731_v25, %v4739_v26  ;;  %v11298_v36 = vcombine.high %v4732_v17, %v4740_v24  ;;  %v4971_v37 = vld [vmem:[#allocation55 + $0x790] sm:$0xff]  ;;  %v4892_v12 = vld [vmem:[#allocation55 + $0x518] sm:$0xff] }
 0xe0a   :  { %v4900_v16 = vld [vmem:[#allocation55 + $0x558] sm:$0xff]  ;;  %v11473_v19 = vcombine.low %v4908_v1, %v4916_v4 }
 0xe0b   :  { %v4721_v14 = vmax.f32 %v4719_v13, 0.0  ;;  %v14850_v44 = vpack.c.bf16 %v4720_v30, %v4720_v30  ;;  %v4979_v13 = vld [vmem:[#allocation55 + $0x7d0] sm:$0xff]  ;;  %v4972_v30 = vld [vmem:[#allocation55 + $0x798] sm:$0xff]  ;;  %v11457_v24 = vcombine.low %v4892_v12, %v4900_v16 }
 0xe0c   :  { %v11536_v42 = vcombine.high %v4971_v37, %v4979_v13  ;;  %v11535_v47 = vcombine.low %v4971_v37, %v4979_v13  ;;  %v4876_v25 = vld [vmem:[#allocation55 + $0x498] sm:$0xff] }
 0xe0d   :  { %v14848_v28 = vpack.c.bf16 %v4721_v14, %v4721_v14  ;;  %v4980_v14 = vld [vmem:[#allocation55 + $0x7d8] sm:$0xff] }
 0xe0e   :  { %v11538_v43 = vcombine.high %v4972_v30, %v4980_v14  ;;  %v11537_v48 = vcombine.low %v4972_v30, %v4980_v14  ;;  %v4884_v26 = vld [vmem:[#allocation55 + $0x4d8] sm:$0xff] }
 0xe0f   :  { %6297 = vmatprep.mubr.bf16.mxu1 %v14848_v28  ;;  %6338 = vmatprep.mubr.bf16.mxu0 %v14848_v28  ;;  %v4860_v37 = vld [vmem:[#allocation55 + $0x418] sm:$0xff]  ;;  %v11441_v14 = vcombine.low %v4876_v25, %v4884_v26 }
 0xe10   :  { %6298 = vmatmul.mubr.bf16.vlgmr.msra.gmra.mxu1 %v14850_v44  ;;  %6339 = vmatmul.mubr.bf16.vlgmr.msra.gmra.mxu0 %v14850_v44  ;;  %v4868_v13 = vld [vmem:[#allocation55 + $0x458] sm:$0xff] }
 0xe11   :  { %6348 = vmatpush1.bf16.msra.mxu1 %v11407_v6  ;;  %6389 = vmatpush1.bf16.msra.mxu0 %v11409_v7  ;;  %v4772_v6 = vld [vmem:[#allocation55 + $0x158] sm:$0xff]  ;;  %v11343_v7 = vcombine.low %v4779_v57, %v4787_v58 }
 0xe12   :  { %6379 = vmatprep.mubr.bf16.mxu1 %v14848_v28  ;;  %6420 = vmatprep.mubr.bf16.mxu0 %v14848_v28  ;;  %v11330_v11 = vcombine.high %v4764_v5, %v4772_v6  ;;  %v11329_v20 = vcombine.low %v4764_v5, %v4772_v6  ;;  %v4924_v57 = vld [vmem:[#allocation55 + $0x618] sm:$0xff] }
 0xe13   :  { %6349 = vmatprep.subr.bf16.mxu1 %v11392_v39  ;;  %6390 = vmatprep.subr.bf16.mxu0 %v11394_v29  ;;  %v4963_v39 = vld [vmem:[#allocation55 + $0x750] sm:$0xff]  ;;  %v4956_v29 = vld [vmem:[#allocation55 + $0x718] sm:$0xff] }
 0xe14   :  { %v11519_v53 = vcombine.low %v4955_v40, %v4963_v39  ;;  %v11521_v3 = vcombine.low %v4956_v29, %v4964_v45  ;;  %v4932_v58 = vld [vmem:[#allocation55 + $0x658] sm:$0xff] }
 0xe15   :  { %6350 = vmatpush1.bf16.msra.mxu1 %v11391_v49  ;;  %6391 = vmatpush1.bf16.msra.mxu0 %v11393_v31  ;;  %v11520_v49 = vcombine.high %v4955_v40, %v4963_v39  ;;  %v11522_v31 = vcombine.high %v4956_v29, %v4964_v45  ;;  %v11489_v6 = vcombine.low %v4924_v57, %v4932_v58  ;;  %v4846_v40 = vld [vmem:[#allocation55 + $0x3a8] sm:$0xff] }
 0xe16   :  { %6351 = vmatprep.subr.bf16.mxu1 %v11376_v33  ;;  %6392 = vmatprep.subr.bf16.mxu0 %v11378_v50  ;;  %v4939_v33 = vld [vmem:[#allocation55 + $0x690] sm:$0xff]  ;;  %v4854_v39 = vld [vmem:[#allocation55 + $0x3e8] sm:$0xff]  ;;  %v11425_v45 = vcombine.low %v4860_v37, %v4868_v13 }
 0xe17   :  { %v4947_v50 = vld [vmem:[#allocation55 + $0x6d0] sm:$0xff] }
 0xe18   :  { %v11503_v59 = vcombine.low %v4939_v33, %v4947_v50 }
 0xe19   :  { %6352 = vmatpush1.bf16.msra.mxu1 %v11375_v38  ;;  %6393 = vmatpush1.bf16.msra.mxu0 %v11377_v54  ;;  %v11504_v38 = vcombine.high %v4939_v33, %v4947_v50  ;;  %v11506_v54 = vcombine.high %v4940_v51, %v4948_v52  ;;  %v4830_v33 = vld [vmem:[#allocation55 + $0x328] sm:$0xff]  ;;  %v11413_v52 = vcombine.low %v4846_v40, %v4854_v39 }
 0xe1a   :  { %6353 = vmatprep.subr.bf16.mxu1 %v11360_v55  ;;  %6394 = vmatprep.subr.bf16.mxu0 %v11362_v56  ;;  %v4923_v55 = vld [vmem:[#allocation55 + $0x610] sm:$0xff]  ;;  %v4838_v50 = vld [vmem:[#allocation55 + $0x368] sm:$0xff] }
 0xe1b   :  { %v4931_v56 = vld [vmem:[#allocation55 + $0x650] sm:$0xff] }
 0xe1c   :  { %v11487_v5 = vcombine.low %v4923_v55, %v4931_v56 }
 0xe1d   :  { %6354 = vmatpush1.bf16.msra.mxu1 %v11359_v61  ;;  %6395 = vmatpush1.bf16.msra.mxu0 %v11361_v62  ;;  %v11488_v61 = vcombine.high %v4923_v55, %v4931_v56  ;;  %v11490_v62 = vcombine.high %v4924_v57, %v4932_v58  ;;  %v4814_v55 = vld [vmem:[#allocation55 + $0x2a8] sm:$0xff]  ;;  %v11397_v58 = vcombine.low %v4830_v33, %v4838_v50 }
 0xe1e   :  { %6355 = vmatprep.subr.bf16.mxu1 %v11344_v63  ;;  %6396 = vmatprep.subr.bf16.mxu0 %v11346_v0  ;;  %v4907_v63 = vld [vmem:[#allocation55 + $0x590] sm:$0xff]  ;;  %v4822_v56 = vld [vmem:[#allocation55 + $0x2e8] sm:$0xff] }
 0xe1f   :  { %v4915_v0 = vld [vmem:[#allocation55 + $0x5d0] sm:$0xff] }
 0xe20   :  { %v11471_v18 = vcombine.low %v4907_v63, %v4915_v0 }
 0xe21   :  { %6356 = vmatpush1.bf16.msra.mxu1 %v11343_v7  ;;  %6397 = vmatpush1.bf16.msra.mxu0 %v11345_v8  ;;  %v11472_v7 = vcombine.high %v4907_v63, %v4915_v0  ;;  %v11474_v8 = vcombine.high %v4908_v1, %v4916_v4  ;;  %v4798_v63 = vld [vmem:[#allocation55 + $0x228] sm:$0xff]  ;;  %v11381_v4 = vcombine.low %v4814_v55, %v4822_v56 }
 0xe22   :  { %6357 = vmatprep.subr.bf16.mxu1 %v11328_v10  ;;  %6398 = vmatprep.subr.bf16.mxu0 %v11330_v11  ;;  %v4891_v10 = vld [vmem:[#allocation55 + $0x510] sm:$0xff]  ;;  %v4806_v0 = vld [vmem:[#allocation55 + $0x268] sm:$0xff] }
 0xe23   :  { %v4899_v11 = vld [vmem:[#allocation55 + $0x550] sm:$0xff] }
 0xe24   :  { %v11455_v17 = vcombine.low %v4891_v10, %v4899_v11 }
 0xe25   :  { %6358 = vmatpush1.bf16.msra.mxu1 %v11327_v21  ;;  %6399 = vmatpush1.bf16.msra.mxu0 %v11329_v20  ;;  %v11456_v21 = vcombine.high %v4891_v10, %v4899_v11  ;;  %v11458_v20 = vcombine.high %v4892_v12, %v4900_v16  ;;  %v4782_v10 = vld [vmem:[#allocation55 + $0x1a8] sm:$0xff]  ;;  %v11365_v16 = vcombine.low %v4798_v63, %v4806_v0 }
 0xe26   :  { %6359 = vmatprep.subr.bf16.mxu1 %v11312_v22  ;;  %6400 = vmatprep.subr.bf16.mxu0 %v11314_v23  ;;  %v4875_v22 = vld [vmem:[#allocation55 + $0x490] sm:$0xff]  ;;  %v4790_v11 = vld [vmem:[#allocation55 + $0x1e8] sm:$0xff] }
 0xe27   :  { %v4883_v23 = vld [vmem:[#allocation55 + $0x4d0] sm:$0xff] }
 0xe28   :  { %v11439_v30 = vcombine.low %v4875_v22, %v4883_v23 }
 0xe29   :  { %6360 = vmatpush1.bf16.msra.mxu1 %v11311_v32  ;;  %6401 = vmatpush1.bf16.msra.mxu0 %v11313_v34  ;;  %v11440_v32 = vcombine.high %v4875_v22, %v4883_v23  ;;  %v11442_v34 = vcombine.high %v4876_v25, %v4884_v26  ;;  %v4766_v22 = vld [vmem:[#allocation55 + $0x128] sm:$0xff]  ;;  %v11349_v26 = vcombine.low %v4782_v10, %v4790_v11 }
 0xe2a   :  { %6361 = vmatprep.subr.bf16.mxu1 %v11296_v35  ;;  %6402 = vmatprep.subr.bf16.mxu0 %v11298_v36  ;;  %v4859_v35 = vld [vmem:[#allocation55 + $0x410] sm:$0xff]  ;;  %v4774_v23 = vld [vmem:[#allocation55 + $0x168] sm:$0xff] }
 0xe2b   :  { %v4867_v36 = vld [vmem:[#allocation55 + $0x450] sm:$0xff] }
 0xe2c   :  { %v11423_v29 = vcombine.low %v4859_v35, %v4867_v36 }
 0xe2d   :  { %6362 = vmatpush1.bf16.msra.mxu1 %v11295_v41  ;;  %6403 = vmatpush1.bf16.msra.mxu0 %v11297_v15  ;;  %v11424_v41 = vcombine.high %v4859_v35, %v4867_v36  ;;  %v11426_v15 = vcombine.high %v4860_v37, %v4868_v13  ;;  %v4750_v35 = vld [vmem:[#allocation55 + $0xa8] sm:$0xff]  ;;  %v11333_v13 = vcombine.low %v4766_v22, %v4774_v23 }
 0xe2e   :  { %6363 = vmatprep.subr.bf16.mxu1 %v11536_v42  ;;  %6404 = vmatprep.subr.bf16.mxu0 %v11538_v43  ;;  %v4845_v42 = vld [vmem:[#allocation55 + $0x3a0] sm:$0xff]  ;;  %v4758_v36 = vld [vmem:[#allocation55 + $0xe8] sm:$0xff] }
 0xe2f   :  { %v4853_v43 = vld [vmem:[#allocation55 + $0x3e0] sm:$0xff] }
 0xe30   :  { %v11411_v51 = vcombine.low %v4845_v42, %v4853_v43 }
 0xe31   :  { %6364 = vmatpush2.bf16.msra.mxu1 %v11535_v47  ;;  %6405 = vmatpush2.bf16.msra.mxu0 %v11537_v48  ;;  %v11412_v47 = vcombine.high %v4845_v42, %v4853_v43  ;;  %v11414_v48 = vcombine.high %v4846_v40, %v4854_v39  ;;  %v4734_v42 = vld [vmem:[#allocation55 + $0x28] sm:$0xff]  ;;  %v11317_v39 = vcombine.low %v4750_v35, %v4758_v36 }
 0xe32   :  { %6365 = vmatprep.subr.bf16.mxu1 %v11520_v49  ;;  %6406 = vmatprep.subr.bf16.mxu0 %v11522_v31  ;;  %v4829_v49 = vld [vmem:[#allocation55 + $0x320] sm:$0xff]  ;;  %v4742_v43 = vld [vmem:[#allocation55 + $0x68] sm:$0xff] }
 0xe33   :  { %v4837_v31 = vld [vmem:[#allocation55 + $0x360] sm:$0xff] }
 0xe34   :  { %v11395_v57 = vcombine.low %v4829_v49, %v4837_v31 }
 0xe35   :  { %6366 = vmatpush2.bf16.msra.mxu1 %v11519_v53  ;;  %6407 = vmatpush2.bf16.msra.mxu0 %v11521_v3  ;;  %v11396_v53 = vcombine.high %v4829_v49, %v4837_v31  ;;  %v11398_v3 = vcombine.high %v4830_v33, %v4838_v50  ;;  %v4974_v49 = vld [vmem:[#allocation55 + $0x7a8] sm:$0xff]  ;;  %v11301_v50 = vcombine.low %v4734_v42, %v4742_v43 }
 0xe36   :  { %6367 = vmatprep.subr.bf16.mxu1 %v11504_v38  ;;  %6408 = vmatprep.subr.bf16.mxu0 %v11506_v54  ;;  %v4813_v38 = vld [vmem:[#allocation55 + $0x2a0] sm:$0xff]  ;;  %v4982_v31 = vld [vmem:[#allocation55 + $0x7e8] sm:$0xff] }
 0xe37   :  { %v4821_v54 = vld [vmem:[#allocation55 + $0x2e0] sm:$0xff] }
 0xe38   :  { %v11379_v1 = vcombine.low %v4813_v38, %v4821_v54 }
 0xe39   :  { %6368 = vmatpush2.bf16.msra.mxu1 %v11503_v59  ;;  %6409 = vmatpush2.bf16.msra.mxu0 %v11505_v60  ;;  %v11380_v59 = vcombine.high %v4813_v38, %v4821_v54  ;;  %v11382_v60 = vcombine.high %v4814_v55, %v4822_v56  ;;  %v4958_v38 = vld [vmem:[#allocation55 + $0x728] sm:$0xff]  ;;  %v11541_v56 = vcombine.low %v4974_v49, %v4982_v31 }
 0xe3a   :  { %6369 = vmatprep.subr.bf16.mxu1 %v11488_v61  ;;  %6410 = vmatprep.subr.bf16.mxu0 %v11490_v62  ;;  %v4797_v61 = vld [vmem:[#allocation55 + $0x220] sm:$0xff]  ;;  %v4966_v54 = vld [vmem:[#allocation55 + $0x768] sm:$0xff] }
 0xe3b   :  { %v4805_v62 = vld [vmem:[#allocation55 + $0x260] sm:$0xff] }
 0xe3c   :  { %v11363_v12 = vcombine.low %v4797_v61, %v4805_v62 }
 0xe3d   :  { %6370 = vmatpush2.bf16.msra.mxu1 %v11487_v5  ;;  %6411 = vmatpush2.bf16.msra.mxu0 %v11489_v6  ;;  %v11364_v5 = vcombine.high %v4797_v61, %v4805_v62  ;;  %v11366_v6 = vcombine.high %v4798_v63, %v4806_v0  ;;  %v4942_v61 = vld [vmem:[#allocation55 + $0x6a8] sm:$0xff]  ;;  %v11525_v0 = vcombine.low %v4958_v38, %v4966_v54 }
 0xe3e   :  { %6371 = vmatprep.subr.bf16.mxu1 %v11472_v7  ;;  %6412 = vmatprep.subr.bf16.mxu0 %v11474_v8  ;;  %v4781_v7 = vld [vmem:[#allocation55 + $0x1a0] sm:$0xff]  ;;  %v4950_v62 = vld [vmem:[#allocation55 + $0x6e8] sm:$0xff] }
 0xe3f   :  { %v4789_v8 = vld [vmem:[#allocation55 + $0x1e0] sm:$0xff] }
 0xe40   :  { %v11347_v25 = vcombine.low %v4781_v7, %v4789_v8 }
 0xe41   :  { %6372 = vmatpush2.bf16.msra.mxu1 %v11471_v18  ;;  %6413 = vmatpush2.bf16.msra.mxu0 %v11473_v19  ;;  %v11348_v18 = vcombine.high %v4781_v7, %v4789_v8  ;;  %v11350_v19 = vcombine.high %v4782_v10, %v4790_v11  ;;  %v4926_v7 = vld [vmem:[#allocation55 + $0x628] sm:$0xff]  ;;  %v11509_v11 = vcombine.low %v4942_v61, %v4950_v62 }
 0xe42   :  { %6373 = vmatprep.subr.bf16.mxu1 %v11456_v21  ;;  %6414 = vmatprep.subr.bf16.mxu0 %v11458_v20  ;;  %v4765_v21 = vld [vmem:[#allocation55 + $0x120] sm:$0xff]  ;;  %v4934_v8 = vld [vmem:[#allocation55 + $0x668] sm:$0xff] }
 0xe43   :  { %v4773_v20 = vld [vmem:[#allocation55 + $0x160] sm:$0xff] }
 0xe44   :  { %v11331_v37 = vcombine.low %v4765_v21, %v4773_v20 }
 0xe45   :  { %6374 = vmatpush2.bf16.msra.mxu1 %v11455_v17  ;;  %6415 = vmatpush2.bf16.msra.mxu0 %v11457_v24  ;;  %v11332_v17 = vcombine.high %v4765_v21, %v4773_v20  ;;  %v11334_v24 = vcombine.high %v4766_v22, %v4774_v23  ;;  %v4910_v21 = vld [vmem:[#allocation55 + $0x5a8] sm:$0xff]  ;;  %v11493_v23 = vcombine.low %v4926_v7, %v4934_v8 }
 0xe46   :  { %6375 = vmatprep.subr.bf16.mxu1 %v11440_v32  ;;  %6416 = vmatprep.subr.bf16.mxu0 %v11442_v34  ;;  %v4749_v32 = vld [vmem:[#allocation55 + $0xa0] sm:$0xff]  ;;  %v4918_v20 = vld [vmem:[#allocation55 + $0x5e8] sm:$0xff] }
 0xe47   :  { %v4757_v34 = vld [vmem:[#allocation55 + $0xe0] sm:$0xff] }
 0xe48   :  { %v11315_v40 = vcombine.low %v4749_v32, %v4757_v34 }
 0xe49   :  { %6376 = vmatpush2.bf16.msra.mxu1 %v11439_v30  ;;  %6417 = vmatpush2.bf16.msra.mxu0 %v11441_v14  ;;  %v11316_v30 = vcombine.high %v4749_v32, %v4757_v34  ;;  %v11318_v14 = vcombine.high %v4750_v35, %v4758_v36  ;;  %v4894_v32 = vld [vmem:[#allocation55 + $0x528] sm:$0xff]  ;;  %v11477_v36 = vcombine.low %v4910_v21, %v4918_v20 }
 0xe4a   :  { %6377 = vmatprep.subr.bf16.mxu1 %v11424_v41  ;;  %6418 = vmatprep.subr.bf16.mxu0 %v11426_v15  ;;  %v4733_v41 = vld [vmem:[#allocation55 + $0x20] sm:$0xff]  ;;  %v4902_v34 = vld [vmem:[#allocation55 + $0x568] sm:$0xff] }
 0xe4b   :  { %v4741_v15 = vld [vmem:[#allocation55 + $0x60] sm:$0xff] }
 0xe4c   :  { %v11299_v33 = vcombine.low %v4733_v41, %v4741_v15 }
 0xe4d   :  { %6378 = vmatpush2.bf16.msra.mxu1 %v11423_v29  ;;  %6419 = vmatpush2.bf16.msra.mxu0 %v11425_v45  ;;  %v11300_v29 = vcombine.high %v4733_v41, %v4741_v15  ;;  %v11302_v45 = vcombine.high %v4734_v42, %v4742_v43  ;;  %v4878_v41 = vld [vmem:[#allocation55 + $0x4a8] sm:$0xff]  ;;  %v11461_v43 = vcombine.low %v4894_v32, %v4902_v34 }
 0xe4e   :  { %6429 = vmatprep.subr.bf16.mxu1 %v11412_v47  ;;  %6470 = vmatprep.subr.bf16.mxu0 %v11414_v48  ;;  %v4973_v47 = vld [vmem:[#allocation55 + $0x7a0] sm:$0xff]  ;;  %v4886_v15 = vld [vmem:[#allocation55 + $0x4e8] sm:$0xff] }
 0xe4f   :  { %v4981_v48 = vld [vmem:[#allocation55 + $0x7e0] sm:$0xff] }
 0xe50   :  { %6380 = vmatmul.mubr.bf16.vlgmr.msra.gmra.mxu1 %v14850_v44  ;;  %6421 = vmatmul.mubr.bf16.vlgmr.msra.gmra.mxu0 %v14850_v44  ;;  %v11539_v55 = vcombine.low %v4973_v47, %v4981_v48 }
 0xe51   :  { %6430 = vmatpush1.bf16.msra.mxu1 %v11411_v51  ;;  %6461 = vmatprep.mubr.bf16.mxu1 %v14848_v28  ;;  %v11540_v51 = vcombine.high %v4973_v47, %v4981_v48  ;;  %v4862_v47 = vld [vmem:[#allocation55 + $0x428] sm:$0xff] }
 0xe52   :  { %6471 = vmatpush1.bf16.msra.mxu0 %v11413_v52  ;;  %6502 = vmatprep.mubr.bf16.mxu0 %v14848_v28  ;;  %v11542_v52 = vcombine.high %v4974_v49, %v4982_v31  ;;  %v4870_v48 = vld [vmem:[#allocation55 + $0x468] sm:$0xff]  ;;  %v11445_v31 = vcombine.low %v4878_v41, %v4886_v15 }
 0xe53   :  { %6431 = vmatprep.subr.bf16.mxu1 %v11396_v53  ;;  %6472 = vmatprep.subr.bf16.mxu0 %v11398_v3  ;;  %v4957_v53 = vld [vmem:[#allocation55 + $0x720] sm:$0xff] }
 0xe54   :  { %v4965_v3 = vld [vmem:[#allocation55 + $0x760] sm:$0xff] }
 0xe55   :  { %6432 = vmatpush1.bf16.msra.mxu1 %v11395_v57  ;;  %v11524_v57 = vcombine.high %v4957_v53, %v4965_v3  ;;  %v11523_v63 = vcombine.low %v4957_v53, %v4965_v3  ;;  %v4848_v53 = vld [vmem:[#allocation55 + $0x3b8] sm:$0xff] }
 0xe56   :  { %6473 = vmatpush1.bf16.msra.mxu0 %v11397_v58  ;;  %6433 = vmatprep.subr.bf16.mxu1 %v11380_v59  ;;  %v11526_v58 = vcombine.high %v4958_v38, %v4966_v54  ;;  %v4941_v59 = vld [vmem:[#allocation55 + $0x6a0] sm:$0xff]  ;;  %v4856_v3 = vld [vmem:[#allocation55 + $0x3f8] sm:$0xff]  ;;  %v11429_v54 = vcombine.low %v4862_v47, %v4870_v48 }
 0xe57   :  { %6474 = vmatprep.subr.bf16.mxu0 %v11382_v60  ;;  %v4949_v60 = vld [vmem:[#allocation55 + $0x6e0] sm:$0xff] }
 0xe58   :  { %v11507_v10 = vcombine.low %v4941_v59, %v4949_v60 }
 0xe59   :  { %6434 = vmatpush1.bf16.msra.mxu1 %v11379_v1  ;;  %v11508_v1 = vcombine.high %v4941_v59, %v4949_v60  ;;  %v4832_v60 = vld [vmem:[#allocation55 + $0x338] sm:$0xff] }
 0xe5a   :  { %6475 = vmatpush1.bf16.msra.mxu0 %v11381_v4  ;;  %6435 = vmatprep.subr.bf16.mxu1 %v11364_v5  ;;  %v11510_v4 = vcombine.high %v4942_v61, %v4950_v62  ;;  %v4925_v5 = vld [vmem:[#allocation55 + $0x620] sm:$0xff]  ;;  %v4840_v61 = vld [vmem:[#allocation55 + $0x378] sm:$0xff]  ;;  %v11417_v62 = vcombine.low %v4848_v53, %v4856_v3 }
 0xe5b   :  { %6476 = vmatprep.subr.bf16.mxu0 %v11366_v6  ;;  %v4933_v6 = vld [vmem:[#allocation55 + $0x660] sm:$0xff] }
 0xe5c   :  { %v11491_v22 = vcombine.low %v4925_v5, %v4933_v6 }
 0xe5d   :  { %6436 = vmatpush1.bf16.msra.mxu1 %v11363_v12  ;;  %v11492_v12 = vcombine.high %v4925_v5, %v4933_v6  ;;  %v4816_v5 = vld [vmem:[#allocation55 + $0x2b8] sm:$0xff] }
 0xe5e   :  { %6477 = vmatpush1.bf16.msra.mxu0 %v11365_v16  ;;  %6437 = vmatprep.subr.bf16.mxu1 %v11348_v18  ;;  %v11494_v16 = vcombine.high %v4926_v7, %v4934_v8  ;;  %v4909_v18 = vld [vmem:[#allocation55 + $0x5a0] sm:$0xff]  ;;  %v4824_v6 = vld [vmem:[#allocation55 + $0x2f8] sm:$0xff]  ;;  %v11401_v8 = vcombine.low %v4832_v60, %v4840_v61 }
 0xe5f   :  { %6478 = vmatprep.subr.bf16.mxu0 %v11350_v19  ;;  %v4917_v19 = vld [vmem:[#allocation55 + $0x5e0] sm:$0xff] }
 0xe60   :  { %v11475_v35 = vcombine.low %v4909_v18, %v4917_v19 }
 0xe61   :  { %6438 = vmatpush1.bf16.msra.mxu1 %v11347_v25  ;;  %v11476_v25 = vcombine.high %v4909_v18, %v4917_v19  ;;  %v4800_v18 = vld [vmem:[#allocation55 + $0x238] sm:$0xff] }
 0xe62   :  { %6479 = vmatpush1.bf16.msra.mxu0 %v11349_v26  ;;  %6439 = vmatprep.subr.bf16.mxu1 %v11332_v17  ;;  %v11478_v26 = vcombine.high %v4910_v21, %v4918_v20  ;;  %v4893_v17 = vld [vmem:[#allocation55 + $0x520] sm:$0xff]  ;;  %v4808_v19 = vld [vmem:[#allocation55 + $0x278] sm:$0xff]  ;;  %v11385_v20 = vcombine.low %v4816_v5, %v4824_v6 }
 0xe63   :  { %6480 = vmatprep.subr.bf16.mxu0 %v11334_v24  ;;  %v4901_v24 = vld [vmem:[#allocation55 + $0x560] sm:$0xff] }
 0xe64   :  { %v11459_v42 = vcombine.low %v4893_v17, %v4901_v24 }
 0xe65   :  { %6440 = vmatpush1.bf16.msra.mxu1 %v11331_v37  ;;  %v11460_v37 = vcombine.high %v4893_v17, %v4901_v24  ;;  %v4784_v17 = vld [vmem:[#allocation55 + $0x1b8] sm:$0xff] }
 0xe66   :  { %6481 = vmatpush1.bf16.msra.mxu0 %v11333_v13  ;;  %6441 = vmatprep.subr.bf16.mxu1 %v11316_v30  ;;  %v11462_v13 = vcombine.high %v4894_v32, %v4902_v34  ;;  %v4877_v30 = vld [vmem:[#allocation55 + $0x4a0] sm:$0xff]  ;;  %v4792_v24 = vld [vmem:[#allocation55 + $0x1f8] sm:$0xff]  ;;  %v11369_v32 = vcombine.low %v4800_v18, %v4808_v19 }
 0xe67   :  { %6482 = vmatprep.subr.bf16.mxu0 %v11318_v14  ;;  %v4885_v14 = vld [vmem:[#allocation55 + $0x4e0] sm:$0xff] }
 0xe68   :  { %v11443_v49 = vcombine.low %v4877_v30, %v4885_v14 }
 0xe69   :  { %6442 = vmatpush1.bf16.msra.mxu1 %v11315_v40  ;;  %v11444_v40 = vcombine.high %v4877_v30, %v4885_v14  ;;  %v4776_v30 = vld [vmem:[#allocation55 + $0x178] sm:$0xff] }
 0xe6a   :  { %6483 = vmatpush1.bf16.msra.mxu0 %v11317_v39  ;;  %6443 = vmatprep.subr.bf16.mxu1 %v11300_v29  ;;  %v11446_v39 = vcombine.high %v4878_v41, %v4886_v15  ;;  %v4861_v29 = vld [vmem:[#allocation55 + $0x420] sm:$0xff]  ;;  %v11353_v41 = vcombine.low %v4784_v17, %v4792_v24 }
 0xe6b   :  { %6484 = vmatprep.subr.bf16.mxu0 %v11302_v45  ;;  %v4869_v45 = vld [vmem:[#allocation55 + $0x460] sm:$0xff] }
 0xe6c   :  { %v11427_v38 = vcombine.low %v4861_v29, %v4869_v45 }
 0xe6d   :  { %6444 = vmatpush1.bf16.msra.mxu1 %v11299_v33  ;;  %v11428_v33 = vcombine.high %v4861_v29, %v4869_v45  ;;  %v4760_v29 = vld [vmem:[#allocation55 + $0xf8] sm:$0xff] }
 0xe6e   :  { %6485 = vmatpush1.bf16.msra.mxu0 %v11301_v50  ;;  %6445 = vmatprep.subr.bf16.mxu1 %v11540_v51  ;;  %v11430_v50 = vcombine.high %v4862_v47, %v4870_v48  ;;  %v4847_v51 = vld [vmem:[#allocation55 + $0x3b0] sm:$0xff] }
 0xe6f   :  { %6486 = vmatprep.subr.bf16.mxu0 %v11542_v52  ;;  %v4855_v52 = vld [vmem:[#allocation55 + $0x3f0] sm:$0xff] }
 0xe70   :  { %v11415_v59 = vcombine.low %v4847_v51, %v4855_v52 }
 0xe71   :  { %6446 = vmatpush2.bf16.msra.mxu1 %v11539_v55  ;;  %v11416_v55 = vcombine.high %v4847_v51, %v4855_v52  ;;  %v4744_v51 = vld [vmem:[#allocation55 + $0x78] sm:$0xff] }
 0xe72   :  { %6487 = vmatpush2.bf16.msra.mxu0 %v11541_v56  ;;  %6447 = vmatprep.subr.bf16.mxu1 %v11524_v57  ;;  %v11418_v56 = vcombine.high %v4848_v53, %v4856_v3  ;;  %v4831_v57 = vld [vmem:[#allocation55 + $0x330] sm:$0xff] }
 0xe73   :  { %6488 = vmatprep.subr.bf16.mxu0 %v11526_v58  ;;  %v4839_v58 = vld [vmem:[#allocation55 + $0x370] sm:$0xff] }
 0xe74   :  { %v11399_v7 = vcombine.low %v4831_v57, %v4839_v58 }
 0xe75   :  { %6448 = vmatpush2.bf16.msra.mxu1 %v11523_v63  ;;  %v11400_v63 = vcombine.high %v4831_v57, %v4839_v58  ;;  %v4984_v57 = vld [vmem:[#allocation55 + $0x7f8] sm:$0xff] }
 0xe76   :  { %6489 = vmatpush2.bf16.msra.mxu0 %v11525_v0  ;;  %6449 = vmatprep.subr.bf16.mxu1 %v11508_v1  ;;  %v4815_v0 = vld [vmem:[#allocation55 + $0x2b0] sm:$0xff] }
 0xe77   :  { %6490 = vmatprep.subr.bf16.mxu0 %v11510_v4  ;;  %v4823_v1 = vld [vmem:[#allocation55 + $0x2f0] sm:$0xff]  ;;  %v11402_v4 = vcombine.high %v4832_v60, %v4840_v61 }
 0xe78   :  { %v11383_v21 = vcombine.low %v4815_v0, %v4823_v1 }
 0xe79   :  { %6450 = vmatpush2.bf16.msra.mxu1 %v11507_v10  ;;  %v11384_v10 = vcombine.high %v4815_v0, %v4823_v1  ;;  %v4960_v0 = vld [vmem:[#allocation55 + $0x738] sm:$0xff] }
 0xe7a   :  { %6491 = vmatpush2.bf16.msra.mxu0 %v11509_v11  ;;  %6451 = vmatprep.subr.bf16.mxu1 %v11492_v12  ;;  %v11386_v11 = vcombine.high %v4816_v5, %v4824_v6  ;;  %v4799_v12 = vld [vmem:[#allocation55 + $0x230] sm:$0xff]  ;;  %v4968_v1 = vld [vmem:[#allocation55 + $0x778] sm:$0xff] }
 0xe7b   :  { %6492 = vmatprep.subr.bf16.mxu0 %v11494_v16  ;;  %v4807_v16 = vld [vmem:[#allocation55 + $0x270] sm:$0xff] }
 0xe7d   :  { %6452 = vmatpush2.bf16.msra.mxu1 %v11491_v22  ;;  %v11368_v22 = vcombine.high %v4799_v12, %v4807_v16 }
 0xe7e   :  { %6493 = vmatpush2.bf16.msra.mxu0 %v11493_v23  ;;  %6453 = vmatprep.subr.bf16.mxu1 %v11476_v25  ;;  %v11370_v23 = vcombine.high %v4800_v18, %v4808_v19  ;;  %v4783_v25 = vld [vmem:[#allocation55 + $0x1b0] sm:$0xff]  ;;  %v11529_v18 = vcombine.low %v4960_v0, %v4968_v1 }
 0xe7f   :  { %6494 = vmatprep.subr.bf16.mxu0 %v11478_v26  ;;  %v4791_v26 = vld [vmem:[#allocation55 + $0x1f0] sm:$0xff] }
 0xe80   :  { %v11352_v34 = vcombine.high %v4783_v25, %v4791_v26  ;;  %v11351_v14 = vcombine.low %v4783_v25, %v4791_v26  ;;  %v4936_v25 = vld [vmem:[#allocation55 + $0x678] sm:$0xff] }
 0xe81   :  { %6454 = vmatpush2.bf16.msra.mxu1 %v11475_v35  ;;  %v11354_v35 = vcombine.high %v4784_v17, %v4792_v24 }
 0xe82   :  { %6495 = vmatpush2.bf16.msra.mxu0 %v11477_v36  ;;  %6455 = vmatprep.subr.bf16.mxu1 %v11460_v37  ;;  %v4767_v36 = vld [vmem:[#allocation55 + $0x130] sm:$0xff] }
 0xe83   :  { %6496 = vmatprep.subr.bf16.mxu0 %v11462_v13  ;;  %v4775_v37 = vld [vmem:[#allocation55 + $0x170] sm:$0xff]  ;;  %v4768_v13 = vld [vmem:[#allocation55 + $0x138] sm:$0xff] }
 0xe84   :  { %v11336_v15 = vcombine.high %v4767_v36, %v4775_v37  ;;  %v11335_v45 = vcombine.low %v4767_v36, %v4775_v37  ;;  %v11337_v47 = vcombine.low %v4768_v13, %v4776_v30  ;;  %v4920_v36 = vld [vmem:[#allocation55 + $0x5f8] sm:$0xff] }
 0xe85   :  { %6456 = vmatpush2.bf16.msra.mxu1 %v11459_v42  ;;  %v11338_v42 = vcombine.high %v4768_v13, %v4776_v30 }
 0xe86   :  { %6497 = vmatpush2.bf16.msra.mxu0 %v11461_v43  ;;  %6457 = vmatprep.subr.bf16.mxu1 %v11444_v40  ;;  %v4751_v43 = vld [vmem:[#allocation55 + $0xb0] sm:$0xff] }
 0xe87   :  { %6498 = vmatprep.subr.bf16.mxu0 %v11446_v39  ;;  %v4759_v40 = vld [vmem:[#allocation55 + $0xf0] sm:$0xff]  ;;  %v4752_v39 = vld [vmem:[#allocation55 + $0xb8] sm:$0xff] }
 0xe88   :  { %v11320_v48 = vcombine.high %v4751_v43, %v4759_v40  ;;  %v11319_v52 = vcombine.low %v4751_v43, %v4759_v40  ;;  %v11321_v53 = vcombine.low %v4752_v39, %v4760_v29  ;;  %v4904_v43 = vld [vmem:[#allocation55 + $0x578] sm:$0xff] }
 0xe89   :  { %6458 = vmatpush2.bf16.msra.mxu1 %v11443_v49  ;;  %v11322_v49 = vcombine.high %v4752_v39, %v4760_v29 }
 0xe8a   :  { %6499 = vmatpush2.bf16.msra.mxu0 %v11445_v31  ;;  %6459 = vmatprep.subr.bf16.mxu1 %v11428_v33  ;;  %v4735_v31 = vld [vmem:[#allocation55 + $0x30] sm:$0xff] }
 0xe8b   :  { %6500 = vmatprep.subr.bf16.mxu0 %v11430_v50  ;;  %v4743_v33 = vld [vmem:[#allocation55 + $0x70] sm:$0xff]  ;;  %v4736_v50 = vld [vmem:[#allocation55 + $0x38] sm:$0xff] }
 0xe8c   :  { %v11304_v3 = vcombine.high %v4735_v31, %v4743_v33  ;;  %v11303_v58 = vcombine.low %v4735_v31, %v4743_v33  ;;  %v4888_v31 = vld [vmem:[#allocation55 + $0x4f8] sm:$0xff] }
 0xe8d   :  { %6460 = vmatpush2.bf16.msra.mxu1 %v11427_v38  ;;  %v11306_v38 = vcombine.high %v4736_v50, %v4744_v51 }
 0xe8e   :  { %6501 = vmatpush2.bf16.msra.mxu0 %v11429_v54  ;;  %6511 = vmatprep.subr.bf16.mxu1 %v11416_v55  ;;  %v4975_v54 = vld [vmem:[#allocation55 + $0x7b0] sm:$0xff] }
 0xe8f   :  { %6552 = vmatprep.subr.bf16.mxu0 %v11418_v56  ;;  %v4983_v55 = vld [vmem:[#allocation55 + $0x7f0] sm:$0xff]  ;;  %v4976_v56 = vld [vmem:[#allocation55 + $0x7b8] sm:$0xff] }
 0xe90   :  { %6462 = vmatmul.mubr.bf16.vlgmr.msra.gmra.mxu1 %v14850_v44  ;;  %v11544_v60 = vcombine.high %v4975_v54, %v4983_v55  ;;  %v11546_v61 = vcombine.high %v4976_v56, %v4984_v57  ;;  %v11545_v5 = vcombine.low %v4976_v56, %v4984_v57 }
 0xe91   :  { %6503 = vmatmul.mubr.bf16.vlgmr.msra.gmra.mxu0 %v14850_v44  ;;  %6512 = vmatpush1.bf16.msra.mxu1 %v11415_v59  ;;  %v11305_v59 = vcombine.low %v4736_v50, %v4744_v51 }
 0xe92   :  { %6543 = vmatprep.mubr.bf16.mxu1 %v14848_v28  ;;  %6553 = vmatpush1.bf16.msra.mxu0 %v11417_v62  ;;  %v4959_v62 = vld [vmem:[#allocation55 + $0x730] sm:$0xff] }
 0xe93   :  { %6584 = vmatprep.mubr.bf16.mxu0 %v14848_v28  ;;  %6513 = vmatprep.subr.bf16.mxu1 %v11400_v63  ;;  %v11367_v28 = vcombine.low %v4799_v12, %v4807_v16  ;;  %v4967_v63 = vld [vmem:[#allocation55 + $0x770] sm:$0xff]  ;;  %v4952_v12 = vld [vmem:[#allocation55 + $0x6f8] sm:$0xff] }
 0xe94   :  { %6554 = vmatprep.subr.bf16.mxu0 %v11402_v4  ;;  %v11543_v4 = vcombine.low %v4975_v54, %v4983_v55  ;;  %v11528_v6 = vcombine.high %v4959_v62, %v4967_v63  ;;  %v11527_v16 = vcombine.low %v4959_v62, %v4967_v63  ;;  %v4872_v54 = vld [vmem:[#allocation55 + $0x478] sm:$0xff] }
 0xe95   :  { %6514 = vmatpush1.bf16.msra.mxu1 %v11399_v7  ;;  %v11530_v7 = vcombine.high %v4960_v0, %v4968_v1 }
 0xe96   :  { %6555 = vmatpush1.bf16.msra.mxu0 %v11401_v8  ;;  %6515 = vmatprep.subr.bf16.mxu1 %v11384_v10  ;;  %v4943_v8 = vld [vmem:[#allocation55 + $0x6b0] sm:$0xff] }
 0xe97   :  { %6556 = vmatprep.subr.bf16.mxu0 %v11386_v11  ;;  %v4951_v10 = vld [vmem:[#allocation55 + $0x6f0] sm:$0xff]  ;;  %v4944_v11 = vld [vmem:[#allocation55 + $0x6b8] sm:$0xff] }
 0xe98   :  { %v11512_v19 = vcombine.high %v4943_v8, %v4951_v10  ;;  %v11511_v26 = vcombine.low %v4943_v8, %v4951_v10  ;;  %v11513_v17 = vcombine.low %v4944_v11, %v4952_v12 }
 0xe99   :  { %6516 = vmatpush1.bf16.msra.mxu1 %v11383_v21  ;;  %v11514_v21 = vcombine.high %v4944_v11, %v4952_v12  ;;  %v14869_v12 = vld [vmem:[#allocation49] sm:$0xf] }
 0xe9a   :  { %6557 = vmatpush1.bf16.msra.mxu0 %v11385_v20  ;;  %6517 = vmatprep.subr.bf16.mxu1 %v11368_v22  ;;  %v4927_v20 = vld [vmem:[#allocation55 + $0x630] sm:$0xff] }
 0xe9b   :  { %6558 = vmatprep.subr.bf16.mxu0 %v11370_v23  ;;  %v4935_v22 = vld [vmem:[#allocation55 + $0x670] sm:$0xff]  ;;  %v4928_v23 = vld [vmem:[#allocation55 + $0x638] sm:$0xff] }
 0xe9c   :  { %v11496_v24 = vcombine.high %v4927_v20, %v4935_v22  ;;  %v11495_v37 = vcombine.low %v4927_v20, %v4935_v22  ;;  %v11497_v13 = vcombine.low %v4928_v23, %v4936_v25  ;;  %v12746_v20 = vld [vmem:[#allocation58 + $0x8a0] ss:$48 sps:$4 sm:$0xff]   ;;  %v12748_v22 = vld [vmem:[#allocation58 + $0x8a4] ss:$48 sps:$4 sm:$0xff]  }
 0xe9d   :  { %6518 = vmatpush1.bf16.msra.mxu1 %v11367_v28  ;;  %v11498_v28 = vcombine.high %v4928_v23, %v4936_v25  ;;  %v12752_v23 = vld [vmem:[#allocation58 + $0x840] ss:$48 sps:$4 sm:$0xff]   ;;  %v12754_v25 = vld [vmem:[#allocation58 + $0x844] ss:$48 sps:$4 sm:$0xff]  }
 0xe9e   :  { %6559 = vmatpush1.bf16.msra.mxu0 %v11369_v32  ;;  %6519 = vmatprep.subr.bf16.mxu1 %v11352_v34  ;;  %v4911_v32 = vld [vmem:[#allocation55 + $0x5b0] sm:$0xff] }
 0xe9f   :  { %6560 = vmatprep.subr.bf16.mxu0 %v11354_v35  ;;  %v4919_v34 = vld [vmem:[#allocation55 + $0x5f0] sm:$0xff]  ;;  %v4912_v35 = vld [vmem:[#allocation55 + $0x5b8] sm:$0xff] }
 0xea0   :  { %v11480_v30 = vcombine.high %v4911_v32, %v4919_v34  ;;  %v11479_v40 = vcombine.low %v4911_v32, %v4919_v34  ;;  %v11481_v39 = vcombine.low %v4912_v35, %v4920_v36  ;;  %v12770_v32 = vld [vmem:[#allocation58 + $0x720] ss:$48 sps:$4 sm:$0xff]   ;;  %v12772_v34 = vld [vmem:[#allocation58 + $0x724] ss:$48 sps:$4 sm:$0xff]  }
 0xea1   :  { %6520 = vmatpush1.bf16.msra.mxu1 %v11351_v14  ;;  %v11482_v14 = vcombine.high %v4912_v35, %v4920_v36  ;;  %v12776_v35 = vld [vmem:[#allocation58 + $0x6c0] ss:$48 sps:$4 sm:$0xff]   ;;  %v12778_v36 = vld [vmem:[#allocation58 + $0x6c4] ss:$48 sps:$4 sm:$0xff]  }
 0xea2   :  { %6561 = vmatpush1.bf16.msra.mxu0 %v11353_v41  ;;  %6521 = vmatprep.subr.bf16.mxu1 %v11336_v15  ;;  %v4895_v41 = vld [vmem:[#allocation55 + $0x530] sm:$0xff] }
 0xea3   :  { %6562 = vmatprep.subr.bf16.mxu0 %v11338_v42  ;;  %v4903_v15 = vld [vmem:[#allocation55 + $0x570] sm:$0xff]  ;;  %v4896_v42 = vld [vmem:[#allocation55 + $0x538] sm:$0xff] }
 0xea4   :  { %v11464_v29 = vcombine.high %v4895_v41, %v4903_v15  ;;  %v11463_v33 = vcombine.low %v4895_v41, %v4903_v15  ;;  %v11465_v50 = vcombine.low %v4896_v42, %v4904_v43  ;;  %v4728_v15 = vld [vmem:[#allocation50] sm:$0xf] }
 0xea5   :  { %6522 = vmatpush1.bf16.msra.mxu1 %v11335_v45  ;;  %v11466_v45 = vcombine.high %v4896_v42, %v4904_v43 }
 0xea6   :  { %6563 = vmatpush1.bf16.msra.mxu0 %v11337_v47  ;;  %6523 = vmatprep.subr.bf16.mxu1 %v11320_v48  ;;  %v4879_v47 = vld [vmem:[#allocation55 + $0x4b0] sm:$0xff] }
 0xea7   :  { %6564 = vmatprep.subr.bf16.mxu0 %v11322_v49  ;;  %v4887_v48 = vld [vmem:[#allocation55 + $0x4f0] sm:$0xff]  ;;  %v4880_v49 = vld [vmem:[#allocation55 + $0x4b8] sm:$0xff] }
 0xea8   :  { %v11448_v51 = vcombine.high %v4879_v47, %v4887_v48  ;;  %v11447_v55 = vcombine.low %v4879_v47, %v4887_v48  ;;  %v11449_v56 = vcombine.low %v4880_v49, %v4888_v31  ;;  %v12794_v48 = vld [vmem:[#allocation58 + $0xba0] ss:$48 sps:$4 sm:$0xff]  }
 0xea9   :  { %6524 = vmatpush1.bf16.msra.mxu1 %v11319_v52  ;;  %v11450_v52 = vcombine.high %v4880_v49, %v4888_v31  ;;  %v12796_v49 = vld [vmem:[#allocation58 + $0xba4] ss:$48 sps:$4 sm:$0xff]   ;;  %v12800_v31 = vld [vmem:[#allocation58 + $0xb40] ss:$48 sps:$4 sm:$0xff]  }
 0xeaa   :  { %6565 = vmatpush1.bf16.msra.mxu0 %v11321_v53  ;;  %6525 = vmatprep.subr.bf16.mxu1 %v11304_v3  ;;  %v4863_v53 = vld [vmem:[#allocation55 + $0x430] sm:$0xff] }
 0xeab   :  { %6566 = vmatprep.subr.bf16.mxu0 %v11306_v38  ;;  %v4871_v3 = vld [vmem:[#allocation55 + $0x470] sm:$0xff]  ;;  %v4864_v38 = vld [vmem:[#allocation55 + $0x438] sm:$0xff] }
 0xeac   :  { %v11432_v57 = vcombine.high %v4863_v53, %v4871_v3 }
 0xead   :  { %6526 = vmatpush1.bf16.msra.mxu1 %v11303_v58  ;;  %v11434_v58 = vcombine.high %v4864_v38, %v4872_v54 }
 0xeae   :  { %6567 = vmatpush1.bf16.msra.mxu0 %v11305_v59  ;;  %6527 = vmatprep.subr.bf16.mxu1 %v11544_v60  ;;  %v11431_v59 = vcombine.low %v4863_v53, %v4871_v3  ;;  %v11433_v60 = vcombine.low %v4864_v38, %v4872_v54  ;;  %v12812_v53 = vld [vmem:[#allocation58 + $0xa80] ss:$48 sps:$4 sm:$0xff]   ;;  %v12820_v3 = vld [vmem:[#allocation58 + $0xa24] ss:$48 sps:$4 sm:$0xff]  }
 0xeaf   :  { %6568 = vmatprep.subr.bf16.mxu0 %v11546_v61  ;;  %v12818_v38 = vld [vmem:[#allocation58 + $0xa20] ss:$48 sps:$4 sm:$0xff]  }
 0xeb1   :  { %6528 = vmatpush2.bf16.msra.mxu1 %v11543_v4 }
 0xeb2   :  { %6569 = vmatpush2.bf16.msra.mxu0 %v11545_v5  ;;  %6529 = vmatprep.subr.bf16.mxu1 %v11528_v6 }
 0xeb3   :  { %6570 = vmatprep.subr.bf16.mxu0 %v11530_v7 }
 0xeb5   :  { %6530 = vmatpush2.bf16.msra.mxu1 %v11527_v16 }
 0xeb6   :  { %6571 = vmatpush2.bf16.msra.mxu0 %v11529_v18  ;;  %6531 = vmatprep.subr.bf16.mxu1 %v11512_v19 }
 0xeb7   :  { %6572 = vmatprep.subr.bf16.mxu0 %v11514_v21  ;;  %v4726_v21 = vld [vmem:[#allocation47] sm:$0xf] }
 0xeb9   :  { %6532 = vmatpush2.bf16.msra.mxu1 %v11511_v26  ;;  %v12758_v26 = vld [vmem:[#allocation58 + $0x7e0] ss:$48 sps:$4 sm:$0xff]  }
 0xeba   :  { %6573 = vmatpush2.bf16.msra.mxu0 %v11513_v17  ;;  %6533 = vmatprep.subr.bf16.mxu1 %v11496_v24  ;;  %v12760_v17 = vld [vmem:[#allocation58 + $0x7e4] ss:$48 sps:$4 sm:$0xff]   ;;  %v12764_v24 = vld [vmem:[#allocation58 + $0x780] ss:$48 sps:$4 sm:$0xff]  }
 0xebb   :  { %6574 = vmatprep.subr.bf16.mxu0 %v11498_v28  ;;  %v12766_v28 = vld [vmem:[#allocation58 + $0x784] ss:$48 sps:$4 sm:$0xff]  }
 0xebd   :  { %6534 = vmatpush2.bf16.msra.mxu1 %v11495_v37  ;;  %v12782_v37 = vld [vmem:[#allocation58 + $0x660] ss:$48 sps:$4 sm:$0xff]  }
 0xebe   :  { %6575 = vmatpush2.bf16.msra.mxu0 %v11497_v13  ;;  %6535 = vmatprep.subr.bf16.mxu1 %v11480_v30  ;;  %v12784_v13 = vld [vmem:[#allocation58 + $0x664] ss:$48 sps:$4 sm:$0xff]  }
 0xebf   :  { %6576 = vmatprep.subr.bf16.mxu0 %v11482_v14 }
 0xec1   :  { %6536 = vmatpush2.bf16.msra.mxu1 %v11479_v40 }
 0xec2   :  { %6577 = vmatpush2.bf16.msra.mxu0 %v11481_v39  ;;  %6537 = vmatprep.subr.bf16.mxu1 %v11464_v29  ;;  %v12788_v39 = vld [vmem:[#allocation58 + $0x600] ss:$48 sps:$4 sm:$0xff]  }
 0xec3   :  { %6578 = vmatprep.subr.bf16.mxu0 %v11466_v45  ;;  %v12790_v45 = vld [vmem:[#allocation58 + $0x604] ss:$48 sps:$4 sm:$0xff]  }
 0xec5   :  { %6538 = vmatpush2.bf16.msra.mxu1 %v11463_v33  ;;  %v12802_v33 = vld [vmem:[#allocation58 + $0xb44] ss:$48 sps:$4 sm:$0xff]  }
 0xec6   :  { %6579 = vmatpush2.bf16.msra.mxu0 %v11465_v50  ;;  %6539 = vmatprep.subr.bf16.mxu1 %v11448_v51  ;;  %v12806_v50 = vld [vmem:[#allocation58 + $0xae0] ss:$48 sps:$4 sm:$0xff]   ;;  %v12808_v51 = vld [vmem:[#allocation58 + $0xae4] ss:$48 sps:$4 sm:$0xff]  }
 0xec7   :  { %6580 = vmatprep.subr.bf16.mxu0 %v11450_v52  ;;  %v12814_v52 = vld [vmem:[#allocation58 + $0xa84] ss:$48 sps:$4 sm:$0xff]  }
 0xec9   :  { %6540 = vmatpush2.bf16.msra.mxu1 %v11447_v55 }
 0xeca   :  { %6581 = vmatpush2.bf16.msra.mxu0 %v11449_v56  ;;  %6541 = vmatprep.subr.bf16.mxu1 %v11432_v57 }
 0xecb   :  { %6582 = vmatprep.subr.bf16.mxu0 %v11434_v58  ;;  %v12742_v58 = vld [vmem:[#allocation58 + $0x2a4] ss:$48 sps:$4 sm:$0xff]  }
 0xecd   :  { %6542 = vmatpush2.bf16.msra.mxu1 %v11431_v59 }
 0xece   :  { %6583 = vmatpush2.bf16.msra.mxu0 %v11433_v60 }
 0xecf   :  { %9575 = vmatprep.subr.bf16.mxu0 %v12748_v22  ;;  %v12767_v22 = vld [vmem:[#allocation58 + $0xc0] ss:$48 sps:$4 sm:$0xff]  }
 0xed0   :  { %6544 = vmatmul.mubr.bf16.vlgmr.msra.gmra.mxu1 %v14850_v44  ;;  %v6299_v61 = vpop.f32.mrf.mxu1  ;;  %v6340_v62 = vpop.f32.mrf.mxu0 }
 0xed1   :  { %6585 = vmatmul.mubr.bf16.vlgmr.msra.gmra.mxu0 %v14850_v44  ;;  %6660 = vmatprep.mubr.f32.mxu1 %v14357_v2 }
 0xed2   :  { %v6301_v63 = vpop.f32.mrf.mxu1  ;;  %v6342_v0 = vpop.f32.mrf.mxu0  ;;  %9576 = vmatpush1.bf16.msra.mxu0 %v12746_v20  ;;  %v12769_v20 = vld [vmem:[#allocation58 + $0xc4] ss:$48 sps:$4 sm:$0xff]  }
 0xed3   :  { %9577 = vmatprep.subr.bf16.mxu0 %v12754_v25  ;;  %v12773_v25 = vld [vmem:[#allocation58 + $0x60] ss:$48 sps:$4 sm:$0xff]  }
 0xed4   :  { %v6303_v1 = vpop.f32.mrf.mxu1  ;;  %v6344_v4 = vpop.f32.mrf.mxu0 }
 0xed5   :  { %v12826_v1 = vld [vmem:[#allocation58 + $0x9c4] ss:$48 sps:$4 sm:$0xff]   ;;  %v12824_v4 = vld [vmem:[#allocation58 + $0x9c0] ss:$48 sps:$4 sm:$0xff]  }
 0xed6   :  { %v6304_v5 = vpop.f32.mrf.mxu1  ;;  %v6345_v6 = vpop.f32.mrf.mxu0  ;;  %9578 = vmatpush1.bf16.msra.mxu0 %v12752_v23  ;;  %v12775_v23 = vld [vmem:[#allocation58 + $0x64] ss:$48 sps:$4 sm:$0xff]  }
 0xed7   :  { %9579 = vmatprep.subr.bf16.mxu0 %v12760_v17  ;;  %v12743_v5 = vld [vmem:[#allocation58 + $0x240] ss:$48 sps:$4 sm:$0xff]   ;;  %v12751_v6 = vld [vmem:[#allocation58 + $0x1e4] ss:$48 sps:$4 sm:$0xff]  }
 0xed8   :  { %v12779_v17 = vld [vmem:[#allocation58] ss:$48 sps:$4 sm:$0xff]  }
 0xeda   :  { %9580 = vmatpush1.bf16.msra.mxu0 %v12758_v26  ;;  %v12781_v26 = vld [vmem:[#allocation58 + $0x4] ss:$48 sps:$4 sm:$0xff]  }
 0xedb   :  { %9581 = vmatprep.subr.bf16.mxu0 %v12766_v28  ;;  %v12785_v28 = vld [vmem:[#allocation58 + $0x5a0] ss:$48 sps:$4 sm:$0xff]  }
 0xede   :  { %9582 = vmatpush1.bf16.msra.mxu0 %v12764_v24  ;;  %v12787_v24 = vld [vmem:[#allocation58 + $0x5a4] ss:$48 sps:$4 sm:$0xff]  }
 0xedf   :  { %9583 = vmatprep.subr.bf16.mxu0 %v12772_v34  ;;  %v12791_v34 = vld [vmem:[#allocation58 + $0x540] ss:$48 sps:$4 sm:$0xff]  }
 0xee2   :  { %9584 = vmatpush1.bf16.msra.mxu0 %v12770_v32  ;;  %v12793_v32 = vld [vmem:[#allocation58 + $0x544] ss:$48 sps:$4 sm:$0xff]  }
 0xee3   :  { %9585 = vmatprep.subr.bf16.mxu0 %v12778_v36  ;;  %v12797_v36 = vld [vmem:[#allocation58 + $0x4e0] ss:$48 sps:$4 sm:$0xff]  }
 0xee6   :  { %9586 = vmatpush1.bf16.msra.mxu0 %v12776_v35  ;;  %v12799_v35 = vld [vmem:[#allocation58 + $0x4e4] ss:$48 sps:$4 sm:$0xff]  }
 0xee7   :  { %9587 = vmatprep.subr.bf16.mxu0 %v12784_v13  ;;  %v12803_v13 = vld [vmem:[#allocation58 + $0x480] ss:$48 sps:$4 sm:$0xff]  }
 0xeea   :  { %9588 = vmatpush1.bf16.msra.mxu0 %v12782_v37  ;;  %v12805_v37 = vld [vmem:[#allocation58 + $0x484] ss:$48 sps:$4 sm:$0xff]  }
 0xeeb   :  { %9589 = vmatprep.subr.bf16.mxu0 %v12790_v45 }
 0xeee   :  { %9590 = vmatpush1.bf16.msra.mxu0 %v12788_v39  ;;  %v12827_v39 = vld [vmem:[#allocation58 + $0x300] ss:$48 sps:$4 sm:$0xff]  }
 0xeef   :  { %9591 = vmatprep.subr.bf16.mxu0 %v12796_v49 }
 0xef2   :  { %9592 = vmatpush2.bf16.msra.mxu0 %v12794_v48 }
 0xef3   :  { %9593 = vmatprep.subr.bf16.mxu0 %v12802_v33 }
 0xef6   :  { %9594 = vmatpush2.bf16.msra.mxu0 %v12800_v31 }
 0xef7   :  { %9595 = vmatprep.subr.bf16.mxu0 %v12808_v51  ;;  %v7032_v51 = vld [vmem:[#allocation56] sm:$0xf] }
 0xefa   :  { %9596 = vmatpush2.bf16.msra.mxu0 %v12806_v50 }
 0xefb   :  { %9597 = vmatprep.subr.bf16.mxu0 %v12814_v52 }
 0xefe   :  { %9598 = vmatpush2.bf16.msra.mxu0 %v12812_v53 }
 0xeff   :  { %9599 = vmatprep.subr.bf16.mxu0 %v12820_v3  ;;  %v7037_v3 = vrot.slane %v7032_v51, %v14816_v46 }
 0xf02   :  { %9600 = vmatpush2.bf16.msra.mxu0 %v12818_v38  ;;  %v14892_v38 = vsub.s32 2, %v14813_v9 }
 0xf03   :  { %9601 = vmatprep.subr.bf16.mxu0 %v12826_v1 }
 0xf06   :  { %9602 = vmatpush2.bf16.msra.mxu0 %v12824_v4 }
 0xf10   :  { %v6381_v7 = vpop.f32.mrf.mxu1  ;;  %v6422_v8 = vpop.f32.mrf.mxu0 }
 0xf12   :  { %v6383_v10 = vpop.f32.mrf.mxu1  ;;  %v6424_v11 = vpop.f32.mrf.mxu0 }
 0xf13   :  { %6626 = vmatprep.subr.mxu1 %v6383_v10  ;;  %v12749_v10 = vld [vmem:[#allocation58 + $0x1e0] ss:$48 sps:$4 sm:$0xff]  }
 0xf14   :  { %v6385_v16 = vpop.f32.mrf.mxu1  ;;  %v6426_v18 = vpop.f32.mrf.mxu0  ;;  %6627 = vmatpush1.msra.mxu1 %v6381_v7  ;;  %v12832_v7 = vld [vmem:[#allocation58 + $0x964] ss:$48 sps:$4 sm:$0xff]  }
 0xf15   :  { %11547 = vmatmul.mubr.msk.f32.vlgmr.msra.gmra.mxu1 %vm4553_vm6, %v14869_v12  ;;  %6697 = vmatprep.subr.mxu1 %v6424_v11  ;;  %v12757_v11 = vld [vmem:[#allocation58 + $0x184] ss:$48 sps:$4 sm:$0xff]   ;;  %v12833_v18 = vld [vmem:[#allocation58 + $0x900] ss:$48 sps:$4 sm:$0xff]  }
 0xf16   :  { %v6386_v44 = vpop.f32.mrf.mxu1  ;;  %v6427_v19 = vpop.f32.mrf.mxu0  ;;  %6698 = vmatpush1.msra.mxu1 %v6422_v8  ;;  %6731 = vmatprep.mubr.f32.mxu1 %v14357_v2  ;;  %v12830_v8 = vld [vmem:[#allocation58 + $0x960] ss:$48 sps:$4 sm:$0xff]   ;;  %v12835_v16 = vld [vmem:[#allocation58 + $0x904] ss:$48 sps:$4 sm:$0xff]  }
 0xf17   :  { %6771 = vmatprep.subr.mxu1 %v6301_v63  ;;  %9603 = vmatprep.subr.bf16.mxu0 %v12832_v7  ;;  %v12755_v44 = vld [vmem:[#allocation58 + $0x180] ss:$48 sps:$4 sm:$0xff]   ;;  %v12844_v19 = vld [vmem:[#allocation58 + $0x8ac] ss:$48 sps:$4 sm:$0xff]  }
 0xf18   :  { %9604 = vmatpush2.bf16.msra.mxu0 %v12830_v8 }
 0xf19   :  { %11548 = vmatmul.mubr.msk.f32.vlgmr.msra.gmra.mxu1 %vm4553_vm6, %v14869_v12  ;;  %9605 = vmatprep.subr.bf16.mxu0 %v12835_v16 }
 0xf1a   :  { %6772 = vmatpush1.msra.mxu1 %v6299_v61  ;;  %6805 = vmatprep.mubr.f32.mxu1 %v14357_v2 }
 0xf1b   :  { %6842 = vmatprep.subr.mxu1 %v6342_v0  ;;  %v12745_v0 = vld [vmem:[#allocation58 + $0x244] ss:$48 sps:$4 sm:$0xff]  }
 0xf1c   :  { %9606 = vmatpush2.bf16.msra.mxu0 %v12833_v18 }
 0xf1d   :  { %11549 = vmatmul.mubr.msk.f32.vlgmr.msra.gmra.mxu1 %vm4553_vm6, %v4726_v21  ;;  %9657 = vmatprep.subr.bf16.mxu0 %v12844_v19 }
 0xf1e   :  { %6843 = vmatpush1.msra.mxu1 %v6340_v62  ;;  %6876 = vmatprep.mubr.f32.mxu1 %v14357_v2  ;;  %v12740_v62 = vld [vmem:[#allocation58 + $0x2a0] ss:$48 sps:$4 sm:$0xff]  }
 0xf21   :  { %11550 = vmatmul.mubr.msk.f32.vlgmr.msra.gmra.mxu1 %vm4553_vm6, %v4726_v21  ;;  %v12761_v21 = vld [vmem:[#allocation58 + $0x120] ss:$48 sps:$4 sm:$0xff]  }
 0xf22   :  { %6950 = vmatprep.mubr.f32.mxu1 %v14357_v2 }
 0xf50   :  { %v6463_v30 = vpop.f32.mrf.mxu1 }
 0xf51   :  { %v6504_v14 = vpop.f32.mrf.mxu0 }
 0xf52   :  { %v6465_v41 = vpop.f32.mrf.mxu1 }
 0xf53   :  { %v6506_v42 = vpop.f32.mrf.mxu0  ;;  %6916 = vmatprep.subr.mxu1 %v6465_v41  ;;  %v12817_v41 = vld [vmem:[#allocation58 + $0x3c4] ss:$48 sps:$4 sm:$0xff]  }
 0xf54   :  { %v6467_v43 = vpop.f32.mrf.mxu1  ;;  %6917 = vmatpush1.msra.mxu1 %v6463_v30  ;;  %v12811_v30 = vld [vmem:[#allocation58 + $0x424] ss:$48 sps:$4 sm:$0xff]  }
 0xf55   :  { %v6508_v40 = vpop.f32.mrf.mxu0  ;;  %11551 = vmatmul.mubr.msk.f32.vlgmr.msra.gmra.mxu1 %vm4553_vm6, %v4728_v15  ;;  %6987 = vmatprep.subr.mxu1 %v6506_v42  ;;  %v12823_v42 = vld [vmem:[#allocation58 + $0x364] ss:$48 sps:$4 sm:$0xff]   ;;  %v12821_v43 = vld [vmem:[#allocation58 + $0x360] ss:$48 sps:$4 sm:$0xff]  }
 0xf56   :  { %v6468_v29 = vpop.f32.mrf.mxu1  ;;  %6988 = vmatpush1.msra.mxu1 %v6504_v14  ;;  %7021 = vmatprep.mubr.f32.mxu1 %v14357_v2  ;;  %v12809_v14 = vld [vmem:[#allocation58 + $0x420] ss:$48 sps:$4 sm:$0xff]   ;;  %v12829_v40 = vld [vmem:[#allocation58 + $0x304] ss:$48 sps:$4 sm:$0xff]  }
 0xf57   :  { %v6509_v47 = vpop.f32.mrf.mxu0  ;;  %v12838_v29 = vld [vmem:[#allocation58 + $0x2ac] ss:$48 sps:$4 sm:$0xff]  }
 0xf59   :  { %11552 = vmatmul.mubr.msk.f32.vlgmr.msra.gmra.mxu1 %vm4553_vm6, %v4728_v15  ;;  %v12815_v15 = vld [vmem:[#allocation58 + $0x3c0] ss:$48 sps:$4 sm:$0xff]  }
 0xf5a   :  { %7148 = vmatprep.mubr.f32.mxu1 %v14357_v2 }
 0xf90   :  { %v6545_v54 = vpop.f32.mrf.mxu1 }
 0xf91   :  { %v6586_v55 = vpop.f32.mrf.mxu0 }
 0xf92   :  { %v6547_v56 = vpop.f32.mrf.mxu1 }
 0xf93   :  { %v6588_v57 = vpop.f32.mrf.mxu0  ;;  %7114 = vmatprep.subr.mxu1 %v6547_v56 }
 0xf94   :  { %v6549_v59 = vpop.f32.mrf.mxu1  ;;  %7115 = vmatpush1.msra.mxu1 %v6545_v54 }
 0xf95   :  { %v6590_v60 = vpop.f32.mrf.mxu0  ;;  %7185 = vmatprep.subr.mxu1 %v6588_v57  ;;  %11553 = vmatmul.mubr.msk.f32.vlgmr.msra.gmra.mxu1 %vm4553_vm6, %v14869_v12  ;;  %v7041_v57 = vrot.slane %v7032_v51, %v14819_v27 }
 0xf96   :  { %v6550_v61 = vpop.f32.mrf.mxu1  ;;  %7186 = vmatpush1.msra.mxu1 %v6586_v55  ;;  %7219 = vmatprep.mubr.f32.mxu1 %v14357_v2 }
 0xf97   :  { %v6591_v63 = vpop.f32.mrf.mxu0  ;;  %9534 = vmatprep.subr.bf16.mxu1 %v12742_v58  ;;  %v14896_v58 = vsub.s32 3, %v14813_v9 }
 0xf98   :  { %v7045_v63 = vrot.slane %v7032_v51, %v14892_v38 }
 0xf99   :  { %11554 = vmatmul.mubr.msk.f32.vlgmr.msra.gmra.mxu1 %vm4553_vm6, %v14869_v12  ;;  %v12763_v12 = vld [vmem:[#allocation58 + $0x124] ss:$48 sps:$4 sm:$0xff]  }
 0xf9a   :  { %9535 = vmatpush1.bf16.msra.mxu1 %v12740_v62 }
 0xf9b   :  { %9536 = vmatprep.subr.bf16.mxu1 %v12745_v0 }
 0xf9e   :  { %9537 = vmatpush1.bf16.msra.mxu1 %v12743_v5 }
 0xf9f   :  { %9538 = vmatprep.subr.bf16.mxu1 %v12751_v6  ;;  %v7049_v6 = vrot.slane %v7032_v51, %v14896_v58  ;;  %v12886_v51 = vld [vmem:[#allocation58 + $0x60c] ss:$48 sps:$4 sm:$0xff]  }
 0xfa2   :  { %9539 = vmatpush1.bf16.msra.mxu1 %v12749_v10 }
 0xfa3   :  { %9540 = vmatprep.subr.bf16.mxu1 %v12757_v11 }
 0xfa6   :  { %9541 = vmatpush1.bf16.msra.mxu1 %v12755_v44  ;;  %v12836_v44 = vld [vmem:[#allocation58 + $0x2a8] ss:$48 sps:$4 sm:$0xff]  }
 0xfa7   :  { %9542 = vmatprep.subr.bf16.mxu1 %v12763_v12 }
 0xfaa   :  { %9543 = vmatpush1.bf16.msra.mxu1 %v12761_v21  ;;  %v12841_v21 = vld [vmem:[#allocation58 + $0x24c] ss:$48 sps:$4 sm:$0xff]  }
 0xfab   :  { %9544 = vmatprep.subr.bf16.mxu1 %v12769_v20 }
 0xfae   :  { %9545 = vmatpush1.bf16.msra.mxu1 %v12767_v22 }
 0xfaf   :  { %9546 = vmatprep.subr.bf16.mxu1 %v12775_v23  ;;  %v12839_v23 = vld [vmem:[#allocation58 + $0x248] ss:$48 sps:$4 sm:$0xff]  }
 0xfb2   :  { %9547 = vmatpush1.bf16.msra.mxu1 %v12773_v25  ;;  %v12842_v25 = vld [vmem:[#allocation58 + $0x8a8] ss:$48 sps:$4 sm:$0xff]  }
 0xfb3   :  { %9548 = vmatprep.subr.bf16.mxu1 %v12781_v26 }
 0xfb6   :  { %9549 = vmatpush1.bf16.msra.mxu1 %v12779_v17  ;;  %v12847_v17 = vld [vmem:[#allocation58 + $0x1ec] ss:$48 sps:$4 sm:$0xff]  }
 0xfb7   :  { %9550 = vmatprep.subr.bf16.mxu1 %v12787_v24  ;;  %v12850_v24 = vld [vmem:[#allocation58 + $0x84c] ss:$48 sps:$4 sm:$0xff]  }
 0xfba   :  { %9551 = vmatpush2.bf16.msra.mxu1 %v12785_v28  ;;  %v12845_v28 = vld [vmem:[#allocation58 + $0x1e8] ss:$48 sps:$4 sm:$0xff]  }
 0xfbb   :  { %9552 = vmatprep.subr.bf16.mxu1 %v12793_v32  ;;  %v12848_v32 = vld [vmem:[#allocation58 + $0x848] ss:$48 sps:$4 sm:$0xff]  }
 0xfbe   :  { %9553 = vmatpush2.bf16.msra.mxu1 %v12791_v34  ;;  %v12853_v34 = vld [vmem:[#allocation58 + $0x18c] ss:$48 sps:$4 sm:$0xff]  }
 0xfbf   :  { %9554 = vmatprep.subr.bf16.mxu1 %v12799_v35  ;;  %v12856_v35 = vld [vmem:[#allocation58 + $0x7ec] ss:$48 sps:$4 sm:$0xff]  }
 0xfc2   :  { %9555 = vmatpush2.bf16.msra.mxu1 %v12797_v36  ;;  %v12851_v36 = vld [vmem:[#allocation58 + $0x188] ss:$48 sps:$4 sm:$0xff]  }
 0xfc3   :  { %9556 = vmatprep.subr.bf16.mxu1 %v12805_v37  ;;  %v12854_v37 = vld [vmem:[#allocation58 + $0x7e8] ss:$48 sps:$4 sm:$0xff]  }
 0xfc6   :  { %9557 = vmatpush2.bf16.msra.mxu1 %v12803_v13  ;;  %v12859_v13 = vld [vmem:[#allocation58 + $0x12c] ss:$48 sps:$4 sm:$0xff]  }
 0xfc7   :  { %9558 = vmatprep.subr.bf16.mxu1 %v12811_v30  ;;  %v12862_v30 = vld [vmem:[#allocation58 + $0x78c] ss:$48 sps:$4 sm:$0xff]  }
 0xfca   :  { %9559 = vmatpush2.bf16.msra.mxu1 %v12809_v14  ;;  %v12857_v14 = vld [vmem:[#allocation58 + $0x128] ss:$48 sps:$4 sm:$0xff]  }
 0xfcb   :  { %9560 = vmatprep.subr.bf16.mxu1 %v12817_v41  ;;  %v12860_v41 = vld [vmem:[#allocation58 + $0x788] ss:$48 sps:$4 sm:$0xff]  }
 0xfce   :  { %9561 = vmatpush2.bf16.msra.mxu1 %v12815_v15  ;;  %v12865_v15 = vld [vmem:[#allocation58 + $0xcc] ss:$48 sps:$4 sm:$0xff]  }
 0xfcf   :  { %9562 = vmatprep.subr.bf16.mxu1 %v12823_v42  ;;  %v12868_v42 = vld [vmem:[#allocation58 + $0x72c] ss:$48 sps:$4 sm:$0xff]  }
 0xfd2   :  { %9563 = vmatpush2.bf16.msra.mxu1 %v12821_v43  ;;  %v12863_v43 = vld [vmem:[#allocation58 + $0xc8] ss:$48 sps:$4 sm:$0xff]  }
 0xfd3   :  { %9564 = vmatprep.subr.bf16.mxu1 %v12829_v40  ;;  %v12866_v40 = vld [vmem:[#allocation58 + $0x728] ss:$48 sps:$4 sm:$0xff]  }
 0xfd5   :  { %v6662_v45 = vpop.f32.mrf.mxu1 }
 0xfd6   :  { %9565 = vmatpush2.bf16.msra.mxu1 %v12827_v39  ;;  %v12871_v39 = vld [vmem:[#allocation58 + $0x6c] ss:$48 sps:$4 sm:$0xff]  }
 0xfd7   :  { %9616 = vmatprep.subr.bf16.mxu1 %v12838_v29  ;;  %v6664_v47 = vpop.f32.mrf.mxu1  ;;  %v12874_v29 = vld [vmem:[#allocation58 + $0x6cc] ss:$48 sps:$4 sm:$0xff]  }
 0xfd9   :  { %v6733_v48 = vpop.f32.mrf.mxu1 }
 0xfdb   :  { %v6735_v49 = vpop.f32.mrf.mxu1 }
 0xfdd   :  { %v6807_v31 = vpop.f32.mrf.mxu1 }
 0xfde   :  { %v6808_v53 = vadd.f32 %v6807_v31, %v6662_v45  ;;  %v12869_v45 = vld [vmem:[#allocation58 + $0x68] ss:$48 sps:$4 sm:$0xff]  }
 0xfdf   :  { %v6809_v33 = vpop.f32.mrf.mxu1  ;;  %v12875_v31 = vld [vmem:[#allocation58 + $0x8] ss:$48 sps:$4 sm:$0xff]  }
 0xfe0   :  { %v6810_v55 = vadd.f32 %v6809_v33, %v6664_v47  ;;  %v12872_v47 = vld [vmem:[#allocation58 + $0x6c8] ss:$48 sps:$4 sm:$0xff]  }
 0xfe1   :  { %v6878_v50 = vpop.f32.mrf.mxu1  ;;  %v12878_v33 = vld [vmem:[#allocation58 + $0x668] ss:$48 sps:$4 sm:$0xff]  }
 0xfe2   :  { %v6879_v60 = vadd.f32 %v6878_v50, %v6733_v48  ;;  %v12877_v48 = vld [vmem:[#allocation58 + $0xc] ss:$48 sps:$4 sm:$0xff]  }
 0xfe3   :  { %v6880_v52 = vpop.f32.mrf.mxu1  ;;  %v12883_v50 = vld [vmem:[#allocation58 + $0x5ac] ss:$48 sps:$4 sm:$0xff]  }
 0xfe4   :  { %v6881_v1 = vadd.f32 %v6880_v52, %v6735_v49  ;;  %v12880_v49 = vld [vmem:[#allocation58 + $0x66c] ss:$48 sps:$4 sm:$0xff]   ;;  %v12881_v52 = vld [vmem:[#allocation58 + $0x5a8] ss:$48 sps:$4 sm:$0xff]  }
0x1015   :  { %v6952_v54 = vpop.f32.mrf.mxu1 }
0x1016   :  { %v7028_v56 = vadd.f32 %v6952_v54, %v6808_v53  ;;  %v12884_v53 = vld [vmem:[#allocation58 + $0x608] ss:$48 sps:$4 sm:$0xff]   ;;  %v12892_v54 = vld [vmem:[#allocation58 + $0xbac] ss:$48 sps:$4 sm:$0xff]  }
0x1017   :  { %v6954_v59 = vpop.f32.mrf.mxu1 }
0x1018   :  { %v7054_v61 = vadd.f32 %v7037_v3, %v7028_v56  ;;  %v7029_v62 = vadd.f32 %v6954_v59, %v6810_v55  ;;  %v12889_v3 = vld [vmem:[#allocation58 + $0x54c] ss:$48 sps:$4 sm:$0xff]   ;;  %v12887_v55 = vld [vmem:[#allocation58 + $0x548] ss:$48 sps:$4 sm:$0xff]  }
0x1019   :  { %v7023_v0 = vpop.f32.mrf.mxu1  ;;  %v12890_v56 = vld [vmem:[#allocation58 + $0xba8] ss:$48 sps:$4 sm:$0xff]   ;;  %v12898_v59 = vld [vmem:[#allocation58 + $0xb4c] ss:$48 sps:$4 sm:$0xff]  }
0x101a   :  { %v7055_v4 = vadd.f32 %v7041_v57, %v7029_v62  ;;  %v7030_v5 = vadd.f32 %v7023_v0, %v6879_v60  ;;  %v7058_v7 = vmax.f32 %v7054_v61, 0.0  ;;  %v12895_v57 = vld [vmem:[#allocation58 + $0x4ec] ss:$48 sps:$4 sm:$0xff]   ;;  %v12893_v60 = vld [vmem:[#allocation58 + $0x4e8] ss:$48 sps:$4 sm:$0xff]  }
0x101b   :  { %v7025_v8 = vpop.f32.mrf.mxu1  ;;  %v12896_v61 = vld [vmem:[#allocation58 + $0xb48] ss:$48 sps:$4 sm:$0xff]   ;;  %v12901_v62 = vld [vmem:[#allocation58 + $0x48c] ss:$48 sps:$4 sm:$0xff]  }
0x101c   :  { %v7059_v10 = vmax.f32 %v7055_v4, 0.0  ;;  %v7056_v11 = vadd.f32 %v7045_v63, %v7030_v5  ;;  %v7031_v16 = vadd.f32 %v7025_v8, %v6881_v1  ;;  %v14902_v12 = vpack.c.bf16 %v7058_v7, %v7058_v7  ;;  %v12904_v63 = vld [vmem:[#allocation58 + $0xaec] ss:$48 sps:$4 sm:$0xff]   ;;  %v12899_v0 = vld [vmem:[#allocation58 + $0x488] ss:$48 sps:$4 sm:$0xff]  }
0x101d   :  { %v12902_v1 = vld [vmem:[#allocation58 + $0xae8] ss:$48 sps:$4 sm:$0xff]   ;;  %v12907_v4 = vld [vmem:[#allocation58 + $0x42c] ss:$48 sps:$4 sm:$0xff]  }
0x101e   :  { %v14900_v18 = vpack.c.bf16 %v7059_v10, %v7059_v10  ;;  %v7057_v9 = vadd.f32 %v7049_v6, %v7031_v16  ;;  %v7060_v19 = vmax.f32 %v7056_v11, 0.0  ;;  %v12910_v5 = vld [vmem:[#allocation58 + $0xa8c] ss:$48 sps:$4 sm:$0xff]   ;;  %v12905_v6 = vld [vmem:[#allocation58 + $0x428] ss:$48 sps:$4 sm:$0xff]  }
0x101f   :  { %v12908_v7 = vld [vmem:[#allocation58 + $0xa88] ss:$48 sps:$4 sm:$0xff]   ;;  %v12913_v8 = vld [vmem:[#allocation58 + $0x3cc] ss:$48 sps:$4 sm:$0xff]  }
0x1020   :  { %v7061_v20 = vmax.f32 %v7057_v9, 0.0  ;;  %9566 = vmatprep.mubr.bf16.mxu1 %v14900_v18  ;;  %v14909_v26 = vpack.c.bf16 %v7060_v19, %v7060_v19  ;;  %v12916_v10 = vld [vmem:[#allocation58 + $0xa2c] ss:$48 sps:$4 sm:$0xff]   ;;  %v12911_v11 = vld [vmem:[#allocation58 + $0x3c8] ss:$48 sps:$4 sm:$0xff]  }
0x1021   :  { %9567 = vmatmul.mubr.bf16.vlgmr.msra.gmra.mxu1 %v14902_v12  ;;  %v12914_v16 = vld [vmem:[#allocation58 + $0xa28] ss:$48 sps:$4 sm:$0xff]   ;;  %v12919_v9 = vld [vmem:[#allocation58 + $0x36c] ss:$48 sps:$4 sm:$0xff]   ;;  %v7062_v19 = vld [vmem:[#allocation61] sm:$0xf] }
0x1022   :  { %v14906_v22 = vpack.c.bf16 %v7061_v20, %v7061_v20  ;;  %9617 = vmatpush1.bf16.msra.mxu1 %v12836_v44  ;;  %9648 = vmatprep.mubr.bf16.mxu1 %v14900_v18  ;;  %v12922_v44 = vld [vmem:[#allocation58 + $0x9cc] ss:$48 sps:$4 sm:$0xff]   ;;  %v12917_v20 = vld [vmem:[#allocation58 + $0x368] ss:$48 sps:$4 sm:$0xff]  }
0x1023   :  { %9618 = vmatprep.subr.bf16.mxu1 %v12841_v21 }
0x1024   :  { %9607 = vmatprep.mubr.bf16.mxu0 %v14906_v22 }
0x1025   :  { %9608 = vmatmul.mubr.bf16.vlgmr.msra.gmra.mxu0 %v14909_v26 }
0x1026   :  { %9619 = vmatpush1.bf16.msra.mxu1 %v12839_v23  ;;  %9658 = vmatpush1.bf16.msra.mxu0 %v12842_v25  ;;  %v12920_v23 = vld [vmem:[#allocation58 + $0x9c8] ss:$48 sps:$4 sm:$0xff]   ;;  %v7075_v25 = vrot.slane %v7062_v19, %v14892_v38  ;;  %v12992_v19 = vld [vmem:[#allocation58 + $0xb50] ss:$48 sps:$4 sm:$0xff]  }
0x1027   :  { %9689 = vmatprep.mubr.bf16.mxu0 %v14906_v22  ;;  %9620 = vmatprep.subr.bf16.mxu1 %v12847_v17  ;;  %v12925_v17 = vld [vmem:[#allocation58 + $0x30c] ss:$48 sps:$4 sm:$0xff]  }
0x1028   :  { %9659 = vmatprep.subr.bf16.mxu0 %v12850_v24  ;;  %v12928_v24 = vld [vmem:[#allocation58 + $0x96c] ss:$48 sps:$4 sm:$0xff]  }
0x102a   :  { %9621 = vmatpush1.bf16.msra.mxu1 %v12845_v28  ;;  %9660 = vmatpush1.bf16.msra.mxu0 %v12848_v32 }
0x102b   :  { %9622 = vmatprep.subr.bf16.mxu1 %v12853_v34  ;;  %9661 = vmatprep.subr.bf16.mxu0 %v12856_v35  ;;  %v12923_v34 = vld [vmem:[#allocation58 + $0x308] ss:$48 sps:$4 sm:$0xff]  }
0x102c   :  { %v12926_v35 = vld [vmem:[#allocation58 + $0x968] ss:$48 sps:$4 sm:$0xff]  }
0x102e   :  { %9623 = vmatpush1.bf16.msra.mxu1 %v12851_v36  ;;  %9662 = vmatpush1.bf16.msra.mxu0 %v12854_v37  ;;  %v12931_v37 = vld [vmem:[#allocation58 + $0x90c] ss:$48 sps:$4 sm:$0xff]  }
0x102f   :  { %9624 = vmatprep.subr.bf16.mxu1 %v12859_v13  ;;  %9663 = vmatprep.subr.bf16.mxu0 %v12862_v30  ;;  %v12934_v13 = vld [vmem:[#allocation58 + $0x2b4] ss:$48 sps:$4 sm:$0xff]   ;;  %v12929_v30 = vld [vmem:[#allocation58 + $0x908] ss:$48 sps:$4 sm:$0xff]  }
0x1032   :  { %9625 = vmatpush1.bf16.msra.mxu1 %v12857_v14  ;;  %9664 = vmatpush1.bf16.msra.mxu0 %v12860_v41  ;;  %v12932_v14 = vld [vmem:[#allocation58 + $0x2b0] ss:$48 sps:$4 sm:$0xff]   ;;  %v12937_v41 = vld [vmem:[#allocation58 + $0x254] ss:$48 sps:$4 sm:$0xff]  }
0x1033   :  { %9626 = vmatprep.subr.bf16.mxu1 %v12865_v15  ;;  %9665 = vmatprep.subr.bf16.mxu0 %v12868_v42  ;;  %v12940_v15 = vld [vmem:[#allocation58 + $0x8b4] ss:$48 sps:$4 sm:$0xff]   ;;  %v12935_v42 = vld [vmem:[#allocation58 + $0x250] ss:$48 sps:$4 sm:$0xff]  }
0x1036   :  { %9627 = vmatpush1.bf16.msra.mxu1 %v12863_v43  ;;  %9666 = vmatpush1.bf16.msra.mxu0 %v12866_v40  ;;  %v12938_v43 = vld [vmem:[#allocation58 + $0x8b0] ss:$48 sps:$4 sm:$0xff]   ;;  %v12943_v40 = vld [vmem:[#allocation58 + $0x1f4] ss:$48 sps:$4 sm:$0xff]  }
0x1037   :  { %9628 = vmatprep.subr.bf16.mxu1 %v12871_v39  ;;  %9667 = vmatprep.subr.bf16.mxu0 %v12874_v29  ;;  %v12946_v39 = vld [vmem:[#allocation58 + $0x854] ss:$48 sps:$4 sm:$0xff]   ;;  %v12941_v29 = vld [vmem:[#allocation58 + $0x1f0] ss:$48 sps:$4 sm:$0xff]  }
0x103a   :  { %9629 = vmatpush1.bf16.msra.mxu1 %v12869_v45  ;;  %9668 = vmatpush1.bf16.msra.mxu0 %v12872_v47  ;;  %v12944_v45 = vld [vmem:[#allocation58 + $0x850] ss:$48 sps:$4 sm:$0xff]   ;;  %v12949_v47 = vld [vmem:[#allocation58 + $0x194] ss:$48 sps:$4 sm:$0xff]  }
0x103b   :  { %9630 = vmatprep.subr.bf16.mxu1 %v12877_v48  ;;  %9669 = vmatprep.subr.bf16.mxu0 %v12880_v49  ;;  %v12952_v48 = vld [vmem:[#allocation58 + $0x7f4] ss:$48 sps:$4 sm:$0xff]   ;;  %v12947_v49 = vld [vmem:[#allocation58 + $0x190] ss:$48 sps:$4 sm:$0xff]  }
0x103e   :  { %9631 = vmatpush1.bf16.msra.mxu1 %v12875_v31  ;;  %9670 = vmatpush1.bf16.msra.mxu0 %v12878_v33  ;;  %v12950_v31 = vld [vmem:[#allocation58 + $0x7f0] ss:$48 sps:$4 sm:$0xff]   ;;  %v12955_v33 = vld [vmem:[#allocation58 + $0x134] ss:$48 sps:$4 sm:$0xff]  }
0x103f   :  { %9632 = vmatprep.subr.bf16.mxu1 %v12883_v50  ;;  %9671 = vmatprep.subr.bf16.mxu0 %v12886_v51  ;;  %v12958_v50 = vld [vmem:[#allocation58 + $0x794] ss:$48 sps:$4 sm:$0xff]   ;;  %v12953_v51 = vld [vmem:[#allocation58 + $0x130] ss:$48 sps:$4 sm:$0xff]  }
0x1042   :  { %9633 = vmatpush2.bf16.msra.mxu1 %v12881_v52  ;;  %9672 = vmatpush1.bf16.msra.mxu0 %v12884_v53  ;;  %v12956_v52 = vld [vmem:[#allocation58 + $0x790] ss:$48 sps:$4 sm:$0xff]   ;;  %v12961_v53 = vld [vmem:[#allocation58 + $0xd4] ss:$48 sps:$4 sm:$0xff]  }
0x1043   :  { %9634 = vmatprep.subr.bf16.mxu1 %v12889_v3  ;;  %9673 = vmatprep.subr.bf16.mxu0 %v12892_v54  ;;  %v12964_v3 = vld [vmem:[#allocation58 + $0x734] ss:$48 sps:$4 sm:$0xff]   ;;  %v12959_v54 = vld [vmem:[#allocation58 + $0xd0] ss:$48 sps:$4 sm:$0xff]  }
0x1046   :  { %9635 = vmatpush2.bf16.msra.mxu1 %v12887_v55  ;;  %9674 = vmatpush2.bf16.msra.mxu0 %v12890_v56  ;;  %v12962_v55 = vld [vmem:[#allocation58 + $0x730] ss:$48 sps:$4 sm:$0xff]   ;;  %v12967_v56 = vld [vmem:[#allocation58 + $0x74] ss:$48 sps:$4 sm:$0xff]  }
0x1047   :  { %9636 = vmatprep.subr.bf16.mxu1 %v12895_v57  ;;  %9675 = vmatprep.subr.bf16.mxu0 %v12898_v59  ;;  %v12970_v57 = vld [vmem:[#allocation58 + $0x6d4] ss:$48 sps:$4 sm:$0xff]   ;;  %v12965_v59 = vld [vmem:[#allocation58 + $0x70] ss:$48 sps:$4 sm:$0xff]  }
0x104a   :  { %9637 = vmatpush2.bf16.msra.mxu1 %v12893_v60  ;;  %9676 = vmatpush2.bf16.msra.mxu0 %v12896_v61  ;;  %v12968_v60 = vld [vmem:[#allocation58 + $0x6d0] ss:$48 sps:$4 sm:$0xff]   ;;  %v12973_v61 = vld [vmem:[#allocation58 + $0x14] ss:$48 sps:$4 sm:$0xff]  }
0x104b   :  { %9638 = vmatprep.subr.bf16.mxu1 %v12901_v62  ;;  %9677 = vmatprep.subr.bf16.mxu0 %v12904_v63  ;;  %v12976_v62 = vld [vmem:[#allocation58 + $0x674] ss:$48 sps:$4 sm:$0xff]   ;;  %v12971_v63 = vld [vmem:[#allocation58 + $0x10] ss:$48 sps:$4 sm:$0xff]  }
0x104e   :  { %9639 = vmatpush2.bf16.msra.mxu1 %v12899_v0  ;;  %9678 = vmatpush2.bf16.msra.mxu0 %v12902_v1  ;;  %v12974_v0 = vld [vmem:[#allocation58 + $0x670] ss:$48 sps:$4 sm:$0xff]   ;;  %v12979_v1 = vld [vmem:[#allocation58 + $0x5b4] ss:$48 sps:$4 sm:$0xff]  }
0x104f   :  { %9640 = vmatprep.subr.bf16.mxu1 %v12907_v4  ;;  %9679 = vmatprep.subr.bf16.mxu0 %v12910_v5  ;;  %v12982_v4 = vld [vmem:[#allocation58 + $0x614] ss:$48 sps:$4 sm:$0xff]   ;;  %v12977_v5 = vld [vmem:[#allocation58 + $0x5b0] ss:$48 sps:$4 sm:$0xff]  }
0x1052   :  { %9641 = vmatpush2.bf16.msra.mxu1 %v12905_v6  ;;  %9680 = vmatpush2.bf16.msra.mxu0 %v12908_v7  ;;  %v12980_v6 = vld [vmem:[#allocation58 + $0x610] ss:$48 sps:$4 sm:$0xff]   ;;  %v12985_v7 = vld [vmem:[#allocation58 + $0x554] ss:$48 sps:$4 sm:$0xff]  }
0x1053   :  { %9642 = vmatprep.subr.bf16.mxu1 %v12913_v8  ;;  %9681 = vmatprep.subr.bf16.mxu0 %v12916_v10  ;;  %v12988_v8 = vld [vmem:[#allocation58 + $0xbb4] ss:$48 sps:$4 sm:$0xff]   ;;  %v12983_v10 = vld [vmem:[#allocation58 + $0x550] ss:$48 sps:$4 sm:$0xff]  }
0x1055   :  { %v14914_v21 = vpop.f32.mrf.mxu1 }
0x1056   :  { %9643 = vmatpush2.bf16.msra.mxu1 %v12911_v11  ;;  %9682 = vmatpush2.bf16.msra.mxu0 %v12914_v16  ;;  %v12986_v11 = vld [vmem:[#allocation58 + $0xbb0] ss:$48 sps:$4 sm:$0xff]   ;;  %v12991_v16 = vld [vmem:[#allocation58 + $0x4f4] ss:$48 sps:$4 sm:$0xff]  }
0x1057   :  { %9644 = vmatprep.subr.bf16.mxu1 %v12919_v9  ;;  %9683 = vmatprep.subr.bf16.mxu0 %v12922_v44  ;;  %v14917_v28 = vpop.f32.mrf.mxu1  ;;  %v12994_v9 = vld [vmem:[#allocation58 + $0xb54] ss:$48 sps:$4 sm:$0xff]   ;;  %v12989_v44 = vld [vmem:[#allocation58 + $0x4f0] ss:$48 sps:$4 sm:$0xff]  }
0x1059   :  { %v7221_v32 = vpop.f32.mrf.mxu1 }
0x105a   :  { %9645 = vmatpush2.bf16.msra.mxu1 %v12917_v20  ;;  %9684 = vmatpush2.bf16.msra.mxu0 %v12920_v23  ;;  %v14919_v36 = vadd.f32 %v7221_v32, %v7075_v25  ;;  %v12997_v20 = vld [vmem:[#allocation58 + $0x494] ss:$48 sps:$4 sm:$0xff]   ;;  %v12995_v25 = vld [vmem:[#allocation58 + $0x490] ss:$48 sps:$4 sm:$0xff]  }
0x105b   :  { %9646 = vmatprep.subr.bf16.mxu1 %v12925_v17  ;;  %9685 = vmatprep.subr.bf16.mxu0 %v12928_v24  ;;  %v13000_v23 = vld [vmem:[#allocation58 + $0xaf4] ss:$48 sps:$4 sm:$0xff]   ;;  %v12998_v17 = vld [vmem:[#allocation58 + $0xaf0] ss:$48 sps:$4 sm:$0xff]  }
0x105c   :  { %v13003_v24 = vld [vmem:[#allocation58 + $0x434] ss:$48 sps:$4 sm:$0xff]  }
0x105d   :  { %v13006_v32 = vld [vmem:[#allocation58 + $0xa94] ss:$48 sps:$4 sm:$0xff]  }
0x105e   :  { %9647 = vmatpush2.bf16.msra.mxu1 %v12923_v34  ;;  %9686 = vmatpush2.bf16.msra.mxu0 %v12926_v35  ;;  %v13001_v34 = vld [vmem:[#allocation58 + $0x430] ss:$48 sps:$4 sm:$0xff]  }
0x105f   :  { %9687 = vmatprep.subr.bf16.mxu0 %v12931_v37  ;;  %9698 = vmatprep.subr.bf16.mxu1 %v12934_v13  ;;  %v13004_v35 = vld [vmem:[#allocation58 + $0xa90] ss:$48 sps:$4 sm:$0xff]   ;;  %v13009_v37 = vld [vmem:[#allocation58 + $0x3d4] ss:$48 sps:$4 sm:$0xff]  }
0x1060   :  { %v13012_v13 = vld [vmem:[#allocation58 + $0xa34] ss:$48 sps:$4 sm:$0xff]  }
0x1061   :  { %9649 = vmatmul.mubr.bf16.vlgmr.msra.gmra.mxu1 %v14902_v12 }
0x1062   :  { %9688 = vmatpush2.bf16.msra.mxu0 %v12929_v30  ;;  %9699 = vmatpush1.bf16.msra.mxu1 %v12932_v14  ;;  %v13007_v30 = vld [vmem:[#allocation58 + $0x3d0] ss:$48 sps:$4 sm:$0xff]  }
0x1063   :  { %9730 = vmatprep.mubr.bf16.mxu1 %v14900_v18  ;;  %9700 = vmatprep.subr.bf16.mxu1 %v12937_v41  ;;  %v13010_v14 = vld [vmem:[#allocation58 + $0xa30] ss:$48 sps:$4 sm:$0xff]   ;;  %v13015_v41 = vld [vmem:[#allocation58 + $0x374] ss:$48 sps:$4 sm:$0xff]  }
0x1064   :  { %9739 = vmatprep.subr.bf16.mxu0 %v12940_v15  ;;  %v13018_v15 = vld [vmem:[#allocation58 + $0x9d4] ss:$48 sps:$4 sm:$0xff]  }
0x1065   :  { %9690 = vmatmul.mubr.bf16.vlgmr.msra.gmra.mxu0 %v14909_v26 }
0x1066   :  { %9701 = vmatpush1.bf16.msra.mxu1 %v12935_v42  ;;  %9740 = vmatpush1.bf16.msra.mxu0 %v12938_v43  ;;  %v13013_v42 = vld [vmem:[#allocation58 + $0x370] ss:$48 sps:$4 sm:$0xff]  }
0x1067   :  { %9771 = vmatprep.mubr.bf16.mxu0 %v14906_v22  ;;  %9702 = vmatprep.subr.bf16.mxu1 %v12943_v40  ;;  %v13016_v43 = vld [vmem:[#allocation58 + $0x9d0] ss:$48 sps:$4 sm:$0xff]   ;;  %v13021_v40 = vld [vmem:[#allocation58 + $0x314] ss:$48 sps:$4 sm:$0xff]  }
0x1068   :  { %9741 = vmatprep.subr.bf16.mxu0 %v12946_v39  ;;  %v13024_v39 = vld [vmem:[#allocation58 + $0x974] ss:$48 sps:$4 sm:$0xff]  }
0x106a   :  { %9703 = vmatpush1.bf16.msra.mxu1 %v12941_v29  ;;  %9742 = vmatpush1.bf16.msra.mxu0 %v12944_v45  ;;  %v13019_v29 = vld [vmem:[#allocation58 + $0x310] ss:$48 sps:$4 sm:$0xff]  }
0x106b   :  { %9704 = vmatprep.subr.bf16.mxu1 %v12949_v47  ;;  %9743 = vmatprep.subr.bf16.mxu0 %v12952_v48  ;;  %v13022_v45 = vld [vmem:[#allocation58 + $0x970] ss:$48 sps:$4 sm:$0xff]   ;;  %v13027_v47 = vld [vmem:[#allocation58 + $0x914] ss:$48 sps:$4 sm:$0xff]   ;;  %v13030_v48 = vld [vmem:[#allocation58 + $0x2bc] ss:$48 sps:$4 sm:$0xff]  }
0x106e   :  { %9705 = vmatpush1.bf16.msra.mxu1 %v12947_v49  ;;  %9744 = vmatpush1.bf16.msra.mxu0 %v12950_v31  ;;  %v13025_v49 = vld [vmem:[#allocation58 + $0x910] ss:$48 sps:$4 sm:$0xff]   ;;  %v13028_v31 = vld [vmem:[#allocation58 + $0x2b8] ss:$48 sps:$4 sm:$0xff]  }
0x106f   :  { %9706 = vmatprep.subr.bf16.mxu1 %v12955_v33  ;;  %9745 = vmatprep.subr.bf16.mxu0 %v12958_v50  ;;  %v13033_v33 = vld [vmem:[#allocation58 + $0x25c] ss:$48 sps:$4 sm:$0xff]  }
0x1070   :  { %v13036_v50 = vld [vmem:[#allocation58 + $0x8bc] ss:$48 sps:$4 sm:$0xff]  }
0x1072   :  { %9707 = vmatpush1.bf16.msra.mxu1 %v12953_v51  ;;  %9746 = vmatpush1.bf16.msra.mxu0 %v12956_v52  ;;  %v13031_v51 = vld [vmem:[#allocation58 + $0x258] ss:$48 sps:$4 sm:$0xff]  }
0x1073   :  { %9708 = vmatprep.subr.bf16.mxu1 %v12961_v53  ;;  %9747 = vmatprep.subr.bf16.mxu0 %v12964_v3  ;;  %v13034_v52 = vld [vmem:[#allocation58 + $0x8b8] ss:$48 sps:$4 sm:$0xff]   ;;  %v13039_v53 = vld [vmem:[#allocation58 + $0x1fc] ss:$48 sps:$4 sm:$0xff]  }
0x1074   :  { %v13042_v3 = vld [vmem:[#allocation58 + $0x85c] ss:$48 sps:$4 sm:$0xff]  }
0x1076   :  { %9709 = vmatpush1.bf16.msra.mxu1 %v12959_v54  ;;  %9748 = vmatpush1.bf16.msra.mxu0 %v12962_v55  ;;  %v13037_v54 = vld [vmem:[#allocation58 + $0x1f8] ss:$48 sps:$4 sm:$0xff]  }
0x1077   :  { %9710 = vmatprep.subr.bf16.mxu1 %v12967_v56  ;;  %9749 = vmatprep.subr.bf16.mxu0 %v12970_v57  ;;  %v13040_v55 = vld [vmem:[#allocation58 + $0x858] ss:$48 sps:$4 sm:$0xff]   ;;  %v13045_v56 = vld [vmem:[#allocation58 + $0x19c] ss:$48 sps:$4 sm:$0xff]  }
0x1078   :  { %v13048_v57 = vld [vmem:[#allocation58 + $0x7fc] ss:$48 sps:$4 sm:$0xff]  }
0x107a   :  { %9711 = vmatpush1.bf16.msra.mxu1 %v12965_v59  ;;  %9750 = vmatpush1.bf16.msra.mxu0 %v12968_v60  ;;  %v13043_v59 = vld [vmem:[#allocation58 + $0x198] ss:$48 sps:$4 sm:$0xff]  }
0x107b   :  { %9712 = vmatprep.subr.bf16.mxu1 %v12973_v61  ;;  %9751 = vmatprep.subr.bf16.mxu0 %v12976_v62  ;;  %v13046_v60 = vld [vmem:[#allocation58 + $0x7f8] ss:$48 sps:$4 sm:$0xff]   ;;  %v13051_v61 = vld [vmem:[#allocation58 + $0x13c] ss:$48 sps:$4 sm:$0xff]  }
0x107c   :  { %v13054_v62 = vld [vmem:[#allocation58 + $0x79c] ss:$48 sps:$4 sm:$0xff]  }
0x107e   :  { %9713 = vmatpush1.bf16.msra.mxu1 %v12971_v63  ;;  %9752 = vmatpush1.bf16.msra.mxu0 %v12974_v0  ;;  %v13049_v63 = vld [vmem:[#allocation58 + $0x138] ss:$48 sps:$4 sm:$0xff]  }
0x107f   :  { %9714 = vmatprep.subr.bf16.mxu1 %v12979_v1  ;;  %9753 = vmatprep.subr.bf16.mxu0 %v12982_v4  ;;  %v13052_v0 = vld [vmem:[#allocation58 + $0x798] ss:$48 sps:$4 sm:$0xff]   ;;  %v13057_v1 = vld [vmem:[#allocation58 + $0xdc] ss:$48 sps:$4 sm:$0xff]  }
0x1080   :  { %v13060_v4 = vld [vmem:[#allocation58 + $0x73c] ss:$48 sps:$4 sm:$0xff]  }
0x1082   :  { %9715 = vmatpush2.bf16.msra.mxu1 %v12977_v5  ;;  %9754 = vmatpush1.bf16.msra.mxu0 %v12980_v6  ;;  %v13055_v5 = vld [vmem:[#allocation58 + $0xd8] ss:$48 sps:$4 sm:$0xff]  }
0x1083   :  { %9716 = vmatprep.subr.bf16.mxu1 %v12985_v7  ;;  %9755 = vmatprep.subr.bf16.mxu0 %v12988_v8  ;;  %v13058_v6 = vld [vmem:[#allocation58 + $0x738] ss:$48 sps:$4 sm:$0xff]   ;;  %v13063_v7 = vld [vmem:[#allocation58 + $0x7c] ss:$48 sps:$4 sm:$0xff]  }
0x1084   :  { %v13066_v8 = vld [vmem:[#allocation58 + $0x6dc] ss:$48 sps:$4 sm:$0xff]  }
0x1086   :  { %9717 = vmatpush2.bf16.msra.mxu1 %v12983_v10  ;;  %9756 = vmatpush2.bf16.msra.mxu0 %v12986_v11  ;;  %v13061_v10 = vld [vmem:[#allocation58 + $0x78] ss:$48 sps:$4 sm:$0xff]  }
0x1087   :  { %9718 = vmatprep.subr.bf16.mxu1 %v12991_v16  ;;  %9757 = vmatprep.subr.bf16.mxu0 %v12994_v9  ;;  %v13064_v11 = vld [vmem:[#allocation58 + $0x6d8] ss:$48 sps:$4 sm:$0xff]   ;;  %v13069_v16 = vld [vmem:[#allocation58 + $0x1c] ss:$48 sps:$4 sm:$0xff]  }
0x1088   :  { %v13072_v9 = vld [vmem:[#allocation58 + $0x67c] ss:$48 sps:$4 sm:$0xff]  }
0x108a   :  { %9719 = vmatpush2.bf16.msra.mxu1 %v12989_v44  ;;  %9758 = vmatpush2.bf16.msra.mxu0 %v12992_v19  ;;  %v13067_v44 = vld [vmem:[#allocation58 + $0x18] ss:$48 sps:$4 sm:$0xff]  }
0x108b   :  { %9720 = vmatprep.subr.bf16.mxu1 %v12997_v20  ;;  %9759 = vmatprep.subr.bf16.mxu0 %v13000_v23  ;;  %v13070_v19 = vld [vmem:[#allocation58 + $0x678] ss:$48 sps:$4 sm:$0xff]   ;;  %v13075_v20 = vld [vmem:[#allocation58 + $0x5bc] ss:$48 sps:$4 sm:$0xff]  }
0x108c   :  { %v13078_v23 = vld [vmem:[#allocation58 + $0x61c] ss:$48 sps:$4 sm:$0xff]  }
0x108e   :  { %9721 = vmatpush2.bf16.msra.mxu1 %v12995_v25  ;;  %9760 = vmatpush2.bf16.msra.mxu0 %v12998_v17  ;;  %v13073_v25 = vld [vmem:[#allocation58 + $0x5b8] ss:$48 sps:$4 sm:$0xff]  }
0x108f   :  { %9722 = vmatprep.subr.bf16.mxu1 %v13003_v24  ;;  %9761 = vmatprep.subr.bf16.mxu0 %v13006_v32  ;;  %v13076_v17 = vld [vmem:[#allocation58 + $0x618] ss:$48 sps:$4 sm:$0xff]   ;;  %v13081_v24 = vld [vmem:[#allocation58 + $0x55c] ss:$48 sps:$4 sm:$0xff]  }
0x1090   :  { %v13084_v32 = vld [vmem:[#allocation58 + $0xbbc] ss:$48 sps:$4 sm:$0xff]  }
0x1092   :  { %9723 = vmatpush2.bf16.msra.mxu1 %v13001_v34  ;;  %9762 = vmatpush2.bf16.msra.mxu0 %v13004_v35  ;;  %v13079_v34 = vld [vmem:[#allocation58 + $0x558] ss:$48 sps:$4 sm:$0xff]  }
0x1093   :  { %9724 = vmatprep.subr.bf16.mxu1 %v13009_v37  ;;  %9763 = vmatprep.subr.bf16.mxu0 %v13012_v13  ;;  %v13082_v35 = vld [vmem:[#allocation58 + $0xbb8] ss:$48 sps:$4 sm:$0xff]   ;;  %v13087_v37 = vld [vmem:[#allocation58 + $0x4fc] ss:$48 sps:$4 sm:$0xff]  }
0x1094   :  { %v13090_v13 = vld [vmem:[#allocation58 + $0xb5c] ss:$48 sps:$4 sm:$0xff]  }
0x1096   :  { %9725 = vmatpush2.bf16.msra.mxu1 %v13007_v30  ;;  %9764 = vmatpush2.bf16.msra.mxu0 %v13010_v14  ;;  %v13085_v30 = vld [vmem:[#allocation58 + $0x4f8] ss:$48 sps:$4 sm:$0xff]  }
0x1097   :  { %9726 = vmatprep.subr.bf16.mxu1 %v13015_v41  ;;  %9765 = vmatprep.subr.bf16.mxu0 %v13018_v15  ;;  %v13088_v14 = vld [vmem:[#allocation58 + $0xb58] ss:$48 sps:$4 sm:$0xff]   ;;  %v13093_v41 = vld [vmem:[#allocation58 + $0x49c] ss:$48 sps:$4 sm:$0xff]  }
0x1098   :  { %v13096_v15 = vld [vmem:[#allocation58 + $0xafc] ss:$48 sps:$4 sm:$0xff]  }
0x109a   :  { %9727 = vmatpush2.bf16.msra.mxu1 %v13013_v42  ;;  %9766 = vmatpush2.bf16.msra.mxu0 %v13016_v43  ;;  %v13091_v42 = vld [vmem:[#allocation58 + $0x498] ss:$48 sps:$4 sm:$0xff]  }
0x109b   :  { %9728 = vmatprep.subr.bf16.mxu1 %v13021_v40  ;;  %9767 = vmatprep.subr.bf16.mxu0 %v13024_v39  ;;  %v13094_v43 = vld [vmem:[#allocation58 + $0xaf8] ss:$48 sps:$4 sm:$0xff]   ;;  %v13099_v40 = vld [vmem:[#allocation58 + $0x43c] ss:$48 sps:$4 sm:$0xff]  }
0x109c   :  { %v13102_v39 = vld [vmem:[#allocation58 + $0xa9c] ss:$48 sps:$4 sm:$0xff]  }
0x109e   :  { %9729 = vmatpush2.bf16.msra.mxu1 %v13019_v29  ;;  %9768 = vmatpush2.bf16.msra.mxu0 %v13022_v45  ;;  %v13097_v29 = vld [vmem:[#allocation58 + $0x438] ss:$48 sps:$4 sm:$0xff]  }
0x109f   :  { %9769 = vmatprep.subr.bf16.mxu0 %v13027_v47  ;;  %9780 = vmatprep.subr.bf16.mxu1 %v13030_v48  ;;  %v13100_v45 = vld [vmem:[#allocation58 + $0xa98] ss:$48 sps:$4 sm:$0xff]   ;;  %v13105_v47 = vld [vmem:[#allocation58 + $0x3dc] ss:$48 sps:$4 sm:$0xff]  }
0x10a0   :  { %v13108_v48 = vld [vmem:[#allocation58 + $0xa3c] ss:$48 sps:$4 sm:$0xff]  }
0x10a1   :  { %9731 = vmatmul.mubr.bf16.vlgmr.msra.gmra.mxu1 %v14902_v12 }
0x10a2   :  { %9770 = vmatpush2.bf16.msra.mxu0 %v13025_v49  ;;  %9781 = vmatpush1.bf16.msra.mxu1 %v13028_v31  ;;  %v13103_v49 = vld [vmem:[#allocation58 + $0x3d8] ss:$48 sps:$4 sm:$0xff]  }
0x10a3   :  { %9812 = vmatprep.mubr.bf16.mxu1 %v14900_v18  ;;  %9782 = vmatprep.subr.bf16.mxu1 %v13033_v33  ;;  %v13106_v31 = vld [vmem:[#allocation58 + $0xa38] ss:$48 sps:$4 sm:$0xff]   ;;  %v13111_v33 = vld [vmem:[#allocation58 + $0x37c] ss:$48 sps:$4 sm:$0xff]  }
0x10a4   :  { %9821 = vmatprep.subr.bf16.mxu0 %v13036_v50  ;;  %v13114_v50 = vld [vmem:[#allocation58 + $0x9dc] ss:$48 sps:$4 sm:$0xff]  }
0x10a5   :  { %9772 = vmatmul.mubr.bf16.vlgmr.msra.gmra.mxu0 %v14909_v26 }
0x10a6   :  { %9783 = vmatpush1.bf16.msra.mxu1 %v13031_v51  ;;  %9822 = vmatpush1.bf16.msra.mxu0 %v13034_v52  ;;  %v13109_v51 = vld [vmem:[#allocation58 + $0x378] ss:$48 sps:$4 sm:$0xff]  }
0x10a7   :  { %9853 = vmatprep.mubr.bf16.mxu0 %v14906_v22  ;;  %9784 = vmatprep.subr.bf16.mxu1 %v13039_v53  ;;  %v13112_v52 = vld [vmem:[#allocation58 + $0x9d8] ss:$48 sps:$4 sm:$0xff]   ;;  %v13117_v53 = vld [vmem:[#allocation58 + $0x31c] ss:$48 sps:$4 sm:$0xff]  }
0x10a8   :  { %9823 = vmatprep.subr.bf16.mxu0 %v13042_v3  ;;  %v13120_v3 = vld [vmem:[#allocation58 + $0x97c] ss:$48 sps:$4 sm:$0xff]  }
0x10aa   :  { %9785 = vmatpush1.bf16.msra.mxu1 %v13037_v54  ;;  %9824 = vmatpush1.bf16.msra.mxu0 %v13040_v55  ;;  %v13115_v54 = vld [vmem:[#allocation58 + $0x318] ss:$48 sps:$4 sm:$0xff]  }
0x10ab   :  { %9786 = vmatprep.subr.bf16.mxu1 %v13045_v56  ;;  %9825 = vmatprep.subr.bf16.mxu0 %v13048_v57  ;;  %v13118_v55 = vld [vmem:[#allocation58 + $0x978] ss:$48 sps:$4 sm:$0xff]   ;;  %v13123_v56 = vld [vmem:[#allocation58 + $0x91c] ss:$48 sps:$4 sm:$0xff]   ;;  %v13126_v57 = vld [vmem:[#allocation58 + $0x2c4] ss:$48 sps:$4 sm:$0xff]  }
0x10ae   :  { %9787 = vmatpush1.bf16.msra.mxu1 %v13043_v59  ;;  %9826 = vmatpush1.bf16.msra.mxu0 %v13046_v60  ;;  %v13121_v59 = vld [vmem:[#allocation58 + $0x918] ss:$48 sps:$4 sm:$0xff]   ;;  %v13124_v60 = vld [vmem:[#allocation58 + $0x2c0] ss:$48 sps:$4 sm:$0xff]  }
0x10af   :  { %9788 = vmatprep.subr.bf16.mxu1 %v13051_v61  ;;  %9827 = vmatprep.subr.bf16.mxu0 %v13054_v62  ;;  %v14929_v61 = vpop.f32.mrf.mxu1  ;;  %v13129_v62 = vld [vmem:[#allocation58 + $0x264] ss:$48 sps:$4 sm:$0xff]  }
0x10b2   :  { %9789 = vmatpush1.bf16.msra.mxu1 %v13049_v63  ;;  %9828 = vmatpush1.bf16.msra.mxu0 %v13052_v0  ;;  %v13132_v63 = vld [vmem:[#allocation58 + $0x8c4] ss:$48 sps:$4 sm:$0xff]  }
0x10b3   :  { %9790 = vmatprep.subr.bf16.mxu1 %v13057_v1  ;;  %9829 = vmatprep.subr.bf16.mxu0 %v13060_v4  ;;  %v13127_v1 = vld [vmem:[#allocation58 + $0x260] ss:$48 sps:$4 sm:$0xff]  }
0x10b4   :  { %v13130_v4 = vld [vmem:[#allocation58 + $0x8c0] ss:$48 sps:$4 sm:$0xff]  }
0x10b6   :  { %9791 = vmatpush1.bf16.msra.mxu1 %v13055_v5  ;;  %9830 = vmatpush1.bf16.msra.mxu0 %v13058_v6  ;;  %v13135_v6 = vld [vmem:[#allocation58 + $0x204] ss:$48 sps:$4 sm:$0xff]  }
0x10b7   :  { %9792 = vmatprep.subr.bf16.mxu1 %v13063_v7  ;;  %9831 = vmatprep.subr.bf16.mxu0 %v13066_v8  ;;  %v13138_v7 = vld [vmem:[#allocation58 + $0x864] ss:$48 sps:$4 sm:$0xff]  }
0x10ba   :  { %9793 = vmatpush1.bf16.msra.mxu1 %v13061_v10  ;;  %9832 = vmatpush1.bf16.msra.mxu0 %v13064_v11 }
0x10bb   :  { %9794 = vmatprep.subr.bf16.mxu1 %v13069_v16  ;;  %9833 = vmatprep.subr.bf16.mxu0 %v13072_v9  ;;  %v13133_v16 = vld [vmem:[#allocation58 + $0x200] ss:$48 sps:$4 sm:$0xff]  }
0x10bc   :  { %v13136_v9 = vld [vmem:[#allocation58 + $0x860] ss:$48 sps:$4 sm:$0xff]  }
0x10be   :  { %9795 = vmatpush1.bf16.msra.mxu1 %v13067_v44  ;;  %9834 = vmatpush1.bf16.msra.mxu0 %v13070_v19 }
0x10bf   :  { %9796 = vmatprep.subr.bf16.mxu1 %v13075_v20  ;;  %9835 = vmatprep.subr.bf16.mxu0 %v13078_v23  ;;  %v13141_v20 = vld [vmem:[#allocation58 + $0x1a4] ss:$48 sps:$4 sm:$0xff]  }
0x10c0   :  { %v13144_v23 = vld [vmem:[#allocation58 + $0x804] ss:$48 sps:$4 sm:$0xff]  }
0x10c2   :  { %9797 = vmatpush2.bf16.msra.mxu1 %v13073_v25  ;;  %9836 = vmatpush1.bf16.msra.mxu0 %v13076_v17 }
0x10c3   :  { %9798 = vmatprep.subr.bf16.mxu1 %v13081_v24  ;;  %9837 = vmatprep.subr.bf16.mxu0 %v13084_v32  ;;  %v13139_v24 = vld [vmem:[#allocation58 + $0x1a0] ss:$48 sps:$4 sm:$0xff]  }
0x10c4   :  { %v13142_v32 = vld [vmem:[#allocation58 + $0x800] ss:$48 sps:$4 sm:$0xff]  }
0x10c6   :  { %9799 = vmatpush2.bf16.msra.mxu1 %v13079_v34  ;;  %9838 = vmatpush2.bf16.msra.mxu0 %v13082_v35  ;;  %v13147_v35 = vld [vmem:[#allocation58 + $0x144] ss:$48 sps:$4 sm:$0xff]  }
0x10c7   :  { %9800 = vmatprep.subr.bf16.mxu1 %v13087_v37  ;;  %9839 = vmatprep.subr.bf16.mxu0 %v13090_v13  ;;  %v13150_v37 = vld [vmem:[#allocation58 + $0x7a4] ss:$48 sps:$4 sm:$0xff]   ;;  %v13145_v13 = vld [vmem:[#allocation58 + $0x140] ss:$48 sps:$4 sm:$0xff]  }
0x10ca   :  { %9801 = vmatpush2.bf16.msra.mxu1 %v13085_v30  ;;  %9840 = vmatpush2.bf16.msra.mxu0 %v13088_v14  ;;  %v13148_v30 = vld [vmem:[#allocation58 + $0x7a0] ss:$48 sps:$4 sm:$0xff]   ;;  %v13153_v14 = vld [vmem:[#allocation58 + $0xe4] ss:$48 sps:$4 sm:$0xff]  }
0x10cb   :  { %9802 = vmatprep.subr.bf16.mxu1 %v13093_v41  ;;  %9841 = vmatprep.subr.bf16.mxu0 %v13096_v15  ;;  %v13156_v41 = vld [vmem:[#allocation58 + $0x744] ss:$48 sps:$4 sm:$0xff]   ;;  %v13151_v15 = vld [vmem:[#allocation58 + $0xe0] ss:$48 sps:$4 sm:$0xff]  }
0x10ce   :  { %9803 = vmatpush2.bf16.msra.mxu1 %v13091_v42  ;;  %9842 = vmatpush2.bf16.msra.mxu0 %v13094_v43  ;;  %v13154_v42 = vld [vmem:[#allocation58 + $0x740] ss:$48 sps:$4 sm:$0xff]   ;;  %v13159_v43 = vld [vmem:[#allocation58 + $0x84] ss:$48 sps:$4 sm:$0xff]  }
0x10cf   :  { %9804 = vmatprep.subr.bf16.mxu1 %v13099_v40  ;;  %9843 = vmatprep.subr.bf16.mxu0 %v13102_v39  ;;  %v13162_v40 = vld [vmem:[#allocation58 + $0x6e4] ss:$48 sps:$4 sm:$0xff]   ;;  %v13157_v39 = vld [vmem:[#allocation58 + $0x80] ss:$48 sps:$4 sm:$0xff]  }
0x10d2   :  { %9805 = vmatpush2.bf16.msra.mxu1 %v13097_v29  ;;  %9844 = vmatpush2.bf16.msra.mxu0 %v13100_v45  ;;  %v13160_v29 = vld [vmem:[#allocation58 + $0x6e0] ss:$48 sps:$4 sm:$0xff]   ;;  %v13165_v45 = vld [vmem:[#allocation58 + $0x24] ss:$48 sps:$4 sm:$0xff]  }
0x10d3   :  { %9806 = vmatprep.subr.bf16.mxu1 %v13105_v47  ;;  %9845 = vmatprep.subr.bf16.mxu0 %v13108_v48  ;;  %v13168_v47 = vld [vmem:[#allocation58 + $0x684] ss:$48 sps:$4 sm:$0xff]   ;;  %v13163_v48 = vld [vmem:[#allocation58 + $0x20] ss:$48 sps:$4 sm:$0xff]  }
0x10d6   :  { %9807 = vmatpush2.bf16.msra.mxu1 %v13103_v49  ;;  %9846 = vmatpush2.bf16.msra.mxu0 %v13106_v31  ;;  %v13166_v49 = vld [vmem:[#allocation58 + $0x680] ss:$48 sps:$4 sm:$0xff]   ;;  %v13171_v31 = vld [vmem:[#allocation58 + $0x5c4] ss:$48 sps:$4 sm:$0xff]  }
0x10d7   :  { %9808 = vmatprep.subr.bf16.mxu1 %v13111_v33  ;;  %9847 = vmatprep.subr.bf16.mxu0 %v13114_v50  ;;  %v13174_v33 = vld [vmem:[#allocation58 + $0x624] ss:$48 sps:$4 sm:$0xff]   ;;  %v13169_v50 = vld [vmem:[#allocation58 + $0x5c0] ss:$48 sps:$4 sm:$0xff]  }
0x10da   :  { %9809 = vmatpush2.bf16.msra.mxu1 %v13109_v51  ;;  %9848 = vmatpush2.bf16.msra.mxu0 %v13112_v52  ;;  %v13172_v51 = vld [vmem:[#allocation58 + $0x620] ss:$48 sps:$4 sm:$0xff]   ;;  %v13177_v52 = vld [vmem:[#allocation58 + $0x564] ss:$48 sps:$4 sm:$0xff]  }
0x10db   :  { %9810 = vmatprep.subr.bf16.mxu1 %v13117_v53  ;;  %9849 = vmatprep.subr.bf16.mxu0 %v13120_v3  ;;  %v13180_v53 = vld [vmem:[#allocation58 + $0xbc4] ss:$48 sps:$4 sm:$0xff]   ;;  %v13175_v3 = vld [vmem:[#allocation58 + $0x560] ss:$48 sps:$4 sm:$0xff]  }
0x10de   :  { %9811 = vmatpush2.bf16.msra.mxu1 %v13115_v54  ;;  %9850 = vmatpush2.bf16.msra.mxu0 %v13118_v55  ;;  %v13178_v54 = vld [vmem:[#allocation58 + $0xbc0] ss:$48 sps:$4 sm:$0xff]   ;;  %v13183_v55 = vld [vmem:[#allocation58 + $0x504] ss:$48 sps:$4 sm:$0xff]  }
0x10df   :  { %9851 = vmatprep.subr.bf16.mxu0 %v13123_v56  ;;  %9862 = vmatprep.subr.bf16.mxu1 %v13126_v57  ;;  %v13186_v56 = vld [vmem:[#allocation58 + $0xb64] ss:$48 sps:$4 sm:$0xff]   ;;  %v13181_v57 = vld [vmem:[#allocation58 + $0x500] ss:$48 sps:$4 sm:$0xff]  }
0x10e1   :  { %9813 = vmatmul.mubr.bf16.vlgmr.msra.gmra.mxu1 %v14902_v12  ;;  %v9568_v0 = vpop.f32.mrf.mxu1 }
0x10e2   :  { %9852 = vmatpush2.bf16.msra.mxu0 %v13121_v59  ;;  %9863 = vmatpush1.bf16.msra.mxu1 %v13124_v60  ;;  %v13184_v59 = vld [vmem:[#allocation58 + $0xb60] ss:$48 sps:$4 sm:$0xff]   ;;  %v13189_v60 = vld [vmem:[#allocation58 + $0x4a4] ss:$48 sps:$4 sm:$0xff]  }
0x10e3   :  { %9894 = vmatprep.mubr.bf16.mxu1 %v14900_v18  ;;  %v9570_v5 = vpop.f32.mrf.mxu1  ;;  %9864 = vmatprep.subr.bf16.mxu1 %v13129_v62  ;;  %v13192_v62 = vld [vmem:[#allocation58 + $0xb04] ss:$48 sps:$4 sm:$0xff]  }
0x10e4   :  { %9903 = vmatprep.subr.bf16.mxu0 %v13132_v63  ;;  %v13187_v63 = vld [vmem:[#allocation58 + $0x4a0] ss:$48 sps:$4 sm:$0xff]  }
0x10e5   :  { %9854 = vmatmul.mubr.bf16.vlgmr.msra.gmra.mxu0 %v14909_v26  ;;  %v9572_v8 = vpop.f32.mrf.mxu1  ;;  %v9609_v10 = vpop.f32.mrf.mxu0 }
0x10e6   :  { %v14934_v11 = vadd.f32 %v9609_v10, %v9568_v0  ;;  %9865 = vmatpush1.bf16.msra.mxu1 %v13127_v1  ;;  %9904 = vmatpush1.bf16.msra.mxu0 %v13130_v4  ;;  %v13190_v0 = vld [vmem:[#allocation58 + $0xb00] ss:$48 sps:$4 sm:$0xff]   ;;  %v13195_v1 = vld [vmem:[#allocation58 + $0x444] ss:$48 sps:$4 sm:$0xff]  }
0x10e7   :  { %9935 = vmatprep.mubr.bf16.mxu0 %v14906_v22  ;;  %v9573_v44 = vpop.f32.mrf.mxu1  ;;  %v9611_v19 = vpop.f32.mrf.mxu0  ;;  %9866 = vmatprep.subr.bf16.mxu1 %v13135_v6  ;;  %v13198_v4 = vld [vmem:[#allocation58 + $0xaa4] ss:$48 sps:$4 sm:$0xff]   ;;  %v13196_v6 = vld [vmem:[#allocation58 + $0xaa0] ss:$48 sps:$4 sm:$0xff]  }
0x10e8   :  { %v14937_v25 = vadd.f32 %v9611_v19, %v9570_v5  ;;  %9905 = vmatprep.subr.bf16.mxu0 %v13138_v7  ;;  %v13193_v5 = vld [vmem:[#allocation58 + $0x440] ss:$48 sps:$4 sm:$0xff]   ;;  %v13201_v7 = vld [vmem:[#allocation58 + $0x3e4] ss:$48 sps:$4 sm:$0xff]  }
0x10e9   :  { %v9613_v17 = vpop.f32.mrf.mxu0  ;;  %v13204_v8 = vld [vmem:[#allocation58 + $0xa44] ss:$48 sps:$4 sm:$0xff]   ;;  %v13199_v10 = vld [vmem:[#allocation58 + $0x3e0] ss:$48 sps:$4 sm:$0xff]  }
0x10ea   :  { %9867 = vmatpush1.bf16.msra.mxu1 %v13133_v16  ;;  %9906 = vmatpush1.bf16.msra.mxu0 %v13136_v9  ;;  %v13202_v16 = vld [vmem:[#allocation58 + $0xa40] ss:$48 sps:$4 sm:$0xff]   ;;  %v13207_v9 = vld [vmem:[#allocation58 + $0x384] ss:$48 sps:$4 sm:$0xff]  }
0x10eb   :  { %v9614_v34 = vpop.f32.mrf.mxu0  ;;  %9868 = vmatprep.subr.bf16.mxu1 %v13141_v20  ;;  %9907 = vmatprep.subr.bf16.mxu0 %v13144_v23  ;;  %v13210_v44 = vld [vmem:[#allocation58 + $0x9e4] ss:$48 sps:$4 sm:$0xff]   ;;  %v13205_v19 = vld [vmem:[#allocation58 + $0x380] ss:$48 sps:$4 sm:$0xff]  }
0x10ec   :  { %v13208_v20 = vld [vmem:[#allocation58 + $0x9e0] ss:$48 sps:$4 sm:$0xff]   ;;  %v13213_v23 = vld [vmem:[#allocation58 + $0x324] ss:$48 sps:$4 sm:$0xff]  }
0x10ed   :  { %v13216_v17 = vld [vmem:[#allocation58 + $0x984] ss:$48 sps:$4 sm:$0xff]  }
0x10ee   :  { %9869 = vmatpush1.bf16.msra.mxu1 %v13139_v24  ;;  %9908 = vmatpush1.bf16.msra.mxu0 %v13142_v32  ;;  %v13211_v24 = vld [vmem:[#allocation58 + $0x320] ss:$48 sps:$4 sm:$0xff]   ;;  %v13219_v34 = vld [vmem:[#allocation58 + $0x924] ss:$48 sps:$4 sm:$0xff]  }
0x10ef   :  { %9870 = vmatprep.subr.bf16.mxu1 %v13147_v35  ;;  %9909 = vmatprep.subr.bf16.mxu0 %v13150_v37  ;;  %v13214_v32 = vld [vmem:[#allocation58 + $0x980] ss:$48 sps:$4 sm:$0xff]   ;;  %v13222_v35 = vld [vmem:[#allocation58 + $0x2cc] ss:$48 sps:$4 sm:$0xff]  }
0x10f0   :  { %v13217_v37 = vld [vmem:[#allocation58 + $0x920] ss:$48 sps:$4 sm:$0xff]  }
0x10f2   :  { %9871 = vmatpush1.bf16.msra.mxu1 %v13145_v13  ;;  %9910 = vmatpush1.bf16.msra.mxu0 %v13148_v30  ;;  %v13220_v13 = vld [vmem:[#allocation58 + $0x2c8] ss:$48 sps:$4 sm:$0xff]   ;;  %v13225_v30 = vld [vmem:[#allocation58 + $0x26c] ss:$48 sps:$4 sm:$0xff]  }
0x10f3   :  { %9872 = vmatprep.subr.bf16.mxu1 %v13153_v14  ;;  %9911 = vmatprep.subr.bf16.mxu0 %v13156_v41  ;;  %v13228_v14 = vld [vmem:[#allocation58 + $0x8cc] ss:$48 sps:$4 sm:$0xff]  }
0x10f6   :  { %9873 = vmatpush1.bf16.msra.mxu1 %v13151_v15  ;;  %9912 = vmatpush1.bf16.msra.mxu0 %v13154_v42  ;;  %v13223_v15 = vld [vmem:[#allocation58 + $0x268] ss:$48 sps:$4 sm:$0xff]  }
0x10f7   :  { %9874 = vmatprep.subr.bf16.mxu1 %v13159_v43  ;;  %9913 = vmatprep.subr.bf16.mxu0 %v13162_v40  ;;  %v13226_v42 = vld [vmem:[#allocation58 + $0x8c8] ss:$48 sps:$4 sm:$0xff]   ;;  %v13231_v40 = vld [vmem:[#allocation58 + $0x20c] ss:$48 sps:$4 sm:$0xff]  }
0x10fa   :  { %9875 = vmatpush1.bf16.msra.mxu1 %v13157_v39  ;;  %9914 = vmatpush1.bf16.msra.mxu0 %v13160_v29  ;;  %v13234_v39 = vld [vmem:[#allocation58 + $0x86c] ss:$48 sps:$4 sm:$0xff]  }
0x10fb   :  { %9876 = vmatprep.subr.bf16.mxu1 %v13165_v45  ;;  %9915 = vmatprep.subr.bf16.mxu0 %v13168_v47 }
0x10fe   :  { %9877 = vmatpush1.bf16.msra.mxu1 %v13163_v48  ;;  %9916 = vmatpush1.bf16.msra.mxu0 %v13166_v49  ;;  %v13229_v48 = vld [vmem:[#allocation58 + $0x208] ss:$48 sps:$4 sm:$0xff]  }
0x10ff   :  { %9878 = vmatprep.subr.bf16.mxu1 %v13171_v31  ;;  %9917 = vmatprep.subr.bf16.mxu0 %v13174_v33  ;;  %v13232_v49 = vld [vmem:[#allocation58 + $0x868] ss:$48 sps:$4 sm:$0xff]   ;;  %v13237_v33 = vld [vmem:[#allocation58 + $0x1ac] ss:$48 sps:$4 sm:$0xff]  }
0x1102   :  { %9879 = vmatpush2.bf16.msra.mxu1 %v13169_v50  ;;  %9918 = vmatpush1.bf16.msra.mxu0 %v13172_v51  ;;  %v13240_v50 = vld [vmem:[#allocation58 + $0x80c] ss:$48 sps:$4 sm:$0xff]  }
0x1103   :  { %9880 = vmatprep.subr.bf16.mxu1 %v13177_v52  ;;  %9919 = vmatprep.subr.bf16.mxu0 %v13180_v53  ;;  %v13235_v52 = vld [vmem:[#allocation58 + $0x1a8] ss:$48 sps:$4 sm:$0xff]  }
0x1104   :  { %v13238_v53 = vld [vmem:[#allocation58 + $0x808] ss:$48 sps:$4 sm:$0xff]  }
0x1106   :  { %9881 = vmatpush2.bf16.msra.mxu1 %v13175_v3  ;;  %9920 = vmatpush2.bf16.msra.mxu0 %v13178_v54  ;;  %v13243_v54 = vld [vmem:[#allocation58 + $0x14c] ss:$48 sps:$4 sm:$0xff]  }
0x1107   :  { %9882 = vmatprep.subr.bf16.mxu1 %v13183_v55  ;;  %9921 = vmatprep.subr.bf16.mxu0 %v13186_v56  ;;  %v13246_v55 = vld [vmem:[#allocation58 + $0x7ac] ss:$48 sps:$4 sm:$0xff]   ;;  %v13244_v56 = vld [vmem:[#allocation58 + $0x7a8] ss:$48 sps:$4 sm:$0xff]  }
0x110a   :  { %9883 = vmatpush2.bf16.msra.mxu1 %v13181_v57  ;;  %9922 = vmatpush2.bf16.msra.mxu0 %v13184_v59  ;;  %v13249_v57 = vld [vmem:[#allocation58 + $0xec] ss:$48 sps:$4 sm:$0xff]  }
0x110b   :  { %9884 = vmatprep.subr.bf16.mxu1 %v13189_v60  ;;  %9923 = vmatprep.subr.bf16.mxu0 %v13192_v62  ;;  %v13252_v59 = vld [vmem:[#allocation58 + $0x74c] ss:$48 sps:$4 sm:$0xff]   ;;  %v13247_v60 = vld [vmem:[#allocation58 + $0xe8] ss:$48 sps:$4 sm:$0xff]  }
0x110c   :  { %v13250_v62 = vld [vmem:[#allocation58 + $0x748] ss:$48 sps:$4 sm:$0xff]  }
0x110e   :  { %9885 = vmatpush2.bf16.msra.mxu1 %v13187_v63  ;;  %9924 = vmatpush2.bf16.msra.mxu0 %v13190_v0  ;;  %v13255_v63 = vld [vmem:[#allocation58 + $0x8c] ss:$48 sps:$4 sm:$0xff]  }
0x110f   :  { %9886 = vmatprep.subr.bf16.mxu1 %v13195_v1  ;;  %9925 = vmatprep.subr.bf16.mxu0 %v13198_v4  ;;  %v13258_v0 = vld [vmem:[#allocation58 + $0x6ec] ss:$48 sps:$4 sm:$0xff]   ;;  %v13253_v1 = vld [vmem:[#allocation58 + $0x88] ss:$48 sps:$4 sm:$0xff]  }
0x1110   :  { %v13256_v4 = vld [vmem:[#allocation58 + $0x6e8] ss:$48 sps:$4 sm:$0xff]  }
0x1112   :  { %9887 = vmatpush2.bf16.msra.mxu1 %v13193_v5  ;;  %9926 = vmatpush2.bf16.msra.mxu0 %v13196_v6  ;;  %v13261_v5 = vld [vmem:[#allocation58 + $0x2c] ss:$48 sps:$4 sm:$0xff]  }
0x1113   :  { %9888 = vmatprep.subr.bf16.mxu1 %v13201_v7  ;;  %9927 = vmatprep.subr.bf16.mxu0 %v13204_v8  ;;  %v13264_v6 = vld [vmem:[#allocation58 + $0x68c] ss:$48 sps:$4 sm:$0xff]   ;;  %v13259_v7 = vld [vmem:[#allocation58 + $0x28] ss:$48 sps:$4 sm:$0xff]  }
0x1114   :  { %v13262_v8 = vld [vmem:[#allocation58 + $0x688] ss:$48 sps:$4 sm:$0xff]  }
0x1116   :  { %9889 = vmatpush2.bf16.msra.mxu1 %v13199_v10  ;;  %9928 = vmatpush2.bf16.msra.mxu0 %v13202_v16  ;;  %v13267_v10 = vld [vmem:[#allocation58 + $0x5cc] ss:$48 sps:$4 sm:$0xff]  }
0x1117   :  { %9890 = vmatprep.subr.bf16.mxu1 %v13207_v9  ;;  %9929 = vmatprep.subr.bf16.mxu0 %v13210_v44  ;;  %v13270_v16 = vld [vmem:[#allocation58 + $0x62c] ss:$48 sps:$4 sm:$0xff]   ;;  %v13265_v9 = vld [vmem:[#allocation58 + $0x5c8] ss:$48 sps:$4 sm:$0xff]  }
0x1118   :  { %v13268_v44 = vld [vmem:[#allocation58 + $0x628] ss:$48 sps:$4 sm:$0xff]  }
0x111a   :  { %9891 = vmatpush2.bf16.msra.mxu1 %v13205_v19  ;;  %9930 = vmatpush2.bf16.msra.mxu0 %v13208_v20  ;;  %v13273_v19 = vld [vmem:[#allocation58 + $0x56c] ss:$48 sps:$4 sm:$0xff]  }
0x111b   :  { %9892 = vmatprep.subr.bf16.mxu1 %v13213_v23  ;;  %9931 = vmatprep.subr.bf16.mxu0 %v13216_v17  ;;  %v13276_v20 = vld [vmem:[#allocation58 + $0xbcc] ss:$48 sps:$4 sm:$0xff]   ;;  %v13271_v23 = vld [vmem:[#allocation58 + $0x568] ss:$48 sps:$4 sm:$0xff]  }
0x111c   :  { %v13274_v17 = vld [vmem:[#allocation58 + $0xbc8] ss:$48 sps:$4 sm:$0xff]  }
0x111e   :  { %9893 = vmatpush2.bf16.msra.mxu1 %v13211_v24  ;;  %9932 = vmatpush2.bf16.msra.mxu0 %v13214_v32  ;;  %v13279_v24 = vld [vmem:[#allocation58 + $0x50c] ss:$48 sps:$4 sm:$0xff]  }
0x111f   :  { %9933 = vmatprep.subr.bf16.mxu0 %v13219_v34  ;;  %9944 = vmatprep.subr.bf16.mxu1 %v13222_v35  ;;  %v13282_v32 = vld [vmem:[#allocation58 + $0xb6c] ss:$48 sps:$4 sm:$0xff]   ;;  %v13277_v34 = vld [vmem:[#allocation58 + $0x508] ss:$48 sps:$4 sm:$0xff]  }
0x1120   :  { %v13280_v35 = vld [vmem:[#allocation58 + $0xb68] ss:$48 sps:$4 sm:$0xff]  }
0x1121   :  { %v9650_v41 = vpop.f32.mrf.mxu1  ;;  %9895 = vmatmul.mubr.bf16.vlgmr.msra.gmra.mxu1 %v14902_v12 }
0x1122   :  { %9934 = vmatpush2.bf16.msra.mxu0 %v13217_v37  ;;  %9945 = vmatpush1.bf16.msra.mxu1 %v13220_v13  ;;  %v13285_v37 = vld [vmem:[#allocation58 + $0x4ac] ss:$48 sps:$4 sm:$0xff]  }
0x1123   :  { %9976 = vmatprep.mubr.bf16.mxu1 %v14900_v18  ;;  %v14941_v43 = vpop.f32.mrf.mxu1  ;;  %9946 = vmatprep.subr.bf16.mxu1 %v13225_v30  ;;  %v13288_v13 = vld [vmem:[#allocation58 + $0xb0c] ss:$48 sps:$4 sm:$0xff]   ;;  %v13283_v30 = vld [vmem:[#allocation58 + $0x4a8] ss:$48 sps:$4 sm:$0xff]  }
0x1124   :  { %9985 = vmatprep.subr.bf16.mxu0 %v13228_v14  ;;  %v13286_v14 = vld [vmem:[#allocation58 + $0xb08] ss:$48 sps:$4 sm:$0xff]  }
0x1125   :  { %v9654_v29 = vpop.f32.mrf.mxu1  ;;  %v9691_v45 = vpop.f32.mrf.mxu0  ;;  %9936 = vmatmul.mubr.bf16.vlgmr.msra.gmra.mxu0 %v14909_v26 }
0x1126   :  { %v14944_v47 = vadd.f32 %v9691_v45, %v9650_v41  ;;  %9947 = vmatpush1.bf16.msra.mxu1 %v13223_v15  ;;  %9986 = vmatpush1.bf16.msra.mxu0 %v13226_v42  ;;  %v13291_v41 = vld [vmem:[#allocation58 + $0x44c] ss:$48 sps:$4 sm:$0xff]   ;;  %v13289_v42 = vld [vmem:[#allocation58 + $0x448] ss:$48 sps:$4 sm:$0xff]  }
0x1127   :  { %10017 = vmatprep.mubr.bf16.mxu0 %v14906_v22  ;;  %v9655_v31 = vpop.f32.mrf.mxu1  ;;  %v14947_v18 = vpop.f32.mrf.mxu0  ;;  %9948 = vmatprep.subr.bf16.mxu1 %v13231_v40  ;;  %v13241_v22 = vld [vmem:[#allocation58 + $0x148] ss:$48 sps:$4 sm:$0xff]   ;;  %v13294_v15 = vld [vmem:[#allocation58 + $0xaac] ss:$48 sps:$4 sm:$0xff]  }
0x1128   :  { %9987 = vmatprep.subr.bf16.mxu0 %v13234_v39  ;;  %v13292_v40 = vld [vmem:[#allocation58 + $0xaa8] ss:$48 sps:$4 sm:$0xff]   ;;  %v13297_v39 = vld [vmem:[#allocation58 + $0x3ec] ss:$48 sps:$4 sm:$0xff]  }
0x1129   :  { %v9695_v51 = vpop.f32.mrf.mxu0  ;;  %v13300_v29 = vld [vmem:[#allocation58 + $0xa4c] ss:$48 sps:$4 sm:$0xff]   ;;  %v13295_v45 = vld [vmem:[#allocation58 + $0x3e8] ss:$48 sps:$4 sm:$0xff]  }
0x112a   :  { %9949 = vmatpush1.bf16.msra.mxu1 %v13229_v48  ;;  %9988 = vmatpush1.bf16.msra.mxu0 %v13232_v49  ;;  %v13298_v48 = vld [vmem:[#allocation58 + $0xa48] ss:$48 sps:$4 sm:$0xff]   ;;  %v13303_v49 = vld [vmem:[#allocation58 + $0x38c] ss:$48 sps:$4 sm:$0xff]  }
0x112b   :  { %v9696_v3 = vpop.f32.mrf.mxu0  ;;  %9950 = vmatprep.subr.bf16.mxu1 %v13237_v33  ;;  %9989 = vmatprep.subr.bf16.mxu0 %v13240_v50  ;;  %v13306_v31 = vld [vmem:[#allocation58 + $0x9ec] ss:$48 sps:$4 sm:$0xff]   ;;  %v13301_v33 = vld [vmem:[#allocation58 + $0x388] ss:$48 sps:$4 sm:$0xff]  }
0x112c   :  { %v13304_v50 = vld [vmem:[#allocation58 + $0x9e8] ss:$48 sps:$4 sm:$0xff]   ;;  %v13309_v51 = vld [vmem:[#allocation58 + $0x32c] ss:$48 sps:$4 sm:$0xff]  }
0x112d   :  { %v13310_v3 = vld [vmem:[#allocation58 + $0x988] ss:$48 sps:$4 sm:$0xff]  }
0x112e   :  { %9951 = vmatpush1.bf16.msra.mxu1 %v13235_v52  ;;  %9990 = vmatpush1.bf16.msra.mxu0 %v13238_v53  ;;  %v13312_v52 = vld [vmem:[#allocation58 + $0x98c] ss:$48 sps:$4 sm:$0xff]   ;;  %v13307_v53 = vld [vmem:[#allocation58 + $0x328] ss:$48 sps:$4 sm:$0xff]  }
0x112f   :  { %9952 = vmatprep.subr.bf16.mxu1 %v13243_v54  ;;  %9991 = vmatprep.subr.bf16.mxu0 %v13246_v55  ;;  %v13315_v54 = vld [vmem:[#allocation58 + $0x92c] ss:$48 sps:$4 sm:$0xff]   ;;  %v13313_v55 = vld [vmem:[#allocation58 + $0x928] ss:$48 sps:$4 sm:$0xff]  }
0x1132   :  { %9953 = vmatpush1.bf16.msra.mxu1 %v13241_v22  ;;  %9992 = vmatpush1.bf16.msra.mxu0 %v13244_v56  ;;  %v9694_v22 = vadd.f32 %v14947_v18, %v14941_v43 }
0x1133   :  { %9954 = vmatprep.subr.bf16.mxu1 %v13249_v57  ;;  %9993 = vmatprep.subr.bf16.mxu0 %v13252_v59 }
0x1136   :  { %9955 = vmatpush1.bf16.msra.mxu1 %v13247_v60  ;;  %9994 = vmatpush1.bf16.msra.mxu0 %v13250_v62  ;;  %v4724_v62 = vld [vmem:[#allocation52] sm:$0xf] }
0x1137   :  { %9956 = vmatprep.subr.bf16.mxu1 %v13255_v63  ;;  %9995 = vmatprep.subr.bf16.mxu0 %v13258_v0 }
0x113a   :  { %9957 = vmatpush1.bf16.msra.mxu1 %v13253_v1  ;;  %9996 = vmatpush1.bf16.msra.mxu0 %v13256_v4 }
0x113b   :  { %9958 = vmatprep.subr.bf16.mxu1 %v13261_v5  ;;  %9997 = vmatprep.subr.bf16.mxu0 %v13264_v6 }
0x113e   :  { %9959 = vmatpush1.bf16.msra.mxu1 %v13259_v7  ;;  %9998 = vmatpush1.bf16.msra.mxu0 %v13262_v8 }
0x113f   :  { %9960 = vmatprep.subr.bf16.mxu1 %v13267_v10  ;;  %9999 = vmatprep.subr.bf16.mxu0 %v13270_v16 }
0x1142   :  { %9961 = vmatpush2.bf16.msra.mxu1 %v13265_v9  ;;  %10000 = vmatpush1.bf16.msra.mxu0 %v13268_v44 }
0x1143   :  { %9962 = vmatprep.subr.bf16.mxu1 %v13273_v19  ;;  %10001 = vmatprep.subr.bf16.mxu0 %v13276_v20 }
0x1146   :  { %9963 = vmatpush2.bf16.msra.mxu1 %v13271_v23  ;;  %10002 = vmatpush2.bf16.msra.mxu0 %v13274_v17 }
0x1147   :  { %9964 = vmatprep.subr.bf16.mxu1 %v13279_v24  ;;  %10003 = vmatprep.subr.bf16.mxu0 %v13282_v32 }
0x114a   :  { %9965 = vmatpush2.bf16.msra.mxu1 %v13277_v34  ;;  %10004 = vmatpush2.bf16.msra.mxu0 %v13280_v35  ;;  %v4725_v34 = vld [vmem:[#allocation53] sm:$0xf] }
0x114b   :  { %9966 = vmatprep.subr.bf16.mxu1 %v13285_v37  ;;  %10005 = vmatprep.subr.bf16.mxu0 %v13288_v13 }
0x114e   :  { %9967 = vmatpush2.bf16.msra.mxu1 %v13283_v30  ;;  %10006 = vmatpush2.bf16.msra.mxu0 %v13286_v14 }
0x114f   :  { %9968 = vmatprep.subr.bf16.mxu1 %v13291_v41  ;;  %10007 = vmatprep.subr.bf16.mxu0 %v13294_v15 }
0x1152   :  { %9969 = vmatpush2.bf16.msra.mxu1 %v13289_v42  ;;  %10008 = vmatpush2.bf16.msra.mxu0 %v13292_v40 }
0x1153   :  { %9970 = vmatprep.subr.bf16.mxu1 %v13297_v39  ;;  %10009 = vmatprep.subr.bf16.mxu0 %v13300_v29 }
0x1156   :  { %9971 = vmatpush2.bf16.msra.mxu1 %v13295_v45  ;;  %10010 = vmatpush2.bf16.msra.mxu0 %v13298_v48 }
0x1157   :  { %9972 = vmatprep.subr.bf16.mxu1 %v13303_v49  ;;  %10011 = vmatprep.subr.bf16.mxu0 %v13306_v31 }
0x115a   :  { %9973 = vmatpush2.bf16.msra.mxu1 %v13301_v33  ;;  %10012 = vmatpush2.bf16.msra.mxu0 %v13304_v50  ;;  %v14976_v33 = vld [vmem:[#allocation59] sm:$0xf] }
0x115b   :  { %9974 = vmatprep.subr.bf16.mxu1 %v13309_v51  ;;  %10013 = vmatprep.subr.bf16.mxu0 %v13312_v52  ;;  %v14978_v51 = vld [vmem:[#allocation61] sm:$0xf] }
0x115c   :  { %v7067_v52 = vrot.slane %v14978_v51, %v14816_v46 }
0x115e   :  { %9975 = vmatpush2.bf16.msra.mxu1 %v13307_v53  ;;  %10014 = vmatpush2.bf16.msra.mxu0 %v13310_v3  ;;  %v10351_v3 = vrot.slane %v14976_v33, %v14816_v46 }
0x115f   :  { %11939 = vmatprep.subr.msk.mxu1 %vm10030_vm7, %v14937_v25  ;;  %10015 = vmatprep.subr.bf16.mxu0 %v13315_v54 }
0x1161   :  { %v9732_v56 = vpop.f32.mrf.mxu1  ;;  %9977 = vmatmul.mubr.bf16.vlgmr.msra.gmra.mxu1 %v14902_v12 }
0x1162   :  { %10016 = vmatpush2.bf16.msra.mxu0 %v13313_v55  ;;  %11940 = vmatpush1.msk.msra.mxu1 %vm10030_vm7, %v14934_v11  ;;  %v7071_v55 = vrot.slane %v14978_v51, %v14819_v27 }
0x1163   :  { %v9734_v57 = vpop.f32.mrf.mxu1  ;;  %11942 = vmatprep.subr.msk.mxu1 %vm10030_vm7, %v9694_v22  ;;  %10107 = vmatprep.mubr.f32.mxu1 %v14357_v2 }
0x1165   :  { %v9736_v59 = vpop.f32.mrf.mxu1  ;;  %v9773_v60 = vpop.f32.mrf.mxu0  ;;  %10018 = vmatmul.mubr.bf16.vlgmr.msra.gmra.mxu0 %v14909_v26 }
0x1166   :  { %v9774_v25 = vadd.f32 %v9773_v60, %v9732_v56  ;;  %10468 = vmatprep.mubr.f32.mxu0 %v14357_v2  ;;  %v7151_v59 = vadd.f32 %v14914_v21, %v7067_v52  ;;  %v13321_v21 = vld [vmem:[#allocation64 + $0x30] sm:$0xff]   ;;  %v13332_v52 = vld [vmem:[#allocation64 + $0xa0] sm:$0xff]  }
0x1167   :  { %v9737_v43 = vpop.f32.mrf.mxu1  ;;  %v9775_v12 = vpop.f32.mrf.mxu0 }
0x1168   :  { %v9776_v18 = vadd.f32 %v9775_v12, %v9734_v57  ;;  %v7153_v43 = vadd.f32 %v14917_v28, %v7071_v55  ;;  %v13323_v28 = vld [vmem:[#allocation64 + $0x68] sm:$0xff]   ;;  %v13340_v55 = vld [vmem:[#allocation64 + $0x90] sm:$0xff]  }
0x1169   :  { %v9777_v63 = vpop.f32.mrf.mxu0  ;;  %11941 = vmatmul.mubr.msk.f32.vlgmr.msra.gmra.mxu1 %vm10026_vm8, %v4724_v62 }
0x116a   :  { %11943 = vmatpush1.msk.msra.mxu1 %vm10030_vm7, %v14944_v47  ;;  %10178 = vmatprep.mubr.f32.mxu1 %v14357_v2 }
0x116b   :  { %v9778_v11 = vpop.f32.mrf.mxu0 }
0x116d   :  { %11944 = vmatmul.mubr.msk.f32.vlgmr.msra.gmra.mxu1 %vm10026_vm8, %v4724_v62 }
0x116e   :  { %10264 = vmatprep.mubr.f32.mxu1 %v14357_v2 }
0x11a1   :  { %v9814_v26 = vpop.f32.mrf.mxu1 }
0x11a3   :  { %v9816_v0 = vpop.f32.mrf.mxu1 }
0x11a5   :  { %v9818_v1 = vpop.f32.mrf.mxu1  ;;  %v9855_v4 = vpop.f32.mrf.mxu0 }
0x11a6   :  { %v9856_v5 = vadd.f32 %v9855_v4, %v9814_v26 }
0x11a7   :  { %v9819_v6 = vpop.f32.mrf.mxu1  ;;  %v9857_v7 = vpop.f32.mrf.mxu0 }
0x11a8   :  { %v14966_v8 = vadd.f32 %v9857_v7, %v9816_v0  ;;  %v13317_v6 = vld [vmem:[#allocation64 + $0x38] sm:$0xff]   ;;  %v13325_v7 = vld [vmem:[#allocation64 + $0x28] sm:$0xff]  }
0x11a9   :  { %v9859_v10 = vpop.f32.mrf.mxu0 }
0x11aa   :  { %v13327_v10 = vld [vmem:[#allocation64 + $0x60] sm:$0xff]  }
0x11ab   :  { %v9860_v16 = vpop.f32.mrf.mxu0 }
0x11ac   :  { %v13329_v16 = vld [vmem:[#allocation64 + $0x20] sm:$0xff]  }
0x11e1   :  { %v9896_v9 = vpop.f32.mrf.mxu1 }
0x11e3   :  { %v9898_v47 = vpop.f32.mrf.mxu1 }
0x11e5   :  { %v9900_v44 = vpop.f32.mrf.mxu1  ;;  %v9937_v19 = vpop.f32.mrf.mxu0 }
0x11e6   :  { %v9938_v24 = vadd.f32 %v9937_v19, %v9896_v9  ;;  %v13331_v9 = vld [vmem:[#allocation64 + $0x58] sm:$0xff]   ;;  %v13335_v44 = vld [vmem:[#allocation64 + $0x50] sm:$0xff]  }
0x11e7   :  { %v9901_v20 = vpop.f32.mrf.mxu1  ;;  %v9939_v23 = vpop.f32.mrf.mxu0  ;;  %v13337_v19 = vld [vmem:[#allocation64 + $0x10] sm:$0xff]  }
0x11e8   :  { %v9940_v17 = vadd.f32 %v9939_v23, %v9898_v47  ;;  %v13333_v47 = vld [vmem:[#allocation64 + $0x18] sm:$0xff]   ;;  %v13339_v20 = vld [vmem:[#allocation64 + $0x48] sm:$0xff]  }
0x11e9   :  { %v9941_v32 = vpop.f32.mrf.mxu0  ;;  %v13341_v23 = vld [vmem:[#allocation64 + $0x8] sm:$0xff]  }
0x11ea   :  { %11945 = vmatprep.subr.msk.mxu1 %vm10030_vm7, %v9940_v17  ;;  %v10359_v17 = vrot.slane %v14976_v33, %v14892_v38  ;;  %v7079_v32 = vrot.slane %v14978_v51, %v14896_v58  ;;  %v13330_v51 = vld [vmem:[#allocation64 + $0xe0] sm:$0xff]  }
0x11eb   :  { %v9942_v35 = vpop.f32.mrf.mxu0  ;;  %11946 = vmatpush1.msk.msra.mxu1 %vm10030_vm7, %v9938_v24 }
0x11ec   :  { %11947 = vmatmul.mubr.msk.f32.vlgmr.msra.gmra.mxu1 %vm10026_vm8, %v4725_v34 }
0x11ed   :  { %10335 = vmatprep.mubr.f32.mxu1 %v14357_v2 }
0x1221   :  { %v9978_v37 = vpop.f32.mrf.mxu1 }
0x1223   :  { %v9980_v13 = vpop.f32.mrf.mxu1 }
0x1225   :  { %v9982_v30 = vpop.f32.mrf.mxu1  ;;  %v10019_v14 = vpop.f32.mrf.mxu0 }
0x1226   :  { %v10020_v40 = vadd.f32 %v10019_v14, %v9978_v37  ;;  %v10363_v37 = vrot.slane %v14976_v33, %v14896_v58  ;;  %v13322_v58 = vld [vmem:[#allocation64 + $0xf0] sm:$0xff]  }
0x1227   :  { %v9983_v41 = vpop.f32.mrf.mxu1  ;;  %v10021_v15 = vpop.f32.mrf.mxu0 }
0x1228   :  { %v10022_v42 = vadd.f32 %v10021_v15, %v9980_v13  ;;  %v7224_v41 = vadd.f32 %v14929_v61, %v7079_v32  ;;  %v13326_v61 = vld [vmem:[#allocation64 + $0xe8] sm:$0xff]  }
0x1229   :  { %v10023_v39 = vpop.f32.mrf.mxu0  ;;  %v10109_v29 = vpop.f32.mrf.mxu1 }
0x122a   :  { %11948 = vmatprep.subr.msk.mxu1 %vm10030_vm7, %v10022_v42  ;;  %v10110_v53 = vadd.f32 %v10109_v29, %v9774_v25 }
0x122b   :  { %v10024_v45 = vpop.f32.mrf.mxu0  ;;  %v10111_v48 = vpop.f32.mrf.mxu1  ;;  %11949 = vmatpush1.msk.msra.mxu1 %vm10030_vm7, %v10020_v40 }
0x122c   :  { %11950 = vmatmul.mubr.msk.f32.vlgmr.msra.gmra.mxu1 %vm10026_vm8, %v4725_v34  ;;  %v10112_v22 = vadd.f32 %v10111_v48, %v9776_v18  ;;  %v13316_v18 = vld [vmem:[#allocation64 + $0x78] sm:$0xff]  }
0x122d   :  { %v10180_v49 = vpop.f32.mrf.mxu1  ;;  %10539 = vmatprep.mubr.f32.mxu1 %v14357_v2  ;;  %v10355_v2 = vrot.slane %v14976_v33, %v14819_v27  ;;  %v13319_v27 = vld [vmem:[#allocation64 + $0x70] sm:$0xff]   ;;  %v13343_v33 = vld [vmem:[#allocation64 + $0x40] sm:$0xff]  }
0x122e   :  { %v10181_v31 = vadd.f32 %v10180_v49, %v9856_v5  ;;  %v10384_v5 = vld [vmem:[#allocation62] sm:$0x3] }
0x122f   :  { %v10182_v50 = vpop.f32.mrf.mxu1  ;;  %v13318_v49 = vld [vmem:[#allocation64 + $0xf8] sm:$0xff]  }
0x1230   :  { %v10183_v34 = vadd.f32 %v10182_v50, %v14966_v8  ;;  %v13328_v50 = vld [vmem:[#allocation64 + $0xa8] sm:$0xff]  }
0x12ac   :  { %v10266_v54 = vpop.f32.mrf.mxu1 }
0x12ad   :  { %v10342_v56 = vadd.f32 %v10266_v54, %v10110_v53  ;;  %v13334_v53 = vld [vmem:[#allocation64 + $0xd8] sm:$0xff]   ;;  %v13338_v54 = vld [vmem:[#allocation64 + $0xd0] sm:$0xff]  }
0x12ae   :  { %v10268_v57 = vpop.f32.mrf.mxu1 }
0x12af   :  { %v10368_v60 = vadd.f32 %v10351_v3, %v10342_v56  ;;  %v10343_v62 = vadd.f32 %v10268_v57, %v10112_v22  ;;  %v13336_v3 = vld [vmem:[#allocation64 + $0x98] sm:$0xff]   ;;  %v13342_v22 = vld [vmem:[#allocation64 + $0xc8] sm:$0xff]   ;;  %v13346_v57 = vld [vmem:[#allocation64 + $0xc0] sm:$0xff]  }
0x12b0   :  { %v13344_v56 = vld [vmem:[#allocation64 + $0x88] sm:$0xff]  }
0x12b1   :  { %v10372_v25 = vadd.f32 %v10368_v60, %v7151_v59  ;;  %v10369_v12 = vadd.f32 %v10355_v2, %v10343_v62  ;;  %v13345_v2 = vld [vmem:[#allocation64] sm:$0xff]  }
0x12b2   :  { %v13347_v59 = vld [vmem:[#allocation64 + $0x80] sm:$0xff]  }
0x12b3   :  { %v10376_v63 = vmax.f32 %v10372_v25, 0.0  ;;  %v10373_v46 = vadd.f32 %v10369_v12, %v7153_v43 }
0x12b5   :  { %v10377_v11 = vmax.f32 %v10373_v46, 0.0  ;;  %v10380_v26 = vpack.c.bf16 %v10376_v63, %v10376_v63 }
0x12b7   :  { %v10381_v0 = vpack.c.bf16 %v10377_v11, %v10377_v11  ;;  %v10385_v4 = vunpack.c.l.bf16 %v10380_v26 }
0x12b9   :  { %v10386_v1 = vunpack.c.l.bf16 %v10381_v0 }
0x12bb   :  { %11951 = vmatprep.subr.msk.mxu0 %vm10030_vm7, %v10386_v1 }
0x12bc   :  { %11952 = vmatpush1.msk.msra.mxu0 %vm10030_vm7, %v10385_v4 }
0x12bd   :  { %11953 = vmatmul.mubr.msk.f32.vlgmr.msra.gmra.mxu0 %vm10026_vm8, %v10384_v5  ;;  %12097 = vmatprep.subr.bf16.mxu0 %v13316_v18 }
0x12be   :  { %12098 = vmatpush3.bf16.msra.mxu0 %v13317_v6 }
0x12bf   :  { %12099 = vmatprep.subr.bf16.mxu0 %v13319_v27 }
0x12c2   :  { %12100 = vmatpush3.bf16.msra.mxu0 %v13321_v21 }
0x12c3   :  { %12101 = vmatprep.subr.bf16.mxu0 %v13323_v28 }
0x12c6   :  { %12102 = vmatpush3.bf16.msra.mxu0 %v13325_v7 }
0x12c7   :  { %12103 = vmatprep.subr.bf16.mxu0 %v13327_v10 }
0x12ca   :  { %12104 = vmatpush3.bf16.msra.mxu0 %v13329_v16 }
0x12cb   :  { %12105 = vmatprep.subr.bf16.mxu0 %v13331_v9 }
0x12ce   :  { %12106 = vmatpush3.bf16.msra.mxu0 %v13333_v47 }
0x12cf   :  { %12107 = vmatprep.subr.bf16.mxu0 %v13335_v44 }
0x12d2   :  { %12108 = vmatpush3.bf16.msra.mxu0 %v13337_v19 }
0x12d3   :  { %12109 = vmatprep.subr.bf16.mxu0 %v13339_v20 }
0x12d6   :  { %12110 = vmatpush3.bf16.msra.mxu0 %v13341_v23 }
0x12d7   :  { %12111 = vmatprep.subr.bf16.mxu0 %v13343_v33 }
0x12da   :  { %12112 = vmatpush3.bf16.msra.mxu0 %v13345_v2 }
0x12ec   :  { %v10337_v24 = vpop.f32.mrf.mxu1 }
0x12ed   :  { %v10344_v35 = vadd.f32 %v10337_v24, %v10181_v31  ;;  %v13320_v31 = vld [vmem:[#allocation64 + $0xb8] sm:$0xff]  }
0x12ee   :  { %v10339_v13 = vpop.f32.mrf.mxu1 }
0x12ef   :  { %v10370_v30 = vadd.f32 %v10359_v17, %v10344_v35  ;;  %v10345_v14 = vadd.f32 %v10339_v13, %v10183_v34 }
0x12f1   :  { %v10374_v15 = vadd.f32 %v10370_v30, %v14919_v36  ;;  %v10371_v42 = vadd.f32 %v10363_v37, %v10345_v14  ;;  %v13324_v36 = vld [vmem:[#allocation64 + $0xb0] sm:$0xff]  }
0x12f3   :  { %v10378_v40 = vmax.f32 %v10374_v15, 0.0  ;;  %v10375_v38 = vadd.f32 %v10371_v42, %v7224_v41 }
0x12f5   :  { %v10379_v39 = vmax.f32 %v10375_v38, 0.0  ;;  %v10382_v29 = vpack.c.bf16 %v10378_v40, %v10378_v40 }
0x12f7   :  { %v10383_v45 = vpack.c.bf16 %v10379_v39, %v10379_v39  ;;  %v10387_v8 = vunpack.c.l.bf16 %v10382_v29 }
0x12f9   :  { %v10388_v48 = vunpack.c.l.bf16 %v10383_v45 }
0x12fb   :  { %11954 = vmatprep.subr.msk.mxu1 %vm10030_vm7, %v10388_v48 }
0x12fc   :  { %11955 = vmatpush1.msk.msra.mxu1 %vm10030_vm7, %v10387_v8 }
0x12fd   :  { %11956 = vmatmul.mubr.msk.f32.vlgmr.msra.gmra.mxu1 %vm10026_vm8, %v10384_v5  ;;  %12119 = vmatprep.subr.bf16.mxu1 %v13318_v49  ;;  %v11957_v5 = vld [vmem:[#allocation65] ss:$0 sm:$0xff] }
0x12fe   :  { %12120 = vmatpush3.bf16.msra.mxu1 %v13320_v31 }
0x12ff   :  { %12121 = vmatprep.subr.bf16.mxu1 %v13322_v58 }
0x1302   :  { %12122 = vmatpush3.bf16.msra.mxu1 %v13324_v36 }
0x1303   :  { %12123 = vmatprep.subr.bf16.mxu1 %v13326_v61 }
0x1306   :  { %12124 = vmatpush3.bf16.msra.mxu1 %v13328_v50 }
0x1307   :  { %12125 = vmatprep.subr.bf16.mxu1 %v13330_v51 }
0x130a   :  { %12126 = vmatpush3.bf16.msra.mxu1 %v13332_v52 }
0x130b   :  { %12127 = vmatprep.subr.bf16.mxu1 %v13334_v53 }
0x130e   :  { %12128 = vmatpush3.bf16.msra.mxu1 %v13336_v3 }
0x130f   :  { %12129 = vmatprep.subr.bf16.mxu1 %v13338_v54 }
0x1312   :  { %12130 = vmatpush3.bf16.msra.mxu1 %v13340_v55 }
0x1313   :  { %12131 = vmatprep.subr.bf16.mxu1 %v13342_v22 }
0x1316   :  { %12132 = vmatpush3.bf16.msra.mxu1 %v13344_v56 }
0x1317   :  { %12133 = vmatprep.subr.bf16.mxu1 %v13346_v57 }
0x131a   :  { %12134 = vmatpush3.bf16.msra.mxu1 %v13347_v59 }
0x137d   :  { %v10470_v60 = vpop.f32.mrf.mxu0 }
0x137e   :  { %v10546_v62 = vpack.c.bf16 %v10470_v60, %v10470_v60 }
0x137f   :  { %v10472_v43 = vpop.f32.mrf.mxu0 }
0x1380   :  { %v10547_v25 = vpack.c.bf16 %v10472_v43, %v10472_v43 }
0x1382   :  { %10845 = vmatprep.mubr.bf16.mxu0 %v10547_v25 }
0x1383   :  { %10846 = vmatmul.mubr.bf16.vlgmr.msra.gmra.mxu0 %v10546_v62 }
0x13bd   :  { %v10541_v12 = vpop.f32.mrf.mxu1 }
0x13be   :  { %v10548_v11 = vpack.c.bf16 %v10541_v12, %v10541_v12 }
0x13bf   :  { %v10543_v63 = vpop.f32.mrf.mxu1 }
0x13c0   :  { %v10549_v46 = vpack.c.bf16 %v10543_v63, %v10543_v63 }
0x13c2   :  { %10885 = vmatprep.mubr.bf16.mxu1 %v10549_v46 }
0x13c3   :  { %10886 = vmatmul.mubr.bf16.vlgmr.msra.gmra.mxu1 %v10548_v11 }
0x1443   :  { %v12113_v26 = vpop.f32.mrf.mxu0 }
0x1445   :  { %v12114_v0 = vpop.f32.mrf.mxu0 }
0x1446   :  { %v12115_v4 = vadd.f32 %v12114_v0, %v12113_v26 }
0x1447   :  { %v12116_v1 = vpop.f32.mrf.mxu0 }
0x1448   :  { %v10848_v21 = vadd.f32 %v12115_v4, %v11957_v5 }
0x1449   :  { %v12117_v18 = vpop.f32.mrf.mxu0 }
0x1483   :  { %v12135_v6 = vpop.f32.mrf.mxu1 }
0x1485   :  { %v12136_v27 = vpop.f32.mrf.mxu1 }
0x1486   :  { %v12137_v28 = vadd.f32 %v12136_v27, %v12135_v6 }
0x1487   :  { %v12138_v7 = vpop.f32.mrf.mxu1 }
0x1488   :  { %v10888_v10 = vadd.f32 %v12137_v28, %v10848_v21 }
0x1489   :  { %v12139_v16 = vpop.f32.mrf.mxu1 }
0x148a   :  { %10893 = vst [vmem:[#allocation67] sm:$0x3] %v10888_v10 }
0x148b   :  { %14200 = shalt.err (!%p14197_p4)
}
0x148c   :  { %10903 = dma.vmem_to_hbm [thread:$0]  %s10901_s3, 32, %s14583_s20, [#allocation4]  }
0x148d   :  { %14253 = dma.done.wait [#allocation4], 32  }
0x148e   :  { %14254 = vsyncadd [#allocation4], 4294967264 }
0x148f   :  { %10907 = vsyncpa [#allocation3], 1 }
0x1490   :  { %10908 = vsyncpa [#allocation6], 1 }
0x1491   :  { %10909 = vsyncpa [#allocation9], 1 }
0x1492   :  { %10910 = vsyncpa [#allocation12], 1 }
0x1493   :  { %10911 = vsyncpa [#allocation15], 1 }
0x1494   :  { %10912 = vsyncpa [#allocation18], 1 }
0x1495   :  { %10913 = vsyncpa [#allocation21], 1 }
0x1496   :  { %10914 = vsyncpa [#allocation24], 1 }
0x1497   :  { %10915 = vsyncpa [#allocation27], 1 }
0x1498   :  { %10916 = vsyncpa [#allocation30], 1 }
0x1499   :  { %10917 = vsyncpa [#allocation33], 1 }
0x149a   :  { %10918 = vsyncpa [#allocation36], 1 }
0x149b   :  { %10919 = vsyncpa [#allocation39], 1 }
0x149c   :  { %10920 = vsyncpa [#allocation42], 1 }
0x149d   :  { %10921 = vsyncpa [#allocation45], 1 }
0x149e   :  { %10922 = vsyncpa [#allocation48], 1 }
0x149f   :  { %10923 = vsyncpa [#allocation51], 1 }
0x14a0   :  { %10924 = vsyncpa [#allocation54], 1 }
0x14a1   :  { %10925 = vsyncpa [#allocation57], 1 }
0x14a2   :  { %10926 = vsyncpa [#allocation60], 1 }
0x14a3   :  { %10927 = vsyncpa [#allocation63], 1 }
0x14a4   :  { %10928 = vsyncpa [#allocation66], 1 }
0x14a5   :  { %10929 = vsyncpa [#allocation4], 1 }

</bundles_post_ra>
